<compile_context>
chip_gen: v5e
topology: v5e:2x2
jax: 0.10.0
libtpu: 0.0.40
codegen_flags: <defaults>
</compile_context>

<pallas_src>
import functools

import jax
import jax.numpy as jnp
from jax.experimental import pallas as pl
from jax.experimental.pallas import tpu as pltpu


# ------------------------------ in-kernel helpers ------------------------------
def _edgeconv_features(x, w1a, w1b, b1, w2, b2, *, k):
    """DynamicEdgeConv for one point cloud.

    out_i = max_{j in kNN(i)} ( relu([x_i, x_j - x_i] @ W1 + b1) @ W2 + b2 )
    kNN is built in feature space (self-loop included, lowest-index tie-break).
    The k neighbours are gathered with a one-hot matmul so the edge MLP only runs
    on (k*N, H) rows instead of all N^2 pairs.
    """
    n = x.shape[0]

    # pairwise squared distances (f32 to keep the graph selection robust)
    xx = jnp.sum(x * x, axis=-1, keepdims=True)                      # (N, 1)
    gram = jnp.dot(x, x.T, preferred_element_type=jnp.float32)       # (N, N)
    dist = xx + xx.T - 2.0 * gram
    col = jax.lax.broadcasted_iota(jnp.int32, (n, n), 1)

    # iterative k-argmin -> (k*N, N) one-hot gather matrix
    onehots = []
    dwork = dist
    for _ in range(k):
        rowmin = jnp.min(dwork, axis=-1, keepdims=True)              # (N, 1)
        cand = jnp.where(dwork == rowmin, col, n)
        sel = jnp.min(cand, axis=-1, keepdims=True)                  # first argmin per row
        oh = col == sel
        onehots.append(oh.astype(jnp.float32))
        dwork = jnp.where(oh, jnp.float32(1e30), dwork)
    sel_mat = jnp.concatenate(onehots, axis=0)                       # (k*N, N)

    # edge MLP decomposed: [x_i, x_j - x_i] @ W1 = x_i@W1a - x_i@W1b + x_j@W1b
    xb = x.astype(jnp.bfloat16)
    a = jnp.dot(xb, w1a.astype(jnp.bfloat16), preferred_element_type=jnp.float32)  # (N, H)
    b = jnp.dot(xb, w1b.astype(jnp.bfloat16), preferred_element_type=jnp.float32)  # (N, H)
    ci = a - b + b1                                                  # per-center term (N, H)

    # exact row gather of the neighbour term (one-hot matmul kept in f32)
    bg = jnp.dot(sel_mat, b, preferred_element_type=jnp.float32)     # (k*N, H)

    h1 = jnp.maximum(jnp.concatenate([ci] * k, axis=0) + bg, 0.0)    # (k*N, H)
    h2 = jnp.dot(h1.astype(jnp.bfloat16), w2.astype(jnp.bfloat16),
                 preferred_element_type=jnp.float32) + b2            # (k*N, Cout)

    out = h2[:n]                                                     # max over the k slots
    for t in range(1, k):
        out = jnp.maximum(out, h2[t * n:(t + 1) * n])
    return out                                                       # (N, Cout)


def _attention_features(x, wqkv, wo, bo, *, heads, dim_head):
    n, d = x.shape
    dh = d // heads
    scale = float(dim_head) ** (-0.5)

    xb = x.astype(jnp.bfloat16)
    qkv = jnp.dot(xb, wqkv.astype(jnp.bfloat16),
                  preferred_element_type=jnp.float32)                # (N, 3D)

    def split_heads(off):
        return jnp.stack(
            [qkv[:, off + h * dh: off + (h + 1) * dh] for h in range(heads)], axis=0)

    q = split_heads(0)                                               # (H, N, dh)
    kk = split_heads(d)
    v = split_heads(2 * d)

    logits = jax.lax.dot_general(
        q.astype(jnp.bfloat16), kk.astype(jnp.bfloat16),
        dimension_numbers=(((2,), (2,)), ((0,), (0,))),
        preferred_element_type=jnp.float32) * scale                  # (H, N, N)
    logits = logits - jnp.max(logits, axis=-1, keepdims=True)
    p = jnp.exp(logits)
    p = p * pl.reciprocal(jnp.sum(p, axis=-1, keepdims=True), approx=True)

    outh = jax.lax.dot_general(
        p.astype(jnp.bfloat16), v.astype(jnp.bfloat16),
        dimension_numbers=(((2,), (1,)), ((0,), (0,))),
        preferred_element_type=jnp.float32)                          # (H, N, dh)
    out = jnp.concatenate([outh[h] for h in range(heads)], axis=-1)  # (N, D)

    return jnp.dot(out.astype(jnp.bfloat16), wo.astype(jnp.bfloat16),
                   preferred_element_type=jnp.float32) + bo


def _head_features(loc, att, wl, wg, wa, b1, w2, b2, w3p, b3p):
    g = jnp.max(loc, axis=0, keepdims=True)                          # (1, D) global max-pool

    lb = loc.astype(jnp.bfloat16)
    ab = att.astype(jnp.bfloat16)
    gb = g.astype(jnp.bfloat16)
    # concat([local, global, attended]) @ W1  ==  loc@Wl + g@Wg + att@Wa
    h = (jnp.dot(lb, wl.astype(jnp.bfloat16), preferred_element_type=jnp.float32)
         + jnp.dot(gb, wg.astype(jnp.bfloat16), preferred_element_type=jnp.float32)
         + jnp.dot(ab, wa.astype(jnp.bfloat16), preferred_element_type=jnp.float32)
         + b1)
    h = jnp.maximum(h, 0.0)
    h = jnp.maximum(jnp.dot(h.astype(jnp.bfloat16), w2.astype(jnp.bfloat16),
                            preferred_element_type=jnp.float32) + b2, 0.0)
    # lane-dense (padded to 128) logits; pad columns carry -1e30 bias -> exp()==0
    logits = jnp.dot(h.astype(jnp.bfloat16), w3p.astype(jnp.bfloat16),
                     preferred_element_type=jnp.float32) + b3p       # (N, 128)

    m = jnp.max(logits, axis=-1, keepdims=True)
    s = logits - m
    lse = jnp.log(jnp.sum(jnp.exp(s), axis=-1, keepdims=True))
    return s - lse                                                   # (N, 128) padded


# ------------------------------- fused kernel ----------------------------------
def _fused_kernel(x_ref,
                  e1w1a, e1w1b, e1b1, e1w2, e1b2,
                  e2w1a, e2w1b, e2b1, e2w2, e2b2,
                  wqkv, wo, bo,
                  rwl, rwg, rwa, rb1, rw2, rb2, rw3p, rb3p,
                  o_ref, *, k, heads, dim_head):
    x = x_ref[0].astype(jnp.float32)                                 # (N, Cin)

    f1 = _edgeconv_features(x, e1w1a[...], e1w1b[...], e1b1[...],
                            e1w2[...], e1b2[...], k=k)               # (N, 64)
    f2 = _edgeconv_features(f1, e2w1a[...], e2w1b[...], e2b1[...],
                            e2w2[...], e2b2[...], k=k)               # (N, 128)
    att = _attention_features(f2, wqkv[...], wo[...], bo[...],
                              heads=heads, dim_head=dim_head)        # (N, 128)
    out = _head_features(f2, att, rwl[...], rwg[...], rwa[...], rb1[...],
                         rw2[...], rb2[...], rw3p[...], rb3p[...])   # (N, 128) padded

    o_ref[0] = out.astype(o_ref.dtype)


# ------------------------------ params / forward -------------------------------
def _linear_init(key, fan_in, fan_out):
    """PyTorch nn.Linear default init: U(-1/sqrt(fan_in), 1/sqrt(fan_in))."""
    bound = 1.0 / (fan_in ** 0.5)
    kw, kb = jax.random.split(key)
    w = jax.random.uniform(kw, (fan_in, fan_out), jnp.float32, -bound, bound)
    b = jax.random.uniform(kb, (1, fan_out), jnp.float32, -bound, bound)
    return w, b


def init_params(key, num_classes=10):
    ks = jax.random.split(key, 9)
    p = {}
    # edgeconv1: Linear(2*3, 64) -> ReLU -> Linear(64, 64)
    p['e1_w1'], p['e1_b1'] = _linear_init(ks[0], 6, 64)
    p['e1_w2'], p['e1_b2'] = _linear_init(ks[1], 64, 64)
    # edgeconv2: Linear(2*64, 64) -> ReLU -> Linear(64, 128)
    p['e2_w1'], p['e2_b1'] = _linear_init(ks[2], 128, 64)
    p['e2_w2'], p['e2_b2'] = _linear_init(ks[3], 64, 128)
    # attention: to_qkv (no bias), fc_out
    p['att_wqkv'], _ = _linear_init(ks[4], 128, 3 * 128)
    p['att_wo'], p['att_bo'] = _linear_init(ks[5], 128, 128)
    # refine MLP: (384 -> 128) -> ReLU -> (128 -> 64) -> ReLU -> (64 -> num_classes)
    p['r_w1'], p['r_b1'] = _linear_init(ks[6], 3 * 128, 128)
    p['r_w2'], p['r_b2'] = _linear_init(ks[7], 128, 64)
    p['r_w3'], p['r_b3'] = _linear_init(ks[8], 64, num_classes)
    return p


def forward(params, x, batch=None, *, k=8, heads=4, dim_head=32):
    del batch  # implied by the (B, N, C) layout (one point cloud per batch row)
    b_sz, n, cin = x.shape
    num_classes = params['r_w3'].shape[1]
    nc_pad = max(128, ((num_classes + 127) // 128) * 128)            # lane-dense output

    # split the concatenated-input weights outside the kernel (cheap XLA slices)
    e1w1a, e1w1b = params['e1_w1'][:cin], params['e1_w1'][cin:]
    c1 = params['e1_w2'].shape[1]
    e2w1a, e2w1b = params['e2_w1'][:c1], params['e2_w1'][c1:]
    d = params['e2_w2'].shape[1]
    rw1 = params['r_w1']
    rwl, rwg, rwa = rw1[:d], rw1[d:2 * d], rw1[2 * d:]

    # pad the classifier to a lane-dense width; pad logits get a -1e30 bias
    w3p = jnp.zeros((params['r_w3'].shape[0], nc_pad), jnp.float32)
    w3p = w3p.at[:, :num_classes].set(params['r_w3'])
    b3p = jnp.full((1, nc_pad), -1e30, jnp.float32)
    b3p = b3p.at[:, :num_classes].set(params['r_b3'])

    weights = [
        e1w1a, e1w1b, params['e1_b1'], params['e1_w2'], params['e1_b2'],
        e2w1a, e2w1b, params['e2_b1'], params['e2_w2'], params['e2_b2'],
        params['att_wqkv'], params['att_wo'], params['att_bo'],
        rwl, rwg, rwa, params['r_b1'], params['r_w2'], params['r_b2'],
        w3p, b3p,
    ]

    kernel = functools.partial(_fused_kernel, k=k, heads=heads, dim_head=dim_head)
    out_pad = pl.pallas_call(
        kernel,
        out_shape=jax.ShapeDtypeStruct((b_sz, n, nc_pad), x.dtype),
        grid=(b_sz,),
        in_specs=[pl.BlockSpec((1, n, cin), lambda i: (i, 0, 0))]
                 + [pl.BlockSpec(w.shape, lambda i: (0, 0)) for w in weights],
        out_specs=pl.BlockSpec((1, n, nc_pad), lambda i: (i, 0, 0)),
        compiler_params=pltpu.CompilerParams(
            dimension_semantics=("parallel",)),                      # batch axis -> megacore
    )(x, *weights)

    return out_pad[..., :num_classes]


if __name__ == "__main__":
    key = jax.random.PRNGKey(0)
    B, N, C = 2, 64, 3
    num_classes = 10
    knn_k = 8

    kx, kp = jax.random.split(key)
    x = jax.random.normal(kx, (B, N, C), jnp.float32)
    batch_vec = jnp.repeat(jnp.arange(B, dtype=jnp.int32), N)   # torch-geometric style batch ids
    params = init_params(kp, num_classes=num_classes)

    out = forward(params, x, batch_vec, k=knn_k, heads=4, dim_head=32)
    out = jax.block_until_ready(out)

    assert out.shape == (B, N, num_classes)
    assert bool(jnp.all(jnp.isfinite(out)))
    print("KERNEL_OK")
</pallas_src>

<mosaic_0001>
module attributes {stable_mosaic.version = 11 : i64} {
  func.func @_fused_kernel(%arg0: i32, %arg1: memref<1x64x3xf32, #tpu.memory_space<vmem>>, %arg2: memref<3x64xf32, #tpu.memory_space<vmem>>, %arg3: memref<3x64xf32, #tpu.memory_space<vmem>>, %arg4: memref<1x64xf32, #tpu.memory_space<vmem>>, %arg5: memref<64x64xf32, #tpu.memory_space<vmem>>, %arg6: memref<1x64xf32, #tpu.memory_space<vmem>>, %arg7: memref<64x64xf32, #tpu.memory_space<vmem>>, %arg8: memref<64x64xf32, #tpu.memory_space<vmem>>, %arg9: memref<1x64xf32, #tpu.memory_space<vmem>>, %arg10: memref<64x128xf32, #tpu.memory_space<vmem>>, %arg11: memref<1x128xf32, #tpu.memory_space<vmem>>, %arg12: memref<128x384xf32, #tpu.memory_space<vmem>>, %arg13: memref<128x128xf32, #tpu.memory_space<vmem>>, %arg14: memref<1x128xf32, #tpu.memory_space<vmem>>, %arg15: memref<128x128xf32, #tpu.memory_space<vmem>>, %arg16: memref<128x128xf32, #tpu.memory_space<vmem>>, %arg17: memref<128x128xf32, #tpu.memory_space<vmem>>, %arg18: memref<1x128xf32, #tpu.memory_space<vmem>>, %arg19: memref<128x64xf32, #tpu.memory_space<vmem>>, %arg20: memref<1x64xf32, #tpu.memory_space<vmem>>, %arg21: memref<64x128xf32, #tpu.memory_space<vmem>>, %arg22: memref<1x128xf32, #tpu.memory_space<vmem>>, %arg23: memref<1x64x128xf32, #tpu.memory_space<vmem>>) attributes {dimension_semantics = [#tpu.dimension_semantics<parallel>], iteration_bounds = array<i64: 2>, scalar_prefetch = 0 : i64, scratch_operands = 0 : i64, tpu.core_type = #tpu.core_type<tc>, window_params = [{transform_indices = @transform_0, window_bounds = array<i64: 1, 64, 3>}, {pipeline_mode = #tpu.pipeline_mode<synchronous>, transform_indices = @transform_1, window_bounds = array<i64: 3, 64>}, {pipeline_mode = #tpu.pipeline_mode<synchronous>, transform_indices = @transform_2, window_bounds = array<i64: 3, 64>}, {pipeline_mode = #tpu.pipeline_mode<synchronous>, transform_indices = @transform_3, window_bounds = array<i64: 1, 64>}, {pipeline_mode = #tpu.pipeline_mode<synchronous>, transform_indices = @transform_4, window_bounds = array<i64: 64, 64>}, {pipeline_mode = #tpu.pipeline_mode<synchronous>, transform_indices = @transform_5, window_bounds = array<i64: 1, 64>}, {pipeline_mode = #tpu.pipeline_mode<synchronous>, transform_indices = @transform_6, window_bounds = array<i64: 64, 64>}, {pipeline_mode = #tpu.pipeline_mode<synchronous>, transform_indices = @transform_7, window_bounds = array<i64: 64, 64>}, {pipeline_mode = #tpu.pipeline_mode<synchronous>, transform_indices = @transform_8, window_bounds = array<i64: 1, 64>}, {pipeline_mode = #tpu.pipeline_mode<synchronous>, transform_indices = @transform_9, window_bounds = array<i64: 64, 128>}, {pipeline_mode = #tpu.pipeline_mode<synchronous>, transform_indices = @transform_10, window_bounds = array<i64: 1, 128>}, {pipeline_mode = #tpu.pipeline_mode<synchronous>, transform_indices = @transform_11, window_bounds = array<i64: 128, 384>}, {pipeline_mode = #tpu.pipeline_mode<synchronous>, transform_indices = @transform_12, window_bounds = array<i64: 128, 128>}, {pipeline_mode = #tpu.pipeline_mode<synchronous>, transform_indices = @transform_13, window_bounds = array<i64: 1, 128>}, {pipeline_mode = #tpu.pipeline_mode<synchronous>, transform_indices = @transform_14, window_bounds = array<i64: 128, 128>}, {pipeline_mode = #tpu.pipeline_mode<synchronous>, transform_indices = @transform_15, window_bounds = array<i64: 128, 128>}, {pipeline_mode = #tpu.pipeline_mode<synchronous>, transform_indices = @transform_16, window_bounds = array<i64: 128, 128>}, {pipeline_mode = #tpu.pipeline_mode<synchronous>, transform_indices = @transform_17, window_bounds = array<i64: 1, 128>}, {pipeline_mode = #tpu.pipeline_mode<synchronous>, transform_indices = @transform_18, window_bounds = array<i64: 128, 64>}, {pipeline_mode = #tpu.pipeline_mode<synchronous>, transform_indices = @transform_19, window_bounds = array<i64: 1, 64>}, {pipeline_mode = #tpu.pipeline_mode<synchronous>, transform_indices = @transform_20, window_bounds = array<i64: 64, 128>}, {pipeline_mode = #tpu.pipeline_mode<synchronous>, transform_indices = @transform_21, window_bounds = array<i64: 1, 128>}, {transform_indices = @transform_22, window_bounds = array<i64: 1, 64, 128>}]} {
    %c0 = arith.constant 0 : index
    %c0_0 = arith.constant 0 : index
    %c0_1 = arith.constant 0 : index
    %0 = vector.load %arg1[%c0, %c0_0, %c0_1] : memref<1x64x3xf32, #tpu.memory_space<vmem>>, vector<1x64x3xf32>
    %1 = vector.shape_cast %0 : vector<1x64x3xf32> to vector<64x3xf32>
    %c0_2 = arith.constant 0 : index
    %c0_3 = arith.constant 0 : index
    %2 = vector.load %arg2[%c0_2, %c0_3] : memref<3x64xf32, #tpu.memory_space<vmem>>, vector<3x64xf32>
    %c0_4 = arith.constant 0 : index
    %c0_5 = arith.constant 0 : index
    %3 = vector.load %arg3[%c0_4, %c0_5] : memref<3x64xf32, #tpu.memory_space<vmem>>, vector<3x64xf32>
    %c0_6 = arith.constant 0 : index
    %c0_7 = arith.constant 0 : index
    %4 = vector.load %arg4[%c0_6, %c0_7] : memref<1x64xf32, #tpu.memory_space<vmem>>, vector<1x64xf32>
    %c0_8 = arith.constant 0 : index
    %c0_9 = arith.constant 0 : index
    %5 = vector.load %arg5[%c0_8, %c0_9] : memref<64x64xf32, #tpu.memory_space<vmem>>, vector<64x64xf32>
    %c0_10 = arith.constant 0 : index
    %c0_11 = arith.constant 0 : index
    %6 = vector.load %arg6[%c0_10, %c0_11] : memref<1x64xf32, #tpu.memory_space<vmem>>, vector<1x64xf32>
    %7 = arith.mulf %1, %1 : vector<64x3xf32>
    %cst = arith.constant dense<0.000000e+00> : vector<64xf32>
    %8 = vector.multi_reduction <add>, %7, %cst [1] : vector<64x3xf32> to vector<64xf32>
    %9 = vector.shape_cast %8 : vector<64xf32> to vector<64x1xf32>
    %10 = tpu.transpose %1, [1, 0] : vector<64x3xf32> -> vector<3x64xf32>
    %cst_12 = arith.constant dense<0.000000e+00> : vector<64x64xf32>
    %11 = tpu.matmul %1, %10, %cst_12 {dimension_numbers = #tpu.dot_dimension_numbers<[1], [0], [0], [1], [0, 0, 1, 1], [], []>} : vector<64x3xf32>, vector<3x64xf32>, vector<64x64xf32> -> vector<64x64xf32>
    %12 = tpu.transpose %9, [1, 0] : vector<64x1xf32> -> vector<1x64xf32>
    %13 = vector.broadcast %9 : vector<64x1xf32> to vector<64x64xf32>
    %14 = vector.broadcast %12 : vector<1x64xf32> to vector<64x64xf32>
    %15 = arith.addf %13, %14 : vector<64x64xf32>
    %cst_13 = arith.constant 2.000000e+00 : f32
    %16 = vector.broadcast %cst_13 : f32 to vector<64x64xf32>
    %17 = arith.mulf %16, %11 : vector<64x64xf32>
    %18 = arith.subf %15, %17 : vector<64x64xf32>
    %19 = tpu.iota {dimensions = array<i32: 1>} : vector<64x64xi32>
    %cst_14 = arith.constant dense<0x7F800000> : vector<64xf32>
    %20 = vector.multi_reduction <minimumf>, %18, %cst_14 [1] : vector<64x64xf32> to vector<64xf32>
    %21 = vector.shape_cast %20 : vector<64xf32> to vector<64x1xf32>
    %22 = vector.broadcast %21 : vector<64x1xf32> to vector<64x64xf32>
    %23 = arith.cmpf oeq, %18, %22 : vector<64x64xf32>
    %c64_i32 = arith.constant 64 : i32
    %24 = vector.broadcast %c64_i32 : i32 to vector<64x64xi32>
    %25 = arith.select %23, %19, %24 : vector<64x64xi1>, vector<64x64xi32>
    %cst_15 = arith.constant dense<2147483647> : vector<64xi32>
    %26 = vector.multi_reduction <minsi>, %25, %cst_15 [1] : vector<64x64xi32> to vector<64xi32>
    %27 = vector.shape_cast %26 : vector<64xi32> to vector<64x1xi32>
    %28 = vector.broadcast %27 : vector<64x1xi32> to vector<64x64xi32>
    %29 = arith.cmpi eq, %19, %28 : vector<64x64xi32>
    %30 = arith.extui %29 : vector<64x64xi1> to vector<64x64xi32>
    %31 = arith.sitofp %30 : vector<64x64xi32> to vector<64x64xf32>
    %cst_16 = arith.constant 1.000000e+30 : f32
    %32 = vector.broadcast %cst_16 : f32 to vector<64x64xf32>
    %33 = arith.select %29, %32, %18 : vector<64x64xi1>, vector<64x64xf32>
    %cst_17 = arith.constant dense<0x7F800000> : vector<64xf32>
    %34 = vector.multi_reduction <minimumf>, %33, %cst_17 [1] : vector<64x64xf32> to vector<64xf32>
    %35 = vector.shape_cast %34 : vector<64xf32> to vector<64x1xf32>
    %36 = vector.broadcast %35 : vector<64x1xf32> to vector<64x64xf32>
    %37 = arith.cmpf oeq, %33, %36 : vector<64x64xf32>
    %c64_i32_18 = arith.constant 64 : i32
    %38 = vector.broadcast %c64_i32_18 : i32 to vector<64x64xi32>
    %39 = arith.select %37, %19, %38 : vector<64x64xi1>, vector<64x64xi32>
    %cst_19 = arith.constant dense<2147483647> : vector<64xi32>
    %40 = vector.multi_reduction <minsi>, %39, %cst_19 [1] : vector<64x64xi32> to vector<64xi32>
    %41 = vector.shape_cast %40 : vector<64xi32> to vector<64x1xi32>
    %42 = vector.broadcast %41 : vector<64x1xi32> to vector<64x64xi32>
    %43 = arith.cmpi eq, %19, %42 : vector<64x64xi32>
    %44 = arith.extui %43 : vector<64x64xi1> to vector<64x64xi32>
    %45 = arith.sitofp %44 : vector<64x64xi32> to vector<64x64xf32>
    %cst_20 = arith.constant 1.000000e+30 : f32
    %46 = vector.broadcast %cst_20 : f32 to vector<64x64xf32>
    %47 = arith.select %43, %46, %33 : vector<64x64xi1>, vector<64x64xf32>
    %cst_21 = arith.constant dense<0x7F800000> : vector<64xf32>
    %48 = vector.multi_reduction <minimumf>, %47, %cst_21 [1] : vector<64x64xf32> to vector<64xf32>
    %49 = vector.shape_cast %48 : vector<64xf32> to vector<64x1xf32>
    %50 = vector.broadcast %49 : vector<64x1xf32> to vector<64x64xf32>
    %51 = arith.cmpf oeq, %47, %50 : vector<64x64xf32>
    %c64_i32_22 = arith.constant 64 : i32
    %52 = vector.broadcast %c64_i32_22 : i32 to vector<64x64xi32>
    %53 = arith.select %51, %19, %52 : vector<64x64xi1>, vector<64x64xi32>
    %cst_23 = arith.constant dense<2147483647> : vector<64xi32>
    %54 = vector.multi_reduction <minsi>, %53, %cst_23 [1] : vector<64x64xi32> to vector<64xi32>
    %55 = vector.shape_cast %54 : vector<64xi32> to vector<64x1xi32>
    %56 = vector.broadcast %55 : vector<64x1xi32> to vector<64x64xi32>
    %57 = arith.cmpi eq, %19, %56 : vector<64x64xi32>
    %58 = arith.extui %57 : vector<64x64xi1> to vector<64x64xi32>
    %59 = arith.sitofp %58 : vector<64x64xi32> to vector<64x64xf32>
    %cst_24 = arith.constant 1.000000e+30 : f32
    %60 = vector.broadcast %cst_24 : f32 to vector<64x64xf32>
    %61 = arith.select %57, %60, %47 : vector<64x64xi1>, vector<64x64xf32>
    %cst_25 = arith.constant dense<0x7F800000> : vector<64xf32>
    %62 = vector.multi_reduction <minimumf>, %61, %cst_25 [1] : vector<64x64xf32> to vector<64xf32>
    %63 = vector.shape_cast %62 : vector<64xf32> to vector<64x1xf32>
    %64 = vector.broadcast %63 : vector<64x1xf32> to vector<64x64xf32>
    %65 = arith.cmpf oeq, %61, %64 : vector<64x64xf32>
    %c64_i32_26 = arith.constant 64 : i32
    %66 = vector.broadcast %c64_i32_26 : i32 to vector<64x64xi32>
    %67 = arith.select %65, %19, %66 : vector<64x64xi1>, vector<64x64xi32>
    %cst_27 = arith.constant dense<2147483647> : vector<64xi32>
    %68 = vector.multi_reduction <minsi>, %67, %cst_27 [1] : vector<64x64xi32> to vector<64xi32>
    %69 = vector.shape_cast %68 : vector<64xi32> to vector<64x1xi32>
    %70 = vector.broadcast %69 : vector<64x1xi32> to vector<64x64xi32>
    %71 = arith.cmpi eq, %19, %70 : vector<64x64xi32>
    %72 = arith.extui %71 : vector<64x64xi1> to vector<64x64xi32>
    %73 = arith.sitofp %72 : vector<64x64xi32> to vector<64x64xf32>
    %cst_28 = arith.constant 1.000000e+30 : f32
    %74 = vector.broadcast %cst_28 : f32 to vector<64x64xf32>
    %75 = arith.select %71, %74, %61 : vector<64x64xi1>, vector<64x64xf32>
    %cst_29 = arith.constant dense<0x7F800000> : vector<64xf32>
    %76 = vector.multi_reduction <minimumf>, %75, %cst_29 [1] : vector<64x64xf32> to vector<64xf32>
    %77 = vector.shape_cast %76 : vector<64xf32> to vector<64x1xf32>
    %78 = vector.broadcast %77 : vector<64x1xf32> to vector<64x64xf32>
    %79 = arith.cmpf oeq, %75, %78 : vector<64x64xf32>
    %c64_i32_30 = arith.constant 64 : i32
    %80 = vector.broadcast %c64_i32_30 : i32 to vector<64x64xi32>
    %81 = arith.select %79, %19, %80 : vector<64x64xi1>, vector<64x64xi32>
    %cst_31 = arith.constant dense<2147483647> : vector<64xi32>
    %82 = vector.multi_reduction <minsi>, %81, %cst_31 [1] : vector<64x64xi32> to vector<64xi32>
    %83 = vector.shape_cast %82 : vector<64xi32> to vector<64x1xi32>
    %84 = vector.broadcast %83 : vector<64x1xi32> to vector<64x64xi32>
    %85 = arith.cmpi eq, %19, %84 : vector<64x64xi32>
    %86 = arith.extui %85 : vector<64x64xi1> to vector<64x64xi32>
    %87 = arith.sitofp %86 : vector<64x64xi32> to vector<64x64xf32>
    %cst_32 = arith.constant 1.000000e+30 : f32
    %88 = vector.broadcast %cst_32 : f32 to vector<64x64xf32>
    %89 = arith.select %85, %88, %75 : vector<64x64xi1>, vector<64x64xf32>
    %cst_33 = arith.constant dense<0x7F800000> : vector<64xf32>
    %90 = vector.multi_reduction <minimumf>, %89, %cst_33 [1] : vector<64x64xf32> to vector<64xf32>
    %91 = vector.shape_cast %90 : vector<64xf32> to vector<64x1xf32>
    %92 = vector.broadcast %91 : vector<64x1xf32> to vector<64x64xf32>
    %93 = arith.cmpf oeq, %89, %92 : vector<64x64xf32>
    %c64_i32_34 = arith.constant 64 : i32
    %94 = vector.broadcast %c64_i32_34 : i32 to vector<64x64xi32>
    %95 = arith.select %93, %19, %94 : vector<64x64xi1>, vector<64x64xi32>
    %cst_35 = arith.constant dense<2147483647> : vector<64xi32>
    %96 = vector.multi_reduction <minsi>, %95, %cst_35 [1] : vector<64x64xi32> to vector<64xi32>
    %97 = vector.shape_cast %96 : vector<64xi32> to vector<64x1xi32>
    %98 = vector.broadcast %97 : vector<64x1xi32> to vector<64x64xi32>
    %99 = arith.cmpi eq, %19, %98 : vector<64x64xi32>
    %100 = arith.extui %99 : vector<64x64xi1> to vector<64x64xi32>
    %101 = arith.sitofp %100 : vector<64x64xi32> to vector<64x64xf32>
    %cst_36 = arith.constant 1.000000e+30 : f32
    %102 = vector.broadcast %cst_36 : f32 to vector<64x64xf32>
    %103 = arith.select %99, %102, %89 : vector<64x64xi1>, vector<64x64xf32>
    %cst_37 = arith.constant dense<0x7F800000> : vector<64xf32>
    %104 = vector.multi_reduction <minimumf>, %103, %cst_37 [1] : vector<64x64xf32> to vector<64xf32>
    %105 = vector.shape_cast %104 : vector<64xf32> to vector<64x1xf32>
    %106 = vector.broadcast %105 : vector<64x1xf32> to vector<64x64xf32>
    %107 = arith.cmpf oeq, %103, %106 : vector<64x64xf32>
    %c64_i32_38 = arith.constant 64 : i32
    %108 = vector.broadcast %c64_i32_38 : i32 to vector<64x64xi32>
    %109 = arith.select %107, %19, %108 : vector<64x64xi1>, vector<64x64xi32>
    %cst_39 = arith.constant dense<2147483647> : vector<64xi32>
    %110 = vector.multi_reduction <minsi>, %109, %cst_39 [1] : vector<64x64xi32> to vector<64xi32>
    %111 = vector.shape_cast %110 : vector<64xi32> to vector<64x1xi32>
    %112 = vector.broadcast %111 : vector<64x1xi32> to vector<64x64xi32>
    %113 = arith.cmpi eq, %19, %112 : vector<64x64xi32>
    %114 = arith.extui %113 : vector<64x64xi1> to vector<64x64xi32>
    %115 = arith.sitofp %114 : vector<64x64xi32> to vector<64x64xf32>
    %cst_40 = arith.constant 1.000000e+30 : f32
    %116 = vector.broadcast %cst_40 : f32 to vector<64x64xf32>
    %117 = arith.select %113, %116, %103 : vector<64x64xi1>, vector<64x64xf32>
    %cst_41 = arith.constant dense<0x7F800000> : vector<64xf32>
    %118 = vector.multi_reduction <minimumf>, %117, %cst_41 [1] : vector<64x64xf32> to vector<64xf32>
    %119 = vector.shape_cast %118 : vector<64xf32> to vector<64x1xf32>
    %120 = vector.broadcast %119 : vector<64x1xf32> to vector<64x64xf32>
    %121 = arith.cmpf oeq, %117, %120 : vector<64x64xf32>
    %c64_i32_42 = arith.constant 64 : i32
    %122 = vector.broadcast %c64_i32_42 : i32 to vector<64x64xi32>
    %123 = arith.select %121, %19, %122 : vector<64x64xi1>, vector<64x64xi32>
    %cst_43 = arith.constant dense<2147483647> : vector<64xi32>
    %124 = vector.multi_reduction <minsi>, %123, %cst_43 [1] : vector<64x64xi32> to vector<64xi32>
    %125 = vector.shape_cast %124 : vector<64xi32> to vector<64x1xi32>
    %126 = vector.broadcast %125 : vector<64x1xi32> to vector<64x64xi32>
    %127 = arith.cmpi eq, %19, %126 : vector<64x64xi32>
    %128 = arith.extui %127 : vector<64x64xi1> to vector<64x64xi32>
    %129 = arith.sitofp %128 : vector<64x64xi32> to vector<64x64xf32>
    %130 = tpu.concatenate %31, %45, %59, %73, %87, %101, %115, %129 in 0 : vector<64x64xf32>, vector<64x64xf32>, vector<64x64xf32>, vector<64x64xf32>, vector<64x64xf32>, vector<64x64xf32>, vector<64x64xf32>, vector<64x64xf32> -> vector<512x64xf32>
    %131 = arith.truncf %1 : vector<64x3xf32> to vector<64x3xbf16>
    %132 = arith.truncf %2 : vector<3x64xf32> to vector<3x64xbf16>
    %cst_44 = arith.constant dense<0.000000e+00> : vector<64x64xf32>
    %133 = tpu.matmul %131, %132, %cst_44 {dimension_numbers = #tpu.dot_dimension_numbers<[1], [0], [0], [1], [0, 0, 1, 1], [], []>} : vector<64x3xbf16>, vector<3x64xbf16>, vector<64x64xf32> -> vector<64x64xf32>
    %134 = arith.truncf %3 : vector<3x64xf32> to vector<3x64xbf16>
    %cst_45 = arith.constant dense<0.000000e+00> : vector<64x64xf32>
    %135 = tpu.matmul %131, %134, %cst_45 {dimension_numbers = #tpu.dot_dimension_numbers<[1], [0], [0], [1], [0, 0, 1, 1], [], []>} : vector<64x3xbf16>, vector<3x64xbf16>, vector<64x64xf32> -> vector<64x64xf32>
    %136 = arith.subf %133, %135 : vector<64x64xf32>
    %137 = vector.broadcast %4 : vector<1x64xf32> to vector<64x64xf32>
    %138 = arith.addf %136, %137 : vector<64x64xf32>
    %cst_46 = arith.constant dense<0.000000e+00> : vector<512x64xf32>
    %139 = tpu.matmul %130, %135, %cst_46 {dimension_numbers = #tpu.dot_dimension_numbers<[1], [0], [0], [1], [0, 0, 1, 1], [], []>} : vector<512x64xf32>, vector<64x64xf32>, vector<512x64xf32> -> vector<512x64xf32>
    %140 = tpu.concatenate %138, %138, %138, %138, %138, %138, %138, %138 in 0 : vector<64x64xf32>, vector<64x64xf32>, vector<64x64xf32>, vector<64x64xf32>, vector<64x64xf32>, vector<64x64xf32>, vector<64x64xf32>, vector<64x64xf32> -> vector<512x64xf32>
    %141 = arith.addf %140, %139 : vector<512x64xf32>
    %cst_47 = arith.constant 0.000000e+00 : f32
    %142 = vector.broadcast %cst_47 : f32 to vector<512x64xf32>
    %143 = arith.maximumf %141, %142 : vector<512x64xf32>
    %144 = arith.truncf %143 : vector<512x64xf32> to vector<512x64xbf16>
    %145 = arith.truncf %5 : vector<64x64xf32> to vector<64x64xbf16>
    %cst_48 = arith.constant dense<0.000000e+00> : vector<512x64xf32>
    %146 = tpu.matmul %144, %145, %cst_48 {dimension_numbers = #tpu.dot_dimension_numbers<[1], [0], [0], [1], [0, 0, 1, 1], [], []>} : vector<512x64xbf16>, vector<64x64xbf16>, vector<512x64xf32> -> vector<512x64xf32>
    %147 = vector.broadcast %6 : vector<1x64xf32> to vector<512x64xf32>
    %148 = arith.addf %146, %147 : vector<512x64xf32>
    %149 = vector.extract_strided_slice %148 {offsets = [0, 0], sizes = [64, 64], strides = [1, 1]} : vector<512x64xf32> to vector<64x64xf32>
    %150 = vector.extract_strided_slice %148 {offsets = [64, 0], sizes = [64, 64], strides = [1, 1]} : vector<512x64xf32> to vector<64x64xf32>
    %151 = arith.maximumf %149, %150 : vector<64x64xf32>
    %152 = vector.extract_strided_slice %148 {offsets = [128, 0], sizes = [64, 64], strides = [1, 1]} : vector<512x64xf32> to vector<64x64xf32>
    %153 = arith.maximumf %151, %152 : vector<64x64xf32>
    %154 = vector.extract_strided_slice %148 {offsets = [192, 0], sizes = [64, 64], strides = [1, 1]} : vector<512x64xf32> to vector<64x64xf32>
    %155 = arith.maximumf %153, %154 : vector<64x64xf32>
    %156 = vector.extract_strided_slice %148 {offsets = [256, 0], sizes = [64, 64], strides = [1, 1]} : vector<512x64xf32> to vector<64x64xf32>
    %157 = arith.maximumf %155, %156 : vector<64x64xf32>
    %158 = vector.extract_strided_slice %148 {offsets = [320, 0], sizes = [64, 64], strides = [1, 1]} : vector<512x64xf32> to vector<64x64xf32>
    %159 = arith.maximumf %157, %158 : vector<64x64xf32>
    %160 = vector.extract_strided_slice %148 {offsets = [384, 0], sizes = [64, 64], strides = [1, 1]} : vector<512x64xf32> to vector<64x64xf32>
    %161 = arith.maximumf %159, %160 : vector<64x64xf32>
    %162 = vector.extract_strided_slice %148 {offsets = [448, 0], sizes = [64, 64], strides = [1, 1]} : vector<512x64xf32> to vector<64x64xf32>
    %163 = arith.maximumf %161, %162 : vector<64x64xf32>
    %c0_49 = arith.constant 0 : index
    %c0_50 = arith.constant 0 : index
    %164 = vector.load %arg7[%c0_49, %c0_50] : memref<64x64xf32, #tpu.memory_space<vmem>>, vector<64x64xf32>
    %c0_51 = arith.constant 0 : index
    %c0_52 = arith.constant 0 : index
    %165 = vector.load %arg8[%c0_51, %c0_52] : memref<64x64xf32, #tpu.memory_space<vmem>>, vector<64x64xf32>
    %c0_53 = arith.constant 0 : index
    %c0_54 = arith.constant 0 : index
    %166 = vector.load %arg9[%c0_53, %c0_54] : memref<1x64xf32, #tpu.memory_space<vmem>>, vector<1x64xf32>
    %c0_55 = arith.constant 0 : index
    %c0_56 = arith.constant 0 : index
    %167 = vector.load %arg10[%c0_55, %c0_56] : memref<64x128xf32, #tpu.memory_space<vmem>>, vector<64x128xf32>
    %c0_57 = arith.constant 0 : index
    %c0_58 = arith.constant 0 : index
    %168 = vector.load %arg11[%c0_57, %c0_58] : memref<1x128xf32, #tpu.memory_space<vmem>>, vector<1x128xf32>
    %169 = arith.mulf %163, %163 : vector<64x64xf32>
    %cst_59 = arith.constant dense<0.000000e+00> : vector<64xf32>
    %170 = vector.multi_reduction <add>, %169, %cst_59 [1] : vector<64x64xf32> to vector<64xf32>
    %171 = vector.shape_cast %170 : vector<64xf32> to vector<64x1xf32>
    %172 = tpu.transpose %163, [1, 0] : vector<64x64xf32> -> vector<64x64xf32>
    %cst_60 = arith.constant dense<0.000000e+00> : vector<64x64xf32>
    %173 = tpu.matmul %163, %172, %cst_60 {dimension_numbers = #tpu.dot_dimension_numbers<[1], [0], [0], [1], [0, 0, 1, 1], [], []>} : vector<64x64xf32>, vector<64x64xf32>, vector<64x64xf32> -> vector<64x64xf32>
    %174 = tpu.transpose %171, [1, 0] : vector<64x1xf32> -> vector<1x64xf32>
    %175 = vector.broadcast %171 : vector<64x1xf32> to vector<64x64xf32>
    %176 = vector.broadcast %174 : vector<1x64xf32> to vector<64x64xf32>
    %177 = arith.addf %175, %176 : vector<64x64xf32>
    %cst_61 = arith.constant 2.000000e+00 : f32
    %178 = vector.broadcast %cst_61 : f32 to vector<64x64xf32>
    %179 = arith.mulf %178, %173 : vector<64x64xf32>
    %180 = arith.subf %177, %179 : vector<64x64xf32>
    %181 = tpu.iota {dimensions = array<i32: 1>} : vector<64x64xi32>
    %cst_62 = arith.constant dense<0x7F800000> : vector<64xf32>
    %182 = vector.multi_reduction <minimumf>, %180, %cst_62 [1] : vector<64x64xf32> to vector<64xf32>
    %183 = vector.shape_cast %182 : vector<64xf32> to vector<64x1xf32>
    %184 = vector.broadcast %183 : vector<64x1xf32> to vector<64x64xf32>
    %185 = arith.cmpf oeq, %180, %184 : vector<64x64xf32>
    %c64_i32_63 = arith.constant 64 : i32
    %186 = vector.broadcast %c64_i32_63 : i32 to vector<64x64xi32>
    %187 = arith.select %185, %181, %186 : vector<64x64xi1>, vector<64x64xi32>
    %cst_64 = arith.constant dense<2147483647> : vector<64xi32>
    %188 = vector.multi_reduction <minsi>, %187, %cst_64 [1] : vector<64x64xi32> to vector<64xi32>
    %189 = vector.shape_cast %188 : vector<64xi32> to vector<64x1xi32>
    %190 = vector.broadcast %189 : vector<64x1xi32> to vector<64x64xi32>
    %191 = arith.cmpi eq, %181, %190 : vector<64x64xi32>
    %192 = arith.extui %191 : vector<64x64xi1> to vector<64x64xi32>
    %193 = arith.sitofp %192 : vector<64x64xi32> to vector<64x64xf32>
    %cst_65 = arith.constant 1.000000e+30 : f32
    %194 = vector.broadcast %cst_65 : f32 to vector<64x64xf32>
    %195 = arith.select %191, %194, %180 : vector<64x64xi1>, vector<64x64xf32>
    %cst_66 = arith.constant dense<0x7F800000> : vector<64xf32>
    %196 = vector.multi_reduction <minimumf>, %195, %cst_66 [1] : vector<64x64xf32> to vector<64xf32>
    %197 = vector.shape_cast %196 : vector<64xf32> to vector<64x1xf32>
    %198 = vector.broadcast %197 : vector<64x1xf32> to vector<64x64xf32>
    %199 = arith.cmpf oeq, %195, %198 : vector<64x64xf32>
    %c64_i32_67 = arith.constant 64 : i32
    %200 = vector.broadcast %c64_i32_67 : i32 to vector<64x64xi32>
    %201 = arith.select %199, %181, %200 : vector<64x64xi1>, vector<64x64xi32>
    %cst_68 = arith.constant dense<2147483647> : vector<64xi32>
    %202 = vector.multi_reduction <minsi>, %201, %cst_68 [1] : vector<64x64xi32> to vector<64xi32>
    %203 = vector.shape_cast %202 : vector<64xi32> to vector<64x1xi32>
    %204 = vector.broadcast %203 : vector<64x1xi32> to vector<64x64xi32>
    %205 = arith.cmpi eq, %181, %204 : vector<64x64xi32>
    %206 = arith.extui %205 : vector<64x64xi1> to vector<64x64xi32>
    %207 = arith.sitofp %206 : vector<64x64xi32> to vector<64x64xf32>
    %cst_69 = arith.constant 1.000000e+30 : f32
    %208 = vector.broadcast %cst_69 : f32 to vector<64x64xf32>
    %209 = arith.select %205, %208, %195 : vector<64x64xi1>, vector<64x64xf32>
    %cst_70 = arith.constant dense<0x7F800000> : vector<64xf32>
    %210 = vector.multi_reduction <minimumf>, %209, %cst_70 [1] : vector<64x64xf32> to vector<64xf32>
    %211 = vector.shape_cast %210 : vector<64xf32> to vector<64x1xf32>
    %212 = vector.broadcast %211 : vector<64x1xf32> to vector<64x64xf32>
    %213 = arith.cmpf oeq, %209, %212 : vector<64x64xf32>
    %c64_i32_71 = arith.constant 64 : i32
    %214 = vector.broadcast %c64_i32_71 : i32 to vector<64x64xi32>
    %215 = arith.select %213, %181, %214 : vector<64x64xi1>, vector<64x64xi32>
    %cst_72 = arith.constant dense<2147483647> : vector<64xi32>
    %216 = vector.multi_reduction <minsi>, %215, %cst_72 [1] : vector<64x64xi32> to vector<64xi32>
    %217 = vector.shape_cast %216 : vector<64xi32> to vector<64x1xi32>
    %218 = vector.broadcast %217 : vector<64x1xi32> to vector<64x64xi32>
    %219 = arith.cmpi eq, %181, %218 : vector<64x64xi32>
    %220 = arith.extui %219 : vector<64x64xi1> to vector<64x64xi32>
    %221 = arith.sitofp %220 : vector<64x64xi32> to vector<64x64xf32>
    %cst_73 = arith.constant 1.000000e+30 : f32
    %222 = vector.broadcast %cst_73 : f32 to vector<64x64xf32>
    %223 = arith.select %219, %222, %209 : vector<64x64xi1>, vector<64x64xf32>
    %cst_74 = arith.constant dense<0x7F800000> : vector<64xf32>
    %224 = vector.multi_reduction <minimumf>, %223, %cst_74 [1] : vector<64x64xf32> to vector<64xf32>
    %225 = vector.shape_cast %224 : vector<64xf32> to vector<64x1xf32>
    %226 = vector.broadcast %225 : vector<64x1xf32> to vector<64x64xf32>
    %227 = arith.cmpf oeq, %223, %226 : vector<64x64xf32>
    %c64_i32_75 = arith.constant 64 : i32
    %228 = vector.broadcast %c64_i32_75 : i32 to vector<64x64xi32>
    %229 = arith.select %227, %181, %228 : vector<64x64xi1>, vector<64x64xi32>
    %cst_76 = arith.constant dense<2147483647> : vector<64xi32>
    %230 = vector.multi_reduction <minsi>, %229, %cst_76 [1] : vector<64x64xi32> to vector<64xi32>
    %231 = vector.shape_cast %230 : vector<64xi32> to vector<64x1xi32>
    %232 = vector.broadcast %231 : vector<64x1xi32> to vector<64x64xi32>
    %233 = arith.cmpi eq, %181, %232 : vector<64x64xi32>
    %234 = arith.extui %233 : vector<64x64xi1> to vector<64x64xi32>
    %235 = arith.sitofp %234 : vector<64x64xi32> to vector<64x64xf32>
    %cst_77 = arith.constant 1.000000e+30 : f32
    %236 = vector.broadcast %cst_77 : f32 to vector<64x64xf32>
    %237 = arith.select %233, %236, %223 : vector<64x64xi1>, vector<64x64xf32>
    %cst_78 = arith.constant dense<0x7F800000> : vector<64xf32>
    %238 = vector.multi_reduction <minimumf>, %237, %cst_78 [1] : vector<64x64xf32> to vector<64xf32>
    %239 = vector.shape_cast %238 : vector<64xf32> to vector<64x1xf32>
    %240 = vector.broadcast %239 : vector<64x1xf32> to vector<64x64xf32>
    %241 = arith.cmpf oeq, %237, %240 : vector<64x64xf32>
    %c64_i32_79 = arith.constant 64 : i32
    %242 = vector.broadcast %c64_i32_79 : i32 to vector<64x64xi32>
    %243 = arith.select %241, %181, %242 : vector<64x64xi1>, vector<64x64xi32>
    %cst_80 = arith.constant dense<2147483647> : vector<64xi32>
    %244 = vector.multi_reduction <minsi>, %243, %cst_80 [1] : vector<64x64xi32> to vector<64xi32>
    %245 = vector.shape_cast %244 : vector<64xi32> to vector<64x1xi32>
    %246 = vector.broadcast %245 : vector<64x1xi32> to vector<64x64xi32>
    %247 = arith.cmpi eq, %181, %246 : vector<64x64xi32>
    %248 = arith.extui %247 : vector<64x64xi1> to vector<64x64xi32>
    %249 = arith.sitofp %248 : vector<64x64xi32> to vector<64x64xf32>
    %cst_81 = arith.constant 1.000000e+30 : f32
    %250 = vector.broadcast %cst_81 : f32 to vector<64x64xf32>
    %251 = arith.select %247, %250, %237 : vector<64x64xi1>, vector<64x64xf32>
    %cst_82 = arith.constant dense<0x7F800000> : vector<64xf32>
    %252 = vector.multi_reduction <minimumf>, %251, %cst_82 [1] : vector<64x64xf32> to vector<64xf32>
    %253 = vector.shape_cast %252 : vector<64xf32> to vector<64x1xf32>
    %254 = vector.broadcast %253 : vector<64x1xf32> to vector<64x64xf32>
    %255 = arith.cmpf oeq, %251, %254 : vector<64x64xf32>
    %c64_i32_83 = arith.constant 64 : i32
    %256 = vector.broadcast %c64_i32_83 : i32 to vector<64x64xi32>
    %257 = arith.select %255, %181, %256 : vector<64x64xi1>, vector<64x64xi32>
    %cst_84 = arith.constant dense<2147483647> : vector<64xi32>
    %258 = vector.multi_reduction <minsi>, %257, %cst_84 [1] : vector<64x64xi32> to vector<64xi32>
    %259 = vector.shape_cast %258 : vector<64xi32> to vector<64x1xi32>
    %260 = vector.broadcast %259 : vector<64x1xi32> to vector<64x64xi32>
    %261 = arith.cmpi eq, %181, %260 : vector<64x64xi32>
    %262 = arith.extui %261 : vector<64x64xi1> to vector<64x64xi32>
    %263 = arith.sitofp %262 : vector<64x64xi32> to vector<64x64xf32>
    %cst_85 = arith.constant 1.000000e+30 : f32
    %264 = vector.broadcast %cst_85 : f32 to vector<64x64xf32>
    %265 = arith.select %261, %264, %251 : vector<64x64xi1>, vector<64x64xf32>
    %cst_86 = arith.constant dense<0x7F800000> : vector<64xf32>
    %266 = vector.multi_reduction <minimumf>, %265, %cst_86 [1] : vector<64x64xf32> to vector<64xf32>
    %267 = vector.shape_cast %266 : vector<64xf32> to vector<64x1xf32>
    %268 = vector.broadcast %267 : vector<64x1xf32> to vector<64x64xf32>
    %269 = arith.cmpf oeq, %265, %268 : vector<64x64xf32>
    %c64_i32_87 = arith.constant 64 : i32
    %270 = vector.broadcast %c64_i32_87 : i32 to vector<64x64xi32>
    %271 = arith.select %269, %181, %270 : vector<64x64xi1>, vector<64x64xi32>
    %cst_88 = arith.constant dense<2147483647> : vector<64xi32>
    %272 = vector.multi_reduction <minsi>, %271, %cst_88 [1] : vector<64x64xi32> to vector<64xi32>
    %273 = vector.shape_cast %272 : vector<64xi32> to vector<64x1xi32>
    %274 = vector.broadcast %273 : vector<64x1xi32> to vector<64x64xi32>
    %275 = arith.cmpi eq, %181, %274 : vector<64x64xi32>
    %276 = arith.extui %275 : vector<64x64xi1> to vector<64x64xi32>
    %277 = arith.sitofp %276 : vector<64x64xi32> to vector<64x64xf32>
    %cst_89 = arith.constant 1.000000e+30 : f32
    %278 = vector.broadcast %cst_89 : f32 to vector<64x64xf32>
    %279 = arith.select %275, %278, %265 : vector<64x64xi1>, vector<64x64xf32>
    %cst_90 = arith.constant dense<0x7F800000> : vector<64xf32>
    %280 = vector.multi_reduction <minimumf>, %279, %cst_90 [1] : vector<64x64xf32> to vector<64xf32>
    %281 = vector.shape_cast %280 : vector<64xf32> to vector<64x1xf32>
    %282 = vector.broadcast %281 : vector<64x1xf32> to vector<64x64xf32>
    %283 = arith.cmpf oeq, %279, %282 : vector<64x64xf32>
    %c64_i32_91 = arith.constant 64 : i32
    %284 = vector.broadcast %c64_i32_91 : i32 to vector<64x64xi32>
    %285 = arith.select %283, %181, %284 : vector<64x64xi1>, vector<64x64xi32>
    %cst_92 = arith.constant dense<2147483647> : vector<64xi32>
    %286 = vector.multi_reduction <minsi>, %285, %cst_92 [1] : vector<64x64xi32> to vector<64xi32>
    %287 = vector.shape_cast %286 : vector<64xi32> to vector<64x1xi32>
    %288 = vector.broadcast %287 : vector<64x1xi32> to vector<64x64xi32>
    %289 = arith.cmpi eq, %181, %288 : vector<64x64xi32>
    %290 = arith.extui %289 : vector<64x64xi1> to vector<64x64xi32>
    %291 = arith.sitofp %290 : vector<64x64xi32> to vector<64x64xf32>
    %292 = tpu.concatenate %193, %207, %221, %235, %249, %263, %277, %291 in 0 : vector<64x64xf32>, vector<64x64xf32>, vector<64x64xf32>, vector<64x64xf32>, vector<64x64xf32>, vector<64x64xf32>, vector<64x64xf32>, vector<64x64xf32> -> vector<512x64xf32>
    %293 = arith.truncf %163 : vector<64x64xf32> to vector<64x64xbf16>
    %294 = arith.truncf %164 : vector<64x64xf32> to vector<64x64xbf16>
    %cst_93 = arith.constant dense<0.000000e+00> : vector<64x64xf32>
    %295 = tpu.matmul %293, %294, %cst_93 {dimension_numbers = #tpu.dot_dimension_numbers<[1], [0], [0], [1], [0, 0, 1, 1], [], []>} : vector<64x64xbf16>, vector<64x64xbf16>, vector<64x64xf32> -> vector<64x64xf32>
    %296 = arith.truncf %165 : vector<64x64xf32> to vector<64x64xbf16>
    %cst_94 = arith.constant dense<0.000000e+00> : vector<64x64xf32>
    %297 = tpu.matmul %293, %296, %cst_94 {dimension_numbers = #tpu.dot_dimension_numbers<[1], [0], [0], [1], [0, 0, 1, 1], [], []>} : vector<64x64xbf16>, vector<64x64xbf16>, vector<64x64xf32> -> vector<64x64xf32>
    %298 = arith.subf %295, %297 : vector<64x64xf32>
    %299 = vector.broadcast %166 : vector<1x64xf32> to vector<64x64xf32>
    %300 = arith.addf %298, %299 : vector<64x64xf32>
    %cst_95 = arith.constant dense<0.000000e+00> : vector<512x64xf32>
    %301 = tpu.matmul %292, %297, %cst_95 {dimension_numbers = #tpu.dot_dimension_numbers<[1], [0], [0], [1], [0, 0, 1, 1], [], []>} : vector<512x64xf32>, vector<64x64xf32>, vector<512x64xf32> -> vector<512x64xf32>
    %302 = tpu.concatenate %300, %300, %300, %300, %300, %300, %300, %300 in 0 : vector<64x64xf32>, vector<64x64xf32>, vector<64x64xf32>, vector<64x64xf32>, vector<64x64xf32>, vector<64x64xf32>, vector<64x64xf32>, vector<64x64xf32> -> vector<512x64xf32>
    %303 = arith.addf %302, %301 : vector<512x64xf32>
    %cst_96 = arith.constant 0.000000e+00 : f32
    %304 = vector.broadcast %cst_96 : f32 to vector<512x64xf32>
    %305 = arith.maximumf %303, %304 : vector<512x64xf32>
    %306 = arith.truncf %305 : vector<512x64xf32> to vector<512x64xbf16>
    %307 = arith.truncf %167 : vector<64x128xf32> to vector<64x128xbf16>
    %cst_97 = arith.constant dense<0.000000e+00> : vector<512x128xf32>
    %308 = tpu.matmul %306, %307, %cst_97 {dimension_numbers = #tpu.dot_dimension_numbers<[1], [0], [0], [1], [0, 0, 1, 1], [], []>} : vector<512x64xbf16>, vector<64x128xbf16>, vector<512x128xf32> -> vector<512x128xf32>
    %309 = vector.broadcast %168 : vector<1x128xf32> to vector<512x128xf32>
    %310 = arith.addf %308, %309 : vector<512x128xf32>
    %311 = vector.extract_strided_slice %310 {offsets = [0, 0], sizes = [64, 128], strides = [1, 1]} : vector<512x128xf32> to vector<64x128xf32>
    %312 = vector.extract_strided_slice %310 {offsets = [64, 0], sizes = [64, 128], strides = [1, 1]} : vector<512x128xf32> to vector<64x128xf32>
    %313 = arith.maximumf %311, %312 : vector<64x128xf32>
    %314 = vector.extract_strided_slice %310 {offsets = [128, 0], sizes = [64, 128], strides = [1, 1]} : vector<512x128xf32> to vector<64x128xf32>
    %315 = arith.maximumf %313, %314 : vector<64x128xf32>
    %316 = vector.extract_strided_slice %310 {offsets = [192, 0], sizes = [64, 128], strides = [1, 1]} : vector<512x128xf32> to vector<64x128xf32>
    %317 = arith.maximumf %315, %316 : vector<64x128xf32>
    %318 = vector.extract_strided_slice %310 {offsets = [256, 0], sizes = [64, 128], strides = [1, 1]} : vector<512x128xf32> to vector<64x128xf32>
    %319 = arith.maximumf %317, %318 : vector<64x128xf32>
    %320 = vector.extract_strided_slice %310 {offsets = [320, 0], sizes = [64, 128], strides = [1, 1]} : vector<512x128xf32> to vector<64x128xf32>
    %321 = arith.maximumf %319, %320 : vector<64x128xf32>
    %322 = vector.extract_strided_slice %310 {offsets = [384, 0], sizes = [64, 128], strides = [1, 1]} : vector<512x128xf32> to vector<64x128xf32>
    %323 = arith.maximumf %321, %322 : vector<64x128xf32>
    %324 = vector.extract_strided_slice %310 {offsets = [448, 0], sizes = [64, 128], strides = [1, 1]} : vector<512x128xf32> to vector<64x128xf32>
    %325 = arith.maximumf %323, %324 : vector<64x128xf32>
    %c0_98 = arith.constant 0 : index
    %c0_99 = arith.constant 0 : index
    %326 = vector.load %arg12[%c0_98, %c0_99] : memref<128x384xf32, #tpu.memory_space<vmem>>, vector<128x384xf32>
    %c0_100 = arith.constant 0 : index
    %c0_101 = arith.constant 0 : index
    %327 = vector.load %arg13[%c0_100, %c0_101] : memref<128x128xf32, #tpu.memory_space<vmem>>, vector<128x128xf32>
    %c0_102 = arith.constant 0 : index
    %c0_103 = arith.constant 0 : index
    %328 = vector.load %arg14[%c0_102, %c0_103] : memref<1x128xf32, #tpu.memory_space<vmem>>, vector<1x128xf32>
    %329 = arith.truncf %325 : vector<64x128xf32> to vector<64x128xbf16>
    %330 = arith.truncf %326 : vector<128x384xf32> to vector<128x384xbf16>
    %cst_104 = arith.constant dense<0.000000e+00> : vector<64x384xf32>
    %331 = tpu.matmul %329, %330, %cst_104 {dimension_numbers = #tpu.dot_dimension_numbers<[1], [0], [0], [1], [0, 0, 1, 1], [], []>} : vector<64x128xbf16>, vector<128x384xbf16>, vector<64x384xf32> -> vector<64x384xf32>
    %332 = vector.extract_strided_slice %331 {offsets = [0, 0], sizes = [64, 32], strides = [1, 1]} : vector<64x384xf32> to vector<64x32xf32>
    %333 = vector.extract_strided_slice %331 {offsets = [0, 32], sizes = [64, 32], strides = [1, 1]} : vector<64x384xf32> to vector<64x32xf32>
    %334 = vector.extract_strided_slice %331 {offsets = [0, 64], sizes = [64, 32], strides = [1, 1]} : vector<64x384xf32> to vector<64x32xf32>
    %335 = vector.extract_strided_slice %331 {offsets = [0, 96], sizes = [64, 32], strides = [1, 1]} : vector<64x384xf32> to vector<64x32xf32>
    %336 = vector.shape_cast %332 : vector<64x32xf32> to vector<1x64x32xf32>
    %337 = vector.shape_cast %333 : vector<64x32xf32> to vector<1x64x32xf32>
    %338 = vector.shape_cast %334 : vector<64x32xf32> to vector<1x64x32xf32>
    %339 = vector.shape_cast %335 : vector<64x32xf32> to vector<1x64x32xf32>
    %340 = tpu.concatenate %336, %337, %338, %339 in 0 : vector<1x64x32xf32>, vector<1x64x32xf32>, vector<1x64x32xf32>, vector<1x64x32xf32> -> vector<4x64x32xf32>
    %341 = vector.extract_strided_slice %331 {offsets = [0, 128], sizes = [64, 32], strides = [1, 1]} : vector<64x384xf32> to vector<64x32xf32>
    %342 = vector.extract_strided_slice %331 {offsets = [0, 160], sizes = [64, 32], strides = [1, 1]} : vector<64x384xf32> to vector<64x32xf32>
    %343 = vector.extract_strided_slice %331 {offsets = [0, 192], sizes = [64, 32], strides = [1, 1]} : vector<64x384xf32> to vector<64x32xf32>
    %344 = vector.extract_strided_slice %331 {offsets = [0, 224], sizes = [64, 32], strides = [1, 1]} : vector<64x384xf32> to vector<64x32xf32>
    %345 = vector.shape_cast %341 : vector<64x32xf32> to vector<1x64x32xf32>
    %346 = vector.shape_cast %342 : vector<64x32xf32> to vector<1x64x32xf32>
    %347 = vector.shape_cast %343 : vector<64x32xf32> to vector<1x64x32xf32>
    %348 = vector.shape_cast %344 : vector<64x32xf32> to vector<1x64x32xf32>
    %349 = tpu.concatenate %345, %346, %347, %348 in 0 : vector<1x64x32xf32>, vector<1x64x32xf32>, vector<1x64x32xf32>, vector<1x64x32xf32> -> vector<4x64x32xf32>
    %350 = vector.extract_strided_slice %331 {offsets = [0, 256], sizes = [64, 32], strides = [1, 1]} : vector<64x384xf32> to vector<64x32xf32>
    %351 = vector.extract_strided_slice %331 {offsets = [0, 288], sizes = [64, 32], strides = [1, 1]} : vector<64x384xf32> to vector<64x32xf32>
    %352 = vector.extract_strided_slice %331 {offsets = [0, 320], sizes = [64, 32], strides = [1, 1]} : vector<64x384xf32> to vector<64x32xf32>
    %353 = vector.extract_strided_slice %331 {offsets = [0, 352], sizes = [64, 32], strides = [1, 1]} : vector<64x384xf32> to vector<64x32xf32>
    %354 = vector.shape_cast %350 : vector<64x32xf32> to vector<1x64x32xf32>
    %355 = vector.shape_cast %351 : vector<64x32xf32> to vector<1x64x32xf32>
    %356 = vector.shape_cast %352 : vector<64x32xf32> to vector<1x64x32xf32>
    %357 = vector.shape_cast %353 : vector<64x32xf32> to vector<1x64x32xf32>
    %358 = tpu.concatenate %354, %355, %356, %357 in 0 : vector<1x64x32xf32>, vector<1x64x32xf32>, vector<1x64x32xf32>, vector<1x64x32xf32> -> vector<4x64x32xf32>
    %359 = arith.truncf %340 : vector<4x64x32xf32> to vector<4x64x32xbf16>
    %360 = arith.truncf %349 : vector<4x64x32xf32> to vector<4x64x32xbf16>
    %cst_105 = arith.constant dense<0.000000e+00> : vector<4x64x64xf32>
    %361 = tpu.matmul %359, %360, %cst_105 {dimension_numbers = #tpu.dot_dimension_numbers<[2], [2], [1], [1], [0, 0, 0, 1, 1, 1], [0], [0]>} : vector<4x64x32xbf16>, vector<4x64x32xbf16>, vector<4x64x64xf32> -> vector<4x64x64xf32>
    %cst_106 = arith.constant 0.176776692 : f32
    %362 = vector.broadcast %cst_106 : f32 to vector<4x64x64xf32>
    %363 = arith.mulf %361, %362 : vector<4x64x64xf32>
    %cst_107 = arith.constant dense<0xFF800000> : vector<4x64xf32>
    %364 = vector.multi_reduction <maximumf>, %363, %cst_107 [2] : vector<4x64x64xf32> to vector<4x64xf32>
    %365 = vector.shape_cast %364 : vector<4x64xf32> to vector<4x64x1xf32>
    %366 = vector.broadcast %365 : vector<4x64x1xf32> to vector<4x64x64xf32>
    %367 = arith.subf %363, %366 : vector<4x64x64xf32>
    %368 = math.exp %367 : vector<4x64x64xf32>
    %cst_108 = arith.constant dense<0.000000e+00> : vector<4x64xf32>
    %369 = vector.multi_reduction <add>, %368, %cst_108 [2] : vector<4x64x64xf32> to vector<4x64xf32>
    %370 = vector.shape_cast %369 : vector<4x64xf32> to vector<4x64x1xf32>
    %371 = tpu.reciprocal %370 {approx = true} : vector<4x64x1xf32> -> vector<4x64x1xf32>
    %372 = vector.broadcast %371 : vector<4x64x1xf32> to vector<4x64x64xf32>
    %373 = arith.mulf %368, %372 : vector<4x64x64xf32>
    %374 = arith.truncf %373 : vector<4x64x64xf32> to vector<4x64x64xbf16>
    %375 = arith.truncf %358 : vector<4x64x32xf32> to vector<4x64x32xbf16>
    %cst_109 = arith.constant dense<0.000000e+00> : vector<4x64x32xf32>
    %376 = tpu.matmul %374, %375, %cst_109 {dimension_numbers = #tpu.dot_dimension_numbers<[2], [1], [1], [2], [0, 0, 0, 1, 1, 2], [0], [0]>} : vector<4x64x64xbf16>, vector<4x64x32xbf16>, vector<4x64x32xf32> -> vector<4x64x32xf32>
    %377 = vector.extract_strided_slice %376 {offsets = [0, 0, 0], sizes = [1, 64, 32], strides = [1, 1, 1]} : vector<4x64x32xf32> to vector<1x64x32xf32>
    %378 = vector.shape_cast %377 : vector<1x64x32xf32> to vector<64x32xf32>
    %379 = vector.extract_strided_slice %376 {offsets = [1, 0, 0], sizes = [1, 64, 32], strides = [1, 1, 1]} : vector<4x64x32xf32> to vector<1x64x32xf32>
    %380 = vector.shape_cast %379 : vector<1x64x32xf32> to vector<64x32xf32>
    %381 = vector.extract_strided_slice %376 {offsets = [2, 0, 0], sizes = [1, 64, 32], strides = [1, 1, 1]} : vector<4x64x32xf32> to vector<1x64x32xf32>
    %382 = vector.shape_cast %381 : vector<1x64x32xf32> to vector<64x32xf32>
    %383 = vector.extract_strided_slice %376 {offsets = [3, 0, 0], sizes = [1, 64, 32], strides = [1, 1, 1]} : vector<4x64x32xf32> to vector<1x64x32xf32>
    %384 = vector.shape_cast %383 : vector<1x64x32xf32> to vector<64x32xf32>
    %385 = tpu.concatenate %378, %380, %382, %384 in 1 : vector<64x32xf32>, vector<64x32xf32>, vector<64x32xf32>, vector<64x32xf32> -> vector<64x128xf32>
    %386 = arith.truncf %385 : vector<64x128xf32> to vector<64x128xbf16>
    %387 = arith.truncf %327 : vector<128x128xf32> to vector<128x128xbf16>
    %cst_110 = arith.constant dense<0.000000e+00> : vector<64x128xf32>
    %388 = tpu.matmul %386, %387, %cst_110 {dimension_numbers = #tpu.dot_dimension_numbers<[1], [0], [0], [1], [0, 0, 1, 1], [], []>} : vector<64x128xbf16>, vector<128x128xbf16>, vector<64x128xf32> -> vector<64x128xf32>
    %389 = vector.broadcast %328 : vector<1x128xf32> to vector<64x128xf32>
    %390 = arith.addf %388, %389 : vector<64x128xf32>
    %c0_111 = arith.constant 0 : index
    %c0_112 = arith.constant 0 : index
    %391 = vector.load %arg15[%c0_111, %c0_112] : memref<128x128xf32, #tpu.memory_space<vmem>>, vector<128x128xf32>
    %c0_113 = arith.constant 0 : index
    %c0_114 = arith.constant 0 : index
    %392 = vector.load %arg16[%c0_113, %c0_114] : memref<128x128xf32, #tpu.memory_space<vmem>>, vector<128x128xf32>
    %c0_115 = arith.constant 0 : index
    %c0_116 = arith.constant 0 : index
    %393 = vector.load %arg17[%c0_115, %c0_116] : memref<128x128xf32, #tpu.memory_space<vmem>>, vector<128x128xf32>
    %c0_117 = arith.constant 0 : index
    %c0_118 = arith.constant 0 : index
    %394 = vector.load %arg18[%c0_117, %c0_118] : memref<1x128xf32, #tpu.memory_space<vmem>>, vector<1x128xf32>
    %c0_119 = arith.constant 0 : index
    %c0_120 = arith.constant 0 : index
    %395 = vector.load %arg19[%c0_119, %c0_120] : memref<128x64xf32, #tpu.memory_space<vmem>>, vector<128x64xf32>
    %c0_121 = arith.constant 0 : index
    %c0_122 = arith.constant 0 : index
    %396 = vector.load %arg20[%c0_121, %c0_122] : memref<1x64xf32, #tpu.memory_space<vmem>>, vector<1x64xf32>
    %c0_123 = arith.constant 0 : index
    %c0_124 = arith.constant 0 : index
    %397 = vector.load %arg21[%c0_123, %c0_124] : memref<64x128xf32, #tpu.memory_space<vmem>>, vector<64x128xf32>
    %c0_125 = arith.constant 0 : index
    %c0_126 = arith.constant 0 : index
    %398 = vector.load %arg22[%c0_125, %c0_126] : memref<1x128xf32, #tpu.memory_space<vmem>>, vector<1x128xf32>
    %cst_127 = arith.constant dense<0xFF800000> : vector<128xf32>
    %399 = vector.multi_reduction <maximumf>, %325, %cst_127 [0] : vector<64x128xf32> to vector<128xf32>
    %400 = vector.shape_cast %399 : vector<128xf32> to vector<1x128xf32>
    %401 = arith.truncf %325 : vector<64x128xf32> to vector<64x128xbf16>
    %402 = arith.truncf %390 : vector<64x128xf32> to vector<64x128xbf16>
    %403 = arith.truncf %400 : vector<1x128xf32> to vector<1x128xbf16>
    %404 = arith.truncf %391 : vector<128x128xf32> to vector<128x128xbf16>
    %cst_128 = arith.constant dense<0.000000e+00> : vector<64x128xf32>
    %405 = tpu.matmul %401, %404, %cst_128 {dimension_numbers = #tpu.dot_dimension_numbers<[1], [0], [0], [1], [0, 0, 1, 1], [], []>} : vector<64x128xbf16>, vector<128x128xbf16>, vector<64x128xf32> -> vector<64x128xf32>
    %406 = arith.truncf %392 : vector<128x128xf32> to vector<128x128xbf16>
    %cst_129 = arith.constant dense<0.000000e+00> : vector<1x128xf32>
    %407 = tpu.matmul %403, %406, %cst_129 {dimension_numbers = #tpu.dot_dimension_numbers<[1], [0], [0], [1], [0, 0, 1, 1], [], []>} : vector<1x128xbf16>, vector<128x128xbf16>, vector<1x128xf32> -> vector<1x128xf32>
    %408 = vector.broadcast %407 : vector<1x128xf32> to vector<64x128xf32>
    %409 = arith.addf %405, %408 : vector<64x128xf32>
    %410 = arith.truncf %393 : vector<128x128xf32> to vector<128x128xbf16>
    %cst_130 = arith.constant dense<0.000000e+00> : vector<64x128xf32>
    %411 = tpu.matmul %402, %410, %cst_130 {dimension_numbers = #tpu.dot_dimension_numbers<[1], [0], [0], [1], [0, 0, 1, 1], [], []>} : vector<64x128xbf16>, vector<128x128xbf16>, vector<64x128xf32> -> vector<64x128xf32>
    %412 = arith.addf %409, %411 : vector<64x128xf32>
    %413 = vector.broadcast %394 : vector<1x128xf32> to vector<64x128xf32>
    %414 = arith.addf %412, %413 : vector<64x128xf32>
    %cst_131 = arith.constant 0.000000e+00 : f32
    %415 = vector.broadcast %cst_131 : f32 to vector<64x128xf32>
    %416 = arith.maximumf %414, %415 : vector<64x128xf32>
    %417 = arith.truncf %416 : vector<64x128xf32> to vector<64x128xbf16>
    %418 = arith.truncf %395 : vector<128x64xf32> to vector<128x64xbf16>
    %cst_132 = arith.constant dense<0.000000e+00> : vector<64x64xf32>
    %419 = tpu.matmul %417, %418, %cst_132 {dimension_numbers = #tpu.dot_dimension_numbers<[1], [0], [0], [1], [0, 0, 1, 1], [], []>} : vector<64x128xbf16>, vector<128x64xbf16>, vector<64x64xf32> -> vector<64x64xf32>
    %420 = vector.broadcast %396 : vector<1x64xf32> to vector<64x64xf32>
    %421 = arith.addf %419, %420 : vector<64x64xf32>
    %cst_133 = arith.constant 0.000000e+00 : f32
    %422 = vector.broadcast %cst_133 : f32 to vector<64x64xf32>
    %423 = arith.maximumf %421, %422 : vector<64x64xf32>
    %424 = arith.truncf %423 : vector<64x64xf32> to vector<64x64xbf16>
    %425 = arith.truncf %397 : vector<64x128xf32> to vector<64x128xbf16>
    %cst_134 = arith.constant dense<0.000000e+00> : vector<64x128xf32>
    %426 = tpu.matmul %424, %425, %cst_134 {dimension_numbers = #tpu.dot_dimension_numbers<[1], [0], [0], [1], [0, 0, 1, 1], [], []>} : vector<64x64xbf16>, vector<64x128xbf16>, vector<64x128xf32> -> vector<64x128xf32>
    %427 = vector.broadcast %398 : vector<1x128xf32> to vector<64x128xf32>
    %428 = arith.addf %426, %427 : vector<64x128xf32>
    %cst_135 = arith.constant dense<0xFF800000> : vector<64xf32>
    %429 = vector.multi_reduction <maximumf>, %428, %cst_135 [1] : vector<64x128xf32> to vector<64xf32>
    %430 = vector.shape_cast %429 : vector<64xf32> to vector<64x1xf32>
    %431 = vector.broadcast %430 : vector<64x1xf32> to vector<64x128xf32>
    %432 = arith.subf %428, %431 : vector<64x128xf32>
    %433 = math.exp %432 : vector<64x128xf32>
    %cst_136 = arith.constant dense<0.000000e+00> : vector<64xf32>
    %434 = vector.multi_reduction <add>, %433, %cst_136 [1] : vector<64x128xf32> to vector<64xf32>
    %435 = vector.shape_cast %434 : vector<64xf32> to vector<64x1xf32>
    %436 = math.log %435 : vector<64x1xf32>
    %437 = vector.broadcast %436 : vector<64x1xf32> to vector<64x128xf32>
    %438 = arith.subf %432, %437 : vector<64x128xf32>
    %c0_137 = arith.constant 0 : index
    %c0_138 = arith.constant 0 : index
    %c0_139 = arith.constant 0 : index
    %439 = vector.load %arg23[%c0_137, %c0_138, %c0_139] : memref<1x64x128xf32, #tpu.memory_space<vmem>>, vector<1x64x128xf32>
    %440 = vector.shape_cast %439 : vector<1x64x128xf32> to vector<64x128xf32>
    %441 = vector.shape_cast %438 : vector<64x128xf32> to vector<1x64x128xf32>
    tpu.vector_store %arg23[%c0_137, %c0_138, %c0_139], %441 {strides = array<i32>} : memref<1x64x128xf32, #tpu.memory_space<vmem>>, vector<1x64x128xf32>,
    return
  }
  func.func @transform_0(%arg0: i32) -> (i32, i32, i32) {
    %c0_i32 = arith.constant 0 : i32
    %c0_i32_0 = arith.constant 0 : i32
    %c0_i32_1 = arith.constant 0 : i32
    return %arg0, %c0_i32, %c0_i32_0 : i32, i32, i32
  }
  func.func @transform_1(%arg0: i32) -> (i32, i32) {
    %c0_i32 = arith.constant 0 : i32
    %c0_i32_0 = arith.constant 0 : i32
    %c0_i32_1 = arith.constant 0 : i32
    return %c0_i32, %c0_i32_0 : i32, i32
  }
  func.func @transform_2(%arg0: i32) -> (i32, i32) {
    %c0_i32 = arith.constant 0 : i32
    %c0_i32_0 = arith.constant 0 : i32
    %c0_i32_1 = arith.constant 0 : i32
    return %c0_i32, %c0_i32_0 : i32, i32
  }
  func.func @transform_3(%arg0: i32) -> (i32, i32) {
    %c0_i32 = arith.constant 0 : i32
    %c0_i32_0 = arith.constant 0 : i32
    %c0_i32_1 = arith.constant 0 : i32
    return %c0_i32, %c0_i32_0 : i32, i32
  }
  func.func @transform_4(%arg0: i32) -> (i32, i32) {
    %c0_i32 = arith.constant 0 : i32
    %c0_i32_0 = arith.constant 0 : i32
    %c0_i32_1 = arith.constant 0 : i32
    return %c0_i32, %c0_i32_0 : i32, i32
  }
  func.func @transform_5(%arg0: i32) -> (i32, i32) {
    %c0_i32 = arith.constant 0 : i32
    %c0_i32_0 = arith.constant 0 : i32
    %c0_i32_1 = arith.constant 0 : i32
    return %c0_i32, %c0_i32_0 : i32, i32
  }
  func.func @transform_6(%arg0: i32) -> (i32, i32) {
    %c0_i32 = arith.constant 0 : i32
    %c0_i32_0 = arith.constant 0 : i32
    %c0_i32_1 = arith.constant 0 : i32
    return %c0_i32, %c0_i32_0 : i32, i32
  }
  func.func @transform_7(%arg0: i32) -> (i32, i32) {
    %c0_i32 = arith.constant 0 : i32
    %c0_i32_0 = arith.constant 0 : i32
    %c0_i32_1 = arith.constant 0 : i32
    return %c0_i32, %c0_i32_0 : i32, i32
  }
  func.func @transform_8(%arg0: i32) -> (i32, i32) {
    %c0_i32 = arith.constant 0 : i32
    %c0_i32_0 = arith.constant 0 : i32
    %c0_i32_1 = arith.constant 0 : i32
    return %c0_i32, %c0_i32_0 : i32, i32
  }
  func.func @transform_9(%arg0: i32) -> (i32, i32) {
    %c0_i32 = arith.constant 0 : i32
    %c0_i32_0 = arith.constant 0 : i32
    %c0_i32_1 = arith.constant 0 : i32
    return %c0_i32, %c0_i32_0 : i32, i32
  }
  func.func @transform_10(%arg0: i32) -> (i32, i32) {
    %c0_i32 = arith.constant 0 : i32
    %c0_i32_0 = arith.constant 0 : i32
    %c0_i32_1 = arith.constant 0 : i32
    return %c0_i32, %c0_i32_0 : i32, i32
  }
  func.func @transform_11(%arg0: i32) -> (i32, i32) {
    %c0_i32 = arith.constant 0 : i32
    %c0_i32_0 = arith.constant 0 : i32
    %c0_i32_1 = arith.constant 0 : i32
    return %c0_i32, %c0_i32_0 : i32, i32
  }
  func.func @transform_12(%arg0: i32) -> (i32, i32) {
    %c0_i32 = arith.constant 0 : i32
    %c0_i32_0 = arith.constant 0 : i32
    %c0_i32_1 = arith.constant 0 : i32
    return %c0_i32, %c0_i32_0 : i32, i32
  }
  func.func @transform_13(%arg0: i32) -> (i32, i32) {
    %c0_i32 = arith.constant 0 : i32
    %c0_i32_0 = arith.constant 0 : i32
    %c0_i32_1 = arith.constant 0 : i32
    return %c0_i32, %c0_i32_0 : i32, i32
  }
  func.func @transform_14(%arg0: i32) -> (i32, i32) {
    %c0_i32 = arith.constant 0 : i32
    %c0_i32_0 = arith.constant 0 : i32
    %c0_i32_1 = arith.constant 0 : i32
    return %c0_i32, %c0_i32_0 : i32, i32
  }
  func.func @transform_15(%arg0: i32) -> (i32, i32) {
    %c0_i32 = arith.constant 0 : i32
    %c0_i32_0 = arith.constant 0 : i32
    %c0_i32_1 = arith.constant 0 : i32
    return %c0_i32, %c0_i32_0 : i32, i32
  }
  func.func @transform_16(%arg0: i32) -> (i32, i32) {
    %c0_i32 = arith.constant 0 : i32
    %c0_i32_0 = arith.constant 0 : i32
    %c0_i32_1 = arith.constant 0 : i32
    return %c0_i32, %c0_i32_0 : i32, i32
  }
  func.func @transform_17(%arg0: i32) -> (i32, i32) {
    %c0_i32 = arith.constant 0 : i32
    %c0_i32_0 = arith.constant 0 : i32
    %c0_i32_1 = arith.constant 0 : i32
    return %c0_i32, %c0_i32_0 : i32, i32
  }
  func.func @transform_18(%arg0: i32) -> (i32, i32) {
    %c0_i32 = arith.constant 0 : i32
    %c0_i32_0 = arith.constant 0 : i32
    %c0_i32_1 = arith.constant 0 : i32
    return %c0_i32, %c0_i32_0 : i32, i32
  }
  func.func @transform_19(%arg0: i32) -> (i32, i32) {
    %c0_i32 = arith.constant 0 : i32
    %c0_i32_0 = arith.constant 0 : i32
    %c0_i32_1 = arith.constant 0 : i32
    return %c0_i32, %c0_i32_0 : i32, i32
  }
  func.func @transform_20(%arg0: i32) -> (i32, i32) {
    %c0_i32 = arith.constant 0 : i32
    %c0_i32_0 = arith.constant 0 : i32
    %c0_i32_1 = arith.constant 0 : i32
    return %c0_i32, %c0_i32_0 : i32, i32
  }
  func.func @transform_21(%arg0: i32) -> (i32, i32) {
    %c0_i32 = arith.constant 0 : i32
    %c0_i32_0 = arith.constant 0 : i32
    %c0_i32_1 = arith.constant 0 : i32
    return %c0_i32, %c0_i32_0 : i32, i32
  }
  func.func @transform_22(%arg0: i32) -> (i32, i32, i32) {
    %c0_i32 = arith.constant 0 : i32
    %c0_i32_0 = arith.constant 0 : i32
    %c0_i32_1 = arith.constant 0 : i32
    return %arg0, %c0_i32, %c0_i32_0 : i32, i32, i32
  }
}

</mosaic_0001>

<bundles_post_ra>
// kernel: tpu_custom_call.1
= control target key start
LH: loop header
LB: loop body
LE: loop exit
PB: predicated region body
PF: predicated region fallthrough
CT: control target
= control target key end

     0   :  { %s15151_s0 = inlined_call_operand.vmem [shape: f32[2,64,3], index: 0, kind: input, shape index: {}]   ;;  %s15152_s1 = inlined_call_operand.vmem [shape: f32[3,64], index: 1, kind: input, shape index: {}]   ;;  %s15153_s2 = inlined_call_operand.hbm [shape: f32[3,64], index: 2, kind: input, shape index: {}]   ;;  %s15154_s3 = inlined_call_operand.vmem [shape: f32[1,64], index: 3, kind: input, shape index: {}]   ;;  %s15155_s4 = inlined_call_operand.hbm [shape: f32[64,64], index: 4, kind: input, shape index: {}]   ;;  %s15156_s5 = inlined_call_operand.vmem [shape: f32[1,64], index: 5, kind: input, shape index: {}]   ;;  %s15157_s6 = inlined_call_operand.hbm [shape: f32[64,64], index: 6, kind: input, shape index: {}]   ;;  %s15158_s7 = inlined_call_operand.hbm [shape: f32[64,64], index: 7, kind: input, shape index: {}]   ;;  %s15159_s8 = inlined_call_operand.vmem [shape: f32[1,64], index: 8, kind: input, shape index: {}]   ;;  %s15160_s9 = inlined_call_operand.hbm [shape: f32[64,128], index: 9, kind: input, shape index: {}]   ;;  %s15161_s10 = inlined_call_operand.vmem [shape: f32[1,128], index: 10, kind: input, shape index: {}]   ;;  %s15162_s11 = inlined_call_operand.hbm [shape: f32[128,384], index: 11, kind: input, shape index: {}]   ;;  %s15163_s12 = inlined_call_operand.vmem [shape: f32[128,128], index: 12, kind: input, shape index: {}]   ;;  %s15164_s13 = inlined_call_operand.vmem [shape: f32[1,128], index: 13, kind: input, shape index: {}]   ;;  %s15165_s14 = inlined_call_operand.vmem [shape: f32[128,128], index: 14, kind: input, shape index: {}]   ;;  %s15166_s15 = inlined_call_operand.hbm [shape: f32[128,128], index: 15, kind: input, shape index: {}]   ;;  %s15167_s16 = inlined_call_operand.hbm [shape: f32[128,128], index: 16, kind: input, shape index: {}]   ;;  %s15168_s17 = inlined_call_operand.vmem [shape: f32[1,128], index: 17, kind: input, shape index: {}]   ;;  %s15169_s18 = inlined_call_operand.vmem [shape: f32[128,64], index: 18, kind: input, shape index: {}]   ;;  %s15170_s19 = inlined_call_operand.vmem [shape: f32[1,64], index: 19, kind: input, shape index: {}]   ;;  %s15171_s20 = inlined_call_operand.hbm [shape: f32[64,128], index: 20, kind: input, shape index: {}]   ;;  %s15172_s21 = inlined_call_operand.vmem [shape: f32[1,128], index: 21, kind: input, shape index: {}]   ;;  %s15173_s22 = inlined_call_operand.hbm [shape: f32[2,64,128], index: 22, kind: output, shape index: {}]  }
   0x1   :  { %15188 = sst [smem:[#allocation38_spill]] %s15151_s0 }
   0x2   :  { %15189 = sst [smem:[#allocation39_spill]] %s15152_s1 }
   0x3   :  { %15190 = sst [smem:[#allocation40_spill]] %s15153_s2 }
   0x4   :  { %15191 = sst [smem:[#allocation41_spill]] %s15154_s3 }
   0x5   :  { %15192 = sst [smem:[#allocation42_spill]] %s15155_s4 }
   0x6   :  { %15193 = sst [smem:[#allocation43_spill]] %s15156_s5 }
   0x7   :  { %15194 = sst [smem:[#allocation44_spill]] %s15157_s6 }
   0x8   :  { %15195 = sst [smem:[#allocation45_spill]] %s15158_s7 }
   0x9   :  { %15196 = sst [smem:[#allocation46_spill]] %s15162_s11 }
   0xa   :  { %15197 = sst [smem:[#allocation47_spill]] %s15170_s19 }
   0xb   :  { %15198 = sst [smem:[#allocation48_spill]] %s15172_s21 }
   0xc   :  { %15199 = sst [smem:[#allocation49_spill]] %s15173_s22 }
   0xd   :  { %27 = vsyncpa [#allocation3], 0 }
   0xe   :  { %28 = vsyncpa [#allocation6], 0 }
   0xf   :  { %29 = vsyncpa [#allocation9], 0 }
  0x10   :  { %30 = vsyncpa [#allocation12], 0 }
  0x11   :  { %31 = vsyncpa [#allocation15], 0 }
  0x12   :  { %32 = vsyncpa [#allocation4], 0 }
  0x13   :  { %34 = vsyncpa [#allocation4 + $0x1], 0  ;;  %s10098_s3 = smov 0   ;;  %s10100_s28 = smov 0  }
  0x14   :  { %s10102_s29 = smov 0   ;;  %s10104_s30 = smov 0  }
  0x15 LB: > { %15200 = sst [smem:[#allocation24_spill]] %s9949_s3  ;;  %s10119_s4 = sadd.s32 4294967295, %s9961_s30   ;;  %s9961_s30 = sphi %s10104_s30, %s15272_s30   ;;  %s9957_s29 = sphi %s10102_s29, %s15275_s29   ;;  %s9953_s28 = sphi %s10100_s28, %s15274_s28   ;;  %s9949_s3 = sphi %s10098_s3, %s15273_s3  }
  0x16   : > { %15201 = sst [smem:[#allocation25_spill]] %s9953_s28  ;;  %s8612_s0 = sadd.s32 4294967294, %s9961_s30  }
  0x17   : > { %15202 = sst [smem:[#allocation26_spill]] %s9957_s29  ;;  %s10123_s23 = sadd.s32 1, %s9961_s30  }
  0x18   : > { %15203 = sst [smem:[#allocation27_spill]] %s9961_s30  ;;  %s514_s1 = sadd.s32 1, %s9957_s29 }
  0x19   : > { %15204 = sst [smem:[#allocation28_spill]] %s10123_s23  ;;  %s511_s5 = ssub.s32 %s9961_s30, %s10123_s23 }
  0x1a   : > { %p524_p0 = scmp.ne.s32.totalorder %s9957_s29, %s9953_s28  ;;  %p512_p1 = scmp.eq.s32.totalorder %s511_s5, 0 }
  0x1b   : > { %p525_p2 = scmp.eq.s32.totalorder %s10119_s4, 1  ;;  %p530_p3 = scmp.ne.s32.totalorder %s9953_s28, %s9949_s3 }
  0x1c   : > { %p531_p4 = scmp.eq.s32.totalorder %s8612_s0, 1  ;;  %p8613_p7 = scmp.ge.s32.totalorder %s9961_s30, 1 }
  0x1d   : > { %s10134_s24 = scalar_select %p512_p1, %s9957_s29, %s514_s1  }
  0x1e   : > { %p10136_p5 = por %p525_p2, %p524_p0  ;;  %p10140_p6 = por %p531_p4, %p530_p3 }
  0x1f   : > { %15205 = sst [smem:[#allocation29_spill]] %s10134_s24  ;;  %p538_p8 = scmp.lt.s32.totalorder %s9961_s30, 3 }
  0x20   : > { %s15206_s6 = scalar_select %p10136_p5, 1, 0 }
  0x21   : > { %s15208_s25 = scalar_select %p10140_p6, 1, 0 }
  0x22   : > { %15207 = sst [smem:[#allocation30_spill]] %s15206_s6  ;;  %p9126_p9 = scmp.eq.s32.totalorder %s10119_s4, 0 }
  0x23   : > { %15209 = sst [smem:[#allocation31_spill]] %s15208_s25  ;;  %p10147_p10 = pnand %p8613_p7, %p538_p8 }
  0x24   : > { %s15211_s0 = sld [smem:[#allocation42_spill]]  ;;  %s9963_s5 = smov [#allocation5]  }
  0x25   : > { %p9094_p11 = pneg %p10147_p10  ;;  %s569_s24 = sshll.u32 %s9963_s5, 4  ;;  %s570_s24 = int_to_ptr.vmem [resolvable:$true] %s569_s24 }
  0x26   : > { %s15213_s7 = sld [smem:[#allocation45_spill]]  ;;  %s9964_s2 = smov 128  }
  0x27   : > { %p10158_p12 = pnand %p9126_p9, %p9094_p11  ;;  %s9965_s27 = smov 8  }
  0x28   : > { %s15214_s11 = sld [smem:[#allocation46_spill]]  ;;  %s9967_s23 = smov [#allocation11]  }
  0x29   : > { %s634_s25 = sshll.u32 %s9967_s23, 4  ;;  %s9970_s22 = smov [#allocation14]   ;;  %s635_s25 = int_to_ptr.vmem [resolvable:$true] %s634_s25 }
  0x2a   : > { %s567_s1 = sshll.u32 %s15211_s0, 4  ;;  %s9966_s0 = smov [#allocation8]   ;;  %s568_s1 = int_to_ptr.hbm [resolvable:$true] %s567_s1 }
  0x2b   : > { %9100 = dma.hbm_to_vmem [thread:$0]  (!%p10158_p12), %s568_s1, 1024, %s570_s24, [#allocation6], %s9964_s2, %s9964_s2, %s9965_s27  }
  0x2c   : > { %s598_s3 = sshll.u32 %s15213_s7, 4  ;;  %s600_s5 = sshll.u32 %s9966_s0, 4  ;;  %s599_s3 = int_to_ptr.hbm [resolvable:$true] %s598_s3  ;;  %s601_s5 = int_to_ptr.vmem [resolvable:$true] %s600_s5 }
  0x2d   : > { %9106 = dma.hbm_to_vmem [thread:$0]  (!%p10158_p12), %s599_s3, 1024, %s601_s5, [#allocation9], %s9964_s2, %s9964_s2, %s9965_s27  }
  0x2e   : > { %s632_s6 = sshll.u32 %s15214_s11, 4  ;;  %s669_s24 = sshll.u32 %s15167_s16, 4  ;;  %s633_s6 = int_to_ptr.hbm [resolvable:$true] %s632_s6  ;;  %s670_s24 = int_to_ptr.hbm [resolvable:$true] %s669_s24 }
  0x2f   : > { %s9968_s1 = smov 384   ;;  %s9969_s0 = smov 24  }
  0x30   : > { %9112 = dma.hbm_to_vmem [thread:$0]  (!%p10158_p12), %s633_s6, 6144, %s635_s25, [#allocation12], %s9968_s1, %s9968_s1, %s9969_s0  }
  0x31   : > { %s671_s30 = sshll.u32 %s9970_s22, 4  ;;  %s15215_s19 = sld [smem:[#allocation40_spill]]  ;;  %s672_s30 = int_to_ptr.vmem [resolvable:$true] %s671_s30 }
  0x32   : > { %9118 = dma.hbm_to_vmem [thread:$0]  (!%p10158_p12), %s670_s24, 2048, %s672_s30, [#allocation15], %s9964_s2, %s9964_s2, %s9965_s27  }
  0x33   : > { %s15216_s5 = sld [smem:[#allocation44_spill]]  ;;  %s9971_s6 = smov [#allocation2]  }
  0x34   : > { %s555_s25 = sshll.u32 %s9971_s6, 4  ;;  %s9972_s11 = smov [#allocation7]   ;;  %s556_s25 = int_to_ptr.vmem [resolvable:$true] %s555_s25 }
  0x35   : > { %s615_s0 = sshll.u32 %s15160_s9, 4  ;;  %s655_s30 = sshll.u32 %s15166_s15, 4  ;;  %s616_s0 = int_to_ptr.hbm [resolvable:$true] %s615_s0  ;;  %s656_s30 = int_to_ptr.hbm [resolvable:$true] %s655_s30 }
  0x36   : > { %s9974_s28 = smov [#allocation13]  }
  0x37   : > { %s553_s3 = sshll.u32 %s15215_s19, 4  ;;  %s586_s19 = sshll.u32 %s9972_s11, 4  ;;  %s554_s3 = int_to_ptr.hbm [resolvable:$true] %s553_s3  ;;  %s587_s19 = int_to_ptr.vmem [resolvable:$true] %s586_s19 }
  0x38   : > { %9097 = dma.hbm_to_vmem [thread:$0]  (!%p10158_p12), %s554_s3, 64, %s556_s25, [#allocation3]  }
  0x39   : > { %s584_s23 = sshll.u32 %s15216_s5, 4  ;;  %s9973_s3 = smov [#allocation10]   ;;  %s585_s23 = int_to_ptr.hbm [resolvable:$true] %s584_s23 }
  0x3a   : > { %9103 = dma.hbm_to_vmem [thread:$0]  (!%p10158_p12), %s585_s23, 1024, %s587_s19, [#allocation6], %s9964_s2, %s9964_s2, %s9965_s27  }
  0x3b   : > { %s617_s7 = sshll.u32 %s9973_s3, 4  ;;  %s657_s5 = sshll.u32 %s9974_s28, 4  ;;  %s618_s7 = int_to_ptr.vmem [resolvable:$true] %s617_s7  ;;  %s658_s5 = int_to_ptr.vmem [resolvable:$true] %s657_s5 }
  0x3c   : > { %9109 = dma.hbm_to_vmem [thread:$0]  (!%p10158_p12), %s616_s0, 1024, %s618_s7, [#allocation9], %s9964_s2, %s9964_s2, %s9965_s27  }
  0x3d   : > { %s692_s23 = sshll.u32 %s15171_s20, 4  ;;  %s9975_s11 = smov [#allocation16]   ;;  %s693_s23 = int_to_ptr.hbm [resolvable:$true] %s692_s23 }
  0x3e   : > { %9115 = dma.hbm_to_vmem [thread:$0]  (!%p10158_p12), %s656_s30, 2048, %s658_s5, [#allocation12], %s9964_s2, %s9964_s2, %s9965_s27  }
  0x3f   : > { %s694_s19 = sshll.u32 %s9975_s11, 4  ;;  %721 = sbr.rel (%p10147_p10) target bundleno = 9083 (0x237b), region = 108  ;;  %s695_s19 = int_to_ptr.vmem [resolvable:$true] %s694_s19 }
  0x40   : > { %9121 = dma.hbm_to_vmem [thread:$0]  (!%p10158_p12), %s693_s23, 1024, %s695_s19, [#allocation15], %s9964_s2, %s9964_s2, %s9965_s27  }
  0x44   : > { %9924 = dma.done.wait (%p9126_p9), [#allocation3], 64  }
  0x45   : > { %9926 = vsyncadd (%p9126_p9), [#allocation3], 4294967232 }
  0x46   : > { %9928 = dma.done.wait (%p9126_p9), [#allocation6], 2048  }
  0x47   : > { %9930 = vsyncadd (%p9126_p9), [#allocation6], 4294965248 }
  0x48   : > { %9932 = dma.done.wait (%p9126_p9), [#allocation9], 2048  }
  0x49   : > { %9934 = vsyncadd (%p9126_p9), [#allocation9], 4294965248 }
  0x4a   : > { %9936 = dma.done.wait (%p9126_p9), [#allocation12], 8192  }
  0x4b   : > { %9938 = vsyncadd (%p9126_p9), [#allocation12], 4294959104 }
  0x4c   : > { %9940 = dma.done.wait (%p9126_p9), [#allocation15], 3072  }
  0x4d   : > { %9942 = vsyncadd (%p9126_p9), [#allocation15], 4294964224  ;;  %p824_p13 = scmp.lt.s32.totalorder %s10119_s4, 1  ;;  %s15217_s21 = sld [smem:[#allocation38_spill]]  ;;  %vm858_vm0 = vcmask 23552   ;;  %vm1007_vm1 = vcmask 523264  }
  0x4e   : > { %vm2553_vm4 = vcmask 1040384   ;;  %vm2554_vm5 = vcmask 1041408   ;;  %s15218_s22 = sld [smem:[#allocation39_spill]]  ;;  %s9979_s30 = smov 64  }
  0x4f   : > { %s825_s29 = scalar_select %p824_p13, %s10119_s4, 1 }
  0x50   : > { %s15219_s7 = sld [smem:[#allocation41_spill]]  ;;  %s9980_s3 = smov 32  }
  0x51   : > { %s9046_s26 = sshll.u32 %s825_s29, 6  ;;  %s15221_s6 = sld [smem:[#allocation43_spill]] }
  0x52   : > { %s15265_s25 = sld [smem:[#allocation48_spill]]  ;;  %s9047_s29 = sshll.u32 %s10119_s4, 6 }
  0x53   : > { %s828_s1 = scalar_lea.vmem %s15217_s21, %s9046_s26  ;;  %s15266_s23 = sld [smem:[#allocation25_spill]] }
  0x54   : > { %v10252_v0 = vld [vmem:[%s828_s1] sm:$0xff]  ;;  %v10254_v1 = vld [vmem:[%s828_s1 + $0x10] sm:$0xff]  ;;  %v10258_v3 = vld [vmem:[%s828_s1 + $0x8] sm:$0xff]  ;;  %s15268_s2 = sld [smem:[#allocation49_spill]] }
  0x55   : > { %v850_v2 = vmul.f32 %v10252_v0, %v10252_v0  ;;  %v852_v4 = vmul.f32 %v10254_v1, %v10254_v1  ;;  %v10262_v5 = vld [vmem:[%s828_s1 + $0x20] sm:$0xff]  ;;  %v10264_v6 = vld [vmem:[%s828_s1 + $0x18] sm:$0xff]  ;;  %v10272_v11 = vld [vmem:[%s828_s1 + $0x28] sm:$0xff]  ;;  %v851_v13 = vmul.f32 %v10258_v3, %v10258_v3 }
  0x56   : > { %v854_v7 = vmul.f32 %v10262_v5, %v10262_v5  ;;  %v10268_v8 = vld [vmem:[%s828_s1 + $0x38] sm:$0xff]  ;;  %v853_v14 = vmul.f32 %v10264_v6, %v10264_v6  ;;  %v855_v15 = vmul.f32 %v10272_v11, %v10272_v11  ;;  %v10283_v16 = vld [vmem:[%s828_s1 + $0x30] sm:$0xff] }
  0x57   : > { %v859_v9 = vsel %vm858_vm0, %v850_v2, 0.0  ;;  %v865_v10 = vsel %vm858_vm0, %v852_v4, 0.0  ;;  %8637 = vmatpush.xpose.msk.msra.mxu0 %vm858_vm0, %v10268_v8  ;;  %v862_v17 = vsel %vm858_vm0, %v851_v13, 0.0  ;;  %v856_v20 = vmul.f32 %v10283_v16, %v10283_v16 }
  0x58   : > { %860 = vadd.xlane.f32.xlu0 %v859_v9  ;;  %866 = vadd.xlane.f32.xlu1 %v865_v10  ;;  %v871_v12 = vsel %vm858_vm0, %v854_v7, 0.0  ;;  %v868_v18 = vsel %vm858_vm0, %v853_v14, 0.0  ;;  %v874_v19 = vsel %vm858_vm0, %v855_v15, 0.0  ;;  %v857_v21 = vmul.f32 %v10268_v8, %v10268_v8 }
  0x59   : > { %872 = vadd.xlane.f32.xlu2 %v871_v12  ;;  %v877_v22 = vsel %vm858_vm0, %v856_v20, 0.0  ;;  %s821_s11 = sand.u32 1, %s15266_s23  }
  0x5a   : > { %v880_v23 = vsel %vm858_vm0, %v857_v21, 0.0  ;;  %s8634_s19 = sshll.u32 %s821_s11, 6  ;;  %s8458_s27 = scalar_lea.hbm %s15268_s2, %s9047_s29 }
  0x5b   : > { %8638 = vmatpush.xpose.msk.msra.mxu0 %vm858_vm0, %v10283_v16  ;;  %s8461_s1 = sshll.u32 %s8458_s27, 4  ;;  %s8447_s0 = scalar_lea.sflag [#allocation4], %s821_s11  ;;  %s8462_s1 = int_to_ptr.hbm [resolvable:$true] %s8461_s1 }
  0x5c   : > { %s9893_s24 = sshra.s32 %s8462_s1, 4  ;;  %s9899_s5 = scalar_lea.hbm %s15268_s2, 128  ;;  %s9894_s24 = int_to_ptr.hbm [resolvable:$true] %s9893_s24 }
  0x5d   : > { %s9895_s4 = scalar_lea.hbm %s9894_s24, 64  ;;  %p9900_p3 = scmp.lt.s32.totalorder %s9894_s24, %s15268_s2 }
  0x5e   : > { %p9896_p0 = scmp.ne.s32.totalorder %s9894_s24, %s9895_s4  ;;  %p9901_p4 = scmp.lt.s32.totalorder %s9899_s5, %s9895_s4 }
  0x5f   : > { %8639 = vmatpush.xpose.msk.msra.mxu0 %vm858_vm0, %v10272_v11 }
  0x60   : > { %863 = vadd.xlane.f32.xlu0 %v862_v17  ;;  %869 = vadd.xlane.f32.xlu1 %v868_v18  ;;  %v1005_v18 = vlaneseq  ;;  %p9897_p1 = pnand %p9896_p0, %p10136_p5  ;;  %p9902_p7 = por %p9901_p4, %p9900_p3 }
  0x61   : > { %875 = vadd.xlane.f32.xlu2 %v874_v19 }
  0x62   : > { %v10356_v19 = vand.u32 127, %v1005_v18  ;;  %p9898_p2 = pneg %p9897_p1 }
  0x63   : > { %8640 = vmatpush.xpose.msk.msra.mxu0 %vm858_vm0, %v10262_v5 }
  0x64   : > { %p9903_p8 = pnand %p9902_p7, %p9898_p2 }
  0x67   : > { %8641 = vmatpush.xpose.msk.msra.mxu0 %vm858_vm0, %v10264_v6 }
  0x68   : > { %878 = vadd.xlane.f32.xlu0 %v877_v22  ;;  %881 = vadd.xlane.f32.xlu1 %v880_v23 }
  0x6b   : > { %8642 = vmatpush.xpose.msk.msra.mxu0 %vm858_vm0, %v10254_v1 }
  0x6f   : > { %8643 = vmatpush.xpose.msk.msra.mxu0 %vm858_vm0, %v10258_v3 }
  0x73   : > { %8644 = vmatpush.xpose.msk.msra.mxu0 %vm858_vm0, %v10252_v0 }
  0x76   : > { %8645 = vmatmul.msk.f32.vlgmr.msra.gmra.mxu0 %vm858_vm0, %v10252_v0 }
  0x7e   : > { %8646 = vmatmul.msk.f32.gmra.mxu0 %vm858_vm0, %v10258_v3 }
  0x86   : > { %8647 = vmatmul.msk.f32.gmra.mxu0 %vm858_vm0, %v10254_v1 }
  0x8e   : > { %8648 = vmatmul.msk.f32.gmra.mxu0 %vm858_vm0, %v10264_v6 }
  0x96   : > { %8649 = vmatmul.msk.f32.gmra.mxu0 %vm858_vm0, %v10262_v5 }
  0x9e   : > { %8650 = vmatmul.msk.f32.gmra.mxu0 %vm858_vm0, %v10272_v11 }
  0xa6   : > { %8651 = vmatmul.msk.f32.gmra.mxu0 %vm858_vm0, %v10283_v16 }
  0xae   : > { %8652 = vmatmul.msk.f32.gmra.mxu0 %vm858_vm0, %v10268_v8 }
  0xcb   : > { %v861_v24 = vpop.xlane.xlu0 %860  ;;  %v867_v26 = vpop.xlane.xlu1 %866 }
  0xcc   : > { %948 = vxpose.xlu2.b32.start [1/8] (short) (narrow) %v861_v24, 8  ;;  %v873_v28 = vpop.xlane.xlu2 %872 }
  0xd3   : > { %v864_v25 = vpop.xlane.xlu0 %863  ;;  %v870_v27 = vpop.xlane.xlu1 %869 }
  0xd4   : > { %949 = vxpose.xlu2.b32.cont [2/8] (short) (narrow) %v864_v25, 8  ;;  %v876_v29 = vpop.xlane.xlu2 %875 }
  0xdb   : > { %v879_v30 = vpop.xlane.xlu0 %878  ;;  %v882_v31 = vpop.xlane.xlu1 %881 }
  0xdc   : > { %950 = vxpose.xlu2.b32.cont [3/8] (short) (narrow) %v867_v26, 8 }
  0xe4   : > { %951 = vxpose.xlu2.b32.cont [4/8] (short) (narrow) %v870_v27, 8 }
  0xec   : > { %952 = vxpose.xlu2.b32.cont [5/8] (short) (narrow) %v873_v28, 8 }
  0xf3   : > { %v924_v32 = vpop.f32.mrf.mxu0 }
  0xf4   : > { %953 = vxpose.xlu2.b32.cont [6/8] (short) (narrow) %v876_v29, 8  ;;  %v989_v38 = vmul.f32 2.0, %v924_v32 }
  0xfb   : > { %v927_v33 = vpop.f32.mrf.mxu0 }
  0xfc   : > { %954 = vxpose.xlu2.b32.cont [7/8] (short) (narrow) %v879_v30, 8  ;;  %v990_v39 = vmul.f32 2.0, %v927_v33 }
 0x103   : > { %v930_v34 = vpop.f32.mrf.mxu0 }
 0x104   : > { %955 = vxpose.xlu2.b32.end [8/8] (short) (narrow) %v882_v31, 8  ;;  %v991_v45 = vmul.f32 2.0, %v930_v34 }
 0x10b   : > { %v933_v35 = vpop.f32.mrf.mxu0 }
 0x10c   : > { %v992_v46 = vmul.f32 2.0, %v933_v35 }
 0x113   : > { %v936_v36 = vpop.f32.mrf.mxu0 }
 0x114   : > { %v993_v54 = vmul.f32 2.0, %v936_v36 }
 0x11b   : > { %v939_v51 = vpop.f32.mrf.mxu0 }
 0x11c   : > { %v994_v55 = vmul.f32 2.0, %v939_v51 }
 0x123   : > { %v942_v60 = vpop.f32.mrf.mxu0 }
 0x124   : > { %v995_v63 = vmul.f32 2.0, %v942_v60  ;;  %v10401_v60 = vpack.c.bf16 %v10264_v6, %v10254_v1 }
 0x12b   : > { %v945_v10 = vpop.f32.mrf.mxu0 }
 0x12c   : > { %v996_v13 = vmul.f32 2.0, %v945_v10 }
 0x165   : > { %v964_v37 = vpop.trf.xlu2 }
 0x166   : > { %v980_v40 = vperm.slane %v964_v37, 0 }
 0x168   : > { %v982_v41 = vadd.f32 %v980_v40, %v864_v25  ;;  %v981_v42 = vadd.f32 %v980_v40, %v861_v24  ;;  %v984_v49 = vadd.f32 %v980_v40, %v870_v27  ;;  %v983_v50 = vadd.f32 %v980_v40, %v867_v26  ;;  %v839_v27 = vld [vmem:[#allocation2] sm:$0x7] }
 0x169   : > { %v986_v58 = vadd.f32 %v980_v40, %v876_v29  ;;  %v985_v59 = vadd.f32 %v980_v40, %v873_v28  ;;  %v987_v7 = vadd.f32 %v980_v40, %v879_v30  ;;  %v988_v12 = vadd.f32 %v980_v40, %v882_v31 }
 0x16a   : > { %v10324_v43 = vsub.f32 %v982_v41, %v990_v39  ;;  %v10326_v44 = vsub.f32 %v981_v42, %v989_v38  ;;  %v10332_v52 = vsub.f32 %v984_v49, %v992_v46  ;;  %v10334_v53 = vsub.f32 %v983_v50, %v991_v45 }
 0x16b   : > { %v10340_v61 = vsub.f32 %v986_v58, %v994_v55  ;;  %v10342_v62 = vsub.f32 %v985_v59, %v993_v54  ;;  %v10348_v9 = vsub.f32 %v987_v7, %v995_v63  ;;  %v10352_v15 = vsub.f32 %v988_v12, %v996_v13 }
 0x16c   : > { %v1011_v47 = vsel %vm1007_vm1, %v10324_v43, inf  ;;  %v1008_v48 = vsel %vm1007_vm1, %v10326_v44, inf  ;;  %v1017_v56 = vsel %vm1007_vm1, %v10332_v52, inf  ;;  %v1014_v57 = vsel %vm1007_vm1, %v10334_v53, inf }
 0x16d   : > { %1012 = vmin.xlane.f32.xlu1 %v1011_v47  ;;  %1009 = vmin.xlane.f32.xlu0 %v1008_v48  ;;  %v1023_v2 = vsel %vm1007_vm1, %v10340_v61, inf  ;;  %v1020_v4 = vsel %vm1007_vm1, %v10342_v62, inf  ;;  %v1026_v14 = vsel %vm1007_vm1, %v10348_v9, inf  ;;  %v1029_v17 = vsel %vm1007_vm1, %v10352_v15, inf }
 0x16e   : > { %v9976_v29 = vmov 65535   ;;  %v2589_v31 = vpack.c.bf16 %v839_v27, %v839_v27  ;;  %v10381_v38 = vpack.c.bf16 %v10258_v3, %v10252_v0 }
 0x16f   : > { %v2555_v30 = vsel %vm2553_vm4, 4294967295, %v9976_v29 }
 0x170   : > { %v10372_v34 = vsel %vm2554_vm5, %v2555_v30, 0 }
 0x171   : > { %v2591_v35 = vand.u32 %v2589_v31, %v10372_v34 }
 0x173   : > { %2600 = vmatpush.bf16.msra.mxu2 %v2591_v35 }
 0x175   : > { %1018 = vmin.xlane.f32.xlu1 %v1017_v56  ;;  %1015 = vmin.xlane.f32.xlu0 %v1014_v57 }
 0x176   : > { %8721 = vmatmul.msk.bf16.vlgmr.msra.gmra.mxu2 %vm858_vm0, %v10381_v38 }
 0x17d   : > { %1024 = vmin.xlane.f32.xlu1 %v1023_v2  ;;  %1021 = vmin.xlane.f32.xlu0 %v1020_v4 }
 0x185   : > { %1027 = vmin.xlane.f32.xlu1 %v1026_v14  ;;  %v10417_v14 = vpack.c.bf16 %v10272_v11, %v10262_v5 }
 0x186   : > { %8722 = vmatmul.msk.bf16.gmra.mxu2 %vm858_vm0, %v10401_v60 }
 0x18d   : > { %1030 = vmin.xlane.f32.xlu1 %v1029_v17  ;;  %v10423_v17 = vpack.c.bf16 %v10268_v8, %v10283_v16 }
 0x196   : > { %8723 = vmatmul.msk.bf16.gmra.mxu2 %vm858_vm0, %v10417_v14 }
 0x1a6   : > { %8724 = vmatmul.msk.bf16.gmra.mxu2 %vm858_vm0, %v10423_v17 }
 0x1e0   : > { %v1013_v20 = vpop.xlane.xlu1 %1012  ;;  %v1010_v21 = vpop.xlane.xlu0 %1009 }
 0x1e1   : > { %vm1033_vm2 = vcmp.eq.f32.partialorder %v10324_v43, %v1013_v20  ;;  %vm1032_vm3 = vcmp.eq.f32.partialorder %v10326_v44, %v1010_v21 }
 0x1e2   : > { %v1040_v22 = vsel %vm1032_vm3, %v10356_v19, 64  ;;  %v1041_v24 = vsel %vm1033_vm2, %v10356_v19, 64 }
 0x1e3   : > { %v10362_v23 = vsel %vm1007_vm1, %v1040_v22, 2147483647  ;;  %v10369_v28 = vsel %vm1007_vm1, %v1041_v24, 2147483647 }
 0x1e4   : > { %v1050_v25 = vshra.s32 %v10362_v23, 16  ;;  %v1065_v37 = vshra.s32 %v10369_v28, 16  ;;  %v1049_v18 = vand.u32 65535, %v10362_v23  ;;  %v1064_v22 = vand.u32 65535, %v10369_v28 }
 0x1e6   : > { %v10366_v26 = vcvt.s32.f32 %v1050_v25  ;;  %v1067_v45 = vcvt.s32.f32 %v1065_v37  ;;  %v1051_v21 = vcvt.s32.f32 %v1049_v18  ;;  %v1066_v25 = vcvt.s32.f32 %v1064_v22 }
 0x1e8   : > { %v1019_v32 = vpop.xlane.xlu1 %1018  ;;  %1053 = vmin.xlane.f32.xlu0 %v10366_v26  ;;  %v1016_v33 = vpop.xlane.xlu0 %1015 }
 0x1e9   : > { %vm1035_vm6 = vcmp.eq.f32.partialorder %v10332_v52, %v1019_v32  ;;  %vm1034_vm7 = vcmp.eq.f32.partialorder %v10334_v53, %v1016_v33 }
 0x1ea   : > { %v1043_v36 = vsel %vm1035_vm6, %v10356_v19, 64  ;;  %v1042_v40 = vsel %vm1034_vm7, %v10356_v19, 64 }
 0x1eb   : > { %v1093_v39 = vsel %vm1007_vm1, %v1043_v36, 2147483647  ;;  %v10388_v46 = vsel %vm1007_vm1, %v1042_v40, 2147483647 }
 0x1ec   : > { %v1095_v41 = vshra.s32 %v1093_v39, 16  ;;  %v1080_v3 = vshra.s32 %v10388_v46, 16  ;;  %v1094_v11 = vand.u32 65535, %v1093_v39  ;;  %v1079_v29 = vand.u32 65535, %v10388_v46 }
 0x1ee   : > { %v1097_v42 = vcvt.s32.f32 %v1095_v41  ;;  %v1082_v55 = vcvt.s32.f32 %v1080_v3  ;;  %v1096_v16 = vcvt.s32.f32 %v1094_v11  ;;  %v1081_v32 = vcvt.s32.f32 %v1079_v29 }
 0x1f0   : > { %1098 = vmin.xlane.f32.xlu1 %v1097_v42  ;;  %v1025_v47 = vpop.xlane.xlu1 %1024  ;;  %1068 = vmin.xlane.f32.xlu0 %v1067_v45  ;;  %v1022_v48 = vpop.xlane.xlu0 %1021 }
 0x1f1   : > { %vm1037_vm8 = vcmp.eq.f32.partialorder %v10340_v61, %v1025_v47  ;;  %vm1036_vm9 = vcmp.eq.f32.partialorder %v10342_v62, %v1022_v48 }
 0x1f2   : > { %v1045_v0 = vsel %vm1037_vm8, %v10356_v19, 64  ;;  %v1044_v50 = vsel %vm1036_vm9, %v10356_v19, 64 }
 0x1f3   : > { %v1123_v49 = vsel %vm1007_vm1, %v1045_v0, 2147483647  ;;  %v1108_v56 = vsel %vm1007_vm1, %v1044_v50, 2147483647 }
 0x1f4   : > { %v1125_v51 = vshra.s32 %v1123_v49, 16  ;;  %v1110_v59 = vshra.s32 %v1108_v56, 16  ;;  %v1109_v37 = vand.u32 65535, %v1108_v56 }
 0x1f6   : > { %v1127_v54 = vcvt.s32.f32 %v1125_v51  ;;  %v1112_v7 = vcvt.s32.f32 %v1110_v59 }
 0x1f8   : > { %1128 = vmin.xlane.f32.xlu1 %v1127_v54  ;;  %v1028_v57 = vpop.xlane.xlu1 %1027  ;;  %1083 = vmin.xlane.f32.xlu0 %v1082_v55 }
 0x1f9   : > { %vm1038_vm10 = vcmp.eq.f32.partialorder %v10348_v9, %v1028_v57  ;;  %v10446_v39 = vpop.f32.mrf.mxu2 }
 0x1fa   : > { %v1046_v58 = vsel %vm1038_vm10, %v10356_v19, 64 }
 0x1fb   : > { %v1138_v63 = vsel %vm1007_vm1, %v1046_v58, 2147483647 }
 0x1fc   : > { %v1140_v2 = vshra.s32 %v1138_v63, 16  ;;  %v1139_v36 = vand.u32 65535, %v1138_v63 }
 0x1fe   : > { %v1142_v4 = vcvt.s32.f32 %v1140_v2 }
 0x200   : > { %1143 = vmin.xlane.f32.xlu1 %v1142_v4  ;;  %v1031_v10 = vpop.xlane.xlu1 %1030  ;;  %1113 = vmin.xlane.f32.xlu0 %v1112_v7 }
 0x201   : > { %vm1039_vm11 = vcmp.eq.f32.partialorder %v10352_v15, %v1031_v10  ;;  %v10454_v48 = vpop.f32.mrf.mxu2 }
 0x202   : > { %v1047_v12 = vsel %vm1039_vm11, %v10356_v19, 64 }
 0x203   : > { %v10409_v13 = vsel %vm1007_vm1, %v1047_v12, 2147483647 }
 0x204   : > { %v1155_v1 = vshra.s32 %v10409_v13, 16  ;;  %v1154_v22 = vand.u32 65535, %v10409_v13 }
 0x206   : > { %v10412_v6 = vcvt.s32.f32 %v1155_v1 }
 0x208   : > { %1158 = vmin.xlane.f32.xlu1 %v10412_v6 }
 0x209   : > { %v10456_v0 = vpop.f32.mrf.mxu2 }
 0x211   : > { %v10458_v3 = vpop.f32.mrf.mxu2 }
 0x25b   : > { %v10428_v20 = vpop.xlane.xlu0 %1053 }
 0x25c   : > { %vm1055_vm12 = vcmp.eq.f32.partialorder %v10366_v26, %v10428_v20  ;;  %v1124_v26 = vand.u32 65535, %v1123_v49  ;;  %v10460_v49 = vpop.f32.mrf.mxu2  ;;  %v1060_v58 = vcvt.f32.s32 %v10428_v20 }
 0x25d   : > { %v1056_v5 = vsel %vm1055_vm12, %v1051_v21, inf }
 0x25e   : > { %1057 = vmin.xlane.f32.xlu0 %v1056_v5  ;;  %v1126_v31 = vcvt.s32.f32 %v1124_v26  ;;  %v1061_v2 = vshll.u32 %v1060_v58, 16 }
 0x263   : > { %v10433_v24 = vpop.xlane.xlu1 %1098  ;;  %v10435_v8 = vpop.xlane.xlu0 %1068 }
 0x264   : > { %vm1100_vm13 = vcmp.eq.f32.partialorder %v1097_v42, %v10433_v24  ;;  %vm1070_vm14 = vcmp.eq.f32.partialorder %v1067_v45, %v10435_v8  ;;  %v1141_v42 = vcvt.s32.f32 %v1139_v36  ;;  %v1111_v45 = vcvt.s32.f32 %v1109_v37  ;;  %v10462_v50 = vpop.f32.mrf.mxu2 }
 0x265   : > { %v1101_v23 = vsel %vm1100_vm13, %v1096_v16, inf  ;;  %v1071_v27 = vsel %vm1070_vm14, %v1066_v25, inf  ;;  %v1075_v10 = vcvt.f32.s32 %v10435_v8  ;;  %v1156_v25 = vcvt.s32.f32 %v1154_v22  ;;  %v844_v22 = vld [vmem:[#allocation5 + $0x18] sm:$0xff] }
 0x266   : > { %1102 = vmin.xlane.f32.xlu1 %v1101_v23  ;;  %1072 = vmin.xlane.f32.xlu0 %v1071_v27 }
 0x267   : > { %v1076_v21 = vshll.u32 %v1075_v10, 16 }
 0x26b   : > { %v10440_v30 = vpop.xlane.xlu1 %1128  ;;  %v10442_v28 = vpop.xlane.xlu0 %1083 }
 0x26c   : > { %vm1130_vm15 = vcmp.eq.f32.partialorder %v1127_v54, %v10440_v30  ;;  %vm1085_vm2 = vcmp.eq.f32.partialorder %v1082_v55, %v10442_v28  ;;  %v10464_v51 = vpop.f32.mrf.mxu2  ;;  %v838_v55 = vld [vmem:[%s15218_s22] sm:$0x7]  ;;  %v1135_v13 = vcvt.f32.s32 %v10440_v30  ;;  %s9978_s22 = smov 96  }
 0x26d   : > { %v1131_v33 = vsel %vm1130_vm15, %v1126_v31, inf  ;;  %v1086_v35 = vsel %vm1085_vm2, %v1081_v32, inf  ;;  %v2540_v56 = vpack.c.bf16 %v838_v55, %v838_v55 }
 0x26e   : > { %1132 = vmin.xlane.f32.xlu1 %v1131_v33  ;;  %1087 = vmin.xlane.f32.xlu0 %v1086_v35  ;;  %v1136_v33 = vshll.u32 %v1135_v13, 16 }
 0x26f   : > { %v2558_v57 = vand.u32 %v10372_v34, %v2540_v56  ;;  %v15186_v34 = vmov 0.0  }
 0x271   : > { %2567 = vmatpush.bf16.msra.mxu1 %v2558_v57 }
 0x273   : > { %v10448_v40 = vpop.xlane.xlu1 %1143  ;;  %v10450_v41 = vpop.xlane.xlu0 %1113 }
 0x274   : > { %vm1145_vm3 = vcmp.eq.f32.partialorder %v1142_v4, %v10448_v40  ;;  %vm1115_vm4 = vcmp.eq.f32.partialorder %v1112_v7, %v10450_v41  ;;  %v10466_v54 = vpop.f32.mrf.mxu2  ;;  %8717 = vmatmul.msk.bf16.vlgmr.msra.gmra.mxu1 %vm858_vm0, %v10381_v38  ;;  %v1120_v35 = vcvt.f32.s32 %v10450_v41 }
 0x275   : > { %v1146_v46 = vsel %vm1145_vm3, %v1141_v42, inf  ;;  %v1116_v47 = vsel %vm1115_vm4, %v1111_v45, inf  ;;  %2841 = vmatpush.msra.mxu3 %v10466_v54  ;;  %v1150_v45 = vcvt.f32.s32 %v10448_v40 }
 0x276   : > { %1147 = vmin.xlane.f32.xlu1 %v1146_v46  ;;  %1117 = vmin.xlane.f32.xlu0 %v1116_v47  ;;  %v1121_v55 = vshll.u32 %v1120_v35, 16 }
 0x277   : > { %2842 = vmatpush.msra.mxu3 %v10464_v51 }
 0x279   : > { %2843 = vmatpush.msra.mxu3 %v10462_v50 }
 0x27b   : > { %2844 = vmatpush.msra.mxu3 %v10460_v49  ;;  %v10485_v59 = vpop.xlane.xlu1 %1158 }
 0x27c   : > { %vm1160_vm6 = vcmp.eq.f32.partialorder %v10412_v6, %v10485_v59 }
 0x27d   : > { %2845 = vmatpush.msra.mxu3 %v10458_v3  ;;  %v1161_v26 = vsel %vm1160_vm6, %v1156_v25, inf }
 0x27f   : > { %2846 = vmatpush.msra.mxu3 %v10456_v0 }
 0x281   : > { %2847 = vmatpush.msra.mxu3 %v10454_v48 }
 0x283   : > { %2848 = vmatpush.msra.mxu3 %v10446_v39 }
 0x284   : > { %8718 = vmatmul.msk.bf16.gmra.mxu1 %vm858_vm0, %v10401_v60  ;;  %v1105_v60 = vcvt.f32.s32 %v10433_v24 }
 0x286   : > { %v1106_v8 = vshll.u32 %v1105_v60, 16 }
 0x294   : > { %8719 = vmatmul.msk.bf16.gmra.mxu1 %vm858_vm0, %v10417_v14 }
 0x2a4   : > { %8720 = vmatmul.msk.bf16.gmra.mxu1 %vm858_vm0, %v10423_v17 }
 0x2d1   : > { %v1058_v63 = vpop.xlane.xlu0 %1057 }
 0x2d2   : > { %v1059_v4 = vcvt.f32.s32 %v1058_v63 }
 0x2d4   : > { %v1062_v7 = vadd.s32 %v1061_v2, %v1059_v4 }
 0x2d6   : > { %vm1168_vm5 = vcmp.eq.s32.totalorder %v10356_v19, %v1062_v7 }
 0x2d7   : > { %v8653_v12 = vsel %vm1168_vm5, 1.0, %v15186_v34  ;;  %v10491_v38 = vsel %vm1168_vm5, 1e+30, %v10326_v44  ;;  %v1090_v44 = vcvt.f32.s32 %v10442_v28 }
 0x2d8   : > { %8725 = vmatmul.msk.f32.vlgmr.msra.gmra.mxu3 %vm1007_vm1, %v8653_v12  ;;  %v1200_v1 = vsel %vm1007_vm1, %v10491_v38, inf }
 0x2d9   : > { %v1103_v18 = vpop.xlane.xlu1 %1102  ;;  %1201 = vmin.xlane.f32.xlu0 %v1200_v1  ;;  %v1073_v20 = vpop.xlane.xlu0 %1072  ;;  %v1091_v28 = vshll.u32 %v1090_v44, 16  ;;  %v848_v1 = vld [vmem:[#allocation5 + $0x38] sm:$0xff]  ;;  %v841_v44 = vld [vmem:[#allocation5] sm:$0xff] }
 0x2da   : > { %v1104_v5 = vcvt.f32.s32 %v1103_v18  ;;  %v1074_v11 = vcvt.f32.s32 %v1073_v20  ;;  %v845_v20 = vld [vmem:[#allocation5 + $0x20] sm:$0xff] }
 0x2dc   : > { %v1077_v16 = vadd.s32 %v1076_v21, %v1074_v11  ;;  %v1107_v24 = vadd.s32 %v1106_v8, %v1104_v5  ;;  %v846_v21 = vld [vmem:[#allocation5 + $0x28] sm:$0xff]  ;;  %v843_v11 = vld [vmem:[#allocation5 + $0x10] sm:$0xff] }
 0x2dd   : > { %v3204_v5 = vpack.c.bf16 %v846_v21, %v845_v20  ;;  %v3203_v8 = vpack.c.bf16 %v844_v22, %v843_v11 }
 0x2de   : > { %vm1169_vm7 = vcmp.eq.s32.totalorder %v10356_v19, %v1077_v16  ;;  %vm1171_vm8 = vcmp.eq.s32.totalorder %v10356_v19, %v1107_v24  ;;  %v842_v24 = vld [vmem:[#allocation5 + $0x8] sm:$0xff] }
 0x2df   : > { %v8654_v23 = vsel %vm1169_vm7, 1.0, %v15186_v34  ;;  %v10506_v27 = vsel %vm1169_vm7, 1e+30, %v10324_v43  ;;  %v10516_v30 = vsel %vm1171_vm8, 1e+30, %v10332_v52  ;;  %v8656_v2 = vsel %vm1171_vm8, 1.0, %v15186_v34 }
 0x2e0   : > { %8726 = vmatmul.msk.f32.gmra.mxu3 %vm1007_vm1, %v8654_v23  ;;  %v1203_v14 = vsel %vm1007_vm1, %v10506_v27, inf  ;;  %v1209_v46 = vsel %vm1007_vm1, %v10516_v30, inf  ;;  %v3202_v25 = vpack.c.bf16 %v842_v24, %v841_v44 }
 0x2e1   : > { %v1133_v6 = vpop.xlane.xlu1 %1132  ;;  %1162 = vmin.xlane.f32.xlu0 %v1161_v26  ;;  %1204 = vmin.xlane.f32.xlu2 %v1203_v14  ;;  %v1088_v29 = vpop.xlane.xlu0 %1087 }
 0x2e2   : > { %v1134_v31 = vcvt.f32.s32 %v1133_v6  ;;  %v1089_v32 = vcvt.f32.s32 %v1088_v29  ;;  %v1165_v6 = vcvt.f32.s32 %v10485_v59 }
 0x2e4   : > { %v1092_v43 = vadd.s32 %v1091_v28, %v1089_v32  ;;  %v1137_v36 = vadd.s32 %v1136_v33, %v1134_v31  ;;  %v1166_v33 = vshll.u32 %v1165_v6, 16 }
 0x2e6   : > { %vm1170_vm9 = vcmp.eq.s32.totalorder %v10356_v19, %v1092_v43  ;;  %vm1173_vm10 = vcmp.eq.s32.totalorder %v10356_v19, %v1137_v36 }
 0x2e7   : > { %v8655_v37 = vsel %vm1170_vm9, 1.0, %v15186_v34  ;;  %v10522_v42 = vsel %vm1170_vm9, 1e+30, %v10334_v53  ;;  %v1151_v53 = vshll.u32 %v1150_v45, 16  ;;  %v10536_v40 = vsel %vm1173_vm10, 1e+30, %v10340_v61 }
 0x2e8   : > { %8727 = vmatmul.msk.f32.gmra.mxu3 %vm1007_vm1, %v8655_v37  ;;  %v1206_v52 = vsel %vm1007_vm1, %v10522_v42, inf  ;;  %v1215_v17 = vsel %vm1007_vm1, %v10536_v40, inf  ;;  %v8658_v12 = vsel %vm1173_vm10, 1.0, %v15186_v34 }
 0x2e9   : > { %v1148_v47 = vpop.xlane.xlu1 %1147  ;;  %1210 = vmin.xlane.f32.xlu0 %v1209_v46  ;;  %1207 = vmin.xlane.f32.xlu1 %v1206_v52  ;;  %v1118_v41 = vpop.xlane.xlu0 %1117  ;;  %v10585_v46 = vld [vmem:[%s15219_s7] ss:$0 sm:$0xff]  ;;  %s15264_s7 = sld [smem:[#allocation47_spill]] }
 0x2ea   : > { %v1149_v56 = vcvt.f32.s32 %v1148_v47  ;;  %v1119_v57 = vcvt.f32.s32 %v1118_v41 }
 0x2ec   : > { %v1122_v58 = vadd.s32 %v1121_v55, %v1119_v57  ;;  %v1152_v63 = vadd.s32 %v1151_v53, %v1149_v56 }
 0x2ee   : > { %vm1172_vm11 = vcmp.eq.s32.totalorder %v10356_v19, %v1122_v58  ;;  %vm1174_vm0 = vcmp.eq.s32.totalorder %v10356_v19, %v1152_v63 }
 0x2ef   : > { %v10543_v4 = vsel %vm1172_vm11, 1e+30, %v10342_v62  ;;  %v10552_v61 = vsel %vm1174_vm0, 1e+30, %v10348_v9  ;;  %v8657_v10 = vsel %vm1172_vm11, 1.0, %v15186_v34  ;;  %v8659_v60 = vsel %vm1174_vm0, 1.0, %v15186_v34 }
 0x2f0   : > { %8728 = vmatmul.msk.f32.gmra.mxu3 %vm1007_vm1, %v8656_v2  ;;  %v1212_v7 = vsel %vm1007_vm1, %v10543_v4, inf  ;;  %v1218_v62 = vsel %vm1007_vm1, %v10552_v61, inf  ;;  %v847_v9 = vld [vmem:[#allocation5 + $0x30] sm:$0xff] }
 0x2f1   : > { %1216 = vmin.xlane.f32.xlu0 %v1215_v17  ;;  %1213 = vmin.xlane.f32.xlu1 %v1212_v7  ;;  %v3205_v18 = vpack.c.bf16 %v848_v1, %v847_v9  ;;  %v2569_v16 = vpop.f32.mrf.mxu1 }
 0x2f2   : > { %v2622_v59 = vsub.f32 %v2569_v16, %v10446_v39 }
 0x2f3   : > { %3309 = vmatpush.bf16.msrb.mxu1 %v3205_v18 }
 0x2f7   : > { %3310 = vmatpush.bf16.msrb.mxu1 %v3204_v5 }
 0x2f8   : > { %8729 = vmatmul.msk.f32.gmra.mxu3 %vm1007_vm1, %v8657_v10 }
 0x2f9   : > { %1219 = vmin.xlane.f32.xlu0 %v1218_v62  ;;  %v2571_v29 = vpop.f32.mrf.mxu1 }
 0x2fa   : > { %v2623_v58 = vsub.f32 %v2571_v29, %v10454_v48 }
 0x2fb   : > { %3311 = vmatpush.bf16.msrb.mxu1 %v3203_v8 }
 0x2fc   : > { %v10612_v10 = vadd.f32 %v10585_v46, %v2623_v58 }
 0x2ff   : > { %3312 = vmatpush.bf16.msrb.mxu1 %v3202_v25 }
 0x300   : > { %8730 = vmatmul.msk.f32.gmra.mxu3 %vm1007_vm1, %v8658_v12 }
 0x301   : > { %v2574_v57 = vpop.f32.mrf.mxu1 }
 0x308   : > { %8731 = vmatmul.msk.f32.gmra.mxu3 %vm1007_vm1, %v8659_v60 }
 0x309   : > { %v2576_v5 = vpop.f32.mrf.mxu1 }
 0x34c   : > { %v1202_v23 = vpop.xlane.xlu0 %1201 }
 0x34d   : > { %vm1224_vm12 = vcmp.eq.f32.partialorder %v10491_v38, %v1202_v23 }
 0x34e   : > { %v1232_v13 = vsel %vm1224_vm12, %v10356_v19, 64 }
 0x34f   : > { %v10567_v26 = vsel %vm1007_vm1, %v1232_v13, 2147483647 }
 0x350   : > { %v1242_v14 = vshra.s32 %v10567_v26, 16 }
 0x352   : > { %v10571_v28 = vcvt.s32.f32 %v1242_v14  ;;  %v2624_v14 = vsub.f32 %v2574_v57, %v10456_v0 }
 0x354   : > { %v1205_v31 = vpop.xlane.xlu2 %1204  ;;  %1245 = vmin.xlane.f32.xlu1 %v10571_v28  ;;  %v1163_v32 = vpop.xlane.xlu0 %1162 }
 0x355   : > { %vm1225_vm13 = vcmp.eq.f32.partialorder %v10506_v27, %v1205_v31  ;;  %v1164_v43 = vcvt.f32.s32 %v1163_v32 }
 0x356   : > { %v1233_v35 = vsel %vm1225_vm13, %v10356_v19, 64 }
 0x357   : > { %v1167_v36 = vadd.s32 %v1166_v33, %v1164_v43  ;;  %v10577_v37 = vsel %vm1007_vm1, %v1233_v35, 2147483647  ;;  %v2625_v33 = vsub.f32 %v2576_v5, %v10458_v3  ;;  %v10647_v43 = vadd.f32 %v10585_v46, %v2624_v14 }
 0x358   : > { %v1257_v45 = vshra.s32 %v10577_v37, 16 }
 0x359   : > { %vm1175_vm14 = vcmp.eq.s32.totalorder %v10356_v19, %v1167_v36  ;;  %v2579_v36 = vpop.f32.mrf.mxu1 }
 0x35a   : > { %v8660_v52 = vsel %vm1175_vm14, 1.0, %v15186_v34  ;;  %v10588_v47 = vcvt.s32.f32 %v1257_v45  ;;  %v10591_v41 = vsel %vm1175_vm14, 1e+30, %v10352_v15  ;;  %v10601_v15 = vadd.f32 %v10585_v46, %v2622_v59 }
 0x35b   : > { %v2850_v55 = vpop.f32.mrf.mxu3  ;;  %8732 = vmatmul.msk.f32.gmra.mxu3 %vm1007_vm1, %v8660_v52  ;;  %v1221_v56 = vsel %vm1007_vm1, %v10591_v41, inf  ;;  %v10654_v45 = vadd.f32 %v10585_v46, %v2625_v33 }
 0x35c   : > { %v1208_v39 = vpop.xlane.xlu1 %1207  ;;  %1260 = vmin.xlane.f32.xlu1 %v10588_v47  ;;  %1222 = vmin.xlane.f32.xlu0 %v1221_v56  ;;  %v1211_v53 = vpop.xlane.xlu0 %1210  ;;  %v3042_v12 = vadd.f32 %v2850_v55, %v10601_v15 }
 0x35d   : > { %vm1226_vm15 = vcmp.eq.f32.partialorder %v10522_v42, %v1208_v39  ;;  %vm1227_vm2 = vcmp.eq.f32.partialorder %v10516_v30, %v1211_v53 }
 0x35e   : > { %v1234_v63 = vsel %vm1226_vm15, %v10356_v19, 64  ;;  %v1235_v2 = vsel %vm1227_vm2, %v10356_v19, 64  ;;  %v3106_v11 = vmax.f32 %v3042_v12, 0.0 }
 0x35f   : > { %v10606_v17 = vsel %vm1007_vm1, %v1234_v63, 2147483647  ;;  %v10609_v7 = vsel %vm1007_vm1, %v1235_v2, 2147483647  ;;  %v2626_v63 = vsub.f32 %v2579_v36, %v10460_v49  ;;  %v1241_v49 = vand.u32 65535, %v10567_v26 }
 0x360   : > { %v1272_v48 = vshra.s32 %v10606_v17, 16  ;;  %v1287_v62 = vshra.s32 %v10609_v7, 16 }
 0x361   : > { %v2581_v58 = vpop.f32.mrf.mxu1 }
 0x362   : > { %v10617_v60 = vcvt.s32.f32 %v1272_v48  ;;  %v10619_v9 = vcvt.s32.f32 %v1287_v62  ;;  %v2627_v48 = vsub.f32 %v2581_v58, %v10462_v50  ;;  %v10666_v62 = vadd.f32 %v10585_v46, %v2626_v63 }
 0x363   : > { %v2853_v1 = vpop.f32.mrf.mxu3  ;;  %v1243_v50 = vcvt.s32.f32 %v1241_v49 }
 0x364   : > { %v3043_v18 = vadd.f32 %v2853_v1, %v10612_v10  ;;  %v1214_v20 = vpop.xlane.xlu1 %1213  ;;  %1275 = vmin.xlane.f32.xlu1 %v10617_v60  ;;  %1290 = vmin.xlane.f32.xlu0 %v10619_v9  ;;  %v1217_v21 = vpop.xlane.xlu0 %1216  ;;  %v10669_v12 = vadd.f32 %v10585_v46, %v2627_v48 }
 0x365   : > { %vm1228_vm3 = vcmp.eq.f32.partialorder %v10543_v4, %v1214_v20  ;;  %vm1229_vm4 = vcmp.eq.f32.partialorder %v10536_v40, %v1217_v21 }
 0x366   : > { %v3107_v22 = vmax.f32 %v3043_v18, 0.0  ;;  %v1236_v8 = vsel %vm1228_vm3, %v10356_v19, 64  ;;  %v1237_v16 = vsel %vm1229_vm4, %v10356_v19, 64 }
 0x367   : > { %v10629_v44 = vsel %vm1007_vm1, %v1236_v8, 2147483647  ;;  %v10632_v24 = vsel %vm1007_vm1, %v1237_v16, 2147483647  ;;  %v1256_v16 = vand.u32 65535, %v10577_v37  ;;  %v1271_v37 = vand.u32 65535, %v10606_v17 }
 0x368   : > { %v3170_v25 = vpack.c.bf16 %v3107_v22, %v3106_v11  ;;  %v1302_v23 = vshra.s32 %v10629_v44, 16  ;;  %v1317_v13 = vshra.s32 %v10632_v24, 16  ;;  %v1286_v17 = vand.u32 65535, %v10609_v7 }
 0x369   : > { %v1258_v14 = vcvt.s32.f32 %v1256_v16 }
 0x36a   : > { %8789 = vmatmul.msk.bf16.vlgmr.msrb.gmra.mxu1 %vm1007_vm1, %v3170_v25  ;;  %v10638_v6 = vcvt.s32.f32 %v1302_v23  ;;  %v10640_v29 = vcvt.s32.f32 %v1317_v13  ;;  %v2584_v25 = vpop.f32.mrf.mxu1 }
 0x36b   : > { %v2856_v31 = vpop.f32.mrf.mxu3 }
 0x36c   : > { %1305 = vmin.xlane.f32.xlu1 %v10638_v6  ;;  %1320 = vmin.xlane.f32.xlu0 %v10640_v29  ;;  %v1220_v32 = vpop.xlane.xlu0 %1219  ;;  %v3044_v52 = vadd.f32 %v2856_v31, %v10647_v43 }
 0x36d   : > { %vm1230_vm5 = vcmp.eq.f32.partialorder %v10552_v61, %v1220_v32 }
 0x36e   : > { %v1238_v0 = vsel %vm1230_vm5, %v10356_v19, 64  ;;  %v3108_v57 = vmax.f32 %v3044_v52, 0.0 }
 0x36f   : > { %v10651_v35 = vsel %vm1007_vm1, %v1238_v0, 2147483647  ;;  %v2628_v0 = vsub.f32 %v2584_v25, %v10464_v51 }
 0x370   : > { %v1332_v59 = vshra.s32 %v10651_v35, 16  ;;  %v1331_v49 = vand.u32 65535, %v10651_v35 }
 0x372   : > { %v10658_v55 = vcvt.s32.f32 %v1332_v59  ;;  %v2586_v33 = vpop.f32.mrf.mxu1 }
 0x373   : > { %v2859_v3 = vpop.f32.mrf.mxu3 }
 0x374   : > { %v3045_v56 = vadd.f32 %v2859_v3, %v10654_v45  ;;  %1335 = vmin.xlane.f32.xlu0 %v10658_v55  ;;  %v2629_v3 = vsub.f32 %v2586_v33, %v10466_v54  ;;  %v1288_v54 = vcvt.s32.f32 %v1286_v17 }
 0x376   : > { %v3109_v39 = vmax.f32 %v3045_v56, 0.0  ;;  %v1273_v56 = vcvt.s32.f32 %v1271_v37 }
 0x378   : > { %v3171_v53 = vpack.c.bf16 %v3109_v39, %v3108_v57  ;;  %v10704_v57 = vadd.f32 %v10585_v46, %v2628_v0  ;;  %v10707_v39 = vadd.f32 %v10585_v46, %v2629_v3  ;;  %v1316_v46 = vand.u32 65535, %v10632_v24 }
 0x379   : > { %v1333_v24 = vcvt.s32.f32 %v1331_v49 }
 0x37a   : > { %8790 = vmatmul.msk.bf16.gmra.mxu1 %vm1007_vm1, %v3171_v53  ;;  %v1301_v53 = vand.u32 65535, %v10629_v44 }
 0x37b   : > { %v2862_v2 = vpop.f32.mrf.mxu3 }
 0x37c   : > { %v3046_v1 = vadd.f32 %v2862_v2, %v10666_v62 }
 0x37e   : > { %v3110_v21 = vmax.f32 %v3046_v1, 0.0  ;;  %v1303_v1 = vcvt.s32.f32 %v1301_v53 }
 0x383   : > { %v2865_v18 = vpop.f32.mrf.mxu3 }
 0x384   : > { %v3047_v20 = vadd.f32 %v2865_v18, %v10669_v12 }
 0x386   : > { %v3111_v5 = vmax.f32 %v3047_v20, 0.0 }
 0x388   : > { %v3172_v11 = vpack.c.bf16 %v3111_v5, %v3110_v21  ;;  %v1318_v21 = vcvt.s32.f32 %v1316_v46 }
 0x38a   : > { %8791 = vmatmul.msk.bf16.gmra.mxu1 %vm1007_vm1, %v3172_v11 }
 0x38b   : > { %v2868_v59 = vpop.f32.mrf.mxu3 }
 0x38c   : > { %v3048_v58 = vadd.f32 %v2868_v59, %v10704_v57 }
 0x3c7   : > { %v10675_v22 = vpop.xlane.xlu1 %1245 }
 0x3c8   : > { %vm1247_vm6 = vcmp.eq.f32.partialorder %v10571_v28, %v10675_v22 }
 0x3c9   : > { %v1248_v8 = vsel %vm1247_vm6, %v1243_v50, inf  ;;  %v1252_v50 = vcvt.f32.s32 %v10675_v22 }
 0x3ca   : > { %1249 = vmin.xlane.f32.xlu1 %v1248_v8 }
 0x3cb   : > { %v1253_v16 = vshll.u32 %v1252_v50, 16 }
 0x3cf   : > { %v10680_v23 = vpop.xlane.xlu1 %1260  ;;  %v1223_v13 = vpop.xlane.xlu0 %1222 }
 0x3d0   : > { %vm1231_vm7 = vcmp.eq.f32.partialorder %v10591_v41, %v1223_v13  ;;  %vm1262_vm8 = vcmp.eq.f32.partialorder %v10588_v47, %v10680_v23  ;;  %v1267_v13 = vcvt.f32.s32 %v10680_v23 }
 0x3d1   : > { %v1239_v26 = vsel %vm1231_vm7, %v10356_v19, 64  ;;  %v1263_v31 = vsel %vm1262_vm8, %v1258_v14, inf }
 0x3d2   : > { %1264 = vmin.xlane.f32.xlu1 %v1263_v31  ;;  %v10687_v28 = vsel %vm1007_vm1, %v1239_v26, 2147483647  ;;  %v1268_v26 = vshll.u32 %v1267_v13, 16 }
 0x3d3   : > { %v1347_v32 = vshra.s32 %v10687_v28, 16 }
 0x3d5   : > { %v10692_v36 = vcvt.s32.f32 %v1347_v32  ;;  %v1346_v32 = vand.u32 65535, %v10687_v28 }
 0x3d7   : > { %v10694_v52 = vpop.xlane.xlu1 %1275  ;;  %1350 = vmin.xlane.f32.xlu0 %v10692_v36  ;;  %v10697_v47 = vpop.xlane.xlu0 %1290 }
 0x3d8   : > { %vm1277_vm9 = vcmp.eq.f32.partialorder %v10617_v60, %v10694_v52  ;;  %vm1292_vm10 = vcmp.eq.f32.partialorder %v10619_v9, %v10697_v47  ;;  %v3112_v9 = vmax.f32 %v3048_v58, 0.0  ;;  %v1282_v23 = vcvt.f32.s32 %v10694_v52 }
 0x3d9   : > { %v1278_v51 = vsel %vm1277_vm9, %v1273_v56, inf  ;;  %v1293_v60 = vsel %vm1292_vm10, %v1288_v54, inf }
 0x3da   : > { %1279 = vmin.xlane.f32.xlu1 %v1278_v51  ;;  %v1283_v56 = vshll.u32 %v1282_v23, 16  ;;  %v1297_v51 = vcvt.f32.s32 %v10697_v47 }
 0x3de   : > { %v2871_v63 = vpop.f32.mrf.mxu3 }
 0x3df   : > { %v3049_v7 = vadd.f32 %v2871_v63, %v10707_v39  ;;  %v10714_v2 = vpop.xlane.xlu1 %1305  ;;  %1294 = vmin.xlane.f32.xlu0 %v1293_v60  ;;  %v10716_v48 = vpop.xlane.xlu0 %1320 }
 0x3e0   : > { %vm1307_vm11 = vcmp.eq.f32.partialorder %v10638_v6, %v10714_v2  ;;  %vm1322_vm0 = vcmp.eq.f32.partialorder %v10640_v29, %v10716_v48 }
 0x3e1   : > { %v3113_v44 = vmax.f32 %v3049_v7, 0.0  ;;  %v1308_v18 = vsel %vm1307_vm11, %v1303_v1, inf  ;;  %v1323_v5 = vsel %vm1322_vm0, %v1318_v21, inf }
 0x3e2   : > { %1309 = vmin.xlane.f32.xlu1 %v1308_v18 }
 0x3e3   : > { %v3173_v20 = vpack.c.bf16 %v3113_v44, %v3112_v9  ;;  %v1327_v9 = vcvt.f32.s32 %v10716_v48 }
 0x3e5   : > { %8792 = vmatmul.msk.bf16.gmra.mxu1 %vm1007_vm1, %v3173_v20  ;;  %v1328_v21 = vshll.u32 %v1327_v9, 16 }
 0x3e7   : > { %1324 = vmin.xlane.f32.xlu0 %v1323_v5  ;;  %v10724_v11 = vpop.xlane.xlu0 %1335 }
 0x3e8   : > { %vm1337_vm12 = vcmp.eq.f32.partialorder %v10658_v55, %v10724_v11 }
 0x3e9   : > { %v1338_v6 = vsel %vm1337_vm12, %v1333_v24, inf }
 0x3ef   : > { %1339 = vmin.xlane.f32.xlu0 %v1338_v6  ;;  %v1342_v6 = vcvt.f32.s32 %v10724_v11 }
 0x43d   : > { %v1250_v8 = vpop.xlane.xlu1 %1249 }
 0x43e   : > { %v1251_v29 = vcvt.f32.s32 %v1250_v8 }
 0x440   : > { %v1254_v25 = vadd.s32 %v1253_v16, %v1251_v29  ;;  %v1343_v16 = vshll.u32 %v1342_v6, 16 }
 0x442   : > { %vm1360_vm13 = vcmp.eq.s32.totalorder %v10356_v19, %v1254_v25 }
 0x443   : > { %v8661_v14 = vsel %vm1360_vm13, 1.0, %v15186_v34  ;;  %v10734_v35 = vsel %vm1360_vm13, 1e+30, %v10491_v38  ;;  %v1348_v38 = vcvt.s32.f32 %v1346_v32 }
 0x444   : > { %8733 = vmatmul.msk.f32.gmra.mxu3 %vm1007_vm1, %v8661_v14  ;;  %v1392_v55 = vsel %vm1007_vm1, %v10734_v35, inf }
 0x445   : > { %1393 = vmin.xlane.f32.xlu1 %v1392_v55  ;;  %v1265_v22 = vpop.xlane.xlu1 %1264 }
 0x446   : > { %v1266_v31 = vcvt.f32.s32 %v1265_v22 }
 0x448   : > { %v1269_v37 = vadd.s32 %v1268_v26, %v1266_v31 }
 0x44a   : > { %v10741_v33 = vpop.xlane.xlu0 %1350  ;;  %vm1361_vm14 = vcmp.eq.s32.totalorder %v10356_v19, %v1269_v37 }
 0x44b   : > { %v8662_v0 = vsel %vm1361_vm14, 1.0, %v15186_v34  ;;  %v10746_v59 = vsel %vm1361_vm14, 1e+30, %v10506_v27  ;;  %vm1352_vm15 = vcmp.eq.f32.partialorder %v10692_v36, %v10741_v33  ;;  %v1312_v27 = vcvt.f32.s32 %v10714_v2 }
 0x44c   : > { %8734 = vmatmul.msk.f32.gmra.mxu3 %vm1007_vm1, %v8662_v0  ;;  %v1395_v28 = vsel %vm1007_vm1, %v10746_v59, inf  ;;  %v1353_v3 = vsel %vm1352_vm15, %v1348_v38, inf  ;;  %v1298_v36 = vshll.u32 %v1297_v51, 16  ;;  %v1357_v32 = vcvt.f32.s32 %v10741_v33 }
 0x44d   : > { %1396 = vmin.xlane.f32.xlu1 %v1395_v28  ;;  %v1280_v52 = vpop.xlane.xlu1 %1279  ;;  %1354 = vmin.xlane.f32.xlu0 %v1353_v3  ;;  %v1313_v46 = vshll.u32 %v1312_v27, 16 }
 0x44e   : > { %v1281_v17 = vcvt.f32.s32 %v1280_v52  ;;  %v1358_v0 = vshll.u32 %v1357_v32, 16 }
 0x450   : > { %v1284_v53 = vadd.s32 %v1283_v56, %v1281_v17 }
 0x452   : > { %v1295_v54 = vpop.xlane.xlu0 %1294  ;;  %vm1362_vm2 = vcmp.eq.s32.totalorder %v10356_v19, %v1284_v53 }
 0x453   : > { %v1296_v58 = vcvt.f32.s32 %v1295_v54  ;;  %v8663_v63 = vsel %vm1362_vm2, 1.0, %v15186_v34  ;;  %v10758_v60 = vsel %vm1362_vm2, 1e+30, %v10522_v42 }
 0x454   : > { %8735 = vmatmul.msk.f32.gmra.mxu3 %vm1007_vm1, %v8663_v63  ;;  %v1398_v7 = vsel %vm1007_vm1, %v10758_v60, inf }
 0x455   : > { %v1299_v1 = vadd.s32 %v1298_v36, %v1296_v58  ;;  %1399 = vmin.xlane.f32.xlu1 %v1398_v7  ;;  %v1310_v47 = vpop.xlane.xlu1 %1309 }
 0x456   : > { %v1311_v2 = vcvt.f32.s32 %v1310_v47 }
 0x457   : > { %vm1363_vm3 = vcmp.eq.s32.totalorder %v10356_v19, %v1299_v1 }
 0x458   : > { %v1314_v44 = vadd.s32 %v1313_v46, %v1311_v2  ;;  %v10766_v18 = vsel %vm1363_vm3, 1e+30, %v10516_v30  ;;  %v8664_v49 = vsel %vm1363_vm3, 1.0, %v15186_v34 }
 0x459   : > { %v1401_v42 = vsel %vm1007_vm1, %v10766_v18, inf }
 0x45a   : > { %1402 = vmin.xlane.f32.xlu0 %v1401_v42  ;;  %v1325_v20 = vpop.xlane.xlu0 %1324  ;;  %vm1364_vm4 = vcmp.eq.s32.totalorder %v10356_v19, %v1314_v44 }
 0x45b   : > { %v1326_v5 = vcvt.f32.s32 %v1325_v20  ;;  %v10775_v48 = vsel %vm1364_vm4, 1e+30, %v10543_v4  ;;  %v8665_v25 = vsel %vm1364_vm4, 1.0, %v15186_v34 }
 0x45c   : > { %8736 = vmatmul.msk.f32.gmra.mxu3 %vm1007_vm1, %v8664_v49  ;;  %v1404_v30 = vsel %vm1007_vm1, %v10775_v48, inf }
 0x45d   : > { %v1329_v24 = vadd.s32 %v1328_v21, %v1326_v5  ;;  %1405 = vmin.xlane.f32.xlu1 %v1404_v30 }
 0x45f   : > { %vm1365_vm5 = vcmp.eq.s32.totalorder %v10356_v19, %v1329_v24 }
 0x460   : > { %v10783_v50 = vsel %vm1365_vm5, 1e+30, %v10536_v40  ;;  %v8666_v14 = vsel %vm1365_vm5, 1.0, %v15186_v34 }
 0x461   : > { %v1407_v8 = vsel %vm1007_vm1, %v10783_v50, inf }
 0x462   : > { %1408 = vmin.xlane.f32.xlu2 %v1407_v8  ;;  %v1340_v4 = vpop.xlane.xlu0 %1339 }
 0x463   : > { %v1341_v29 = vcvt.f32.s32 %v1340_v4 }
 0x464   : > { %8737 = vmatmul.msk.f32.gmra.mxu3 %vm1007_vm1, %v8665_v25 }
 0x465   : > { %v1344_v13 = vadd.s32 %v1343_v16, %v1341_v29 }
 0x467   : > { %vm1366_vm6 = vcmp.eq.s32.totalorder %v10356_v19, %v1344_v13 }
 0x468   : > { %v10793_v11 = vsel %vm1366_vm6, 1e+30, %v10552_v61  ;;  %v8667_v55 = vsel %vm1366_vm6, 1.0, %v15186_v34 }
 0x469   : > { %v1410_v40 = vsel %vm1007_vm1, %v10793_v11, inf }
 0x46a   : > { %1411 = vmin.xlane.f32.xlu1 %v1410_v40 }
 0x46c   : > { %8738 = vmatmul.msk.f32.gmra.mxu3 %vm1007_vm1, %v8666_v14 }
 0x474   : > { %8739 = vmatmul.msk.f32.gmra.mxu3 %vm1007_vm1, %v8667_v55 }
 0x4b8   : > { %v1394_v22 = vpop.xlane.xlu1 %1393 }
 0x4b9   : > { %vm1416_vm7 = vcmp.eq.f32.partialorder %v10734_v35, %v1394_v22 }
 0x4ba   : > { %v1424_v26 = vsel %vm1416_vm7, %v10356_v19, 64 }
 0x4bb   : > { %v10804_v61 = vsel %vm1007_vm1, %v1424_v26, 2147483647 }
 0x4bc   : > { %v1434_v31 = vshra.s32 %v10804_v61, 16 }
 0x4be   : > { %v10808_v37 = vcvt.s32.f32 %v1434_v31 }
 0x4c0   : > { %v1397_v23 = vpop.xlane.xlu1 %1396  ;;  %1437 = vmin.xlane.f32.xlu0 %v10808_v37  ;;  %v1355_v38 = vpop.xlane.xlu0 %1354 }
 0x4c1   : > { %vm1417_vm8 = vcmp.eq.f32.partialorder %v10746_v59, %v1397_v23  ;;  %v1356_v28 = vcvt.f32.s32 %v1355_v38 }
 0x4c2   : > { %v1425_v3 = vsel %vm1417_vm8, %v10356_v19, 64 }
 0x4c3   : > { %v1359_v52 = vadd.s32 %v1358_v0, %v1356_v28  ;;  %v10814_v56 = vsel %vm1007_vm1, %v1425_v3, 2147483647 }
 0x4c4   : > { %v1449_v17 = vshra.s32 %v10814_v56, 16 }
 0x4c5   : > { %vm1367_vm9 = vcmp.eq.s32.totalorder %v10356_v19, %v1359_v52 }
 0x4c6   : > { %v8668_v33 = vsel %vm1367_vm9, 1.0, %v15186_v34  ;;  %v10819_v51 = vcvt.s32.f32 %v1449_v17  ;;  %v10822_v53 = vsel %vm1367_vm9, 1e+30, %v10591_v41 }
 0x4c7   : > { %v2874_v27 = vpop.f32.mrf.mxu3  ;;  %8740 = vmatmul.msk.f32.gmra.mxu3 %vm1007_vm1, %v8668_v33  ;;  %v1413_v54 = vsel %vm1007_vm1, %v10822_v53, inf }
 0x4c8   : > { %v1400_v36 = vpop.xlane.xlu1 %1399  ;;  %1452 = vmin.xlane.f32.xlu2 %v10819_v51  ;;  %1414 = vmin.xlane.f32.xlu0 %v1413_v54  ;;  %v3050_v1 = vadd.f32 %v2874_v27, %v10601_v15 }
 0x4c9   : > { %vm1418_vm10 = vcmp.eq.f32.partialorder %v10758_v60, %v1400_v36 }
 0x4ca   : > { %v1426_v58 = vsel %vm1418_vm10, %v10356_v19, 64  ;;  %v3114_v21 = vmax.f32 %v3050_v1, 0.0 }
 0x4cb   : > { %v10831_v63 = vsel %vm1007_vm1, %v1426_v58, 2147483647 }
 0x4cc   : > { %v1464_v41 = vshra.s32 %v10831_v63, 16 }
 0x4cd   : > { %v1403_v7 = vpop.xlane.xlu0 %1402 }
 0x4ce   : > { %vm1419_vm11 = vcmp.eq.f32.partialorder %v10766_v18, %v1403_v7  ;;  %v10836_v47 = vcvt.s32.f32 %v1464_v41  ;;  %v3314_v7 = vpop.f32.mrf.mxu1 }
 0x4cf   : > { %v1427_v46 = vsel %vm1419_vm11, %v10356_v19, 64  ;;  %v2877_v2 = vpop.f32.mrf.mxu3 }
 0x4d0   : > { %v3051_v9 = vadd.f32 %v2877_v2, %v10612_v10  ;;  %v1406_v44 = vpop.xlane.xlu1 %1405  ;;  %1467 = vmin.xlane.f32.xlu1 %v10836_v47  ;;  %v10842_v42 = vsel %vm1007_vm1, %v1427_v46, 2147483647 }
 0x4d1   : > { %vm1420_vm0 = vcmp.eq.f32.partialorder %v10775_v48, %v1406_v44  ;;  %v1479_v20 = vshra.s32 %v10842_v42, 16  ;;  %v1433_v44 = vand.u32 65535, %v10804_v61 }
 0x4d2   : > { %v3115_v5 = vmax.f32 %v3051_v9, 0.0  ;;  %v1428_v49 = vsel %vm1420_vm0, %v10356_v19, 64 }
 0x4d3   : > { %v10847_v30 = vcvt.s32.f32 %v1479_v20  ;;  %v10850_v24 = vsel %vm1007_vm1, %v1428_v49, 2147483647  ;;  %v1448_v49 = vand.u32 65535, %v10814_v56 }
 0x4d4   : > { %v3174_v6 = vpack.c.bf16 %v3115_v5, %v3114_v21  ;;  %v1494_v8 = vshra.s32 %v10850_v24, 16  ;;  %v1435_v21 = vcvt.s32.f32 %v1433_v44  ;;  %v10936_v44 = vld [vmem:[%s15221_s6] ss:$0 sm:$0xff] }
 0x4d5   : > { %v1409_v4 = vpop.xlane.xlu2 %1408  ;;  %1482 = vmin.xlane.f32.xlu2 %v10847_v30 }
 0x4d6   : > { %vm1421_vm12 = vcmp.eq.f32.partialorder %v10783_v50, %v1409_v4  ;;  %8793 = vmatmul.msk.bf16.gmra.mxu1 %vm1007_vm1, %v3174_v6  ;;  %v10856_v16 = vcvt.s32.f32 %v1494_v8  ;;  %v10882_v1 = vpop.f32.mrf.mxu1 }
 0x4d7   : > { %v1429_v29 = vsel %vm1421_vm12, %v10356_v19, 64  ;;  %v2880_v25 = vpop.f32.mrf.mxu3 }
 0x4d8   : > { %1497 = vmin.xlane.f32.xlu0 %v10856_v16  ;;  %v10861_v13 = vsel %vm1007_vm1, %v1429_v29, 2147483647  ;;  %v3052_v22 = vadd.f32 %v2880_v25, %v10647_v43  ;;  %v1450_v29 = vcvt.s32.f32 %v1448_v49  ;;  %v10944_v49 = vadd.f32 %v10936_v44, %v3314_v7 }
 0x4d9   : > { %v1509_v40 = vshra.s32 %v10861_v13, 16 }
 0x4da   : > { %v3116_v0 = vmax.f32 %v3052_v22, 0.0 }
 0x4db   : > { %v10864_v14 = vcvt.s32.f32 %v1509_v40  ;;  %v1463_v40 = vand.u32 65535, %v10831_v63 }
 0x4dd   : > { %1512 = vmin.xlane.f32.xlu1 %v10864_v14  ;;  %v1412_v55 = vpop.xlane.xlu1 %1411 }
 0x4de   : > { %vm1422_vm13 = vcmp.eq.f32.partialorder %v10793_v11, %v1412_v55  ;;  %v10884_v46 = vpop.f32.mrf.mxu1 }
 0x4df   : > { %v1430_v26 = vsel %vm1422_vm13, %v10356_v19, 64  ;;  %v2883_v31 = vpop.f32.mrf.mxu3 }
 0x4e0   : > { %v3053_v32 = vadd.f32 %v2883_v31, %v10654_v45  ;;  %v10872_v23 = vsel %vm1007_vm1, %v1430_v26, 2147483647 }
 0x4e1   : > { %v1524_v38 = vshra.s32 %v10872_v23, 16 }
 0x4e2   : > { %v3117_v28 = vmax.f32 %v3053_v32, 0.0  ;;  %v1478_v32 = vand.u32 65535, %v10842_v42 }
 0x4e3   : > { %v10875_v3 = vcvt.s32.f32 %v1524_v38 }
 0x4e4   : > { %v3175_v52 = vpack.c.bf16 %v3117_v28, %v3116_v0  ;;  %v1493_v0 = vand.u32 65535, %v10850_v24  ;;  %v1480_v28 = vcvt.s32.f32 %v1478_v32  ;;  %v1508_v24 = vand.u32 65535, %v10861_v13 }
 0x4e5   : > { %1527 = vmin.xlane.f32.xlu0 %v10875_v3 }
 0x4e6   : > { %8794 = vmatmul.msk.bf16.gmra.mxu1 %vm1007_vm1, %v3175_v52  ;;  %v10886_v2 = vpop.f32.mrf.mxu1 }
 0x4e7   : > { %v2886_v17 = vpop.f32.mrf.mxu3 }
 0x4e8   : > { %v3054_v33 = vadd.f32 %v2886_v17, %v10666_v62 }
 0x4ea   : > { %v3118_v36 = vmax.f32 %v3054_v33, 0.0 }
 0x4ee   : > { %v10888_v9 = vpop.f32.mrf.mxu1 }
 0x4ef   : > { %v2889_v27 = vpop.f32.mrf.mxu3 }
 0x4f0   : > { %v3055_v54 = vadd.f32 %v2889_v27, %v10669_v12 }
 0x4f2   : > { %v3119_v58 = vmax.f32 %v3055_v54, 0.0  ;;  %v1495_v54 = vcvt.s32.f32 %v1493_v0 }
 0x4f4   : > { %v3176_v41 = vpack.c.bf16 %v3119_v58, %v3118_v36 }
 0x4f6   : > { %8795 = vmatmul.msk.bf16.gmra.mxu1 %vm1007_vm1, %v3176_v41  ;;  %v10896_v6 = vpop.f32.mrf.mxu1 }
 0x4f7   : > { %v2892_v26 = vpop.f32.mrf.mxu3 }
 0x4f8   : > { %v3056_v52 = vadd.f32 %v2892_v26, %v10704_v57  ;;  %v10960_v26 = vadd.f32 %v10936_v44, %v10884_v46 }
 0x4fa   : > { %v3120_v36 = vmax.f32 %v3056_v52, 0.0 }
 0x4fe   : > { %v10909_v55 = vpop.f32.mrf.mxu1 }
 0x506   : > { %v10925_v27 = vpop.f32.mrf.mxu1 }
 0x507   : > { %15220 = vst [vmem:[#allocation32_spill] sm:$0xff] %v10925_v27 }
 0x533   : > { %v10891_v20 = vpop.xlane.xlu0 %1437 }
 0x534   : > { %vm1439_vm14 = vcmp.eq.f32.partialorder %v10808_v37, %v10891_v20 }
 0x535   : > { %v1440_v5 = vsel %vm1439_vm14, %v1435_v21, inf }
 0x536   : > { %1441 = vmin.xlane.f32.xlu2 %v1440_v5  ;;  %v1510_v5 = vcvt.s32.f32 %v1508_v24 }
 0x53b   : > { %v10898_v8 = vpop.xlane.xlu2 %1452  ;;  %v1415_v4 = vpop.xlane.xlu0 %1414 }
 0x53c   : > { %vm1423_vm15 = vcmp.eq.f32.partialorder %v10822_v53, %v1415_v4  ;;  %vm1454_vm2 = vcmp.eq.f32.partialorder %v10819_v51, %v10898_v8  ;;  %v1465_v51 = vcvt.s32.f32 %v1463_v40 }
 0x53d   : > { %v1431_v61 = vsel %vm1423_vm15, %v10356_v19, 64  ;;  %v1455_v25 = vsel %vm1454_vm2, %v1450_v29, inf  ;;  %v1523_v29 = vand.u32 65535, %v10872_v23 }
 0x53e   : > { %1456 = vmin.xlane.f32.xlu1 %v1455_v25  ;;  %v10905_v37 = vsel %vm1007_vm1, %v1431_v61, 2147483647 }
 0x53f   : > { %v1539_v56 = vshra.s32 %v10905_v37, 16 }
 0x541   : > { %v10911_v22 = vcvt.s32.f32 %v1539_v56  ;;  %v1525_v56 = vcvt.s32.f32 %v1523_v29 }
 0x543   : > { %v10913_v31 = vpop.xlane.xlu1 %1467  ;;  %1542 = vmin.xlane.f32.xlu2 %v10911_v22 }
 0x544   : > { %vm1469_vm3 = vcmp.eq.f32.partialorder %v10836_v47, %v10913_v31 }
 0x545   : > { %v1470_v38 = vsel %vm1469_vm3, %v1465_v51, inf }
 0x546   : > { %1471 = vmin.xlane.f32.xlu0 %v1470_v38 }
 0x548   : > { %v10920_v63 = vpop.xlane.xlu2 %1482 }
 0x549   : > { %vm1484_vm4 = vcmp.eq.f32.partialorder %v10847_v30, %v10920_v63 }
 0x54a   : > { %v2895_v17 = vpop.f32.mrf.mxu3  ;;  %v1485_v33 = vsel %vm1484_vm4, %v1480_v28, inf  ;;  %v1444_v28 = vcvt.f32.s32 %v10891_v20 }
 0x54b   : > { %v3057_v47 = vadd.f32 %v2895_v17, %v10707_v39  ;;  %1486 = vmin.xlane.f32.xlu1 %v1485_v33  ;;  %v10928_v42 = vpop.xlane.xlu0 %1497 }
 0x54c   : > { %vm1499_vm5 = vcmp.eq.f32.partialorder %v10856_v16, %v10928_v42  ;;  %v1445_v17 = vshll.u32 %v1444_v28, 16 }
 0x54d   : > { %v3121_v58 = vmax.f32 %v3057_v47, 0.0  ;;  %v1500_v41 = vsel %vm1499_vm5, %v1495_v54, inf  ;;  %v1459_v54 = vcvt.f32.s32 %v10898_v8  ;;  %v1474_v8 = vcvt.f32.s32 %v10913_v31 }
 0x54e   : > { %1501 = vmin.xlane.f32.xlu2 %v1500_v41 }
 0x54f   : > { %v3177_v30 = vpack.c.bf16 %v3121_v58, %v3120_v36  ;;  %v1460_v20 = vshll.u32 %v1459_v54, 16 }
 0x550   : > { %v10938_v21 = vpop.xlane.xlu1 %1512 }
 0x551   : > { %8796 = vmatmul.msk.bf16.gmra.mxu1 %vm1007_vm1, %v3177_v30  ;;  %vm1514_vm6 = vcmp.eq.f32.partialorder %v10864_v14, %v10938_v21  ;;  %v1538_v30 = vand.u32 65535, %v10905_v37 }
 0x552   : > { %v1515_v16 = vsel %vm1514_vm6, %v1510_v5, inf }
 0x553   : > { %v3334_v13 = vpop.f32.mrf.mxu1  ;;  %1516 = vmin.xlane.f32.xlu0 %v1515_v16 }
 0x554   : > { %v10947_v4 = vadd.f32 %v10936_v44, %v3334_v13 }
 0x556   : > { %v3474_v61 = vmax.f32 %v10944_v49, %v10947_v4 }
 0x558   : > { %v10952_v25 = vpop.xlane.xlu0 %1527 }
 0x559   : > { %vm1529_vm7 = vcmp.eq.f32.partialorder %v10875_v3, %v10952_v25  ;;  %v10971_v3 = vadd.f32 %v10936_v44, %v10888_v9 }
 0x55a   : > { %v1530_v14 = vsel %vm1529_vm7, %v1525_v56, inf }
 0x55b   : > { %v10956_v40 = vpop.f32.mrf.mxu1  ;;  %1531 = vmin.xlane.f32.xlu2 %v1530_v14  ;;  %v1475_v14 = vshll.u32 %v1474_v8, 16 }
 0x563   : > { %v3339_v7 = vpop.f32.mrf.mxu1 }
 0x564   : > { %v10963_v23 = vadd.f32 %v10936_v44, %v3339_v7 }
 0x566   : > { %v3476_v51 = vmax.f32 %v10960_v26, %v10963_v23 }
 0x56b   : > { %v10967_v32 = vpop.f32.mrf.mxu1 }
 0x573   : > { %v3344_v38 = vpop.f32.mrf.mxu1 }
 0x574   : > { %v10974_v0 = vadd.f32 %v10936_v44, %v3344_v38  ;;  %v1489_v38 = vcvt.f32.s32 %v10920_v63 }
 0x576   : > { %v3478_v46 = vmax.f32 %v10971_v3, %v10974_v0 }
 0x5a9   : > { %v1442_v52 = vpop.xlane.xlu2 %1441 }
 0x5aa   : > { %v1443_v33 = vcvt.f32.s32 %v1442_v52 }
 0x5ac   : > { %v1446_v47 = vadd.s32 %v1445_v17, %v1443_v33 }
 0x5ae   : > { %vm1552_vm8 = vcmp.eq.s32.totalorder %v10356_v19, %v1446_v47 }
 0x5af   : > { %v8669_v24 = vsel %vm1552_vm8, 1.0, %v15186_v34  ;;  %v10983_v9 = vsel %vm1552_vm8, 1e+30, %v10734_v35  ;;  %v1540_v35 = vcvt.s32.f32 %v1538_v30  ;;  %v11019_v30 = vpop.f32.mrf.mxu1 }
 0x5b0   : > { %8741 = vmatmul.msk.f32.gmra.mxu3 %vm1007_vm1, %v8669_v24  ;;  %v1584_v36 = vsel %vm1007_vm1, %v10983_v9, inf }
 0x5b1   : > { %v1457_v58 = vpop.xlane.xlu1 %1456  ;;  %1585 = vmin.xlane.f32.xlu1 %v1584_v36 }
 0x5b2   : > { %v1458_v41 = vcvt.f32.s32 %v1457_v58  ;;  %v1519_v58 = vcvt.f32.s32 %v10938_v21 }
 0x5b4   : > { %v1461_v5 = vadd.s32 %v1460_v20, %v1458_v41  ;;  %v1520_v8 = vshll.u32 %v1519_v58, 16 }
 0x5b6   : > { %v10990_v16 = vpop.xlane.xlu2 %1542  ;;  %vm1553_vm9 = vcmp.eq.s32.totalorder %v10356_v19, %v1461_v5 }
 0x5b7   : > { %v8670_v13 = vsel %vm1553_vm9, 1.0, %v15186_v34  ;;  %v10995_v29 = vsel %vm1553_vm9, 1e+30, %v10746_v59  ;;  %vm1544_vm10 = vcmp.eq.f32.partialorder %v10911_v22, %v10990_v16  ;;  %v1504_v59 = vcvt.f32.s32 %v10928_v42 }
 0x5b8   : > { %8742 = vmatmul.msk.f32.gmra.mxu3 %vm1007_vm1, %v8670_v13  ;;  %v1587_v37 = vsel %vm1007_vm1, %v10995_v29, inf  ;;  %v1545_v56 = vsel %vm1544_vm10, %v1540_v35, inf  ;;  %v1490_v22 = vshll.u32 %v1489_v38, 16 }
 0x5b9   : > { %1588 = vmin.xlane.f32.xlu0 %v1587_v37  ;;  %1546 = vmin.xlane.f32.xlu1 %v1545_v56  ;;  %v1472_v31 = vpop.xlane.xlu0 %1471  ;;  %v1505_v36 = vshll.u32 %v1504_v59, 16  ;;  %v1534_v56 = vcvt.f32.s32 %v10952_v25 }
 0x5ba   : > { %v1473_v7 = vcvt.f32.s32 %v1472_v31 }
 0x5bc   : > { %v1476_v28 = vadd.s32 %v1475_v14, %v1473_v7  ;;  %v11042_v14 = vadd.f32 %v10936_v44, %v10909_v55 }
 0x5be   : > { %v1487_v52 = vpop.xlane.xlu1 %1486  ;;  %vm1554_vm11 = vcmp.eq.s32.totalorder %v10356_v19, %v1476_v28  ;;  %v1535_v28 = vshll.u32 %v1534_v56, 16 }
 0x5bf   : > { %v1488_v17 = vcvt.f32.s32 %v1487_v52  ;;  %v8671_v33 = vsel %vm1554_vm11, 1.0, %v15186_v34  ;;  %v11007_v47 = vsel %vm1554_vm11, 1e+30, %v10758_v60 }
 0x5c0   : > { %8743 = vmatmul.msk.f32.gmra.mxu3 %vm1007_vm1, %v8671_v33  ;;  %v1590_v54 = vsel %vm1007_vm1, %v11007_v47, inf }
 0x5c1   : > { %v1491_v24 = vadd.s32 %v1490_v22, %v1488_v17  ;;  %v1502_v63 = vpop.xlane.xlu2 %1501  ;;  %1591 = vmin.xlane.f32.xlu2 %v1590_v54 }
 0x5c2   : > { %v1503_v42 = vcvt.f32.s32 %v1502_v63 }
 0x5c3   : > { %vm1555_vm0 = vcmp.eq.s32.totalorder %v10356_v19, %v1491_v24 }
 0x5c4   : > { %v1506_v20 = vadd.s32 %v1505_v36, %v1503_v42  ;;  %v11015_v41 = vsel %vm1555_vm0, 1e+30, %v10766_v18  ;;  %v8672_v13 = vsel %vm1555_vm0, 1.0, %v15186_v34  ;;  %v1549_v42 = vcvt.f32.s32 %v10990_v16 }
 0x5c5   : > { %v1593_v60 = vsel %vm1007_vm1, %v11015_v41, inf }
 0x5c6   : > { %1594 = vmin.xlane.f32.xlu0 %v1593_v60  ;;  %v1517_v5 = vpop.xlane.xlu0 %1516  ;;  %vm1556_vm12 = vcmp.eq.s32.totalorder %v10356_v19, %v1506_v20 }
 0x5c7   : > { %v1518_v35 = vcvt.f32.s32 %v1517_v5  ;;  %v11026_v21 = vsel %vm1556_vm12, 1e+30, %v10775_v48  ;;  %v1550_v5 = vshll.u32 %v1549_v42, 16 }
 0x5c8   : > { %8744 = vmatmul.msk.f32.gmra.mxu3 %vm1007_vm1, %v8672_v13  ;;  %v1596_v18 = vsel %vm1007_vm1, %v11026_v21, inf }
 0x5c9   : > { %v1521_v37 = vadd.s32 %v1520_v8, %v1518_v35  ;;  %1597 = vmin.xlane.f32.xlu1 %v1596_v18 }
 0x5cb   : > { %vm1557_vm13 = vcmp.eq.s32.totalorder %v10356_v19, %v1521_v37 }
 0x5cc   : > { %v11036_v31 = vsel %vm1557_vm13, 1e+30, %v10783_v50  ;;  %v8673_v50 = vsel %vm1556_vm12, 1.0, %v15186_v34  ;;  %v8674_v33 = vsel %vm1557_vm13, 1.0, %v15186_v34 }
 0x5cd   : > { %v1599_v48 = vsel %vm1007_vm1, %v11036_v31, inf }
 0x5ce   : > { %v3349_v7 = vpop.f32.mrf.mxu1  ;;  %v1532_v38 = vpop.xlane.xlu2 %1531  ;;  %1600 = vmin.xlane.f32.xlu2 %v1599_v48 }
 0x5cf   : > { %v11045_v25 = vadd.f32 %v10936_v44, %v3349_v7  ;;  %v1533_v59 = vcvt.f32.s32 %v1532_v38 }
 0x5d0   : > { %8745 = vmatmul.msk.f32.gmra.mxu3 %vm1007_vm1, %v8673_v50 }
 0x5d1   : > { %v1536_v22 = vadd.s32 %v1535_v28, %v1533_v59 }
 0x5d3   : > { %vm1558_vm14 = vcmp.eq.s32.totalorder %v10356_v19, %v1536_v22 }
 0x5d4   : > { %v11055_v55 = vsel %vm1558_vm14, 1e+30, %v10793_v11  ;;  %v8675_v54 = vsel %vm1558_vm14, 1.0, %v15186_v34 }
 0x5d5   : > { %v1602_v17 = vsel %vm1007_vm1, %v11055_v55, inf }
 0x5d6   : > { %1603 = vmin.xlane.f32.xlu1 %v1602_v17 }
 0x5d8   : > { %8746 = vmatmul.msk.f32.gmra.mxu3 %vm1007_vm1, %v8674_v33 }
 0x5e0   : > { %8747 = vmatmul.msk.f32.gmra.mxu3 %vm1007_vm1, %v8675_v54 }
 0x624   : > { %v1586_v24 = vpop.xlane.xlu1 %1585 }
 0x625   : > { %vm1608_vm15 = vcmp.eq.f32.partialorder %v10983_v9, %v1586_v24 }
 0x626   : > { %v1616_v11 = vsel %vm1608_vm15, %v10356_v19, 64 }
 0x627   : > { %v11068_v63 = vsel %vm1007_vm1, %v1616_v11, 2147483647 }
 0x628   : > { %v1626_v36 = vshra.s32 %v11068_v63, 16 }
 0x62a   : > { %v11072_v58 = vcvt.s32.f32 %v1626_v36 }
 0x62c   : > { %1629 = vmin.xlane.f32.xlu0 %v11072_v58  ;;  %v1547_v20 = vpop.xlane.xlu1 %1546  ;;  %v1589_v60 = vpop.xlane.xlu0 %1588 }
 0x62d   : > { %v1548_v8 = vcvt.f32.s32 %v1547_v20  ;;  %vm1609_vm2 = vcmp.eq.f32.partialorder %v10995_v29, %v1589_v60 }
 0x62e   : > { %v1617_v35 = vsel %vm1609_vm2, %v10356_v19, 64 }
 0x62f   : > { %v1551_v13 = vadd.s32 %v1550_v5, %v1548_v8  ;;  %v11078_v18 = vsel %vm1007_vm1, %v1617_v35, 2147483647 }
 0x630   : > { %v1641_v37 = vshra.s32 %v11078_v18, 16 }
 0x631   : > { %vm1559_vm3 = vcmp.eq.s32.totalorder %v10356_v19, %v1551_v13 }
 0x632   : > { %v8676_v16 = vsel %vm1559_vm3, 1.0, %v15186_v34  ;;  %v11084_v56 = vsel %vm1559_vm3, 1e+30, %v10822_v53  ;;  %v11086_v48 = vcvt.s32.f32 %v1641_v37 }
 0x633   : > { %v2898_v7 = vpop.f32.mrf.mxu3  ;;  %8748 = vmatmul.msk.f32.gmra.mxu3 %vm1007_vm1, %v8676_v16  ;;  %v1605_v38 = vsel %vm1007_vm1, %v11084_v56, inf }
 0x634   : > { %1606 = vmin.xlane.f32.xlu0 %v1605_v38  ;;  %v1592_v28 = vpop.xlane.xlu2 %1591  ;;  %1644 = vmin.xlane.f32.xlu2 %v11086_v48  ;;  %v3058_v17 = vadd.f32 %v2898_v7, %v10601_v15 }
 0x635   : > { %vm1610_vm4 = vcmp.eq.f32.partialorder %v11007_v47, %v1592_v28 }
 0x636   : > { %v1618_v59 = vsel %vm1610_vm4, %v10356_v19, 64  ;;  %v3122_v60 = vmax.f32 %v3058_v17, 0.0 }
 0x637   : > { %v11095_v50 = vsel %vm1007_vm1, %v1618_v59, 2147483647 }
 0x638   : > { %v1656_v53 = vshra.s32 %v11095_v50, 16 }
 0x639   : > { %v1595_v22 = vpop.xlane.xlu0 %1594 }
 0x63a   : > { %vm1611_vm5 = vcmp.eq.f32.partialorder %v11015_v41, %v1595_v22  ;;  %v11100_v33 = vcvt.s32.f32 %v1656_v53 }
 0x63b   : > { %v1619_v54 = vsel %vm1611_vm5, %v10356_v19, 64  ;;  %v2901_v24 = vpop.f32.mrf.mxu3 }
 0x63c   : > { %v3059_v11 = vadd.f32 %v2901_v24, %v10612_v10  ;;  %v1598_v36 = vpop.xlane.xlu1 %1597  ;;  %1659 = vmin.xlane.f32.xlu1 %v11100_v33  ;;  %v11106_v42 = vsel %vm1007_vm1, %v1619_v54, 2147483647 }
 0x63d   : > { %vm1612_vm6 = vcmp.eq.f32.partialorder %v11026_v21, %v1598_v36  ;;  %v1671_v20 = vshra.s32 %v11106_v42, 16 }
 0x63e   : > { %v3123_v5 = vmax.f32 %v3059_v11, 0.0  ;;  %v1620_v8 = vsel %vm1612_vm6, %v10356_v19, 64 }
 0x63f   : > { %v11111_v35 = vcvt.s32.f32 %v1671_v20  ;;  %v11114_v13 = vsel %vm1007_vm1, %v1620_v8, 2147483647 }
 0x640   : > { %v3178_v37 = vpack.c.bf16 %v3123_v5, %v3122_v60  ;;  %v1686_v16 = vshra.s32 %v11114_v13, 16 }
 0x641   : > { %v1601_v7 = vpop.xlane.xlu2 %1600  ;;  %1674 = vmin.xlane.f32.xlu2 %v11111_v35 }
 0x642   : > { %vm1613_vm7 = vcmp.eq.f32.partialorder %v11036_v31, %v1601_v7  ;;  %8797 = vmatmul.msk.bf16.gmra.mxu1 %vm1007_vm1, %v3178_v37  ;;  %v11120_v38 = vcvt.s32.f32 %v1686_v16 }
 0x643   : > { %v1621_v28 = vsel %vm1613_vm7, %v10356_v19, 64  ;;  %v2904_v59 = vpop.f32.mrf.mxu3 }
 0x644   : > { %1689 = vmin.xlane.f32.xlu0 %v11120_v38  ;;  %v11125_v53 = vsel %vm1007_vm1, %v1621_v28, 2147483647  ;;  %v3060_v24 = vadd.f32 %v2904_v59, %v10647_v43 }
 0x645   : > { %v1701_v22 = vshra.s32 %v11125_v53, 16 }
 0x646   : > { %v3124_v8 = vmax.f32 %v3060_v24, 0.0  ;;  %v1625_v24 = vand.u32 65535, %v11068_v63 }
 0x647   : > { %v11128_v17 = vcvt.s32.f32 %v1701_v22 }
 0x649   : > { %v1604_v54 = vpop.xlane.xlu1 %1603  ;;  %1704 = vmin.xlane.f32.xlu1 %v11128_v17 }
 0x64a   : > { %vm1614_vm8 = vcmp.eq.f32.partialorder %v11055_v55, %v1604_v54 }
 0x64b   : > { %v1622_v11 = vsel %vm1614_vm8, %v10356_v19, 64  ;;  %v2907_v36 = vpop.f32.mrf.mxu3 }
 0x64c   : > { %v3061_v20 = vadd.f32 %v2907_v36, %v10654_v45  ;;  %v11136_v60 = vsel %vm1007_vm1, %v1622_v11, 2147483647 }
 0x64d   : > { %v1716_v5 = vshra.s32 %v11136_v60, 16 }
 0x64e   : > { %v3125_v37 = vmax.f32 %v3061_v20, 0.0 }
 0x64f   : > { %v11139_v16 = vcvt.s32.f32 %v1716_v5  ;;  %v1627_v5 = vcvt.s32.f32 %v1625_v24 }
 0x650   : > { %v3179_v7 = vpack.c.bf16 %v3125_v37, %v3124_v8  ;;  %v1640_v37 = vand.u32 65535, %v11078_v18  ;;  %v1655_v18 = vand.u32 65535, %v11095_v50 }
 0x651   : > { %1719 = vmin.xlane.f32.xlu0 %v11139_v16 }
 0x652   : > { %8798 = vmatmul.msk.bf16.gmra.mxu1 %vm1007_vm1, %v3179_v7  ;;  %v1657_v24 = vcvt.s32.f32 %v1655_v18 }
 0x653   : > { %v2910_v28 = vpop.f32.mrf.mxu3 }
 0x654   : > { %v3062_v59 = vadd.f32 %v2910_v28, %v10666_v62 }
 0x656   : > { %v3126_v36 = vmax.f32 %v3062_v59, 0.0  ;;  %v1642_v59 = vcvt.s32.f32 %v1640_v37 }
 0x65b   : > { %v2913_v22 = vpop.f32.mrf.mxu3 }
 0x65c   : > { %v3063_v54 = vadd.f32 %v2913_v22, %v10669_v12 }
 0x65e   : > { %v3127_v11 = vmax.f32 %v3063_v54, 0.0 }
 0x660   : > { %v3180_v52 = vpack.c.bf16 %v3127_v11, %v3126_v36 }
 0x662   : > { %8799 = vmatmul.msk.bf16.gmra.mxu1 %vm1007_vm1, %v3180_v52 }
 0x663   : > { %v2916_v36 = vpop.f32.mrf.mxu3 }
 0x69f   : > { %v11147_v20 = vpop.xlane.xlu0 %1629 }
 0x6a0   : > { %vm1631_vm9 = vcmp.eq.f32.partialorder %v11072_v58, %v11147_v20 }
 0x6a1   : > { %v1632_v8 = vsel %vm1631_vm9, %v1627_v5, inf }
 0x6a2   : > { %1633 = vmin.xlane.f32.xlu2 %v1632_v8  ;;  %v1685_v8 = vand.u32 65535, %v11114_v13  ;;  %v1700_v13 = vand.u32 65535, %v11125_v53  ;;  %v1715_v53 = vand.u32 65535, %v11136_v60 }
 0x6a7   : > { %v11152_v7 = vpop.xlane.xlu2 %1644  ;;  %v1607_v28 = vpop.xlane.xlu0 %1606 }
 0x6a8   : > { %vm1615_vm10 = vcmp.eq.f32.partialorder %v11084_v56, %v1607_v28  ;;  %vm1646_vm11 = vcmp.eq.f32.partialorder %v11086_v48, %v11152_v7  ;;  %v1670_v48 = vand.u32 65535, %v11106_v42  ;;  %v3064_v28 = vadd.f32 %v2916_v36, %v10704_v57 }
 0x6a9   : > { %v1623_v52 = vsel %vm1615_vm10, %v10356_v19, 64  ;;  %v1647_v63 = vsel %vm1646_vm11, %v1642_v59, inf  ;;  %v1651_v26 = vcvt.f32.s32 %v11152_v7 }
 0x6aa   : > { %1648 = vmin.xlane.f32.xlu1 %v1647_v63  ;;  %v11159_v22 = vsel %vm1007_vm1, %v1623_v52, 2147483647  ;;  %v1672_v50 = vcvt.s32.f32 %v1670_v48  ;;  %v11177_v63 = vpop.f32.mrf.mxu1  ;;  %v3128_v18 = vmax.f32 %v3064_v28, 0.0 }
 0x6ab   : > { %v1731_v58 = vshra.s32 %v11159_v22, 16  ;;  %15222 = vst [vmem:[#allocation33_spill] sm:$0xff] %v11177_v63 }
 0x6ad   : > { %v11163_v54 = vcvt.s32.f32 %v1731_v58  ;;  %v1687_v58 = vcvt.s32.f32 %v1685_v8 }
 0x6af   : > { %v11165_v11 = vpop.xlane.xlu1 %1659  ;;  %1734 = vmin.xlane.f32.xlu2 %v11163_v54 }
 0x6b0   : > { %vm1661_vm0 = vcmp.eq.f32.partialorder %v11100_v33, %v11165_v11  ;;  %v1666_v7 = vcvt.f32.s32 %v11165_v11 }
 0x6b1   : > { %v1662_v5 = vsel %vm1661_vm0, %v1657_v24, inf }
 0x6b2   : > { %1663 = vmin.xlane.f32.xlu0 %v1662_v5  ;;  %v1702_v5 = vcvt.s32.f32 %v1700_v13 }
 0x6b4   : > { %v11172_v37 = vpop.xlane.xlu2 %1674 }
 0x6b5   : > { %vm1676_vm12 = vcmp.eq.f32.partialorder %v11111_v35, %v11172_v37 }
 0x6b6   : > { %v2919_v59 = vpop.f32.mrf.mxu3  ;;  %v1677_v52 = vsel %vm1676_vm12, %v1672_v50, inf }
 0x6b7   : > { %v3065_v33 = vadd.f32 %v2919_v59, %v10707_v39  ;;  %1678 = vmin.xlane.f32.xlu1 %v1677_v52  ;;  %v11180_v42 = vpop.xlane.xlu0 %1689  ;;  %v1717_v52 = vcvt.s32.f32 %v1715_v53 }
 0x6b8   : > { %vm1691_vm13 = vcmp.eq.f32.partialorder %v11120_v38, %v11180_v42 }
 0x6b9   : > { %v3129_v36 = vmax.f32 %v3065_v33, 0.0  ;;  %v1692_v24 = vsel %vm1691_vm13, %v1687_v58, inf }
 0x6ba   : > { %1693 = vmin.xlane.f32.xlu2 %v1692_v24 }
 0x6bb   : > { %v3181_v35 = vpack.c.bf16 %v3129_v36, %v3128_v18  ;;  %v1636_v18 = vcvt.f32.s32 %v11147_v20 }
 0x6bc   : > { %v11185_v48 = vpop.xlane.xlu1 %1704 }
 0x6bd   : > { %8800 = vmatmul.msk.bf16.gmra.mxu1 %vm1007_vm1, %v3181_v35  ;;  %vm1706_vm14 = vcmp.eq.f32.partialorder %v11128_v17, %v11185_v48  ;;  %v1637_v24 = vshll.u32 %v1636_v18, 16 }
 0x6be   : > { %v1707_v50 = vsel %vm1706_vm14, %v1702_v5, inf }
 0x6bf   : > { %v3354_v8 = vpop.f32.mrf.mxu1  ;;  %1708 = vmin.xlane.f32.xlu0 %v1707_v50  ;;  %v1730_v50 = vand.u32 65535, %v11159_v22 }
 0x6c0   : > { %v3355_v38 = vadd.f32 %v10936_v44, %v3354_v8 }
 0x6c2   : > { %v11195_v28 = vmax.f32 %v3474_v61, %v3355_v38 }
 0x6c4   : > { %v11197_v59 = vpop.xlane.xlu0 %1719 }
 0x6c5   : > { %vm1721_vm15 = vcmp.eq.f32.partialorder %v11139_v16, %v11197_v59 }
 0x6c6   : > { %v1722_v33 = vsel %vm1721_vm15, %v1717_v52, inf }
 0x6c7   : > { %v11201_v17 = vpop.f32.mrf.mxu1  ;;  %1723 = vmin.xlane.f32.xlu2 %v1722_v33 }
 0x6cf   : > { %v3359_v58 = vpop.f32.mrf.mxu1 }
 0x6d0   : > { %v3360_v13 = vadd.f32 %v10936_v44, %v3359_v58  ;;  %v1667_v58 = vshll.u32 %v1666_v7, 16 }
 0x6d2   : > { %v11207_v60 = vmax.f32 %v3476_v51, %v3360_v13 }
 0x6d7   : > { %v11209_v49 = vpop.f32.mrf.mxu1 }
 0x6df   : > { %v3364_v4 = vpop.f32.mrf.mxu1 }
 0x6e0   : > { %v3365_v61 = vadd.f32 %v10936_v44, %v3364_v4  ;;  %v1681_v4 = vcvt.f32.s32 %v11172_v37 }
 0x6e2   : > { %v11215_v16 = vmax.f32 %v3478_v46, %v3365_v61  ;;  %v1652_v46 = vshll.u32 %v1651_v26, 16 }
 0x715   : > { %v1634_v36 = vpop.xlane.xlu2 %1633 }
 0x716   : > { %v1635_v35 = vcvt.f32.s32 %v1634_v36 }
 0x718   : > { %v1638_v5 = vadd.s32 %v1637_v24, %v1635_v35 }
 0x71a   : > { %vm1744_vm2 = vcmp.eq.s32.totalorder %v10356_v19, %v1638_v5 }
 0x71b   : > { %v8677_v23 = vsel %vm1744_vm2, 1.0, %v15186_v34  ;;  %v11222_v51 = vsel %vm1744_vm2, 1e+30, %v10983_v9  ;;  %v1732_v9 = vcvt.s32.f32 %v1730_v50 }
 0x71c   : > { %8749 = vmatmul.msk.f32.gmra.mxu3 %vm1007_vm1, %v8677_v23  ;;  %v1776_v3 = vsel %vm1007_vm1, %v11222_v51, inf }
 0x71d   : > { %v1649_v0 = vpop.xlane.xlu1 %1648  ;;  %1777 = vmin.xlane.f32.xlu1 %v1776_v3  ;;  %v1711_v3 = vcvt.f32.s32 %v11185_v48 }
 0x71e   : > { %v1650_v20 = vcvt.f32.s32 %v1649_v0 }
 0x720   : > { %v1653_v8 = vadd.s32 %v1652_v46, %v1650_v20  ;;  %v11258_v20 = vpop.f32.mrf.mxu1 }
 0x722   : > { %v11229_v38 = vpop.xlane.xlu2 %1734  ;;  %vm1745_vm3 = vcmp.eq.s32.totalorder %v10356_v19, %v1653_v8  ;;  %v1712_v8 = vshll.u32 %v1711_v3, 16 }
 0x723   : > { %v8678_v53 = vsel %vm1745_vm3, 1.0, %v15186_v34  ;;  %v11234_v52 = vsel %vm1745_vm3, 1e+30, %v10995_v29  ;;  %vm1736_vm4 = vcmp.eq.f32.partialorder %v11163_v54, %v11229_v38  ;;  %v1696_v29 = vcvt.f32.s32 %v11180_v42 }
 0x724   : > { %8750 = vmatmul.msk.f32.gmra.mxu3 %vm1007_vm1, %v8678_v53  ;;  %v1779_v22 = vsel %vm1007_vm1, %v11234_v52, inf  ;;  %v1737_v33 = vsel %vm1736_vm4, %v1732_v9, inf  ;;  %v1682_v54 = vshll.u32 %v1681_v4, 16 }
 0x725   : > { %1780 = vmin.xlane.f32.xlu0 %v1779_v22  ;;  %1738 = vmin.xlane.f32.xlu1 %v1737_v33  ;;  %v1664_v11 = vpop.xlane.xlu0 %1663  ;;  %v1697_v23 = vshll.u32 %v1696_v29, 16  ;;  %v1726_v22 = vcvt.f32.s32 %v11197_v59 }
 0x726   : > { %v1665_v13 = vcvt.f32.s32 %v1664_v11 }
 0x728   : > { %v1668_v61 = vadd.s32 %v1667_v58, %v1665_v13  ;;  %v1727_v13 = vshll.u32 %v1726_v22, 16 }
 0x72a   : > { %v1679_v18 = vpop.xlane.xlu1 %1678  ;;  %vm1746_vm5 = vcmp.eq.s32.totalorder %v10356_v19, %v1668_v61 }
 0x72b   : > { %v1680_v36 = vcvt.f32.s32 %v1679_v18  ;;  %v8679_v24 = vsel %vm1746_vm5, 1.0, %v15186_v34  ;;  %v11246_v35 = vsel %vm1746_vm5, 1e+30, %v11007_v47 }
 0x72c   : > { %8751 = vmatmul.msk.f32.gmra.mxu3 %vm1007_vm1, %v8679_v24  ;;  %v1782_v5 = vsel %vm1007_vm1, %v11246_v35, inf }
 0x72d   : > { %v1683_v26 = vadd.s32 %v1682_v54, %v1680_v36  ;;  %v1694_v37 = vpop.xlane.xlu2 %1693  ;;  %1783 = vmin.xlane.f32.xlu2 %v1782_v5 }
 0x72e   : > { %v1695_v42 = vcvt.f32.s32 %v1694_v37  ;;  %v1741_v37 = vcvt.f32.s32 %v11229_v38 }
 0x72f   : > { %vm1747_vm6 = vcmp.eq.s32.totalorder %v10356_v19, %v1683_v26 }
 0x730   : > { %v1698_v0 = vadd.s32 %v1697_v23, %v1695_v42  ;;  %v11254_v46 = vsel %vm1747_vm6, 1e+30, %v11015_v41  ;;  %v8680_v9 = vsel %vm1747_vm6, 1.0, %v15186_v34 }
 0x731   : > { %v1785_v47 = vsel %vm1007_vm1, %v11254_v46, inf }
 0x732   : > { %1786 = vmin.xlane.f32.xlu0 %v1785_v47  ;;  %v1709_v50 = vpop.xlane.xlu0 %1708  ;;  %vm1748_vm7 = vcmp.eq.s32.totalorder %v10356_v19, %v1698_v0  ;;  %v1742_v0 = vshll.u32 %v1741_v37, 16 }
 0x733   : > { %v1710_v7 = vcvt.f32.s32 %v1709_v50  ;;  %v11265_v48 = vsel %vm1748_vm7, 1e+30, %v11026_v21  ;;  %v8681_v59 = vsel %vm1748_vm7, 1.0, %v15186_v34 }
 0x734   : > { %8752 = vmatmul.msk.f32.gmra.mxu3 %vm1007_vm1, %v8680_v9  ;;  %v1788_v41 = vsel %vm1007_vm1, %v11265_v48, inf }
 0x735   : > { %v1713_v53 = vadd.s32 %v1712_v8, %v1710_v7  ;;  %1789 = vmin.xlane.f32.xlu1 %v1788_v41 }
 0x737   : > { %vm1749_vm8 = vcmp.eq.s32.totalorder %v10356_v19, %v1713_v53 }
 0x738   : > { %v11275_v33 = vsel %vm1749_vm8, 1e+30, %v11036_v31  ;;  %v15223_v31 = vmax.f32 %v11042_v14, %v11045_v25  ;;  %v8682_v24 = vsel %vm1749_vm8, 1.0, %v15186_v34 }
 0x739   : > { %v1791_v21 = vsel %vm1007_vm1, %v11275_v33, inf }
 0x73a   : > { %v3369_v11 = vpop.f32.mrf.mxu1  ;;  %v1724_v58 = vpop.xlane.xlu2 %1723  ;;  %1792 = vmin.xlane.f32.xlu2 %v1791_v21 }
 0x73b   : > { %v3370_v4 = vadd.f32 %v10936_v44, %v3369_v11  ;;  %v1725_v61 = vcvt.f32.s32 %v1724_v58 }
 0x73c   : > { %8753 = vmatmul.msk.f32.gmra.mxu3 %vm1007_vm1, %v8681_v59 }
 0x73d   : > { %v11287_v29 = vmax.f32 %v15223_v31, %v3370_v4  ;;  %v1728_v18 = vadd.s32 %v1727_v13, %v1725_v61 }
 0x73f   : > { %vm1750_vm9 = vcmp.eq.s32.totalorder %v10356_v19, %v1728_v18 }
 0x740   : > { %v11291_v54 = vsel %vm1750_vm9, 1e+30, %v11055_v55  ;;  %v8683_v14 = vsel %vm1750_vm9, 1.0, %v15186_v34 }
 0x741   : > { %v1794_v36 = vsel %vm1007_vm1, %v11291_v54, inf }
 0x742   : > { %1795 = vmin.xlane.f32.xlu1 %v1794_v36 }
 0x744   : > { %8754 = vmatmul.msk.f32.gmra.mxu3 %vm1007_vm1, %v8682_v24 }
 0x74c   : > { %8755 = vmatmul.msk.f32.gmra.mxu3 %vm1007_vm1, %v8683_v14 }
 0x790   : > { %v1778_v25 = vpop.xlane.xlu1 %1777 }
 0x791   : > { %vm1800_vm10 = vcmp.eq.f32.partialorder %v11222_v51, %v1778_v25 }
 0x792   : > { %v1808_v55 = vsel %vm1800_vm10, %v10356_v19, 64 }
 0x793   : > { %v11304_v5 = vsel %vm1007_vm1, %v1808_v55, 2147483647 }
 0x794   : > { %v1818_v26 = vshra.s32 %v11304_v5, 16 }
 0x796   : > { %v11308_v23 = vcvt.s32.f32 %v1818_v26 }
 0x798   : > { %1821 = vmin.xlane.f32.xlu0 %v11308_v23  ;;  %v1739_v42 = vpop.xlane.xlu1 %1738  ;;  %v1781_v3 = vpop.xlane.xlu0 %1780 }
 0x799   : > { %v1740_v47 = vcvt.f32.s32 %v1739_v42  ;;  %vm1801_vm11 = vcmp.eq.f32.partialorder %v11234_v52, %v1781_v3 }
 0x79a   : > { %v1809_v50 = vsel %vm1801_vm11, %v10356_v19, 64 }
 0x79b   : > { %v1743_v8 = vadd.s32 %v1742_v0, %v1740_v47  ;;  %v11314_v7 = vsel %vm1007_vm1, %v1809_v50, 2147483647 }
 0x79c   : > { %v1833_v9 = vshra.s32 %v11314_v7, 16 }
 0x79d   : > { %vm1751_vm0 = vcmp.eq.s32.totalorder %v10356_v19, %v1743_v8 }
 0x79e   : > { %v8684_v38 = vsel %vm1751_vm0, 1.0, %v15186_v34  ;;  %v11320_v41 = vsel %vm1751_vm0, 1e+30, %v11084_v56  ;;  %v11322_v53 = vcvt.s32.f32 %v1833_v9 }
 0x79f   : > { %v2922_v22 = vpop.f32.mrf.mxu3  ;;  %8756 = vmatmul.msk.f32.gmra.mxu3 %vm1007_vm1, %v8684_v38  ;;  %v1797_v21 = vsel %vm1007_vm1, %v11320_v41, inf }
 0x7a0   : > { %1798 = vmin.xlane.f32.xlu0 %v1797_v21  ;;  %v1784_v11 = vpop.xlane.xlu2 %1783  ;;  %1836 = vmin.xlane.f32.xlu2 %v11322_v53  ;;  %v3066_v61 = vadd.f32 %v2922_v22, %v10601_v15 }
 0x7a1   : > { %vm1802_vm12 = vcmp.eq.f32.partialorder %v11246_v35, %v1784_v11 }
 0x7a2   : > { %v1810_v58 = vsel %vm1802_vm12, %v10356_v19, 64  ;;  %v3130_v55 = vmax.f32 %v3066_v61, 0.0 }
 0x7a3   : > { %v11331_v13 = vsel %vm1007_vm1, %v1810_v58, 2147483647 }
 0x7a4   : > { %v1848_v56 = vshra.s32 %v11331_v13, 16 }
 0x7a5   : > { %v1787_v4 = vpop.xlane.xlu0 %1786 }
 0x7a6   : > { %vm1803_vm13 = vcmp.eq.f32.partialorder %v11254_v46, %v1787_v4  ;;  %v11336_v59 = vcvt.s32.f32 %v1848_v56 }
 0x7a7   : > { %v1811_v31 = vsel %vm1803_vm13, %v10356_v19, 64  ;;  %v2925_v18 = vpop.f32.mrf.mxu3 }
 0x7a8   : > { %v3067_v36 = vadd.f32 %v2925_v18, %v10612_v10  ;;  %v1790_v24 = vpop.xlane.xlu1 %1789  ;;  %1851 = vmin.xlane.f32.xlu1 %v11336_v59  ;;  %v11342_v14 = vsel %vm1007_vm1, %v1811_v31, 2147483647 }
 0x7a9   : > { %vm1804_vm14 = vcmp.eq.f32.partialorder %v11265_v48, %v1790_v24  ;;  %v1863_v25 = vshra.s32 %v11342_v14, 16 }
 0x7aa   : > { %v3131_v26 = vmax.f32 %v3067_v36, 0.0  ;;  %v1812_v37 = vsel %vm1804_vm14, %v10356_v19, 64 }
 0x7ab   : > { %v11347_v42 = vcvt.s32.f32 %v1863_v25  ;;  %v11350_v3 = vsel %vm1007_vm1, %v1812_v37, 2147483647 }
 0x7ac   : > { %v3182_v0 = vpack.c.bf16 %v3131_v26, %v3130_v55  ;;  %v1878_v47 = vshra.s32 %v11350_v3, 16 }
 0x7ad   : > { %v1793_v50 = vpop.xlane.xlu2 %1792  ;;  %1866 = vmin.xlane.f32.xlu2 %v11347_v42 }
 0x7ae   : > { %vm1805_vm15 = vcmp.eq.f32.partialorder %v11275_v33, %v1793_v50  ;;  %8801 = vmatmul.msk.bf16.gmra.mxu1 %vm1007_vm1, %v3182_v0  ;;  %v11356_v8 = vcvt.s32.f32 %v1878_v47 }
 0x7af   : > { %v1813_v9 = vsel %vm1805_vm15, %v10356_v19, 64  ;;  %v2928_v38 = vpop.f32.mrf.mxu3 }
 0x7b0   : > { %1881 = vmin.xlane.f32.xlu0 %v11356_v8  ;;  %v11361_v22 = vsel %vm1007_vm1, %v1813_v9, 2147483647  ;;  %v3068_v56 = vadd.f32 %v2928_v38, %v10647_v43 }
 0x7b1   : > { %v1893_v21 = vshra.s32 %v11361_v22, 16 }
 0x7b2   : > { %v3132_v24 = vmax.f32 %v3068_v56, 0.0 }
 0x7b3   : > { %v11364_v11 = vcvt.s32.f32 %v1893_v21 }
 0x7b5   : > { %v1796_v58 = vpop.xlane.xlu1 %1795  ;;  %1896 = vmin.xlane.f32.xlu1 %v11364_v11 }
 0x7b6   : > { %vm1806_vm2 = vcmp.eq.f32.partialorder %v11291_v54, %v1796_v58  ;;  %v1817_v58 = vand.u32 65535, %v11304_v5 }
 0x7b7   : > { %v1814_v4 = vsel %vm1806_vm2, %v10356_v19, 64  ;;  %v2931_v61 = vpop.f32.mrf.mxu3 }
 0x7b8   : > { %v3069_v31 = vadd.f32 %v2931_v61, %v10654_v45  ;;  %v11372_v18 = vsel %vm1007_vm1, %v1814_v4, 2147483647  ;;  %v1819_v4 = vcvt.s32.f32 %v1817_v58 }
 0x7b9   : > { %v1908_v36 = vshra.s32 %v11372_v18, 16 }
 0x7ba   : > { %v3133_v25 = vmax.f32 %v3069_v31, 0.0  ;;  %v1832_v31 = vand.u32 65535, %v11314_v7 }
 0x7bb   : > { %v11375_v55 = vcvt.s32.f32 %v1908_v36 }
 0x7bc   : > { %v3183_v26 = vpack.c.bf16 %v3133_v25, %v3132_v24  ;;  %v1834_v25 = vcvt.s32.f32 %v1832_v31 }
 0x7bd   : > { %1911 = vmin.xlane.f32.xlu0 %v11375_v55 }
 0x7be   : > { %8802 = vmatmul.msk.bf16.gmra.mxu1 %vm1007_vm1, %v3183_v26 }
 0x7bf   : > { %v2934_v37 = vpop.f32.mrf.mxu3 }
 0x7c0   : > { %v3070_v0 = vadd.f32 %v2934_v37, %v10666_v62 }
 0x7c2   : > { %v3134_v9 = vmax.f32 %v3070_v0, 0.0 }
 0x7c7   : > { %v2937_v47 = vpop.f32.mrf.mxu3 }
 0x7c8   : > { %v3071_v50 = vadd.f32 %v2937_v47, %v10669_v12 }
 0x7ca   : > { %v3135_v38 = vmax.f32 %v3071_v50, 0.0 }
 0x7cc   : > { %v3184_v21 = vpack.c.bf16 %v3135_v38, %v3134_v9 }
 0x7ce   : > { %8803 = vmatmul.msk.bf16.gmra.mxu1 %vm1007_vm1, %v3184_v21  ;;  %v1877_v21 = vand.u32 65535, %v11350_v3  ;;  %v1892_v3 = vand.u32 65535, %v11361_v22 }
 0x7cf   : > { %v2940_v47 = vpop.f32.mrf.mxu3 }
 0x80b   : > { %v11383_v56 = vpop.xlane.xlu0 %1821 }
 0x80c   : > { %vm1823_vm3 = vcmp.eq.f32.partialorder %v11308_v23, %v11383_v56  ;;  %v1847_v23 = vand.u32 65535, %v11331_v13 }
 0x80d   : > { %v1824_v61 = vsel %vm1823_vm3, %v1819_v4, inf  ;;  %v3072_v4 = vadd.f32 %v2940_v47, %v10704_v57  ;;  %v1894_v47 = vcvt.s32.f32 %v1892_v3 }
 0x80e   : > { %1825 = vmin.xlane.f32.xlu2 %v1824_v61  ;;  %v1849_v9 = vcvt.s32.f32 %v1847_v23 }
 0x813   : > { %v11388_v36 = vpop.xlane.xlu2 %1836  ;;  %v1799_v24 = vpop.xlane.xlu0 %1798 }
 0x814   : > { %vm1807_vm4 = vcmp.eq.f32.partialorder %v11320_v41, %v1799_v24  ;;  %vm1838_vm5 = vcmp.eq.f32.partialorder %v11322_v53, %v11388_v36  ;;  %v1862_v53 = vand.u32 65535, %v11342_v14  ;;  %v11413_v24 = vpop.f32.mrf.mxu1 }
 0x815   : > { %v1815_v5 = vsel %vm1807_vm4, %v10356_v19, 64  ;;  %v1839_v26 = vsel %vm1838_vm5, %v1834_v25, inf  ;;  %15224 = vst [vmem:[#allocation34_spill] sm:$0xff] %v11413_v24  ;;  %v1879_v25 = vcvt.s32.f32 %v1877_v21 }
 0x816   : > { %1840 = vmin.xlane.f32.xlu1 %v1839_v26  ;;  %v11395_v37 = vsel %vm1007_vm1, %v1815_v5, 2147483647  ;;  %v1864_v58 = vcvt.s32.f32 %v1862_v53  ;;  %v3136_v5 = vmax.f32 %v3072_v4, 0.0 }
 0x817   : > { %v1923_v7 = vshra.s32 %v11395_v37, 16 }
 0x819   : > { %v11399_v0 = vcvt.s32.f32 %v1923_v7 }
 0x81b   : > { %v11401_v50 = vpop.xlane.xlu1 %1851  ;;  %1926 = vmin.xlane.f32.xlu2 %v11399_v0 }
 0x81c   : > { %vm1853_vm6 = vcmp.eq.f32.partialorder %v11336_v59, %v11401_v50 }
 0x81d   : > { %v1854_v38 = vsel %vm1853_vm6, %v1849_v9, inf }
 0x81e   : > { %1855 = vmin.xlane.f32.xlu0 %v1854_v38 }
 0x820   : > { %v11408_v13 = vpop.xlane.xlu2 %1866 }
 0x821   : > { %vm1868_vm7 = vcmp.eq.f32.partialorder %v11347_v42, %v11408_v13 }
 0x822   : > { %v2943_v61 = vpop.f32.mrf.mxu3  ;;  %v1869_v31 = vsel %vm1868_vm7, %v1864_v58, inf }
 0x823   : > { %v3073_v14 = vadd.f32 %v2943_v61, %v10707_v39  ;;  %1870 = vmin.xlane.f32.xlu1 %v1869_v31  ;;  %v11416_v59 = vpop.xlane.xlu0 %1881 }
 0x824   : > { %vm1883_vm8 = vcmp.eq.f32.partialorder %v11356_v8, %v11416_v59  ;;  %v1907_v8 = vand.u32 65535, %v11372_v18 }
 0x825   : > { %v3137_v26 = vmax.f32 %v3073_v14, 0.0  ;;  %v1884_v23 = vsel %vm1883_vm8, %v1879_v25, inf }
 0x826   : > { %1885 = vmin.xlane.f32.xlu2 %v1884_v23  ;;  %v1909_v58 = vcvt.s32.f32 %v1907_v8 }
 0x827   : > { %v3185_v42 = vpack.c.bf16 %v3137_v26, %v3136_v5  ;;  %v1828_v5 = vcvt.f32.s32 %v11383_v56 }
 0x828   : > { %v11421_v7 = vpop.xlane.xlu1 %1896 }
 0x829   : > { %8804 = vmatmul.msk.bf16.gmra.mxu1 %vm1007_vm1, %v3185_v42  ;;  %vm1898_vm9 = vcmp.eq.f32.partialorder %v11364_v11, %v11421_v7  ;;  %v1829_v23 = vshll.u32 %v1828_v5, 16 }
 0x82a   : > { %v1899_v9 = vsel %vm1898_vm9, %v1894_v47, inf }
 0x82b   : > { %v3374_v53 = vpop.f32.mrf.mxu1  ;;  %1900 = vmin.xlane.f32.xlu0 %v1899_v9  ;;  %v1843_v9 = vcvt.f32.s32 %v11388_v36  ;;  %v1858_v36 = vcvt.f32.s32 %v11401_v50 }
 0x82c   : > { %v11427_v22 = vadd.f32 %v10936_v44, %v3374_v53 }
 0x82d   : > { %v1844_v56 = vshll.u32 %v1843_v9, 16 }
 0x830   : > { %v11432_v21 = vpop.xlane.xlu0 %1911 }
 0x831   : > { %vm1913_vm10 = vcmp.eq.f32.partialorder %v11375_v55, %v11432_v21 }
 0x832   : > { %v1914_v4 = vsel %vm1913_vm10, %v1909_v58, inf }
 0x833   : > { %v11436_v61 = vpop.f32.mrf.mxu1  ;;  %1915 = vmin.xlane.f32.xlu2 %v1914_v4  ;;  %v1922_v4 = vand.u32 65535, %v11395_v37 }
 0x83b   : > { %v3379_v11 = vpop.f32.mrf.mxu1 }
 0x83c   : > { %v11439_v31 = vadd.f32 %v10936_v44, %v3379_v11 }
 0x843   : > { %v11443_v14 = vpop.f32.mrf.mxu1 }
 0x84b   : > { %v3384_v25 = vpop.f32.mrf.mxu1 }
 0x84c   : > { %v11446_v3 = vadd.f32 %v10936_v44, %v3384_v25 }
 0x881   : > { %v1826_v26 = vpop.xlane.xlu2 %1825 }
 0x882   : > { %v1827_v42 = vcvt.f32.s32 %v1826_v26 }
 0x884   : > { %v1830_v47 = vadd.s32 %v1829_v23, %v1827_v42 }
 0x886   : > { %vm1936_vm11 = vcmp.eq.s32.totalorder %v10356_v19, %v1830_v47  ;;  %v1859_v47 = vshll.u32 %v1858_v36, 16 }
 0x887   : > { %v8685_v53 = vsel %vm1936_vm11, 1.0, %v15186_v34  ;;  %v11455_v8 = vsel %vm1936_vm11, 1e+30, %v11222_v51  ;;  %v1924_v51 = vcvt.s32.f32 %v1922_v4 }
 0x888   : > { %8757 = vmatmul.msk.f32.gmra.mxu3 %vm1007_vm1, %v8685_v53  ;;  %v1968_v44 = vsel %vm1007_vm1, %v11455_v8, inf  ;;  %v1873_v53 = vcvt.f32.s32 %v11408_v13 }
 0x889   : > { %v1841_v58 = vpop.xlane.xlu1 %1840  ;;  %1969 = vmin.xlane.f32.xlu1 %v1968_v44 }
 0x88a   : > { %v1842_v11 = vcvt.f32.s32 %v1841_v58 }
 0x88c   : > { %v1845_v25 = vadd.s32 %v1844_v56, %v1842_v11 }
 0x88e   : > { %v11462_v5 = vpop.xlane.xlu2 %1926  ;;  %vm1937_vm0 = vcmp.eq.s32.totalorder %v10356_v19, %v1845_v25 }
 0x88f   : > { %v8686_v26 = vsel %vm1937_vm0, 1.0, %v15186_v34  ;;  %v11467_v23 = vsel %vm1937_vm0, 1e+30, %v11234_v52  ;;  %vm1928_vm12 = vcmp.eq.f32.partialorder %v11399_v0, %v11462_v5  ;;  %v1888_v52 = vcvt.f32.s32 %v11416_v59 }
 0x890   : > { %8758 = vmatmul.msk.f32.gmra.mxu3 %vm1007_vm1, %v8686_v26  ;;  %v1971_v37 = vsel %vm1007_vm1, %v11467_v23, inf  ;;  %v1929_v42 = vsel %vm1928_vm12, %v1924_v51, inf  ;;  %v1874_v0 = vshll.u32 %v1873_v53, 16  ;;  %v1903_v26 = vcvt.f32.s32 %v11421_v7 }
 0x891   : > { %1972 = vmin.xlane.f32.xlu0 %v1971_v37  ;;  %1930 = vmin.xlane.f32.xlu1 %v1929_v42  ;;  %v1856_v50 = vpop.xlane.xlu0 %1855  ;;  %v1889_v51 = vshll.u32 %v1888_v52, 16 }
 0x892   : > { %v1857_v9 = vcvt.f32.s32 %v1856_v50  ;;  %v11491_v50 = vpop.f32.mrf.mxu1 }
 0x893   : > { %15225 = vst [vmem:[#allocation35_spill] sm:$0xff] %v11491_v50 }
 0x894   : > { %v1860_v44 = vadd.s32 %v1859_v47, %v1857_v9  ;;  %v1904_v9 = vshll.u32 %v1903_v26, 16 }
 0x896   : > { %v1871_v58 = vpop.xlane.xlu1 %1870  ;;  %vm1938_vm13 = vcmp.eq.s32.totalorder %v10356_v19, %v1860_v44 }
 0x897   : > { %v1872_v56 = vcvt.f32.s32 %v1871_v58  ;;  %v8687_v4 = vsel %vm1938_vm13, 1.0, %v15186_v34  ;;  %v11479_v11 = vsel %vm1938_vm13, 1e+30, %v11246_v35  ;;  %v1918_v58 = vcvt.f32.s32 %v11432_v21 }
 0x898   : > { %8759 = vmatmul.msk.f32.gmra.mxu3 %vm1007_vm1, %v8687_v4  ;;  %v1974_v25 = vsel %vm1007_vm1, %v11479_v11, inf }
 0x899   : > { %v1875_v36 = vadd.s32 %v1874_v0, %v1872_v56  ;;  %v1886_v13 = vpop.xlane.xlu2 %1885  ;;  %1975 = vmin.xlane.f32.xlu2 %v1974_v25  ;;  %v1919_v25 = vshll.u32 %v1918_v58, 16 }
 0x89a   : > { %v1887_v59 = vcvt.f32.s32 %v1886_v13 }
 0x89b   : > { %vm1939_vm14 = vcmp.eq.s32.totalorder %v10356_v19, %v1875_v36  ;;  %v11515_v36 = vld [vmem:[%s15221_s6] ss:$0 sm:$0xff] }
 0x89c   : > { %v1890_v37 = vadd.s32 %v1889_v51, %v1887_v59  ;;  %v11487_v42 = vsel %vm1939_vm14, 1e+30, %v11254_v46  ;;  %v8688_v44 = vsel %vm1939_vm14, 1.0, %v15186_v34 }
 0x89d   : > { %v1977_v35 = vsel %vm1007_vm1, %v11487_v42, inf }
 0x89e   : > { %1978 = vmin.xlane.f32.xlu0 %v1977_v35  ;;  %v1901_v47 = vpop.xlane.xlu0 %1900  ;;  %vm1940_vm15 = vcmp.eq.s32.totalorder %v10356_v19, %v1890_v37 }
 0x89f   : > { %v1902_v53 = vcvt.f32.s32 %v1901_v47  ;;  %v11498_v7 = vsel %vm1940_vm15, 1e+30, %v11265_v48 }
 0x8a0   : > { %8760 = vmatmul.msk.f32.gmra.mxu3 %vm1007_vm1, %v8688_v44  ;;  %v1980_v46 = vsel %vm1007_vm1, %v11498_v7, inf }
 0x8a1   : > { %v1905_v52 = vadd.s32 %v1904_v9, %v1902_v53  ;;  %1981 = vmin.xlane.f32.xlu1 %v1980_v46  ;;  %v1933_v46 = vcvt.f32.s32 %v11462_v5 }
 0x8a3   : > { %vm1941_vm2 = vcmp.eq.s32.totalorder %v10356_v19, %v1905_v52 }
 0x8a4   : > { %v11508_v0 = vsel %vm1941_vm2, 1e+30, %v11275_v33  ;;  %v8689_v33 = vsel %vm1940_vm15, 1.0, %v15186_v34  ;;  %v8690_v37 = vsel %vm1941_vm2, 1.0, %v15186_v34 }
 0x8a5   : > { %v1983_v48 = vsel %vm1007_vm1, %v11508_v0, inf }
 0x8a6   : > { %v3389_v56 = vpop.f32.mrf.mxu1  ;;  %v1916_v4 = vpop.xlane.xlu2 %1915  ;;  %1984 = vmin.xlane.f32.xlu2 %v1983_v48 }
 0x8a7   : > { %v11518_v21 = vadd.f32 %v11515_v36, %v3389_v56  ;;  %v1917_v13 = vcvt.f32.s32 %v1916_v4  ;;  %v1934_v56 = vshll.u32 %v1933_v46, 16 }
 0x8a8   : > { %8761 = vmatmul.msk.f32.gmra.mxu3 %vm1007_vm1, %v8689_v33 }
 0x8a9   : > { %v1920_v59 = vadd.s32 %v1919_v25, %v1917_v13 }
 0x8ab   : > { %vm1942_vm3 = vcmp.eq.s32.totalorder %v10356_v19, %v1920_v59 }
 0x8ac   : > { %v11528_v26 = vsel %vm1942_vm3, 1e+30, %v11291_v54  ;;  %v8691_v47 = vsel %vm1942_vm3, 1.0, %v15186_v34 }
 0x8ad   : > { %v1986_v35 = vsel %vm1007_vm1, %v11528_v26, inf }
 0x8ae   : > { %1987 = vmin.xlane.f32.xlu1 %v1986_v35 }
 0x8b0   : > { %8762 = vmatmul.msk.f32.gmra.mxu3 %vm1007_vm1, %v8690_v37 }
 0x8b8   : > { %8763 = vmatmul.msk.f32.gmra.mxu3 %vm1007_vm1, %v8691_v47 }
 0x8fc   : > { %v1970_v9 = vpop.xlane.xlu1 %1969 }
 0x8fd   : > { %vm1992_vm4 = vcmp.eq.f32.partialorder %v11455_v8, %v1970_v9 }
 0x8fe   : > { %v2000_v54 = vsel %vm1992_vm4, %v10356_v19, 64 }
 0x8ff   : > { %v11541_v53 = vsel %vm1007_vm1, %v2000_v54, 2147483647 }
 0x900   : > { %v2010_v44 = vshra.s32 %v11541_v53, 16 }
 0x902   : > { %v11545_v52 = vcvt.s32.f32 %v2010_v44 }
 0x904   : > { %2013 = vmin.xlane.f32.xlu0 %v11545_v52  ;;  %v1931_v58 = vpop.xlane.xlu1 %1930  ;;  %v1973_v48 = vpop.xlane.xlu0 %1972 }
 0x905   : > { %v1932_v4 = vcvt.f32.s32 %v1931_v58  ;;  %vm1993_vm5 = vcmp.eq.f32.partialorder %v11467_v23, %v1973_v48 }
 0x906   : > { %v2001_v25 = vsel %vm1993_vm5, %v10356_v19, 64 }
 0x907   : > { %v1935_v13 = vadd.s32 %v1934_v56, %v1932_v4  ;;  %v11551_v33 = vsel %vm1007_vm1, %v2001_v25, 2147483647 }
 0x908   : > { %v2025_v59 = vshra.s32 %v11551_v33, 16 }
 0x909   : > { %vm1943_vm6 = vcmp.eq.s32.totalorder %v10356_v19, %v1935_v13 }
 0x90a   : > { %v8692_v5 = vsel %vm1943_vm6, 1.0, %v15186_v34  ;;  %v11557_v35 = vsel %vm1943_vm6, 1e+30, %v11320_v41  ;;  %v11559_v37 = vcvt.s32.f32 %v2025_v59 }
 0x90b   : > { %v2946_v47 = vpop.f32.mrf.mxu3  ;;  %8764 = vmatmul.msk.f32.gmra.mxu3 %vm1007_vm1, %v8692_v5  ;;  %v1989_v9 = vsel %vm1007_vm1, %v11557_v35, inf }
 0x90c   : > { %1990 = vmin.xlane.f32.xlu0 %v1989_v9  ;;  %v1976_v54 = vpop.xlane.xlu2 %1975  ;;  %2028 = vmin.xlane.f32.xlu2 %v11559_v37  ;;  %v3074_v48 = vadd.f32 %v2946_v47, %v10601_v15 }
 0x90d   : > { %vm1994_vm7 = vcmp.eq.f32.partialorder %v11479_v11, %v1976_v54 }
 0x90e   : > { %v2002_v44 = vsel %vm1994_vm7, %v10356_v19, 64  ;;  %v3138_v47 = vmax.f32 %v3074_v48, 0.0 }
 0x90f   : > { %v11568_v46 = vsel %vm1007_vm1, %v2002_v44, 2147483647 }
 0x910   : > { %v2040_v41 = vshra.s32 %v11568_v46, 16 }
 0x911   : > { %v1979_v58 = vpop.xlane.xlu0 %1978 }
 0x912   : > { %vm1995_vm8 = vcmp.eq.f32.partialorder %v11487_v42, %v1979_v58  ;;  %v11573_v56 = vcvt.s32.f32 %v2040_v41 }
 0x913   : > { %v2003_v4 = vsel %vm1995_vm8, %v10356_v19, 64  ;;  %v2949_v25 = vpop.f32.mrf.mxu3 }
 0x914   : > { %v3075_v13 = vadd.f32 %v2949_v25, %v10612_v10  ;;  %v1982_v59 = vpop.xlane.xlu1 %1981  ;;  %2043 = vmin.xlane.f32.xlu1 %v11573_v56  ;;  %v11579_v5 = vsel %vm1007_vm1, %v2003_v4, 2147483647 }
 0x915   : > { %vm1996_vm9 = vcmp.eq.f32.partialorder %v11498_v7, %v1982_v59  ;;  %v2055_v9 = vshra.s32 %v11579_v5, 16 }
 0x916   : > { %v3139_v54 = vmax.f32 %v3075_v13, 0.0  ;;  %v2004_v44 = vsel %vm1996_vm9, %v10356_v19, 64 }
 0x917   : > { %v11585_v41 = vsel %vm1007_vm1, %v2004_v44, 2147483647  ;;  %v11587_v58 = vcvt.s32.f32 %v2055_v9 }
 0x918   : > { %v3186_v25 = vpack.c.bf16 %v3139_v54, %v3138_v47  ;;  %v2070_v51 = vshra.s32 %v11585_v41, 16 }
 0x919   : > { %v1985_v34 = vpop.xlane.xlu2 %1984  ;;  %2058 = vmin.xlane.f32.xlu2 %v11587_v58 }
 0x91a   : > { %vm1997_vm10 = vcmp.eq.f32.partialorder %v11508_v0, %v1985_v34  ;;  %8805 = vmatmul.msk.bf16.gmra.mxu1 %vm1007_vm1, %v3186_v25  ;;  %v11593_v4 = vcvt.s32.f32 %v2070_v51 }
 0x91b   : > { %v2005_v48 = vsel %vm1997_vm10, %v10356_v19, 64  ;;  %v2952_v13 = vpop.f32.mrf.mxu3 }
 0x91c   : > { %v11597_v59 = vsel %vm1007_vm1, %v2005_v48, 2147483647  ;;  %2073 = vmin.xlane.f32.xlu0 %v11593_v4  ;;  %v3076_v34 = vadd.f32 %v2952_v13, %v10647_v43 }
 0x91d   : > { %v2085_v9 = vshra.s32 %v11597_v59, 16 }
 0x91e   : > { %v3140_v18 = vmax.f32 %v3076_v34, 0.0  ;;  %v2009_v34 = vand.u32 65535, %v11541_v53 }
 0x91f   : > { %v11601_v47 = vcvt.s32.f32 %v2085_v9 }
 0x921   : > { %v1988_v54 = vpop.xlane.xlu1 %1987  ;;  %2088 = vmin.xlane.f32.xlu1 %v11601_v47 }
 0x922   : > { %vm1998_vm11 = vcmp.eq.f32.partialorder %v11528_v26, %v1988_v54 }
 0x923   : > { %v2006_v51 = vsel %vm1998_vm11, %v10356_v19, 64  ;;  %v2955_v44 = vpop.f32.mrf.mxu3 }
 0x924   : > { %v11608_v25 = vsel %vm1007_vm1, %v2006_v51, 2147483647  ;;  %v3077_v48 = vadd.f32 %v2955_v44, %v10654_v45 }
 0x925   : > { %v2100_v55 = vshra.s32 %v11608_v25, 16 }
 0x926   : > { %v3141_v9 = vmax.f32 %v3077_v48, 0.0  ;;  %v2024_v48 = vand.u32 65535, %v11551_v33  ;;  %v2039_v33 = vand.u32 65535, %v11568_v46 }
 0x927   : > { %v11612_v38 = vcvt.s32.f32 %v2100_v55 }
 0x928   : > { %v3187_v24 = vpack.c.bf16 %v3141_v9, %v3140_v18  ;;  %v2011_v18 = vcvt.s32.f32 %v2009_v34  ;;  %v2041_v34 = vcvt.s32.f32 %v2039_v33 }
 0x929   : > { %2103 = vmin.xlane.f32.xlu0 %v11612_v38 }
 0x92a   : > { %8806 = vmatmul.msk.bf16.gmra.mxu1 %vm1007_vm1, %v3187_v24 }
 0x92b   : > { %v2958_v13 = vpop.f32.mrf.mxu3 }
 0x92c   : > { %v3078_v54 = vadd.f32 %v2958_v13, %v10666_v62  ;;  %v2026_v13 = vcvt.s32.f32 %v2024_v48 }
 0x92e   : > { %v3142_v63 = vmax.f32 %v3078_v54, 0.0 }
 0x933   : > { %v2961_v27 = vpop.f32.mrf.mxu3 }
 0x934   : > { %v3079_v51 = vadd.f32 %v2961_v27, %v10669_v12 }
 0x936   : > { %v3143_v50 = vmax.f32 %v3079_v51, 0.0 }
 0x938   : > { %v3188_v44 = vpack.c.bf16 %v3143_v50, %v3142_v63 }
 0x93a   : > { %8807 = vmatmul.msk.bf16.gmra.mxu1 %vm1007_vm1, %v3188_v44 }
 0x93b   : > { %v2964_v51 = vpop.f32.mrf.mxu3 }
 0x977   : > { %v11620_v55 = vpop.xlane.xlu0 %2013 }
 0x978   : > { %vm2015_vm0 = vcmp.eq.f32.partialorder %v11545_v52, %v11620_v55 }
 0x979   : > { %v2016_v24 = vsel %vm2015_vm0, %v2011_v18, inf }
 0x97a   : > { %2017 = vmin.xlane.f32.xlu2 %v2016_v24  ;;  %v2069_v24 = vand.u32 65535, %v11585_v41  ;;  %v2084_v41 = vand.u32 65535, %v11597_v59  ;;  %v2099_v59 = vand.u32 65535, %v11608_v25  ;;  %v15228_v25 = vmax.f32 %v11207_v60, %v11439_v31 }
 0x97b   : > { %v15230_v31 = vmov 0.0  }
 0x97f   : > { %v11625_v9 = vpop.xlane.xlu2 %2028  ;;  %v1991_v27 = vpop.xlane.xlu0 %1990 }
 0x980   : > { %vm1999_vm12 = vcmp.eq.f32.partialorder %v11557_v35, %v1991_v27  ;;  %vm2030_vm13 = vcmp.eq.f32.partialorder %v11559_v37, %v11625_v9  ;;  %v2054_v37 = vand.u32 65535, %v11579_v5  ;;  %v3080_v27 = vadd.f32 %v2964_v51, %v10704_v57 }
 0x981   : > { %v2007_v63 = vsel %vm1999_vm12, %v10356_v19, 64  ;;  %v2031_v50 = vsel %vm2030_vm13, %v2026_v13, inf  ;;  %v2035_v60 = vcvt.f32.s32 %v11625_v9 }
 0x982   : > { %2032 = vmin.xlane.f32.xlu1 %v2031_v50  ;;  %v11632_v53 = vsel %vm1007_vm1, %v2007_v63, 2147483647  ;;  %v2056_v46 = vcvt.s32.f32 %v2054_v37  ;;  %v11650_v50 = vpop.f32.mrf.mxu1  ;;  %v3144_v33 = vmax.f32 %v3080_v27, 0.0  ;;  %v15227_v27 = vmax.f32 %v11195_v28, %v11427_v22 }
 0x983   : > { %v2115_v52 = vshra.s32 %v11632_v53, 16  ;;  %15226 = vst [vmem:[#allocation36_spill] sm:$0xff] %v11650_v50 }
 0x985   : > { %v11636_v54 = vcvt.s32.f32 %v2115_v52  ;;  %v2071_v52 = vcvt.s32.f32 %v2069_v24 }
 0x987   : > { %v11638_v44 = vpop.xlane.xlu1 %2043  ;;  %2118 = vmin.xlane.f32.xlu2 %v11636_v54 }
 0x988   : > { %vm2045_vm14 = vcmp.eq.f32.partialorder %v11573_v56, %v11638_v44  ;;  %v2050_v9 = vcvt.f32.s32 %v11638_v44 }
 0x989   : > { %v2046_v18 = vsel %vm2045_vm14, %v2041_v34, inf }
 0x98a   : > { %2047 = vmin.xlane.f32.xlu0 %v2046_v18  ;;  %v2086_v18 = vcvt.s32.f32 %v2084_v41 }
 0x98c   : > { %v11645_v48 = vpop.xlane.xlu2 %2058 }
 0x98d   : > { %vm2060_vm15 = vcmp.eq.f32.partialorder %v11587_v58, %v11645_v48 }
 0x98e   : > { %v2967_v13 = vpop.f32.mrf.mxu3  ;;  %v2061_v63 = vsel %vm2060_vm15, %v2056_v46, inf }
 0x98f   : > { %v3081_v5 = vadd.f32 %v2967_v13, %v10707_v39  ;;  %2062 = vmin.xlane.f32.xlu1 %v2061_v63  ;;  %v11653_v56 = vpop.xlane.xlu0 %2073 }
 0x990   : > { %vm2075_vm2 = vcmp.eq.f32.partialorder %v11593_v4, %v11653_v56 }
 0x991   : > { %v3145_v51 = vmax.f32 %v3081_v5, 0.0  ;;  %v2076_v34 = vsel %vm2075_vm2, %v2071_v52, inf  ;;  %v2101_v5 = vcvt.s32.f32 %v2099_v59 }
 0x992   : > { %2077 = vmin.xlane.f32.xlu2 %v2076_v34 }
 0x993   : > { %v3189_v58 = vpack.c.bf16 %v3145_v51, %v3144_v33 }
 0x994   : > { %v11658_v37 = vpop.xlane.xlu1 %2088 }
 0x995   : > { %8808 = vmatmul.msk.bf16.gmra.mxu1 %vm1007_vm1, %v3189_v58  ;;  %vm2090_vm3 = vcmp.eq.f32.partialorder %v11601_v47, %v11658_v37 }
 0x996   : > { %v2091_v46 = vsel %vm2090_vm3, %v2086_v18, inf  ;;  %v2020_v18 = vcvt.f32.s32 %v11620_v55  ;;  %v2036_v55 = vshll.u32 %v2035_v60, 16 }
 0x997   : > { %v3394_v24 = vpop.f32.mrf.mxu1  ;;  %2092 = vmin.xlane.f32.xlu0 %v2091_v46 }
 0x998   : > { %v3395_v4 = vadd.f32 %v11515_v36, %v3394_v24  ;;  %v2021_v24 = vshll.u32 %v2020_v18, 16  ;;  %v2051_v18 = vshll.u32 %v2050_v9, 16 }
 0x99a   : > { %v11668_v13 = vmax.f32 %v15227_v27, %v3395_v4 }
 0x99c   : > { %v11670_v63 = vpop.xlane.xlu0 %2103 }
 0x99d   : > { %vm2105_vm4 = vcmp.eq.f32.partialorder %v11612_v38, %v11670_v63  ;;  %v15229_v38 = vmax.f32 %v11215_v16, %v11446_v3 }
 0x99e   : > { %v2106_v52 = vsel %vm2105_vm4, %v2101_v5, inf }
 0x99f   : > { %v11674_v47 = vpop.f32.mrf.mxu1  ;;  %2107 = vmin.xlane.f32.xlu2 %v2106_v52  ;;  %v2114_v52 = vand.u32 65535, %v11632_v53 }
 0x9a7   : > { %v3399_v41 = vpop.f32.mrf.mxu1 }
 0x9a8   : > { %v3400_v33 = vadd.f32 %v11515_v36, %v3399_v41 }
 0x9aa   : > { %v11680_v51 = vmax.f32 %v15228_v25, %v3400_v33 }
 0x9af   : > { %v11682_v28 = vpop.f32.mrf.mxu1 }
 0x9b7   : > { %v3404_v22 = vpop.f32.mrf.mxu1 }
 0x9b8   : > { %v3405_v34 = vadd.f32 %v11515_v36, %v3404_v22 }
 0x9ba   : > { %v11688_v58 = vmax.f32 %v15229_v38, %v3405_v34 }
 0x9ed   : > { %v2018_v46 = vpop.xlane.xlu2 %2017 }
 0x9ee   : > { %v2019_v4 = vcvt.f32.s32 %v2018_v46 }
 0x9f0   : > { %v2022_v59 = vadd.s32 %v2021_v24, %v2019_v4  ;;  %v2065_v24 = vcvt.f32.s32 %v11645_v48 }
 0x9f2   : > { %vm2128_vm5 = vcmp.eq.s32.totalorder %v10356_v19, %v2022_v59 }
 0x9f3   : > { %v8693_v27 = vsel %vm2128_vm5, 1.0, %v15230_v31  ;;  %v11695_v5 = vsel %vm2128_vm5, 1e+30, %v11455_v8  ;;  %v2116_v8 = vcvt.s32.f32 %v2114_v52 }
 0x9f4   : > { %8765 = vmatmul.msk.f32.gmra.mxu3 %vm1007_vm1, %v8693_v27  ;;  %v2160_v16 = vsel %vm1007_vm1, %v11695_v5, inf }
 0x9f5   : > { %v2033_v3 = vpop.xlane.xlu1 %2032  ;;  %2161 = vmin.xlane.f32.xlu1 %v2160_v16 }
 0x9f6   : > { %v2034_v41 = vcvt.f32.s32 %v2033_v3 }
 0x9f8   : > { %v2037_v33 = vadd.s32 %v2036_v55, %v2034_v41  ;;  %v2095_v41 = vcvt.f32.s32 %v11658_v37 }
 0x9fa   : > { %v11702_v25 = vpop.xlane.xlu2 %2118  ;;  %vm2129_vm6 = vcmp.eq.s32.totalorder %v10356_v19, %v2037_v33 }
 0x9fb   : > { %v8694_v22 = vsel %vm2129_vm6, 1.0, %v15230_v31  ;;  %v11707_v34 = vsel %vm2129_vm6, 1e+30, %v11467_v23  ;;  %vm2120_vm7 = vcmp.eq.f32.partialorder %v11636_v54, %v11702_v25  ;;  %v2080_v23 = vcvt.f32.s32 %v11653_v56 }
 0x9fc   : > { %8766 = vmatmul.msk.f32.gmra.mxu3 %vm1007_vm1, %v8694_v22  ;;  %v2163_v53 = vsel %vm1007_vm1, %v11707_v34, inf  ;;  %v2121_v38 = vsel %vm2120_vm7, %v2116_v8, inf  ;;  %v2066_v54 = vshll.u32 %v2065_v24, 16  ;;  %v11731_v8 = vpop.f32.mrf.mxu1 }
 0x9fd   : > { %2164 = vmin.xlane.f32.xlu0 %v2163_v53  ;;  %2122 = vmin.xlane.f32.xlu1 %v2121_v38  ;;  %v2048_v44 = vpop.xlane.xlu0 %2047  ;;  %v2081_v52 = vshll.u32 %v2080_v23, 16  ;;  %v2096_v53 = vshll.u32 %v2095_v41, 16 }
 0x9fe   : > { %v2049_v46 = vcvt.f32.s32 %v2048_v44 }
 0xa00   : > { %v2052_v4 = vadd.s32 %v2051_v18, %v2049_v46  ;;  %v2110_v46 = vcvt.f32.s32 %v11670_v63 }
 0xa02   : > { %v2063_v59 = vpop.xlane.xlu1 %2062  ;;  %vm2130_vm8 = vcmp.eq.s32.totalorder %v10356_v19, %v2052_v4 }
 0xa03   : > { %v2064_v60 = vcvt.f32.s32 %v2063_v59  ;;  %v8695_v27 = vsel %vm2130_vm8, 1.0, %v15230_v31  ;;  %v11719_v16 = vsel %vm2130_vm8, 1e+30, %v11479_v11  ;;  %v2111_v59 = vshll.u32 %v2110_v46, 16 }
 0xa04   : > { %8767 = vmatmul.msk.f32.gmra.mxu3 %vm1007_vm1, %v8695_v27  ;;  %v2166_v3 = vsel %vm1007_vm1, %v11719_v16, inf }
 0xa05   : > { %v2067_v55 = vadd.s32 %v2066_v54, %v2064_v60  ;;  %v2078_v48 = vpop.xlane.xlu2 %2077  ;;  %2167 = vmin.xlane.f32.xlu2 %v2166_v3 }
 0xa06   : > { %v2079_v56 = vcvt.f32.s32 %v2078_v48 }
 0xa07   : > { %vm2131_vm9 = vcmp.eq.s32.totalorder %v10356_v19, %v2067_v55 }
 0xa08   : > { %v2082_v33 = vadd.s32 %v2081_v52, %v2079_v56  ;;  %v11727_v9 = vsel %vm2131_vm9, 1e+30, %v11487_v42  ;;  %v8696_v44 = vsel %vm2131_vm9, 1.0, %v15230_v31 }
 0xa09   : > { %v2169_v11 = vsel %vm1007_vm1, %v11727_v9, inf }
 0xa0a   : > { %2170 = vmin.xlane.f32.xlu0 %v2169_v11  ;;  %v2093_v22 = vpop.xlane.xlu0 %2092  ;;  %vm2132_vm10 = vcmp.eq.s32.totalorder %v10356_v19, %v2082_v33  ;;  %v2125_v33 = vcvt.f32.s32 %v11702_v25 }
 0xa0b   : > { %v2094_v38 = vcvt.f32.s32 %v2093_v22  ;;  %v11738_v37 = vsel %vm2132_vm10, 1e+30, %v11498_v7  ;;  %v8697_v63 = vsel %vm2132_vm10, 1.0, %v15230_v31 }
 0xa0c   : > { %8768 = vmatmul.msk.f32.gmra.mxu3 %vm1007_vm1, %v8696_v44  ;;  %v2172_v42 = vsel %vm1007_vm1, %v11738_v37, inf }
 0xa0d   : > { %v2097_v18 = vadd.s32 %v2096_v53, %v2094_v38  ;;  %2173 = vmin.xlane.f32.xlu1 %v2172_v42  ;;  %v2126_v38 = vshll.u32 %v2125_v33, 16 }
 0xa0f   : > { %vm2133_vm11 = vcmp.eq.s32.totalorder %v10356_v19, %v2097_v18 }
 0xa10   : > { %v11748_v24 = vsel %vm2133_vm11, 1e+30, %v11508_v0  ;;  %v15231_v0 = vmax.f32 %v11287_v29, %v11518_v21  ;;  %v8698_v52 = vsel %vm2133_vm11, 1.0, %v15230_v31 }
 0xa11   : > { %v2175_v7 = vsel %vm1007_vm1, %v11748_v24, inf }
 0xa12   : > { %v3409_v4 = vpop.f32.mrf.mxu1  ;;  %v2108_v23 = vpop.xlane.xlu2 %2107  ;;  %2176 = vmin.xlane.f32.xlu2 %v2175_v7 }
 0xa13   : > { %v3410_v54 = vadd.f32 %v11515_v36, %v3409_v4  ;;  %v2109_v60 = vcvt.f32.s32 %v2108_v23 }
 0xa14   : > { %8769 = vmatmul.msk.f32.gmra.mxu3 %vm1007_vm1, %v8697_v63 }
 0xa15   : > { %v11760_v27 = vmax.f32 %v15231_v0, %v3410_v54  ;;  %v2112_v3 = vadd.s32 %v2111_v59, %v2109_v60 }
 0xa17   : > { %vm2134_vm0 = vcmp.eq.s32.totalorder %v10356_v19, %v2112_v3 }
 0xa18   : > { %v11764_v55 = vsel %vm2134_vm0, 1e+30, %v11528_v26  ;;  %v8699_v29 = vsel %vm2134_vm0, 1.0, %v15230_v31 }
 0xa19   : > { %v2178_v48 = vsel %vm1007_vm1, %v11764_v55, inf }
 0xa1a   : > { %2179 = vmin.xlane.f32.xlu1 %v2178_v48 }
 0xa1c   : > { %8770 = vmatmul.msk.f32.gmra.mxu3 %vm1007_vm1, %v8698_v52 }
 0xa24   : > { %8771 = vmatmul.msk.f32.gmra.mxu3 %vm1007_vm1, %v8699_v29 }
 0xa68   : > { %v2162_v21 = vpop.xlane.xlu1 %2161 }
 0xa69   : > { %vm2184_vm12 = vcmp.eq.f32.partialorder %v11695_v5, %v2162_v21 }
 0xa6a   : > { %v2192_v26 = vsel %vm2184_vm12, %v10356_v19, 64 }
 0xa6b   : > { %v11777_v56 = vsel %vm1007_vm1, %v2192_v26, 2147483647 }
 0xa6c   : > { %v2202_v41 = vshra.s32 %v11777_v56, 16 }
 0xa6e   : > { %v11781_v11 = vcvt.s32.f32 %v2202_v41 }
 0xa70   : > { %2205 = vmin.xlane.f32.xlu0 %v11781_v11  ;;  %v2123_v22 = vpop.xlane.xlu1 %2122  ;;  %v2165_v53 = vpop.xlane.xlu0 %2164 }
 0xa71   : > { %v2124_v44 = vcvt.f32.s32 %v2123_v22  ;;  %vm2185_vm13 = vcmp.eq.f32.partialorder %v11707_v34, %v2165_v53 }
 0xa72   : > { %v2193_v42 = vsel %vm2185_vm13, %v10356_v19, 64 }
 0xa73   : > { %v2127_v18 = vadd.s32 %v2126_v38, %v2124_v44  ;;  %v11787_v46 = vsel %vm1007_vm1, %v2193_v42, 2147483647 }
 0xa74   : > { %v2217_v7 = vshra.s32 %v11787_v46, 16 }
 0xa75   : > { %vm2135_vm14 = vcmp.eq.s32.totalorder %v10356_v19, %v2127_v18 }
 0xa76   : > { %v8700_v25 = vsel %vm2135_vm14, 1.0, %v15230_v31  ;;  %v11793_v4 = vsel %vm2135_vm14, 1e+30, %v11557_v35  ;;  %v11795_v23 = vcvt.s32.f32 %v2217_v7 }
 0xa77   : > { %v2970_v59 = vpop.f32.mrf.mxu3  ;;  %8772 = vmatmul.msk.f32.gmra.mxu3 %vm1007_vm1, %v8700_v25  ;;  %v2181_v54 = vsel %vm1007_vm1, %v11793_v4, inf }
 0xa78   : > { %2182 = vmin.xlane.f32.xlu0 %v2181_v54  ;;  %v2168_v60 = vpop.xlane.xlu2 %2167  ;;  %2220 = vmin.xlane.f32.xlu2 %v11795_v23  ;;  %v3082_v48 = vadd.f32 %v2970_v59, %v10601_v15 }
 0xa79   : > { %vm2186_vm15 = vcmp.eq.f32.partialorder %v11719_v16, %v2168_v60 }
 0xa7a   : > { %v2194_v63 = vsel %vm2186_vm15, %v10356_v19, 64  ;;  %v3146_v53 = vmax.f32 %v3082_v48, 0.0 }
 0xa7b   : > { %v11804_v0 = vsel %vm1007_vm1, %v2194_v63, 2147483647 }
 0xa7c   : > { %v2232_v35 = vshra.s32 %v11804_v0, 16 }
 0xa7d   : > { %v2171_v3 = vpop.xlane.xlu0 %2170 }
 0xa7e   : > { %vm2187_vm2 = vcmp.eq.f32.partialorder %v11727_v9, %v2171_v3  ;;  %v11809_v52 = vcvt.s32.f32 %v2232_v35 }
 0xa7f   : > { %v2195_v29 = vsel %vm2187_vm2, %v10356_v19, 64  ;;  %v2973_v21 = vpop.f32.mrf.mxu3 }
 0xa80   : > { %v3083_v26 = vadd.f32 %v2973_v21, %v10612_v10  ;;  %v2174_v41 = vpop.xlane.xlu1 %2173  ;;  %2235 = vmin.xlane.f32.xlu1 %v11809_v52  ;;  %v11815_v33 = vsel %vm1007_vm1, %v2195_v29, 2147483647 }
 0xa81   : > { %vm2188_vm3 = vcmp.eq.f32.partialorder %v11738_v37, %v2174_v41  ;;  %v2247_v22 = vshra.s32 %v11815_v33, 16 }
 0xa82   : > { %v3147_v38 = vmax.f32 %v3083_v26, 0.0  ;;  %v2196_v44 = vsel %vm2188_vm3, %v10356_v19, 64 }
 0xa83   : > { %v11821_v42 = vsel %vm1007_vm1, %v2196_v44, 2147483647  ;;  %v11823_v18 = vcvt.s32.f32 %v2247_v22 }
 0xa84   : > { %v3190_v7 = vpack.c.bf16 %v3147_v38, %v3146_v53  ;;  %v2262_v25 = vshra.s32 %v11821_v42, 16 }
 0xa85   : > { %v2177_v59 = vpop.xlane.xlu2 %2176  ;;  %2250 = vmin.xlane.f32.xlu2 %v11823_v18 }
 0xa86   : > { %vm2189_vm4 = vcmp.eq.f32.partialorder %v11748_v24, %v2177_v59  ;;  %8809 = vmatmul.msk.bf16.gmra.mxu1 %vm1007_vm1, %v3190_v7  ;;  %v11829_v54 = vcvt.s32.f32 %v2262_v25 }
 0xa87   : > { %v2197_v60 = vsel %vm2189_vm4, %v10356_v19, 64  ;;  %v2976_v63 = vpop.f32.mrf.mxu3 }
 0xa88   : > { %v11833_v35 = vsel %vm1007_vm1, %v2197_v60, 2147483647  ;;  %2265 = vmin.xlane.f32.xlu0 %v11829_v54  ;;  %v3084_v21 = vadd.f32 %v2976_v63, %v10647_v43 }
 0xa89   : > { %v2277_v3 = vshra.s32 %v11833_v35, 16 }
 0xa8a   : > { %v3148_v44 = vmax.f32 %v3084_v21, 0.0  ;;  %v2201_v21 = vand.u32 65535, %v11777_v56 }
 0xa8b   : > { %v11837_v48 = vcvt.s32.f32 %v2277_v3 }
 0xa8d   : > { %v2180_v29 = vpop.xlane.xlu1 %2179  ;;  %2280 = vmin.xlane.f32.xlu1 %v11837_v48 }
 0xa8e   : > { %vm2190_vm5 = vcmp.eq.f32.partialorder %v11764_v55, %v2180_v29 }
 0xa8f   : > { %v2198_v26 = vsel %vm2190_vm5, %v10356_v19, 64  ;;  %v2979_v41 = vpop.f32.mrf.mxu3 }
 0xa90   : > { %v11844_v22 = vsel %vm1007_vm1, %v2198_v26, 2147483647  ;;  %v3085_v53 = vadd.f32 %v2979_v41, %v10654_v45 }
 0xa91   : > { %v2292_v38 = vshra.s32 %v11844_v22, 16 }
 0xa92   : > { %v3149_v7 = vmax.f32 %v3085_v53, 0.0 }
 0xa93   : > { %v11848_v25 = vcvt.s32.f32 %v2292_v38  ;;  %v2203_v38 = vcvt.s32.f32 %v2201_v21 }
 0xa94   : > { %v3191_v59 = vpack.c.bf16 %v3149_v7, %v3148_v44  ;;  %v2216_v7 = vand.u32 65535, %v11787_v46  ;;  %v2231_v46 = vand.u32 65535, %v11804_v0 }
 0xa95   : > { %2295 = vmin.xlane.f32.xlu0 %v11848_v25 }
 0xa96   : > { %8810 = vmatmul.msk.bf16.gmra.mxu1 %vm1007_vm1, %v3191_v59  ;;  %v2233_v21 = vcvt.s32.f32 %v2231_v46 }
 0xa97   : > { %v2982_v60 = vpop.f32.mrf.mxu3 }
 0xa98   : > { %v3086_v63 = vadd.f32 %v2982_v60, %v10666_v62 }
 0xa9a   : > { %v3150_v26 = vmax.f32 %v3086_v63, 0.0  ;;  %v2218_v63 = vcvt.s32.f32 %v2216_v7 }
 0xa9f   : > { %v2985_v3 = vpop.f32.mrf.mxu3 }
 0xaa0   : > { %v3087_v29 = vadd.f32 %v2985_v3, %v10669_v12 }
 0xaa2   : > { %v3151_v50 = vmax.f32 %v3087_v29, 0.0 }
 0xaa4   : > { %v3192_v41 = vpack.c.bf16 %v3151_v50, %v3150_v26 }
 0xaa6   : > { %8811 = vmatmul.msk.bf16.gmra.mxu1 %vm1007_vm1, %v3192_v41 }
 0xaa7   : > { %v2988_v26 = vpop.f32.mrf.mxu3 }
 0xae3   : > { %v11856_v53 = vpop.xlane.xlu0 %2205 }
 0xae4   : > { %vm2207_vm6 = vcmp.eq.f32.partialorder %v11781_v11, %v11856_v53 }
 0xae5   : > { %v2208_v44 = vsel %vm2207_vm6, %v2203_v38, inf }
 0xae6   : > { %2209 = vmin.xlane.f32.xlu2 %v2208_v44  ;;  %v2261_v44 = vand.u32 65535, %v11821_v42  ;;  %v2276_v42 = vand.u32 65535, %v11833_v35  ;;  %v2291_v35 = vand.u32 65535, %v11844_v22 }
 0xaeb   : > { %v11861_v59 = vpop.xlane.xlu2 %2220  ;;  %v2183_v60 = vpop.xlane.xlu0 %2182 }
 0xaec   : > { %vm2191_vm7 = vcmp.eq.f32.partialorder %v11793_v4, %v2183_v60  ;;  %vm2222_vm8 = vcmp.eq.f32.partialorder %v11795_v23, %v11861_v59  ;;  %v2246_v23 = vand.u32 65535, %v11815_v33  ;;  %v3088_v60 = vadd.f32 %v2988_v26, %v10704_v57 }
 0xaed   : > { %v2199_v50 = vsel %vm2191_vm7, %v10356_v19, 64  ;;  %v2223_v56 = vsel %vm2222_vm8, %v2218_v63, inf }
 0xaee   : > { %2224 = vmin.xlane.f32.xlu1 %v2223_v56  ;;  %v11868_v3 = vsel %vm1007_vm1, %v2199_v50, 2147483647  ;;  %v2248_v0 = vcvt.s32.f32 %v2246_v23  ;;  %v11886_v56 = vpop.f32.mrf.mxu1  ;;  %v3152_v46 = vmax.f32 %v3088_v60, 0.0 }
 0xaef   : > { %v2307_v11 = vshra.s32 %v11868_v3, 16  ;;  %15232 = vst [vmem:[#allocation37_spill] sm:$0xff] %v11886_v56 }
 0xaf1   : > { %v11872_v29 = vcvt.s32.f32 %v2307_v11  ;;  %v2263_v11 = vcvt.s32.f32 %v2261_v44 }
 0xaf3   : > { %v11874_v41 = vpop.xlane.xlu1 %2235  ;;  %2310 = vmin.xlane.f32.xlu2 %v11872_v29 }
 0xaf4   : > { %vm2237_vm9 = vcmp.eq.f32.partialorder %v11809_v52, %v11874_v41 }
 0xaf5   : > { %v2238_v38 = vsel %vm2237_vm9, %v2233_v21, inf }
 0xaf6   : > { %2239 = vmin.xlane.f32.xlu0 %v2238_v38  ;;  %v2278_v38 = vcvt.s32.f32 %v2276_v42 }
 0xaf8   : > { %v11881_v7 = vpop.xlane.xlu2 %2250 }
 0xaf9   : > { %vm2252_vm10 = vcmp.eq.f32.partialorder %v11823_v18, %v11881_v7 }
 0xafa   : > { %v2991_v63 = vpop.f32.mrf.mxu3  ;;  %v2253_v50 = vsel %vm2252_vm10, %v2248_v0, inf }
 0xafb   : > { %v3089_v33 = vadd.f32 %v2991_v63, %v10707_v39  ;;  %2254 = vmin.xlane.f32.xlu1 %v2253_v50  ;;  %v11889_v52 = vpop.xlane.xlu0 %2265  ;;  %v2293_v50 = vcvt.s32.f32 %v2291_v35 }
 0xafc   : > { %vm2267_vm11 = vcmp.eq.f32.partialorder %v11829_v54, %v11889_v52 }
 0xafd   : > { %v3153_v26 = vmax.f32 %v3089_v33, 0.0  ;;  %v2268_v21 = vsel %vm2267_vm11, %v2263_v11, inf }
 0xafe   : > { %2269 = vmin.xlane.f32.xlu2 %v2268_v21 }
 0xaff   : > { %v3193_v18 = vpack.c.bf16 %v3153_v26, %v3152_v46 }
 0xb00   : > { %v11894_v23 = vpop.xlane.xlu1 %2280 }
 0xb01   : > { %8812 = vmatmul.msk.bf16.gmra.mxu1 %vm1007_vm1, %v3193_v18  ;;  %vm2282_vm0 = vcmp.eq.f32.partialorder %v11837_v48, %v11894_v23  ;;  %v2212_v18 = vcvt.f32.s32 %v11856_v53 }
 0xb02   : > { %v2283_v0 = vsel %vm2282_vm0, %v2278_v38, inf }
 0xb03   : > { %v3414_v44 = vpop.f32.mrf.mxu1  ;;  %2284 = vmin.xlane.f32.xlu0 %v2283_v0  ;;  %v2213_v0 = vshll.u32 %v2212_v18, 16  ;;  %v2306_v18 = vand.u32 65535, %v11868_v3 }
 0xb04   : > { %v11900_v54 = vadd.f32 %v11515_v36, %v3414_v44 }
 0xb08   : > { %v11905_v63 = vpop.xlane.xlu0 %2295 }
 0xb09   : > { %vm2297_vm12 = vcmp.eq.f32.partialorder %v11848_v25, %v11905_v63 }
 0xb0a   : > { %v2298_v33 = vsel %vm2297_vm12, %v2293_v50, inf  ;;  %v2227_v50 = vcvt.f32.s32 %v11861_v59  ;;  %v2242_v59 = vcvt.f32.s32 %v11874_v41 }
 0xb0b   : > { %v11909_v11 = vpop.f32.mrf.mxu1  ;;  %2299 = vmin.xlane.f32.xlu2 %v2298_v33 }
 0xb0c   : > { %v2228_v53 = vshll.u32 %v2227_v50, 16  ;;  %v2243_v50 = vshll.u32 %v2242_v59, 16 }
 0xb13   : > { %v3419_v48 = vpop.f32.mrf.mxu1 }
 0xb14   : > { %v11912_v42 = vadd.f32 %v11515_v36, %v3419_v48 }
 0xb1b   : > { %v11916_v46 = vpop.f32.mrf.mxu1 }
 0xb23   : > { %v3424_v26 = vpop.f32.mrf.mxu1 }
 0xb24   : > { %v11919_v21 = vadd.f32 %v11515_v36, %v3424_v26 }
 0xb59   : > { %v2210_v38 = vpop.xlane.xlu2 %2209 }
 0xb5a   : > { %v2211_v44 = vcvt.f32.s32 %v2210_v38 }
 0xb5c   : > { %v2214_v35 = vadd.s32 %v2213_v0, %v2211_v44 }
 0xb5e   : > { %vm2320_vm13 = vcmp.eq.s32.totalorder %v10356_v19, %v2214_v35 }
 0xb5f   : > { %v8701_v33 = vsel %vm2320_vm13, 1.0, %v15230_v31  ;;  %v11928_v48 = vsel %vm2320_vm13, 1e+30, %v11695_v5  ;;  %v2308_v5 = vcvt.s32.f32 %v2306_v18 }
 0xb60   : > { %8773 = vmatmul.msk.f32.gmra.mxu3 %vm1007_vm1, %v8701_v33  ;;  %v2352_v26 = vsel %vm1007_vm1, %v11928_v48, inf }
 0xb61   : > { %v2225_v25 = vpop.xlane.xlu1 %2224  ;;  %2353 = vmin.xlane.f32.xlu1 %v2352_v26 }
 0xb62   : > { %v2226_v38 = vcvt.f32.s32 %v2225_v25 }
 0xb64   : > { %v2229_v0 = vadd.s32 %v2228_v53, %v2226_v38  ;;  %v2257_v53 = vcvt.f32.s32 %v11881_v7 }
 0xb66   : > { %v11935_v44 = vpop.xlane.xlu2 %2310  ;;  %vm2321_vm14 = vcmp.eq.s32.totalorder %v10356_v19, %v2229_v0 }
 0xb67   : > { %v8702_v35 = vsel %vm2321_vm14, 1.0, %v15230_v31  ;;  %v11940_v33 = vsel %vm2321_vm14, 1e+30, %v11707_v34  ;;  %vm2312_vm15 = vcmp.eq.f32.partialorder %v11872_v29, %v11935_v44  ;;  %v2272_v34 = vcvt.f32.s32 %v11889_v52 }
 0xb68   : > { %8774 = vmatmul.msk.f32.gmra.mxu3 %vm1007_vm1, %v8702_v35  ;;  %v2355_v3 = vsel %vm1007_vm1, %v11940_v33, inf  ;;  %v2313_v25 = vsel %vm2312_vm15, %v2308_v5, inf  ;;  %v2258_v29 = vshll.u32 %v2257_v53, 16 }
 0xb69   : > { %2356 = vmin.xlane.f32.xlu0 %v2355_v3  ;;  %2314 = vmin.xlane.f32.xlu1 %v2313_v25  ;;  %v2240_v41 = vpop.xlane.xlu0 %2239  ;;  %v2273_v3 = vshll.u32 %v2272_v34, 16  ;;  %v2287_v25 = vcvt.f32.s32 %v11894_v23 }
 0xb6a   : > { %v2241_v26 = vcvt.f32.s32 %v2240_v41 }
 0xb6c   : > { %v2244_v18 = vadd.s32 %v2243_v50, %v2241_v26  ;;  %v11964_v26 = vpop.f32.mrf.mxu1 }
 0xb6e   : > { %v2255_v38 = vpop.xlane.xlu1 %2254  ;;  %vm2322_vm2 = vcmp.eq.s32.totalorder %v10356_v19, %v2244_v18  ;;  %v2288_v18 = vshll.u32 %v2287_v25, 16 }
 0xb6f   : > { %v2256_v0 = vcvt.f32.s32 %v2255_v38  ;;  %v8703_v35 = vsel %vm2322_vm2, 1.0, %v15230_v31  ;;  %v11952_v22 = vsel %vm2322_vm2, 1e+30, %v11719_v16 }
 0xb70   : > { %8775 = vmatmul.msk.f32.gmra.mxu3 %vm1007_vm1, %v8703_v35  ;;  %v2358_v59 = vsel %vm1007_vm1, %v11952_v22, inf }
 0xb71   : > { %v2259_v5 = vadd.s32 %v2258_v29, %v2256_v0  ;;  %v2270_v7 = vpop.xlane.xlu2 %2269  ;;  %2359 = vmin.xlane.f32.xlu2 %v2358_v59  ;;  %v2302_v0 = vcvt.f32.s32 %v11905_v63 }
 0xb72   : > { %v2271_v52 = vcvt.f32.s32 %v2270_v7 }
 0xb73   : > { %vm2323_vm3 = vcmp.eq.s32.totalorder %v10356_v19, %v2259_v5  ;;  %v2303_v7 = vshll.u32 %v2302_v0, 16 }
 0xb74   : > { %v2274_v41 = vadd.s32 %v2273_v3, %v2271_v52  ;;  %v11960_v50 = vsel %vm2323_vm3, 1e+30, %v11727_v9  ;;  %v8704_v38 = vsel %vm2323_vm3, 1.0, %v15230_v31 }
 0xb75   : > { %v2361_v16 = vsel %vm1007_vm1, %v11960_v50, inf }
 0xb76   : > { %2362 = vmin.xlane.f32.xlu0 %v2361_v16  ;;  %v2285_v53 = vpop.xlane.xlu0 %2284  ;;  %vm2324_vm4 = vcmp.eq.s32.totalorder %v10356_v19, %v2274_v41 }
 0xb77   : > { %v2286_v34 = vcvt.f32.s32 %v2285_v53  ;;  %v11971_v23 = vsel %vm2324_vm4, 1e+30, %v11738_v37  ;;  %v8705_v63 = vsel %vm2324_vm4, 1.0, %v15230_v31 }
 0xb78   : > { %8776 = vmatmul.msk.f32.gmra.mxu3 %vm1007_vm1, %v8704_v38  ;;  %v2364_v9 = vsel %vm1007_vm1, %v11971_v23, inf }
 0xb79   : > { %v2289_v29 = vadd.s32 %v2288_v18, %v2286_v34  ;;  %2365 = vmin.xlane.f32.xlu1 %v2364_v9  ;;  %v2317_v9 = vcvt.f32.s32 %v11935_v44 }
 0xb7b   : > { %vm2325_vm5 = vcmp.eq.s32.totalorder %v10356_v19, %v2289_v29 }
 0xb7c   : > { %v11981_v35 = vsel %vm2325_vm5, 1e+30, %v11748_v24  ;;  %v8706_v41 = vsel %vm2325_vm5, 1.0, %v15230_v31 }
 0xb7d   : > { %v2367_v37 = vsel %vm1007_vm1, %v11981_v35, inf }
 0xb7e   : > { %v3429_v59 = vpop.f32.mrf.mxu1  ;;  %v2300_v5 = vpop.xlane.xlu2 %2299  ;;  %2368 = vmin.xlane.f32.xlu2 %v2367_v37 }
 0xb7f   : > { %v11986_v3 = vadd.f32 %v11515_v36, %v3429_v59  ;;  %v2301_v52 = vcvt.f32.s32 %v2300_v5  ;;  %v2318_v59 = vshll.u32 %v2317_v9, 16 }
 0xb80   : > { %8777 = vmatmul.msk.f32.gmra.mxu3 %vm1007_vm1, %v8705_v63 }
 0xb81   : > { %v2304_v25 = vadd.s32 %v2303_v7, %v2301_v52 }
 0xb83   : > { %vm2326_vm6 = vcmp.eq.s32.totalorder %v10356_v19, %v2304_v25 }
 0xb84   : > { %v11996_v16 = vsel %vm2326_vm6, 1e+30, %v11764_v55  ;;  %v8707_v53 = vsel %vm2326_vm6, 1.0, %v15230_v31 }
 0xb85   : > { %v2370_v36 = vsel %vm1007_vm1, %v11996_v16, inf }
 0xb86   : > { %2371 = vmin.xlane.f32.xlu1 %v2370_v36 }
 0xb88   : > { %8778 = vmatmul.msk.f32.gmra.mxu3 %vm1007_vm1, %v8706_v41 }
 0xb90   : > { %8779 = vmatmul.msk.f32.gmra.mxu3 %vm1007_vm1, %v8707_v53 }
 0xbd4   : > { %v2354_v18 = vpop.xlane.xlu1 %2353 }
 0xbd5   : > { %vm2376_vm7 = vcmp.eq.f32.partialorder %v11928_v48, %v2354_v18 }
 0xbd6   : > { %v2384_v55 = vsel %vm2376_vm7, %v10356_v19, 64 }
 0xbd7   : > { %v12009_v34 = vsel %vm1007_vm1, %v2384_v55, 2147483647 }
 0xbd8   : > { %v2394_v38 = vshra.s32 %v12009_v34, 16 }
 0xbda   : > { %v12013_v29 = vcvt.s32.f32 %v2394_v38 }
 0xbdc   : > { %2397 = vmin.xlane.f32.xlu0 %v12013_v29  ;;  %v2315_v0 = vpop.xlane.xlu1 %2314  ;;  %v2357_v37 = vpop.xlane.xlu0 %2356 }
 0xbdd   : > { %v2316_v5 = vcvt.f32.s32 %v2315_v0  ;;  %vm2377_vm8 = vcmp.eq.f32.partialorder %v11940_v33, %v2357_v37 }
 0xbde   : > { %v2385_v48 = vsel %vm2377_vm8, %v10356_v19, 64 }
 0xbdf   : > { %v2319_v7 = vadd.s32 %v2318_v59, %v2316_v5  ;;  %v12019_v52 = vsel %vm1007_vm1, %v2385_v48, 2147483647 }
 0xbe0   : > { %v2409_v63 = vshra.s32 %v12019_v52, 16 }
 0xbe1   : > { %vm2327_vm9 = vcmp.eq.s32.totalorder %v10356_v19, %v2319_v7 }
 0xbe2   : > { %v8708_v44 = vsel %vm2327_vm9, 1.0, %v15230_v31  ;;  %v12025_v25 = vsel %vm2327_vm9, 1e+30, %v11793_v4  ;;  %v12027_v36 = vcvt.s32.f32 %v2409_v63 }
 0xbe3   : > { %v2994_v41 = vpop.f32.mrf.mxu3  ;;  %8780 = vmatmul.msk.f32.gmra.mxu3 %vm1007_vm1, %v8708_v44  ;;  %v2373_v33 = vsel %vm1007_vm1, %v12025_v25, inf }
 0xbe4   : > { %2374 = vmin.xlane.f32.xlu0 %v2373_v33  ;;  %v2360_v53 = vpop.xlane.xlu2 %2359  ;;  %2412 = vmin.xlane.f32.xlu2 %v12027_v36  ;;  %v3090_v9 = vadd.f32 %v2994_v41, %v10601_v15 }
 0xbe5   : > { %vm2378_vm10 = vcmp.eq.f32.partialorder %v11952_v22, %v2360_v53 }
 0xbe6   : > { %v2386_v18 = vsel %vm2378_vm10, %v10356_v19, 64  ;;  %v3154_v63 = vmax.f32 %v3090_v9, 0.0 }
 0xbe7   : > { %v12036_v55 = vsel %vm1007_vm1, %v2386_v18, 2147483647 }
 0xbe8   : > { %v2424_v4 = vshra.s32 %v12036_v55, 16 }
 0xbe9   : > { %v2363_v38 = vpop.xlane.xlu0 %2362 }
 0xbea   : > { %vm2379_vm11 = vcmp.eq.f32.partialorder %v11960_v50, %v2363_v38  ;;  %v12041_v0 = vcvt.s32.f32 %v2424_v4 }
 0xbeb   : > { %v2387_v37 = vsel %vm2379_vm11, %v10356_v19, 64  ;;  %v2997_v59 = vpop.f32.mrf.mxu3 }
 0xbec   : > { %v3091_v5 = vadd.f32 %v2997_v59, %v10612_v10  ;;  %v2366_v22 = vpop.xlane.xlu1 %2365  ;;  %2427 = vmin.xlane.f32.xlu1 %v12041_v0  ;;  %v12047_v48 = vsel %vm1007_vm1, %v2387_v37, 2147483647 }
 0xbed   : > { %vm2380_vm0 = vcmp.eq.f32.partialorder %v11971_v23, %v2366_v22  ;;  %v2439_v7 = vshra.s32 %v12047_v48, 16 }
 0xbee   : > { %v3155_v44 = vmax.f32 %v3091_v5, 0.0  ;;  %v2388_v50 = vsel %vm2380_vm0, %v10356_v19, 64 }
 0xbef   : > { %v12053_v41 = vsel %vm1007_vm1, %v2388_v50, 2147483647  ;;  %v12055_v33 = vcvt.s32.f32 %v2439_v7 }
 0xbf0   : > { %v3194_v53 = vpack.c.bf16 %v3155_v44, %v3154_v63  ;;  %v2454_v18 = vshra.s32 %v12053_v41, 16 }
 0xbf1   : > { %v2369_v4 = vpop.xlane.xlu2 %2368  ;;  %2442 = vmin.xlane.f32.xlu2 %v12055_v33 }
 0xbf2   : > { %vm2381_vm12 = vcmp.eq.f32.partialorder %v11981_v35, %v2369_v4  ;;  %8813 = vmatmul.msk.bf16.gmra.mxu1 %vm1007_vm1, %v3194_v53  ;;  %v12061_v23 = vcvt.s32.f32 %v2454_v18 }
 0xbf3   : > { %v2389_v38 = vsel %vm2381_vm12, %v10356_v19, 64  ;;  %v3000_v9 = vpop.f32.mrf.mxu3 }
 0xbf4   : > { %v12065_v37 = vsel %vm1007_vm1, %v2389_v38, 2147483647  ;;  %2457 = vmin.xlane.f32.xlu0 %v12061_v23  ;;  %v3092_v35 = vadd.f32 %v3000_v9, %v10647_v43 }
 0xbf5   : > { %v2469_v59 = vshra.s32 %v12065_v37, 16 }
 0xbf6   : > { %v3156_v18 = vmax.f32 %v3092_v35, 0.0  ;;  %v2393_v35 = vand.u32 65535, %v12009_v34 }
 0xbf7   : > { %v12069_v5 = vcvt.s32.f32 %v2469_v59 }
 0xbf9   : > { %v2372_v22 = vpop.xlane.xlu1 %2371  ;;  %2472 = vmin.xlane.f32.xlu1 %v12069_v5 }
 0xbfa   : > { %vm2382_vm13 = vcmp.eq.f32.partialorder %v11996_v16, %v2372_v22 }
 0xbfb   : > { %v2390_v7 = vsel %vm2382_vm13, %v10356_v19, 64  ;;  %v3003_v63 = vpop.f32.mrf.mxu3 }
 0xbfc   : > { %v12076_v44 = vsel %vm1007_vm1, %v2390_v7, 2147483647  ;;  %v3093_v50 = vadd.f32 %v3003_v63, %v10654_v45 }
 0xbfd   : > { %v2484_v53 = vshra.s32 %v12076_v44, 16 }
 0xbfe   : > { %v3157_v4 = vmax.f32 %v3093_v50, 0.0 }
 0xbff   : > { %v12080_v38 = vcvt.s32.f32 %v2484_v53  ;;  %v2395_v53 = vcvt.s32.f32 %v2393_v35 }
 0xc00   : > { %v3195_v59 = vpack.c.bf16 %v3157_v4, %v3156_v18  ;;  %v2408_v4 = vand.u32 65535, %v12019_v52  ;;  %v2423_v52 = vand.u32 65535, %v12036_v55 }
 0xc01   : > { %2487 = vmin.xlane.f32.xlu0 %v12080_v38 }
 0xc02   : > { %8814 = vmatmul.msk.bf16.gmra.mxu1 %vm1007_vm1, %v3195_v59  ;;  %v2410_v56 = vcvt.s32.f32 %v2408_v4 }
 0xc03   : > { %v3006_v16 = vpop.f32.mrf.mxu3 }
 0xc04   : > { %v3094_v9 = vadd.f32 %v3006_v16, %v10666_v62 }
 0xc06   : > { %v3158_v60 = vmax.f32 %v3094_v9, 0.0 }
 0xc0b   : > { %v3009_v22 = vpop.f32.mrf.mxu3 }
 0xc0c   : > { %v3095_v7 = vadd.f32 %v3009_v22, %v10669_v12 }
 0xc0e   : > { %v3159_v24 = vmax.f32 %v3095_v7, 0.0 }
 0xc10   : > { %v3196_v63 = vpack.c.bf16 %v3159_v24, %v3158_v60 }
 0xc12   : > { %8815 = vmatmul.msk.bf16.gmra.mxu1 %vm1007_vm1, %v3196_v63  ;;  %v2453_v63 = vand.u32 65535, %v12053_v41  ;;  %v2468_v41 = vand.u32 65535, %v12065_v37 }
 0xc13   : > { %v3012_v22 = vpop.f32.mrf.mxu3 }
 0xc4f   : > { %v2398_v50 = vpop.xlane.xlu0 %2397 }
 0xc50   : > { %vm2399_vm14 = vcmp.eq.f32.partialorder %v12013_v29, %v2398_v50 }
 0xc51   : > { %v2400_v18 = vsel %vm2399_vm14, %v2395_v53, inf  ;;  %v3096_v53 = vadd.f32 %v3012_v22, %v10704_v57 }
 0xc52   : > { %2401 = vmin.xlane.f32.xlu2 %v2400_v18 }
 0xc57   : > { %v12090_v59 = vpop.xlane.xlu2 %2412  ;;  %v2375_v16 = vpop.xlane.xlu0 %2374 }
 0xc58   : > { %vm2383_vm15 = vcmp.eq.f32.partialorder %v12025_v25, %v2375_v16  ;;  %vm2414_vm2 = vcmp.eq.f32.partialorder %v12027_v36, %v12090_v59  ;;  %v2425_v25 = vcvt.s32.f32 %v2423_v52  ;;  %v2438_v36 = vand.u32 65535, %v12047_v48 }
 0xc59   : > { %v2391_v60 = vsel %vm2383_vm15, %v10356_v19, 64  ;;  %v2415_v24 = vsel %vm2414_vm2, %v2410_v56, inf }
 0xc5a   : > { %2416 = vmin.xlane.f32.xlu1 %v2415_v24  ;;  %v12097_v34 = vsel %vm1007_vm1, %v2391_v60, 2147483647  ;;  %v2440_v55 = vcvt.s32.f32 %v2438_v36  ;;  %v3160_v60 = vmax.f32 %v3096_v53, 0.0  ;;  %v2483_v36 = vand.u32 65535, %v12076_v44 }
 0xc5b   : > { %v2499_v29 = vshra.s32 %v12097_v34, 16 }
 0xc5c   : > { %v2485_v37 = vcvt.s32.f32 %v2483_v36 }
 0xc5d   : > { %v12101_v9 = vcvt.s32.f32 %v2499_v29 }
 0xc5f   : > { %v12103_v7 = vpop.xlane.xlu1 %2427  ;;  %2502 = vmin.xlane.f32.xlu2 %v12101_v9 }
 0xc60   : > { %vm2429_vm3 = vcmp.eq.f32.partialorder %v12041_v0, %v12103_v7  ;;  %v2455_v0 = vcvt.s32.f32 %v2453_v63  ;;  %v12131_v63 = vpop.f32.mrf.mxu1 }
 0xc61   : > { %v2430_v56 = vsel %vm2429_vm3, %v2425_v25, inf }
 0xc62   : > { %2431 = vmin.xlane.f32.xlu0 %v2430_v56 }
 0xc64   : > { %v12110_v35 = vpop.xlane.xlu2 %2442 }
 0xc65   : > { %vm2444_vm4 = vcmp.eq.f32.partialorder %v12055_v33, %v12110_v35  ;;  %v2470_v33 = vcvt.s32.f32 %v2468_v41  ;;  %v2419_v41 = vcvt.f32.s32 %v12090_v59 }
 0xc66   : > { %v3015_v18 = vpop.f32.mrf.mxu3  ;;  %v2445_v4 = vsel %vm2444_vm4, %v2440_v55, inf }
 0xc67   : > { %v3097_v16 = vadd.f32 %v3015_v18, %v10707_v39  ;;  %2446 = vmin.xlane.f32.xlu1 %v2445_v4  ;;  %v12116_v48 = vpop.xlane.xlu0 %2457  ;;  %v2404_v18 = vcvt.f32.s32 %v2398_v50 }
 0xc68   : > { %vm2459_vm5 = vcmp.eq.f32.partialorder %v12061_v23, %v12116_v48 }
 0xc69   : > { %v3161_v24 = vmax.f32 %v3097_v16, 0.0  ;;  %v2460_v29 = vsel %vm2459_vm5, %v2455_v0, inf  ;;  %v2405_v16 = vshll.u32 %v2404_v18, 16 }
 0xc6a   : > { %2461 = vmin.xlane.f32.xlu2 %v2460_v29  ;;  %v2498_v29 = vand.u32 65535, %v12097_v34 }
 0xc6b   : > { %v3197_v52 = vpack.c.bf16 %v3161_v24, %v3160_v60  ;;  %v2420_v24 = vshll.u32 %v2419_v41, 16 }
 0xc6c   : > { %v12121_v22 = vpop.xlane.xlu1 %2472  ;;  %v2500_v59 = vcvt.s32.f32 %v2498_v29  ;;  %v2464_v29 = vcvt.f32.s32 %v12116_v48  ;;  %v12168_v48 = vld [vmem:[%s15221_s6] ss:$0 sm:$0xff] }
 0xc6d   : > { %8816 = vmatmul.msk.bf16.gmra.mxu1 %vm1007_vm1, %v3197_v52  ;;  %vm2474_vm6 = vcmp.eq.f32.partialorder %v12069_v5, %v12121_v22 }
 0xc6e   : > { %v2475_v25 = vsel %vm2474_vm6, %v2470_v33, inf }
 0xc6f   : > { %2476 = vmin.xlane.f32.xlu0 %v2475_v25  ;;  %v12133_v55 = vpop.f32.mrf.mxu1  ;;  %v2434_v25 = vcvt.f32.s32 %v12103_v7 }
 0xc71   : > { %v2435_v34 = vshll.u32 %v2434_v25, 16 }
 0xc74   : > { %v12127_v23 = vpop.xlane.xlu0 %2487 }
 0xc75   : > { %vm2489_vm7 = vcmp.eq.f32.partialorder %v12080_v38, %v12127_v23 }
 0xc76   : > { %v2490_v56 = vsel %vm2489_vm7, %v2485_v37, inf }
 0xc77   : > { %2491 = vmin.xlane.f32.xlu1 %v2490_v56  ;;  %v12135_v53 = vpop.f32.mrf.mxu1 }
 0xc7f   : > { %v12137_v5 = vpop.f32.mrf.mxu1 }
 0xc87   : > { %v12144_v52 = vpop.f32.mrf.mxu1 }
 0xcc5   : > { %v2402_v4 = vpop.xlane.xlu2 %2401 }
 0xcc6   : > { %v2403_v44 = vcvt.f32.s32 %v2402_v4 }
 0xcc8   : > { %v2406_v0 = vadd.s32 %v2405_v16, %v2403_v44  ;;  %v2449_v16 = vcvt.f32.s32 %v12110_v35  ;;  %v12152_v44 = vpop.f32.mrf.mxu1  ;;  %v2465_v35 = vshll.u32 %v2464_v29, 16 }
 0xcca   : > { %vm2512_vm8 = vcmp.eq.s32.totalorder %v10356_v19, %v2406_v0  ;;  %v2450_v41 = vshll.u32 %v2449_v16, 16 }
 0xccb   : > { %v8709_v38 = vsel %vm2512_vm8, 1.0, %v15230_v31 }
 0xccc   : > { %8781 = vmatmul.msk.f32.gmra.mxu3 %vm1007_vm1, %v8709_v38 }
 0xccd   : > { %v2417_v60 = vpop.xlane.xlu1 %2416 }
 0xcce   : > { %v2418_v50 = vcvt.f32.s32 %v2417_v60 }
 0xcd0   : > { %v2421_v33 = vadd.s32 %v2420_v24, %v2418_v50 }
 0xcd2   : > { %v2503_v36 = vpop.xlane.xlu2 %2502  ;;  %vm2513_vm9 = vcmp.eq.s32.totalorder %v10356_v19, %v2421_v33  ;;  %v12159_v33 = vpop.f32.mrf.mxu1 }
 0xcd3   : > { %v8710_v37 = vsel %vm2513_vm9, 1.0, %v15230_v31  ;;  %vm2504_vm10 = vcmp.eq.f32.partialorder %v12101_v9, %v2503_v36 }
 0xcd4   : > { %8782 = vmatmul.msk.f32.gmra.mxu3 %vm1007_vm1, %v8710_v37  ;;  %v2505_v56 = vsel %vm2504_vm10, %v2500_v59, inf }
 0xcd5   : > { %2506 = vmin.xlane.f32.xlu2 %v2505_v56  ;;  %v2432_v18 = vpop.xlane.xlu0 %2431  ;;  %v2479_v56 = vcvt.f32.s32 %v12121_v22  ;;  %v15233_v22 = vmax.f32 %v11760_v27, %v11986_v3  ;;  %v2509_v27 = vcvt.f32.s32 %v2503_v36 }
 0xcd6   : > { %v2433_v4 = vcvt.f32.s32 %v2432_v18 }
 0xcd8   : > { %v2436_v7 = vadd.s32 %v2435_v34, %v2433_v4  ;;  %v2480_v34 = vshll.u32 %v2479_v56, 16 }
 0xcda   : > { %v2447_v0 = vpop.xlane.xlu1 %2446  ;;  %vm2514_vm11 = vcmp.eq.s32.totalorder %v10356_v19, %v2436_v7 }
 0xcdb   : > { %v2448_v38 = vcvt.f32.s32 %v2447_v0  ;;  %v8711_v60 = vsel %vm2514_vm11, 1.0, %v15230_v31 }
 0xcdc   : > { %8783 = vmatmul.msk.f32.gmra.mxu3 %vm1007_vm1, %v8711_v60  ;;  %v2494_v60 = vcvt.f32.s32 %v12127_v23 }
 0xcdd   : > { %v2451_v9 = vadd.s32 %v2450_v41, %v2448_v38  ;;  %v2462_v24 = vpop.xlane.xlu2 %2461 }
 0xcde   : > { %v2463_v50 = vcvt.f32.s32 %v2462_v24  ;;  %v2495_v24 = vshll.u32 %v2494_v60, 16 }
 0xcdf   : > { %vm2515_vm0 = vcmp.eq.s32.totalorder %v10356_v19, %v2451_v9 }
 0xce0   : > { %v8712_v25 = vsel %vm2515_vm0, 1.0, %v15230_v31  ;;  %v2466_v59 = vadd.s32 %v2465_v35, %v2463_v50 }
 0xce2   : > { %v2477_v37 = vpop.xlane.xlu0 %2476  ;;  %vm2516_vm12 = vcmp.eq.s32.totalorder %v10356_v19, %v2466_v59 }
 0xce3   : > { %v2478_v18 = vcvt.f32.s32 %v2477_v37  ;;  %v8713_v7 = vsel %vm2516_vm12, 1.0, %v15230_v31 }
 0xce4   : > { %8784 = vmatmul.msk.f32.gmra.mxu3 %vm1007_vm1, %v8712_v25  ;;  %v2510_v25 = vshll.u32 %v2509_v27, 16 }
 0xce5   : > { %v2481_v0 = vadd.s32 %v2480_v34, %v2478_v18 }
 0xce7   : > { %vm2517_vm13 = vcmp.eq.s32.totalorder %v10356_v19, %v2481_v0 }
 0xce8   : > { %v8714_v29 = vsel %vm2517_vm13, 1.0, %v15230_v31 }
 0xcea   : > { %v3449_v4 = vpop.f32.mrf.mxu1  ;;  %v2492_v38 = vpop.xlane.xlu1 %2491 }
 0xceb   : > { %v3450_v16 = vadd.f32 %v12168_v48, %v3449_v4  ;;  %v2493_v9 = vcvt.f32.s32 %v2492_v38 }
 0xcec   : > { %8785 = vmatmul.msk.f32.gmra.mxu3 %vm1007_vm1, %v8713_v7 }
 0xced   : > { %v12176_v41 = vmax.f32 %v15233_v22, %v3450_v16  ;;  %v2496_v50 = vadd.s32 %v2495_v24, %v2493_v9 }
 0xcef   : > { %vm2518_vm14 = vcmp.eq.s32.totalorder %v10356_v19, %v2496_v50 }
 0xcf0   : > { %v8715_v35 = vsel %vm2518_vm14, 1.0, %v15230_v31 }
 0xcf4   : > { %8786 = vmatmul.msk.f32.gmra.mxu3 %vm1007_vm1, %v8714_v29 }
 0xcfc   : > { %8787 = vmatmul.msk.f32.gmra.mxu3 %vm1007_vm1, %v8715_v35 }
 0xd48   : > { %v2507_v3 = vpop.xlane.xlu2 %2506 }
 0xd49   : > { %v2508_v59 = vcvt.f32.s32 %v2507_v3 }
 0xd4b   : > { %v2511_v23 = vadd.s32 %v2510_v25, %v2508_v59  ;;  %v3537_v59 = vld [vmem:[#allocation7 + $0x38] sm:$0xff] }
 0xd4d   : > { %vm2519_vm15 = vcmp.eq.s32.totalorder %v10356_v19, %v2511_v23 }
 0xd4e   : > { %v8716_v37 = vsel %vm2519_vm15, 1.0, %v15230_v31 }
 0xd4f   : > { %v3018_v56 = vpop.f32.mrf.mxu3  ;;  %8788 = vmatmul.msk.f32.gmra.mxu3 %vm1007_vm1, %v8716_v37  ;;  %v3535_v37 = vld [vmem:[#allocation7 + $0x28] sm:$0xff] }
 0xd50   : > { %v3098_v18 = vadd.f32 %v3018_v56, %v10601_v15 }
 0xd52   : > { %v3162_v16 = vmax.f32 %v3098_v18, 0.0  ;;  %v3532_v18 = vld [vmem:[#allocation7 + $0x10] sm:$0xff] }
 0xd57   : > { %v3021_v34 = vpop.f32.mrf.mxu3 }
 0xd58   : > { %v3099_v4 = vadd.f32 %v3021_v34, %v10612_v10  ;;  %v3533_v34 = vld [vmem:[#allocation7 + $0x18] sm:$0xff] }
 0xd5a   : > { %v3163_v7 = vmax.f32 %v3099_v4, 0.0  ;;  %v5243_v4 = vpack.c.bf16 %v3533_v34, %v3532_v18  ;;  %v3322_v18 = vadd.f32 %v12168_v48, %v10886_v2  ;;  %v3440_v34 = vadd.f32 %v12168_v48, %v12137_v5 }
 0xd5b   : > { %v3402_v5 = vadd.f32 %v12168_v48, %v11682_v28 }
 0xd5c   : > { %v3198_v0 = vpack.c.bf16 %v3163_v7, %v3162_v16  ;;  %v3531_v16 = vld [vmem:[#allocation7 + $0x8] sm:$0xff] }
 0xd5e   : > { %8817 = vmatmul.msk.bf16.gmra.mxu1 %vm1007_vm1, %v3198_v0 }
 0xd5f   : > { %v3024_v36 = vpop.f32.mrf.mxu3 }
 0xd60   : > { %v3100_v22 = vadd.f32 %v3024_v36, %v10647_v43  ;;  %v3536_v43 = vld [vmem:[#allocation7 + $0x30] sm:$0xff] }
 0xd61   : > { %v5245_v23 = vpack.c.bf16 %v3537_v59, %v3536_v43 }
 0xd62   : > { %v3164_v9 = vmax.f32 %v3100_v22, 0.0  ;;  %v12198_v22 = vpop.f32.mrf.mxu1 }
 0xd63   : > { %5262 = vmatpush.bf16.msrb.mxu0 %v5245_v23 }
 0xd67   : > { %v3027_v38 = vpop.f32.mrf.mxu3 }
 0xd68   : > { %v3101_v60 = vadd.f32 %v3027_v38, %v10654_v45  ;;  %v3534_v45 = vld [vmem:[#allocation7 + $0x20] sm:$0xff] }
 0xd69   : > { %v5244_v56 = vpack.c.bf16 %v3535_v37, %v3534_v45 }
 0xd6a   : > { %v3165_v24 = vmax.f32 %v3101_v60, 0.0 }
 0xd6b   : > { %5263 = vmatpush.bf16.msrb.mxu0 %v5244_v56 }
 0xd6c   : > { %v3199_v29 = vpack.c.bf16 %v3165_v24, %v3164_v9  ;;  %v3337_v24 = vadd.f32 %v12168_v48, %v10956_v40  ;;  %v3397_v40 = vadd.f32 %v12168_v48, %v11674_v47 }
 0xd6e   : > { %8818 = vmatmul.msk.bf16.gmra.mxu1 %vm1007_vm1, %v3199_v29 }
 0xd6f   : > { %v3030_v15 = vpop.f32.mrf.mxu3  ;;  %5264 = vmatpush.bf16.msrb.mxu0 %v5243_v4 }
 0xd70   : > { %v3102_v50 = vadd.f32 %v3030_v15, %v10666_v62  ;;  %v3530_v62 = vld [vmem:[#allocation7] sm:$0xff]  ;;  %v3317_v15 = vadd.f32 %v12168_v48, %v10882_v1  ;;  %v15234_v1 = vmax.f32 %v11668_v13, %v11900_v54 }
 0xd72   : > { %v3166_v27 = vmax.f32 %v3102_v50, 0.0  ;;  %v3357_v50 = vadd.f32 %v12168_v48, %v11201_v17 }
 0xd77   : > { %v3033_v10 = vpop.f32.mrf.mxu3 }
 0xd78   : > { %v3103_v35 = vadd.f32 %v3033_v10, %v10669_v12  ;;  %v5242_v12 = vpack.c.bf16 %v3531_v16, %v3530_v62  ;;  %v3475_v10 = vmax.f32 %v3317_v15, %v3337_v24  ;;  %v3442_v24 = vadd.f32 %v12168_v48, %v12144_v52 }
 0xd79   : > { %v3367_v52 = vadd.f32 %v12168_v48, %v11258_v20 }
 0xd7a   : > { %v3167_v3 = vmax.f32 %v3103_v35, 0.0  ;;  %5265 = vmatpush.bf16.msrb.mxu0 %v5242_v12 }
 0xd7c   : > { %v3200_v25 = vpack.c.bf16 %v3167_v3, %v3166_v27  ;;  %v3483_v27 = vmax.f32 %v3475_v10, %v3357_v50  ;;  %v3327_v10 = vadd.f32 %v12168_v48, %v10896_v6 }
 0xd7e   : > { %8819 = vmatmul.msk.bf16.gmra.mxu1 %vm1007_vm1, %v3200_v25 }
 0xd7f   : > { %v3036_v7 = vpop.f32.mrf.mxu3 }
 0xd80   : > { %v3104_v0 = vadd.f32 %v3036_v7, %v10704_v57  ;;  %v3435_v57 = vadd.f32 %v12168_v48, %v12133_v55  ;;  %v3417_v55 = vadd.f32 %v12168_v48, %v11909_v11  ;;  %v3342_v11 = vadd.f32 %v12168_v48, %v10967_v32 }
 0xd81   : > { %v3382_v32 = vadd.f32 %v12168_v48, %v11443_v14  ;;  %v15235_v7 = vmax.f32 %v11680_v51, %v11912_v42  ;;  %v3422_v14 = vadd.f32 %v12168_v48, %v11916_v46  ;;  %v3347_v46 = vadd.f32 %v12168_v48, %v11019_v30  ;;  %v15236_v30 = vld [vmem:[#allocation35_spill] sm:$0xff] }
 0xd82   : > { %v3168_v60 = vmax.f32 %v3104_v0, 0.0  ;;  %v3514_v3 = vmax.f32 %v15234_v1, %v3435_v57  ;;  %v3477_v16 = vmax.f32 %v3322_v18, %v3342_v11  ;;  %v3387_v1 = vadd.f32 %v12168_v48, %v15236_v30 }
 0xd83   : > { %v3516_v0 = vmax.f32 %v15235_v7, %v3440_v34 }
 0xdd2   : > { %v3039_v36 = vpop.f32.mrf.mxu3 }
 0xdd3   : > { %v3105_v38 = vadd.f32 %v3039_v36, %v10707_v39  ;;  %v3377_v39 = vadd.f32 %v12168_v48, %v11436_v61  ;;  %v3437_v61 = vadd.f32 %v12168_v48, %v12135_v53  ;;  %v3362_v53 = vadd.f32 %v12168_v48, %v11209_v49 }
 0xdd5   : > { %v3169_v9 = vmax.f32 %v3105_v38, 0.0  ;;  %v3491_v25 = vmax.f32 %v3483_v27, %v3377_v39  ;;  %v3485_v12 = vmax.f32 %v3477_v16, %v3362_v53  ;;  %v3445_v39 = vadd.f32 %v12168_v48, %v12152_v44  ;;  %v15238_v53 = vld [vmem:[#allocation33_spill] sm:$0xff] }
 0xdd6   : > { %v3407_v44 = vadd.f32 %v12168_v48, %v11731_v8  ;;  %v3352_v34 = vadd.f32 %v12168_v48, %v15238_v53 }
 0xdd7   : > { %v3201_v29 = vpack.c.bf16 %v3169_v9, %v3168_v60  ;;  %v3499_v59 = vmax.f32 %v3491_v25, %v3397_v40  ;;  %v3493_v38 = vmax.f32 %v3485_v12, %v3382_v32  ;;  %v3479_v40 = vmax.f32 %v3327_v10, %v3347_v46  ;;  %v15240_v32 = vld [vmem:[#allocation34_spill] sm:$0xff]  ;;  %v15241_v12 = vld [vmem:[#allocation36_spill] sm:$0xff] }
 0xdd9   : > { %8820 = vmatmul.msk.bf16.gmra.mxu1 %vm1007_vm1, %v3201_v29  ;;  %v3507_v47 = vmax.f32 %v3499_v59, %v3417_v55  ;;  %v3501_v9 = vmax.f32 %v3493_v38, %v3402_v5  ;;  %v3392_v5 = vadd.f32 %v12168_v48, %v15241_v12  ;;  %v15242_v38 = vld [vmem:[#allocation37_spill] sm:$0xff] }
 0xddb   : > { %v3454_v35 = vpop.f32.mrf.mxu1  ;;  %v3515_v54 = vmax.f32 %v3507_v47, %v3437_v61  ;;  %v3509_v28 = vmax.f32 %v3501_v9, %v3422_v14  ;;  %v3427_v61 = vadd.f32 %v12168_v48, %v11964_v26  ;;  %v3412_v14 = vadd.f32 %v12168_v48, %v15242_v38 }
 0xddc   : > { %v3455_v17 = vadd.f32 %v12168_v48, %v3454_v35 }
 0xddd   : > { %v3517_v42 = vmax.f32 %v3509_v28, %v3442_v24 }
 0xdde   : > { %v12220_v43 = vmax.f32 %v3514_v3, %v3455_v17  ;;  %v3487_v3 = vmax.f32 %v3479_v40, %v3367_v52  ;;  %v15237_v17 = vmax.f32 %v11688_v58, %v11919_v21 }
 0xde0   : > { %v3556_v23 = vmul.f32 %v12220_v43, %v12220_v43  ;;  %v3518_v25 = vmax.f32 %v15237_v17, %v3445_v39  ;;  %v3495_v59 = vmax.f32 %v3487_v3, %v3387_v1  ;;  %v3545_v3 = vld [vmem:[#allocation8 + $0x38] sm:$0xff] }
 0xde2   : > { %v3564_v45 = vsel %vm1007_vm1, %v3556_v23, 0.0  ;;  %v3503_v47 = vmax.f32 %v3495_v59, %v3407_v44  ;;  %v3542_v44 = vld [vmem:[#allocation8 + $0x20] sm:$0xff]  ;;  %v3540_v59 = vld [vmem:[#allocation8 + $0x10] sm:$0xff] }
 0xde3   : > { %v3456_v13 = vpop.f32.mrf.mxu1  ;;  %3565 = vadd.xlane.f32.xlu0 %v3564_v45  ;;  %v3447_v45 = vadd.f32 %v12168_v48, %v12159_v33 }
 0xde4   : > { %v3457_v37 = vadd.f32 %v12168_v48, %v3456_v13  ;;  %v3511_v8 = vmax.f32 %v3503_v47, %v3427_v61  ;;  %v3541_v61 = vld [vmem:[#allocation8 + $0x18] sm:$0xff] }
 0xde5   : > { %v5288_v47 = vpack.c.bf16 %v3541_v61, %v3540_v59 }
 0xde6   : > { %v12230_v56 = vmax.f32 %v3515_v54, %v3457_v37  ;;  %v3519_v21 = vmax.f32 %v3511_v8, %v3447_v45  ;;  %v3539_v45 = vld [vmem:[#allocation8 + $0x8] sm:$0xff] }
 0xde8   : > { %v12240_v4 = vpack.c.bf16 %v12230_v56, %v12220_v43  ;;  %v3557_v62 = vmul.f32 %v12230_v56, %v12230_v56 }
 0xdea   : > { %8901 = vmatmul.msk.bf16.vlgmr.msrb.gmra.mxu0 %vm1007_vm1, %v12240_v4  ;;  %v3567_v2 = vsel %vm1007_vm1, %v3557_v62, 0.0  ;;  %v15239_v62 = vld [vmem:[#allocation32_spill] sm:$0xff] }
 0xdeb   : > { %3568 = vadd.xlane.f32.xlu1 %v3567_v2  ;;  %v3459_v49 = vpop.f32.mrf.mxu1  ;;  %v3332_v16 = vadd.f32 %v12168_v48, %v15239_v62  ;;  %v3372_v2 = vadd.f32 %v12168_v48, %v15240_v32 }
 0xdec   : > { %v3460_v36 = vadd.f32 %v12168_v48, %v3459_v49 }
 0xded   : > { %v3481_v49 = vmax.f32 %v3332_v16, %v3352_v34 }
 0xdee   : > { %v12257_v60 = vmax.f32 %v3516_v0, %v3460_v36 }
 0xdef   : > { %v3489_v36 = vmax.f32 %v3481_v49, %v3372_v2 }
 0xdf0   : > { %v3558_v29 = vmul.f32 %v12257_v60, %v12257_v60 }
 0xdf1   : > { %v3497_v24 = vmax.f32 %v3489_v36, %v3392_v5 }
 0xdf2   : > { %v3570_v15 = vsel %vm1007_vm1, %v3558_v29, 0.0  ;;  %v3432_v29 = vadd.f32 %v12168_v48, %v12131_v63 }
 0xdf3   : > { %v3461_v51 = vpop.f32.mrf.mxu1  ;;  %3571 = vadd.xlane.f32.xlu2 %v3570_v15  ;;  %v3505_v15 = vmax.f32 %v3497_v24, %v3412_v14 }
 0xdf4   : > { %v3462_v50 = vadd.f32 %v12168_v48, %v3461_v51  ;;  %v3452_v51 = vadd.f32 %v12168_v48, %v12198_v22 }
 0xdf6   : > { %v12267_v57 = vmax.f32 %v3517_v42, %v3462_v50  ;;  %v3513_v50 = vmax.f32 %v3505_v15, %v3432_v29 }
 0xdf8   : > { %v12277_v35 = vpack.c.bf16 %v12267_v57, %v12257_v60  ;;  %v3559_v27 = vmul.f32 %v12267_v57, %v12267_v57  ;;  %v3521_v39 = vmax.f32 %v3513_v50, %v3452_v51 }
 0xdfa   : > { %8902 = vmatmul.msk.bf16.gmra.mxu0 %vm1007_vm1, %v12277_v35  ;;  %v3573_v6 = vsel %vm1007_vm1, %v3559_v27, 0.0 }
 0xdfb   : > { %3574 = vadd.xlane.f32.xlu0 %v3573_v6  ;;  %v3464_v20 = vpop.f32.mrf.mxu1 }
 0xdfc   : > { %v3465_v55 = vadd.f32 %v12168_v48, %v3464_v20  ;;  %v3544_v20 = vld [vmem:[#allocation8 + $0x30] sm:$0xff] }
 0xdfd   : > { %v5290_v17 = vpack.c.bf16 %v3545_v3, %v3544_v20 }
 0xdfe   : > { %v12294_v23 = vmax.f32 %v3518_v25, %v3465_v55  ;;  %v3543_v25 = vld [vmem:[#allocation8 + $0x28] sm:$0xff] }
 0xdff   : > { %v5289_v55 = vpack.c.bf16 %v3543_v25, %v3542_v44 }
 0xe00   : > { %v3560_v13 = vmul.f32 %v12294_v23, %v12294_v23 }
 0xe02   : > { %v3576_v54 = vsel %vm1007_vm1, %v3560_v13, 0.0 }
 0xe03   : > { %v3466_v58 = vpop.f32.mrf.mxu1  ;;  %3577 = vadd.xlane.f32.xlu1 %v3576_v54 }
 0xe04   : > { %v3467_v37 = vadd.f32 %v12168_v48, %v3466_v58 }
 0xe06   : > { %v12302_v11 = vmax.f32 %v3519_v21, %v3467_v37 }
 0xe08   : > { %v12306_v26 = vpack.c.bf16 %v12302_v11, %v12294_v23  ;;  %v3561_v33 = vmul.f32 %v12302_v11, %v12302_v11 }
 0xe0a   : > { %8903 = vmatmul.msk.bf16.gmra.mxu0 %vm1007_vm1, %v12306_v26  ;;  %v3579_v18 = vsel %vm1007_vm1, %v3561_v33, 0.0 }
 0xe0b   : > { %3580 = vadd.xlane.f32.xlu2 %v3579_v18 }
 0xe56   : > { %v3469_v7 = vpop.f32.mrf.mxu1  ;;  %v12321_v0 = vpop.xlane.xlu0 %3565 }
 0xe57   : > { %v3470_v9 = vadd.f32 %v12168_v48, %v3469_v7  ;;  %3653 = vxpose.xlu2.b32.start [1/8] (short) (narrow) %v12321_v0, 8 }
 0xe59   : > { %v3528_v28 = vmax.f32 %v12176_v41, %v3470_v9 }
 0xe5b   : > { %v3562_v42 = vmul.f32 %v3528_v28, %v3528_v28 }
 0xe5d   : > { %v3582_v46 = vsel %vm1007_vm1, %v3562_v42, 0.0 }
 0xe5e   : > { %v12333_v10 = vpop.xlane.xlu1 %3568  ;;  %v3471_v52 = vpop.f32.mrf.mxu1  ;;  %3583 = vadd.xlane.f32.xlu0 %v3582_v46 }
 0xe5f   : > { %v3472_v27 = vadd.f32 %v12168_v48, %v3471_v52  ;;  %3654 = vxpose.xlu2.b32.cont [2/8] (short) (narrow) %v12333_v10, 8 }
 0xe61   : > { %v3529_v63 = vmax.f32 %v3521_v39, %v3472_v27 }
 0xe63   : > { %8821 = vmatpush.xpose.msk.msrb.mxu2 %vm1007_vm1, %v3529_v63  ;;  %v5241_v41 = vpack.c.bf16 %v3529_v63, %v3528_v28  ;;  %v3563_v40 = vmul.f32 %v3529_v63, %v3529_v63 }
 0xe65   : > { %8904 = vmatmul.msk.bf16.gmra.mxu0 %vm1007_vm1, %v5241_v41  ;;  %v3585_v22 = vsel %vm1007_vm1, %v3563_v40, 0.0 }
 0xe66   : > { %v12340_v30 = vpop.xlane.xlu2 %3571  ;;  %3586 = vadd.xlane.f32.xlu1 %v3585_v22 }
 0xe67   : > { %8822 = vmatpush.xpose.msk.msrb.mxu2 %vm1007_vm1, %v3528_v28  ;;  %3655 = vxpose.xlu2.b32.cont [3/8] (short) (narrow) %v12340_v30, 8 }
 0xe6b   : > { %8823 = vmatpush.xpose.msk.msrb.mxu2 %vm1007_vm1, %v12302_v11 }
 0xe6e   : > { %v3575_v48 = vpop.xlane.xlu0 %3574 }
 0xe6f   : > { %8824 = vmatpush.xpose.msk.msrb.mxu2 %vm1007_vm1, %v12294_v23  ;;  %3656 = vxpose.xlu2.b32.cont [4/8] (short) (narrow) %v3575_v48, 8 }
 0xe73   : > { %8825 = vmatpush.xpose.msk.msrb.mxu2 %vm1007_vm1, %v12267_v57 }
 0xe76   : > { %v12350_v1 = vpop.xlane.xlu1 %3577 }
 0xe77   : > { %8826 = vmatpush.xpose.msk.msrb.mxu2 %vm1007_vm1, %v12257_v60  ;;  %3657 = vxpose.xlu2.b32.cont [5/8] (short) (narrow) %v12350_v1, 8 }
 0xe7b   : > { %8827 = vmatpush.xpose.msk.msrb.mxu2 %vm1007_vm1, %v12230_v56 }
 0xe7e   : > { %v12357_v6 = vpop.xlane.xlu2 %3580 }
 0xe7f   : > { %8828 = vmatpush.xpose.msk.msrb.mxu2 %vm1007_vm1, %v12220_v43  ;;  %3658 = vxpose.xlu2.b32.cont [6/8] (short) (narrow) %v12357_v6, 8 }
 0xe82   : > { %8829 = vmatmul.msk.f32.vlgmr.msrb.gmra.mxu2 %vm1007_vm1, %v12220_v43  ;;  %v3538_v43 = vld [vmem:[#allocation8] sm:$0xff] }
 0xe83   : > { %5295 = vmatpush.bf16.msra.mxu2 %v5290_v17 }
 0xe87   : > { %5296 = vmatpush.bf16.msra.mxu2 %v5289_v55 }
 0xe8a   : > { %8830 = vmatmul.msk.f32.gmra.mxu2 %vm1007_vm1, %v12230_v56  ;;  %v5287_v56 = vpack.c.bf16 %v3539_v45, %v3538_v43  ;;  %v12447_v43 = vld [vmem:[%s15159_s8] ss:$0 sm:$0xff] }
 0xe8b   : > { %5297 = vmatpush.bf16.msra.mxu2 %v5288_v47 }
 0xe8f   : > { %5298 = vmatpush.bf16.msra.mxu2 %v5287_v56 }
 0xe92   : > { %8831 = vmatmul.msk.f32.gmra.mxu2 %vm1007_vm1, %v12257_v60 }
 0xe9a   : > { %8832 = vmatmul.msk.f32.gmra.mxu2 %vm1007_vm1, %v12267_v57 }
 0xea2   : > { %8833 = vmatmul.msk.f32.gmra.mxu2 %vm1007_vm1, %v12294_v23 }
 0xeaa   : > { %8834 = vmatmul.msk.f32.gmra.mxu2 %vm1007_vm1, %v12302_v11 }
 0xeb2   : > { %8835 = vmatmul.msk.f32.gmra.mxu2 %vm1007_vm1, %v3528_v28 }
 0xeba   : > { %8836 = vmatmul.msk.f32.gmra.mxu2 %vm1007_vm1, %v3529_v63 }
 0xec2   : > { %8905 = vmatmul.msk.bf16.vlgmr.msra.gmra.mxu2 %vm1007_vm1, %v12240_v4  ;;  %v12383_v4 = vpop.f32.mrf.mxu0 }
 0xeca   : > { %v12396_v36 = vpop.f32.mrf.mxu0 }
 0xed1   : > { %v3584_v60 = vpop.xlane.xlu0 %3583 }
 0xed2   : > { %8906 = vmatmul.msk.bf16.gmra.mxu2 %vm1007_vm1, %v12277_v35  ;;  %3659 = vxpose.xlu2.b32.cont [7/8] (short) (narrow) %v3584_v60, 8 }
 0xed9   : > { %v3587_v57 = vpop.xlane.xlu1 %3586 }
 0xeda   : > { %3660 = vxpose.xlu2.b32.end [8/8] (short) (narrow) %v3587_v57, 8 }
 0xee2   : > { %8907 = vmatmul.msk.bf16.gmra.mxu2 %vm1007_vm1, %v12306_v26 }
 0xef2   : > { %8908 = vmatmul.msk.bf16.gmra.mxu2 %vm1007_vm1, %v5241_v41 }
 0xf05   : > { %v3629_v23 = vpop.f32.mrf.mxu2 }
 0xf06   : > { %v3694_v18 = vmul.f32 2.0, %v3629_v23 }
 0xf0d   : > { %v3632_v13 = vpop.f32.mrf.mxu2 }
 0xf0e   : > { %v3695_v53 = vmul.f32 2.0, %v3632_v13 }
 0xf15   : > { %v3635_v8 = vpop.f32.mrf.mxu2 }
 0xf16   : > { %v3696_v5 = vmul.f32 2.0, %v3635_v8 }
 0xf1d   : > { %v3638_v54 = vpop.f32.mrf.mxu2 }
 0xf1e   : > { %v3697_v7 = vmul.f32 2.0, %v3638_v54 }
 0xf25   : > { %v3641_v58 = vpop.f32.mrf.mxu2 }
 0xf26   : > { %v3698_v15 = vmul.f32 2.0, %v3641_v58 }
 0xf2d   : > { %v3644_v21 = vpop.f32.mrf.mxu2 }
 0xf2e   : > { %v3699_v51 = vmul.f32 2.0, %v3644_v21 }
 0xf35   : > { %v3647_v37 = vpop.f32.mrf.mxu2 }
 0xf36   : > { %v3700_v63 = vmul.f32 2.0, %v3647_v37 }
 0xf3b   : > { %v3669_v11 = vpop.trf.xlu2 }
 0xf3c   : > { %v3685_v33 = vperm.slane %v3669_v11, 0 }
 0xf3d   : > { %v3650_v35 = vpop.f32.mrf.mxu2 }
 0xf3e   : > { %v3687_v34 = vadd.f32 %v3685_v33, %v12333_v10  ;;  %v3686_v26 = vadd.f32 %v3685_v33, %v12321_v0  ;;  %v3689_v49 = vadd.f32 %v3685_v33, %v3575_v48  ;;  %v3688_v12 = vadd.f32 %v3685_v33, %v12340_v30  ;;  %v12416_v10 = vpop.f32.mrf.mxu0 }
 0xf3f   : > { %v3691_v29 = vadd.f32 %v3685_v33, %v12357_v6  ;;  %v3690_v28 = vadd.f32 %v3685_v33, %v12350_v1  ;;  %v3692_v27 = vadd.f32 %v3685_v33, %v3584_v60  ;;  %v3693_v30 = vadd.f32 %v3685_v33, %v3587_v57 }
 0xf40   : > { %v12387_v62 = vsub.f32 %v3687_v34, %v3695_v53  ;;  %v12389_v16 = vsub.f32 %v3686_v26, %v3694_v18  ;;  %v12400_v38 = vsub.f32 %v3689_v49, %v3697_v7  ;;  %v12402_v14 = vsub.f32 %v3688_v12, %v3696_v5 }
 0xf41   : > { %v12412_v50 = vsub.f32 %v3691_v29, %v3699_v51  ;;  %v12414_v46 = vsub.f32 %v3690_v28, %v3698_v15  ;;  %v12424_v40 = vsub.f32 %v3692_v27, %v3700_v63  ;;  %v3701_v48 = vmul.f32 2.0, %v3650_v35 }
 0xf42   : > { %v3713_v32 = vsel %vm1007_vm1, %v12387_v62, inf  ;;  %v3710_v2 = vsel %vm1007_vm1, %v12389_v16, inf  ;;  %v3719_v9 = vsel %vm1007_vm1, %v12400_v38, inf  ;;  %v3716_v24 = vsel %vm1007_vm1, %v12402_v14, inf }
 0xf43   : > { %3714 = vmin.xlane.f32.xlu1 %v3713_v32  ;;  %3711 = vmin.xlane.f32.xlu0 %v3710_v2  ;;  %v3725_v52 = vsel %vm1007_vm1, %v12412_v50, inf  ;;  %v3722_v39 = vsel %vm1007_vm1, %v12414_v46, inf  ;;  %v3728_v1 = vsel %vm1007_vm1, %v12424_v40, inf  ;;  %v12432_v20 = vsub.f32 %v3693_v30, %v3701_v48 }
 0xf45   : > { %v12398_v0 = vpop.f32.mrf.mxu2  ;;  %v3731_v3 = vsel %vm1007_vm1, %v12432_v20, inf }
 0xf46   : > { %v12426_v22 = vpop.f32.mrf.mxu0 }
 0xf4b   : > { %3720 = vmin.xlane.f32.xlu1 %v3719_v9  ;;  %3717 = vmin.xlane.f32.xlu0 %v3716_v24 }
 0xf4d   : > { %v12410_v42 = vpop.f32.mrf.mxu2 }
 0xf4e   : > { %v12436_v44 = vpop.f32.mrf.mxu0 }
 0xf53   : > { %3726 = vmin.xlane.f32.xlu1 %v3725_v52  ;;  %3723 = vmin.xlane.f32.xlu0 %v3722_v39 }
 0xf55   : > { %v12422_v41 = vpop.f32.mrf.mxu2 }
 0xf56   : > { %v12440_v25 = vpop.f32.mrf.mxu0 }
 0xf5b   : > { %3729 = vmin.xlane.f32.xlu1 %v3728_v1 }
 0xf5d   : > { %v12430_v6 = vpop.f32.mrf.mxu2 }
 0xf5e   : > { %v5282_v59 = vpop.f32.mrf.mxu0 }
 0xf63   : > { %3732 = vmin.xlane.f32.xlu1 %v3731_v3 }
 0xf65   : > { %v12438_v17 = vpop.f32.mrf.mxu2 }
 0xf6d   : > { %v12442_v55 = vpop.f32.mrf.mxu2 }
 0xf75   : > { %v5315_v61 = vpop.f32.mrf.mxu2 }
 0xf76   : > { %v5326_v47 = vsub.f32 %v5282_v59, %v5315_v61 }
 0xf78   : > { %v12450_v45 = vadd.f32 %v12447_v43, %v5326_v47 }
 0xf7d   : > { %v12452_v56 = vpop.f32.mrf.mxu2 }
 0xf7e   : > { %5539 = vmatpush.msra.mxu0 %v12452_v56 }
 0xf80   : > { %5540 = vmatpush.msra.mxu0 %v5315_v61 }
 0xf82   : > { %5541 = vmatpush.msra.mxu0 %v12442_v55 }
 0xf84   : > { %5542 = vmatpush.msra.mxu0 %v12438_v17 }
 0xf86   : > { %5543 = vmatpush.msra.mxu0 %v12430_v6 }
 0xf88   : > { %5544 = vmatpush.msra.mxu0 %v12422_v41 }
 0xf8a   : > { %5545 = vmatpush.msra.mxu0 %v12410_v42 }
 0xf8c   : > { %5546 = vmatpush.msra.mxu0 %v12398_v0 }
 0xfb6   : > { %v3715_v60 = vpop.xlane.xlu1 %3714  ;;  %v3712_v57 = vpop.xlane.xlu0 %3711 }
 0xfb7   : > { %vm3735_vm2 = vcmp.eq.f32.partialorder %v12387_v62, %v3715_v60  ;;  %vm3734_vm3 = vcmp.eq.f32.partialorder %v12389_v16, %v3712_v57 }
 0xfb8   : > { %v3742_v23 = vsel %vm3734_vm3, %v10356_v19, 64  ;;  %v3743_v8 = vsel %vm3735_vm2, %v10356_v19, 64 }
 0xfb9   : > { %v3750_v13 = vsel %vm1007_vm1, %v3742_v23, 2147483647  ;;  %v3765_v21 = vsel %vm1007_vm1, %v3743_v8, 2147483647 }
 0xfba   : > { %v3752_v54 = vshra.s32 %v3750_v13, 16  ;;  %v3767_v35 = vshra.s32 %v3765_v21, 16  ;;  %v3751_v57 = vand.u32 65535, %v3750_v13 }
 0xfbc   : > { %v3754_v58 = vcvt.s32.f32 %v3752_v54  ;;  %v3769_v32 = vcvt.s32.f32 %v3767_v35  ;;  %v3753_v8 = vcvt.s32.f32 %v3751_v57 }
 0xfbe   : > { %v3721_v37 = vpop.xlane.xlu1 %3720  ;;  %3755 = vmin.xlane.f32.xlu0 %v3754_v58  ;;  %v3718_v11 = vpop.xlane.xlu0 %3717 }
 0xfbf   : > { %vm3737_vm4 = vcmp.eq.f32.partialorder %v12400_v38, %v3721_v37  ;;  %vm3736_vm5 = vcmp.eq.f32.partialorder %v12402_v14, %v3718_v11  ;;  %v3766_v11 = vand.u32 65535, %v3765_v21 }
 0xfc0   : > { %v3745_v33 = vsel %vm3737_vm4, %v10356_v19, 64  ;;  %v3744_v53 = vsel %vm3736_vm5, %v10356_v19, 64 }
 0xfc1   : > { %v3795_v18 = vsel %vm1007_vm1, %v3745_v33, 2147483647  ;;  %v3780_v2 = vsel %vm1007_vm1, %v3744_v53, 2147483647 }
 0xfc2   : > { %v3797_v34 = vshra.s32 %v3795_v18, 16  ;;  %v3782_v7 = vshra.s32 %v3780_v2, 16  ;;  %v3796_v37 = vand.u32 65535, %v3795_v18 }
 0xfc4   : > { %v3799_v26 = vcvt.s32.f32 %v3797_v34  ;;  %v3784_v15 = vcvt.s32.f32 %v3782_v7  ;;  %v3798_v53 = vcvt.s32.f32 %v3796_v37  ;;  %v3768_v34 = vcvt.s32.f32 %v3766_v11 }
 0xfc5   : > { %v3781_v7 = vand.u32 65535, %v3780_v2 }
 0xfc6   : > { %3800 = vmin.xlane.f32.xlu1 %v3799_v26  ;;  %v3727_v49 = vpop.xlane.xlu1 %3726  ;;  %3770 = vmin.xlane.f32.xlu0 %v3769_v32  ;;  %v3724_v12 = vpop.xlane.xlu0 %3723 }
 0xfc7   : > { %vm3739_vm6 = vcmp.eq.f32.partialorder %v12412_v50, %v3727_v49  ;;  %vm3738_vm7 = vcmp.eq.f32.partialorder %v12414_v46, %v3724_v12 }
 0xfc8   : > { %v3747_v5 = vsel %vm3739_vm6, %v10356_v19, 64  ;;  %v3746_v24 = vsel %vm3738_vm7, %v10356_v19, 64 }
 0xfc9   : > { %v3825_v9 = vsel %vm1007_vm1, %v3747_v5, 2147483647  ;;  %v3810_v51 = vsel %vm1007_vm1, %v3746_v24, 2147483647 }
 0xfca   : > { %v3827_v29 = vshra.s32 %v3825_v9, 16  ;;  %v3812_v27 = vshra.s32 %v3810_v51, 16  ;;  %v3826_v5 = vand.u32 65535, %v3825_v9 }
 0xfcc   : > { %v3829_v28 = vcvt.s32.f32 %v3827_v29  ;;  %v3814_v1 = vcvt.s32.f32 %v3812_v27  ;;  %v3783_v29 = vcvt.s32.f32 %v3781_v7 }
 0xfce   : > { %3830 = vmin.xlane.f32.xlu1 %v3829_v28  ;;  %v3730_v52 = vpop.xlane.xlu1 %3729  ;;  %3785 = vmin.xlane.f32.xlu0 %v3784_v15 }
 0xfcf   : > { %vm3740_vm8 = vcmp.eq.f32.partialorder %v12424_v40, %v3730_v52 }
 0xfd0   : > { %v3748_v39 = vsel %vm3740_vm8, %v10356_v19, 64 }
 0xfd1   : > { %v3840_v63 = vsel %vm1007_vm1, %v3748_v39, 2147483647 }
 0xfd2   : > { %v3842_v30 = vshra.s32 %v3840_v63, 16 }
 0xfd4   : > { %v3844_v48 = vcvt.s32.f32 %v3842_v30 }
 0xfd6   : > { %3845 = vmin.xlane.f32.xlu1 %v3844_v48  ;;  %v3733_v3 = vpop.xlane.xlu1 %3732  ;;  %3815 = vmin.xlane.f32.xlu0 %v3814_v1 }
 0xfd7   : > { %vm3741_vm9 = vcmp.eq.f32.partialorder %v12432_v20, %v3733_v3 }
 0xfd8   : > { %v3749_v59 = vsel %vm3741_vm9, %v10356_v19, 64 }
 0xfd9   : > { %v12485_v61 = vsel %vm1007_vm1, %v3749_v59, 2147483647 }
 0xfda   : > { %v3857_v47 = vshra.s32 %v12485_v61, 16 }
 0xfdc   : > { %v12488_v60 = vcvt.s32.f32 %v3857_v47 }
 0xfde   : > { %3860 = vmin.xlane.f32.xlu1 %v12488_v60 }
0x1031   : > { %v3756_v23 = vpop.xlane.xlu0 %3755 }
0x1032   : > { %vm3757_vm10 = vcmp.eq.f32.partialorder %v3754_v58, %v3756_v23  ;;  %v3828_v58 = vcvt.s32.f32 %v3826_v5 }
0x1033   : > { %v3758_v54 = vsel %vm3757_vm10, %v3753_v8, inf }
0x1034   : > { %3759 = vmin.xlane.f32.xlu0 %v3758_v54 }
0x1039   : > { %v3801_v33 = vpop.xlane.xlu1 %3800  ;;  %v3771_v35 = vpop.xlane.xlu0 %3770 }
0x103a   : > { %vm3802_vm11 = vcmp.eq.f32.partialorder %v3799_v26, %v3801_v33  ;;  %vm3772_vm0 = vcmp.eq.f32.partialorder %v3769_v32, %v3771_v35  ;;  %v3841_v26 = vand.u32 65535, %v3840_v63  ;;  %v3811_v32 = vand.u32 65535, %v3810_v51 }
0x103b   : > { %v3803_v49 = vsel %vm3802_vm11, %v3798_v53, inf  ;;  %v3773_v12 = vsel %vm3772_vm0, %v3768_v34, inf  ;;  %v3777_v47 = vcvt.f32.s32 %v3771_v35  ;;  %v3856_v35 = vand.u32 65535, %v12485_v61 }
0x103c   : > { %3804 = vmin.xlane.f32.xlu1 %v3803_v49  ;;  %3774 = vmin.xlane.f32.xlu0 %v3773_v12  ;;  %v3843_v9 = vcvt.s32.f32 %v3841_v26  ;;  %v3813_v2 = vcvt.s32.f32 %v3811_v32 }
0x103d   : > { %v3778_v37 = vshll.u32 %v3777_v47, 16  ;;  %v3858_v12 = vcvt.s32.f32 %v3856_v35 }
0x1041   : > { %v12491_v13 = vpop.xlane.xlu1 %3830  ;;  %v3786_v24 = vpop.xlane.xlu0 %3785 }
0x1042   : > { %vm3832_vm12 = vcmp.eq.f32.partialorder %v3829_v28, %v12491_v13  ;;  %vm3787_vm13 = vcmp.eq.f32.partialorder %v3784_v15, %v3786_v24  ;;  %v3762_v28 = vcvt.f32.s32 %v3756_v23 }
0x1043   : > { %v3833_v21 = vsel %vm3832_vm12, %v3828_v58, inf  ;;  %v3788_v18 = vsel %vm3787_vm13, %v3783_v29, inf  ;;  %v3837_v58 = vcvt.f32.s32 %v12491_v13 }
0x1044   : > { %3834 = vmin.xlane.f32.xlu1 %v3833_v21  ;;  %3789 = vmin.xlane.f32.xlu0 %v3788_v18  ;;  %v3763_v63 = vshll.u32 %v3762_v28, 16 }
0x1045   : > { %v3838_v32 = vshll.u32 %v3837_v58, 16  ;;  %v3550_v58 = vld [vmem:[#allocation10 + $0x18] sm:$0xff] }
0x1049   : > { %v12494_v52 = vpop.xlane.xlu1 %3845  ;;  %v12496_v39 = vpop.xlane.xlu0 %3815 }
0x104a   : > { %vm3847_vm14 = vcmp.eq.f32.partialorder %v3844_v48, %v12494_v52  ;;  %vm3817_vm15 = vcmp.eq.f32.partialorder %v3814_v1, %v12496_v39  ;;  %v3807_v1 = vcvt.f32.s32 %v3801_v33  ;;  %v3852_v28 = vcvt.f32.s32 %v12494_v52 }
0x104b   : > { %v3848_v27 = vsel %vm3847_vm14, %v3843_v9, inf  ;;  %v3818_v30 = vsel %vm3817_vm15, %v3813_v2, inf  ;;  %v3822_v9 = vcvt.f32.s32 %v12496_v39 }
0x104c   : > { %3849 = vmin.xlane.f32.xlu1 %v3848_v27  ;;  %3819 = vmin.xlane.f32.xlu0 %v3818_v30  ;;  %v3808_v34 = vshll.u32 %v3807_v1, 16 }
0x1051   : > { %v12500_v15 = vpop.xlane.xlu1 %3860 }
0x1052   : > { %vm3862_vm3 = vcmp.eq.f32.partialorder %v12488_v60, %v12500_v15 }
0x1053   : > { %v3863_v61 = vsel %vm3862_vm3, %v3858_v12, inf }
0x10a7   : > { %v3760_v3 = vpop.xlane.xlu0 %3759 }
0x10a8   : > { %v3761_v51 = vcvt.f32.s32 %v3760_v3 }
0x10aa   : > { %v3764_v59 = vadd.s32 %v3763_v63, %v3761_v51  ;;  %v3823_v51 = vshll.u32 %v3822_v9, 16  ;;  %v3867_v9 = vcvt.f32.s32 %v12500_v15 }
0x10ac   : > { %vm3870_vm2 = vcmp.eq.s32.totalorder %v10356_v19, %v3764_v59 }
0x10ad   : > { %v8837_v57 = vsel %vm3870_vm2, 1.0, %v15230_v31  ;;  %v12505_v48 = vsel %vm3870_vm2, 1e+30, %v12389_v16  ;;  %v3792_v16 = vcvt.f32.s32 %v3786_v24 }
0x10ae   : > { %8909 = vmatmul.msk.f32.vlgmr.msra.gmra.mxu0 %vm1007_vm1, %v8837_v57  ;;  %v3902_v23 = vsel %vm1007_vm1, %v12505_v48, inf }
0x10af   : > { %v3805_v8 = vpop.xlane.xlu1 %3804  ;;  %3903 = vmin.xlane.f32.xlu0 %v3902_v23  ;;  %v3775_v54 = vpop.xlane.xlu0 %3774  ;;  %v3793_v24 = vshll.u32 %v3792_v16, 16  ;;  %v3551_v16 = vld [vmem:[#allocation10 + $0x20] sm:$0xff] }
0x10b0   : > { %v3806_v11 = vcvt.f32.s32 %v3805_v8  ;;  %v3776_v53 = vcvt.f32.s32 %v3775_v54 }
0x10b2   : > { %v3779_v49 = vadd.s32 %v3778_v37, %v3776_v53  ;;  %v3809_v33 = vadd.s32 %v3808_v34, %v3806_v11  ;;  %v3554_v34 = vld [vmem:[#allocation10 + $0x38] sm:$0xff] }
0x10b4   : > { %vm3871_vm4 = vcmp.eq.s32.totalorder %v10356_v19, %v3779_v49  ;;  %vm3873_vm5 = vcmp.eq.s32.totalorder %v10356_v19, %v3809_v33  ;;  %v3552_v33 = vld [vmem:[#allocation10 + $0x28] sm:$0xff] }
0x10b5   : > { %v8838_v5 = vsel %vm3871_vm4, 1.0, %v15230_v31  ;;  %v12516_v7 = vsel %vm3871_vm4, 1e+30, %v12387_v62  ;;  %v12526_v13 = vsel %vm3873_vm5, 1e+30, %v12400_v38  ;;  %v8840_v23 = vsel %vm3873_vm5, 1.0, %v15230_v31 }
0x10b6   : > { %8910 = vmatmul.msk.f32.gmra.mxu0 %vm1007_vm1, %v8838_v5  ;;  %v3905_v29 = vsel %vm1007_vm1, %v12516_v7, inf  ;;  %v3911_v3 = vsel %vm1007_vm1, %v12526_v13, inf  ;;  %v5902_v12 = vpack.c.bf16 %v3552_v33, %v3551_v16  ;;  %v3549_v5 = vld [vmem:[#allocation10 + $0x10] sm:$0xff] }
0x10b7   : > { %v3835_v21 = vpop.xlane.xlu1 %3834  ;;  %3864 = vmin.xlane.f32.xlu0 %v3863_v61  ;;  %3906 = vmin.xlane.f32.xlu2 %v3905_v29  ;;  %v3790_v60 = vpop.xlane.xlu0 %3789  ;;  %v5901_v61 = vpack.c.bf16 %v3550_v58, %v3549_v5  ;;  %v3547_v29 = vld [vmem:[#allocation10] sm:$0xff] }
0x10b8   : > { %v3836_v18 = vcvt.f32.s32 %v3835_v21  ;;  %v3791_v26 = vcvt.f32.s32 %v3790_v60  ;;  %v3548_v21 = vld [vmem:[#allocation10 + $0x8] sm:$0xff] }
0x10b9   : > { %v5900_v60 = vpack.c.bf16 %v3548_v21, %v3547_v29 }
0x10ba   : > { %v3794_v62 = vadd.s32 %v3793_v24, %v3791_v26  ;;  %v3839_v2 = vadd.s32 %v3838_v32, %v3836_v18  ;;  %v12572_v18 = vpop.f32.mrf.mxu0 }
0x10bc   : > { %vm3872_vm6 = vcmp.eq.s32.totalorder %v10356_v19, %v3794_v62  ;;  %vm3875_vm7 = vcmp.eq.s32.totalorder %v10356_v19, %v3839_v2 }
0x10bd   : > { %v8839_v27 = vsel %vm3872_vm6, 1.0, %v15230_v31  ;;  %v12532_v30 = vsel %vm3872_vm6, 1e+30, %v12402_v14  ;;  %v3853_v14 = vshll.u32 %v3852_v28, 16  ;;  %v12544_v52 = vsel %vm3875_vm7, 1e+30, %v12412_v50 }
0x10be   : > { %8911 = vmatmul.msk.f32.gmra.mxu0 %vm1007_vm1, %v8839_v27  ;;  %v3908_v38 = vsel %vm1007_vm1, %v12532_v30, inf  ;;  %v3917_v54 = vsel %vm1007_vm1, %v12544_v52, inf  ;;  %v8842_v53 = vsel %vm3875_vm7, 1.0, %v15230_v31 }
0x10bf   : > { %v3850_v63 = vpop.xlane.xlu1 %3849  ;;  %3912 = vmin.xlane.f32.xlu0 %v3911_v3  ;;  %3909 = vmin.xlane.f32.xlu1 %v3908_v38  ;;  %v3820_v39 = vpop.xlane.xlu0 %3819  ;;  %v3868_v3 = vshll.u32 %v3867_v9, 16 }
0x10c0   : > { %v3851_v59 = vcvt.f32.s32 %v3850_v63  ;;  %v3821_v47 = vcvt.f32.s32 %v3820_v39  ;;  %v5320_v39 = vsub.f32 %v12383_v4, %v12398_v0 }
0x10c2   : > { %v3824_v57 = vadd.s32 %v3823_v51, %v3821_v47  ;;  %v3854_v1 = vadd.s32 %v3853_v14, %v3851_v59  ;;  %v5321_v47 = vsub.f32 %v12396_v36, %v12410_v42 }
0x10c4   : > { %vm3874_vm8 = vcmp.eq.s32.totalorder %v10356_v19, %v3824_v57  ;;  %vm3876_vm9 = vcmp.eq.s32.totalorder %v10356_v19, %v3854_v1  ;;  %v12596_v57 = vadd.f32 %v12447_v43, %v5320_v39  ;;  %v12608_v36 = vadd.f32 %v12447_v43, %v5321_v47 }
0x10c5   : > { %v12551_v8 = vsel %vm3874_vm8, 1e+30, %v12414_v46  ;;  %v12560_v50 = vsel %vm3876_vm9, 1e+30, %v12424_v40  ;;  %v8841_v11 = vsel %vm3874_vm8, 1.0, %v15230_v31  ;;  %v8843_v35 = vsel %vm3876_vm9, 1.0, %v15230_v31 }
0x10c6   : > { %8912 = vmatmul.msk.f32.gmra.mxu0 %vm1007_vm1, %v8840_v23  ;;  %v3914_v37 = vsel %vm1007_vm1, %v12551_v8, inf  ;;  %v3920_v46 = vsel %vm1007_vm1, %v12560_v50, inf  ;;  %v3553_v40 = vld [vmem:[#allocation10 + $0x30] sm:$0xff] }
0x10c7   : > { %3918 = vmin.xlane.f32.xlu0 %v3917_v54  ;;  %3915 = vmin.xlane.f32.xlu1 %v3914_v37  ;;  %v5903_v49 = vpack.c.bf16 %v3554_v34, %v3553_v40 }
0x10c9   : > { %6007 = vmatpush.bf16.msrb.mxu2 %v5903_v49 }
0x10cd   : > { %6008 = vmatpush.bf16.msrb.mxu2 %v5902_v12 }
0x10ce   : > { %8913 = vmatmul.msk.f32.gmra.mxu0 %vm1007_vm1, %v8841_v11 }
0x10cf   : > { %3921 = vmin.xlane.f32.xlu0 %v3920_v46 }
0x10d1   : > { %6009 = vmatpush.bf16.msrb.mxu2 %v5901_v61 }
0x10d5   : > { %6010 = vmatpush.bf16.msrb.mxu2 %v5900_v60  ;;  %v5322_v60 = vsub.f32 %v12416_v10, %v12422_v41 }
0x10d6   : > { %8914 = vmatmul.msk.f32.gmra.mxu0 %vm1007_vm1, %v8842_v53 }
0x10de   : > { %8915 = vmatmul.msk.f32.gmra.mxu0 %vm1007_vm1, %v8843_v35 }
0x1122   : > { %v3904_v24 = vpop.xlane.xlu0 %3903 }
0x1123   : > { %vm3926_vm10 = vcmp.eq.f32.partialorder %v12505_v48, %v3904_v24 }
0x1124   : > { %v3934_v26 = vsel %vm3926_vm10, %v10356_v19, 64 }
0x1125   : > { %v12577_v32 = vsel %vm1007_vm1, %v3934_v26, 2147483647 }
0x1126   : > { %v3944_v62 = vshra.s32 %v12577_v32, 16 }
0x1128   : > { %v12581_v2 = vcvt.s32.f32 %v3944_v62 }
0x112a   : > { %v3907_v27 = vpop.xlane.xlu2 %3906  ;;  %3947 = vmin.xlane.f32.xlu1 %v12581_v2  ;;  %v3865_v28 = vpop.xlane.xlu0 %3864 }
0x112b   : > { %vm3927_vm11 = vcmp.eq.f32.partialorder %v12516_v7, %v3907_v27  ;;  %v3866_v38 = vcvt.f32.s32 %v3865_v28  ;;  %v5548_v63 = vpop.f32.mrf.mxu0  ;;  %v5323_v27 = vsub.f32 %v12426_v22, %v12430_v6 }
0x112c   : > { %v3935_v51 = vsel %vm3927_vm11, %v10356_v19, 64  ;;  %v5740_v42 = vadd.f32 %v5548_v63, %v12596_v57 }
0x112d   : > { %v12589_v59 = vsel %vm1007_vm1, %v3935_v51, 2147483647  ;;  %v3869_v15 = vadd.s32 %v3868_v3, %v3866_v38  ;;  %v12649_v38 = vadd.f32 %v12447_v43, %v5322_v60  ;;  %v12656_v63 = vadd.f32 %v12447_v43, %v5323_v27 }
0x112e   : > { %v3959_v14 = vshra.s32 %v12589_v59, 16  ;;  %v5804_v34 = vmax.f32 %v5740_v42, 0.0 }
0x112f   : > { %vm3877_vm0 = vcmp.eq.s32.totalorder %v10356_v19, %v3869_v15 }
0x1130   : > { %v8844_v1 = vsel %vm3877_vm0, 1.0, %v15230_v31  ;;  %v12600_v4 = vsel %vm3877_vm0, 1e+30, %v12432_v20  ;;  %v12602_v0 = vcvt.s32.f32 %v3959_v14 }
0x1131   : > { %8916 = vmatmul.msk.f32.gmra.mxu0 %vm1007_vm1, %v8844_v1  ;;  %v3923_v23 = vsel %vm1007_vm1, %v12600_v4, inf }
0x1132   : > { %v3910_v54 = vpop.xlane.xlu1 %3909  ;;  %3962 = vmin.xlane.f32.xlu1 %v12602_v0  ;;  %3924 = vmin.xlane.f32.xlu0 %v3923_v23  ;;  %v3913_v37 = vpop.xlane.xlu0 %3912 }
0x1133   : > { %vm3928_vm12 = vcmp.eq.f32.partialorder %v12532_v30, %v3910_v54  ;;  %vm3929_vm13 = vcmp.eq.f32.partialorder %v12526_v13, %v3913_v37  ;;  %v5551_v20 = vpop.f32.mrf.mxu0 }
0x1134   : > { %v3936_v11 = vsel %vm3928_vm12, %v10356_v19, 64  ;;  %v3937_v46 = vsel %vm3929_vm13, %v10356_v19, 64  ;;  %v5741_v53 = vadd.f32 %v5551_v20, %v12608_v36  ;;  %v5324_v20 = vsub.f32 %v12436_v44, %v12438_v17 }
0x1135   : > { %v12618_v35 = vsel %vm1007_vm1, %v3936_v11, 2147483647  ;;  %v12621_v40 = vsel %vm1007_vm1, %v3937_v46, 2147483647  ;;  %v5325_v11 = vsub.f32 %v12440_v25, %v12442_v55  ;;  %v3943_v44 = vand.u32 65535, %v12577_v32 }
0x1136   : > { %v5805_v49 = vmax.f32 %v5741_v53, 0.0  ;;  %v3974_v16 = vshra.s32 %v12618_v35, 16  ;;  %v3989_v33 = vshra.s32 %v12621_v40, 16  ;;  %v12677_v46 = vadd.f32 %v12447_v43, %v5324_v20 }
0x1137   : > { %v12680_v53 = vadd.f32 %v12447_v43, %v5325_v11  ;;  %v3945_v25 = vcvt.s32.f32 %v3943_v44 }
0x1138   : > { %v5868_v12 = vpack.c.bf16 %v5805_v49, %v5804_v34  ;;  %v12625_v5 = vcvt.s32.f32 %v3974_v16  ;;  %v12627_v58 = vcvt.s32.f32 %v3989_v33 }
0x113a   : > { %8973 = vmatmul.msk.bf16.vlgmr.msrb.gmra.mxu2 %vm1007_vm1, %v5868_v12  ;;  %v3916_v61 = vpop.xlane.xlu1 %3915  ;;  %3977 = vmin.xlane.f32.xlu1 %v12625_v5  ;;  %v3919_v29 = vpop.xlane.xlu0 %3918 }
0x113b   : > { %vm3930_vm14 = vcmp.eq.f32.partialorder %v12551_v8, %v3916_v61  ;;  %3992 = vmin.xlane.f32.xlu0 %v12627_v58  ;;  %vm3931_vm15 = vcmp.eq.f32.partialorder %v12544_v52, %v3919_v29  ;;  %v5554_v21 = vpop.f32.mrf.mxu0  ;;  %v3958_v29 = vand.u32 65535, %v12589_v59 }
0x113c   : > { %v3938_v24 = vsel %vm3930_vm14, %v10356_v19, 64  ;;  %v3939_v26 = vsel %vm3931_vm15, %v10356_v19, 64  ;;  %v5742_v39 = vadd.f32 %v5554_v21, %v12649_v38 }
0x113d   : > { %v12639_v62 = vsel %vm1007_vm1, %v3938_v24, 2147483647  ;;  %v12642_v9 = vsel %vm1007_vm1, %v3939_v26, 2147483647  ;;  %v3960_v24 = vcvt.s32.f32 %v3958_v29 }
0x113e   : > { %v4004_v28 = vshra.s32 %v12639_v62, 16  ;;  %v4019_v3 = vshra.s32 %v12642_v9, 16  ;;  %v5806_v14 = vmax.f32 %v5742_v39, 0.0 }
0x1140   : > { %v12651_v10 = vcvt.s32.f32 %v4004_v28  ;;  %v12653_v41 = vcvt.s32.f32 %v4019_v3  ;;  %v3973_v3 = vand.u32 65535, %v12618_v35 }
0x1142   : > { %4007 = vmin.xlane.f32.xlu1 %v12651_v10  ;;  %v3922_v51 = vpop.xlane.xlu0 %3921 }
0x1143   : > { %4022 = vmin.xlane.f32.xlu0 %v12653_v41  ;;  %vm3932_vm2 = vcmp.eq.f32.partialorder %v12560_v50, %v3922_v51  ;;  %v5557_v22 = vpop.f32.mrf.mxu0 }
0x1144   : > { %v3940_v6 = vsel %vm3932_vm2, %v10356_v19, 64  ;;  %v5743_v15 = vadd.f32 %v5557_v22, %v12656_v63 }
0x1145   : > { %v12665_v47 = vsel %vm1007_vm1, %v3940_v6, 2147483647  ;;  %v3975_v6 = vcvt.s32.f32 %v3973_v3 }
0x1146   : > { %v5807_v1 = vmax.f32 %v5743_v15, 0.0  ;;  %v4034_v23 = vshra.s32 %v12665_v47, 16 }
0x1148   : > { %v5869_v42 = vpack.c.bf16 %v5807_v1, %v5806_v14  ;;  %v12668_v54 = vcvt.s32.f32 %v4034_v23  ;;  %v4003_v23 = vand.u32 65535, %v12639_v62 }
0x114a   : > { %8974 = vmatmul.msk.bf16.gmra.mxu2 %vm1007_vm1, %v5869_v42 }
0x114b   : > { %4037 = vmin.xlane.f32.xlu0 %v12668_v54  ;;  %v5560_v37 = vpop.f32.mrf.mxu0 }
0x114c   : > { %v5744_v34 = vadd.f32 %v5560_v37, %v12677_v46 }
0x114e   : > { %v5808_v33 = vmax.f32 %v5744_v34, 0.0  ;;  %v4018_v34 = vand.u32 65535, %v12642_v9 }
0x1153   : > { %v5563_v49 = vpop.f32.mrf.mxu0 }
0x1154   : > { %v5745_v16 = vadd.f32 %v5563_v49, %v12680_v53 }
0x1156   : > { %v5809_v12 = vmax.f32 %v5745_v16, 0.0 }
0x1158   : > { %v5870_v61 = vpack.c.bf16 %v5809_v12, %v5808_v33  ;;  %v4033_v33 = vand.u32 65535, %v12665_v47 }
0x115a   : > { %8975 = vmatmul.msk.bf16.gmra.mxu2 %vm1007_vm1, %v5870_v61  ;;  %v4035_v12 = vcvt.s32.f32 %v4033_v33 }
0x115b   : > { %v5566_v26 = vpop.f32.mrf.mxu0 }
0x119d   : > { %v3948_v17 = vpop.xlane.xlu1 %3947 }
0x119e   : > { %vm3949_vm3 = vcmp.eq.f32.partialorder %v12581_v2, %v3948_v17  ;;  %v5327_v2 = vsub.f32 %v12572_v18, %v12452_v56  ;;  %v3988_v56 = vand.u32 65535, %v12621_v40  ;;  %v4005_v40 = vcvt.s32.f32 %v4003_v23 }
0x119f   : > { %v3950_v55 = vsel %vm3949_vm3, %v3945_v25, inf }
0x11a0   : > { %3951 = vmin.xlane.f32.xlu1 %v3950_v55  ;;  %v12704_v51 = vadd.f32 %v12447_v43, %v5327_v2  ;;  %v3990_v42 = vcvt.s32.f32 %v3988_v56 }
0x11a5   : > { %v12688_v21 = vpop.xlane.xlu1 %3962  ;;  %v3925_v60 = vpop.xlane.xlu0 %3924 }
0x11a6   : > { %vm3933_vm4 = vcmp.eq.f32.partialorder %v12600_v4, %v3925_v60  ;;  %vm3964_vm5 = vcmp.eq.f32.partialorder %v12602_v0, %v12688_v21  ;;  %v5746_v0 = vadd.f32 %v5566_v26, %v12450_v45 }
0x11a7   : > { %v3941_v32 = vsel %vm3933_vm4, %v10356_v19, 64  ;;  %v3965_v27 = vsel %vm3964_vm5, %v3960_v24, inf }
0x11a8   : > { %v12695_v28 = vsel %vm1007_vm1, %v3941_v32, 2147483647  ;;  %3966 = vmin.xlane.f32.xlu1 %v3965_v27  ;;  %v5810_v43 = vmax.f32 %v5746_v0, 0.0 }
0x11a9   : > { %v4049_v59 = vshra.s32 %v12695_v28, 16  ;;  %v4048_v26 = vand.u32 65535, %v12695_v28 }
0x11ab   : > { %v12701_v39 = vcvt.s32.f32 %v4049_v59 }
0x11ad   : > { %v12707_v22 = vpop.xlane.xlu1 %3977  ;;  %4052 = vmin.xlane.f32.xlu0 %v12701_v39 }
0x11ae   : > { %v12710_v15 = vpop.xlane.xlu0 %3992  ;;  %v5569_v14 = vpop.f32.mrf.mxu0  ;;  %vm3979_vm6 = vcmp.eq.f32.partialorder %v12625_v5, %v12707_v22 }
0x11af   : > { %v5747_v18 = vadd.f32 %v5569_v14, %v12704_v51  ;;  %v3980_v35 = vsel %vm3979_vm6, %v3975_v6, inf  ;;  %vm3994_vm7 = vcmp.eq.f32.partialorder %v12627_v58, %v12710_v15  ;;  %v4020_v58 = vcvt.s32.f32 %v4018_v34 }
0x11b0   : > { %3981 = vmin.xlane.f32.xlu1 %v3980_v35  ;;  %v3995_v20 = vsel %vm3994_vm7, %v3990_v42, inf  ;;  %v3999_v14 = vcvt.f32.s32 %v12710_v15 }
0x11b1   : > { %v5811_v1 = vmax.f32 %v5747_v18, 0.0 }
0x11b3   : > { %v5871_v37 = vpack.c.bf16 %v5811_v1, %v5810_v43 }
0x11b5   : > { %v12719_v11 = vpop.xlane.xlu1 %4007  ;;  %8976 = vmatmul.msk.bf16.gmra.mxu2 %vm1007_vm1, %v5871_v37  ;;  %3996 = vmin.xlane.f32.xlu0 %v3995_v20 }
0x11b6   : > { %v12722_v5 = vpop.xlane.xlu0 %4022  ;;  %vm4009_vm8 = vcmp.eq.f32.partialorder %v12651_v10, %v12719_v11  ;;  %v3954_v10 = vcvt.f32.s32 %v3948_v17 }
0x11b7   : > { %v4010_v49 = vsel %vm4009_vm8, %v4005_v40, inf  ;;  %vm4024_vm9 = vcmp.eq.f32.partialorder %v12653_v41, %v12722_v5  ;;  %v3969_v41 = vcvt.f32.s32 %v12688_v21  ;;  %v3984_v21 = vcvt.f32.s32 %v12707_v22 }
0x11b8   : > { %4011 = vmin.xlane.f32.xlu1 %v4010_v49  ;;  %v4025_v62 = vsel %vm4024_vm9, %v4020_v58, inf  ;;  %v3955_v44 = vshll.u32 %v3954_v10, 16 }
0x11b9   : > { %v3970_v17 = vshll.u32 %v3969_v41, 16  ;;  %v3985_v22 = vshll.u32 %v3984_v21, 16 }
0x11bd   : > { %4026 = vmin.xlane.f32.xlu0 %v4025_v62 }
0x11be   : > { %v12729_v16 = vpop.xlane.xlu0 %4037 }
0x11bf   : > { %vm4039_vm10 = vcmp.eq.f32.partialorder %v12668_v54, %v12729_v16 }
0x11c0   : > { %v4040_v61 = vsel %vm4039_vm10, %v4035_v12, inf }
0x11c5   : > { %4041 = vmin.xlane.f32.xlu0 %v4040_v61  ;;  %v4044_v61 = vcvt.f32.s32 %v12729_v16 }
0x1213   : > { %v3952_v9 = vpop.xlane.xlu1 %3951 }
0x1214   : > { %v3953_v25 = vcvt.f32.s32 %v3952_v9 }
0x1216   : > { %v3956_v55 = vadd.s32 %v3955_v44, %v3953_v25  ;;  %v4045_v44 = vshll.u32 %v4044_v61, 16 }
0x1218   : > { %vm4062_vm11 = vcmp.eq.s32.totalorder %v10356_v19, %v3956_v55 }
0x1219   : > { %v8845_v29 = vsel %vm4062_vm11, 1.0, %v15230_v31  ;;  %v12738_v60 = vsel %vm4062_vm11, 1e+30, %v12505_v48  ;;  %v4050_v48 = vcvt.s32.f32 %v4048_v26 }
0x121a   : > { %8917 = vmatmul.msk.f32.gmra.mxu0 %vm1007_vm1, %v8845_v29  ;;  %v4094_v47 = vsel %vm1007_vm1, %v12738_v60, inf }
0x121b   : > { %4095 = vmin.xlane.f32.xlu1 %v4094_v47  ;;  %v3967_v54 = vpop.xlane.xlu1 %3966 }
0x121c   : > { %v3968_v24 = vcvt.f32.s32 %v3967_v54 }
0x121e   : > { %v3971_v32 = vadd.s32 %v3970_v17, %v3968_v24 }
0x1220   : > { %v12745_v27 = vpop.xlane.xlu0 %4052  ;;  %vm4063_vm0 = vcmp.eq.s32.totalorder %v10356_v19, %v3971_v32 }
0x1221   : > { %v8846_v2 = vsel %vm4063_vm0, 1.0, %v15230_v31  ;;  %v12750_v59 = vsel %vm4063_vm0, 1e+30, %v12516_v7  ;;  %vm4054_vm12 = vcmp.eq.f32.partialorder %v12701_v39, %v12745_v27  ;;  %v4014_v7 = vcvt.f32.s32 %v12719_v11 }
0x1222   : > { %8918 = vmatmul.msk.f32.gmra.mxu0 %vm1007_vm1, %v8846_v2  ;;  %v4097_v28 = vsel %vm1007_vm1, %v12750_v59, inf  ;;  %v4055_v3 = vsel %vm4054_vm12, %v4050_v48, inf  ;;  %v4000_v39 = vshll.u32 %v3999_v14, 16  ;;  %v4029_v11 = vcvt.f32.s32 %v12722_v5 }
0x1223   : > { %4098 = vmin.xlane.f32.xlu1 %v4097_v28  ;;  %v3982_v0 = vpop.xlane.xlu1 %3981  ;;  %4056 = vmin.xlane.f32.xlu0 %v4055_v3  ;;  %v4015_v37 = vshll.u32 %v4014_v7, 16  ;;  %v4059_v26 = vcvt.f32.s32 %v12745_v27 }
0x1224   : > { %v3983_v6 = vcvt.f32.s32 %v3982_v0  ;;  %v4030_v58 = vshll.u32 %v4029_v11, 16 }
0x1225   : > { %v4060_v2 = vshll.u32 %v4059_v26, 16 }
0x1226   : > { %v3986_v56 = vadd.s32 %v3985_v22, %v3983_v6 }
0x1228   : > { %v3997_v18 = vpop.xlane.xlu0 %3996  ;;  %vm4064_vm13 = vcmp.eq.s32.totalorder %v10356_v19, %v3986_v56 }
0x1229   : > { %v3998_v35 = vcvt.f32.s32 %v3997_v18  ;;  %v8847_v43 = vsel %vm4064_vm13, 1.0, %v15230_v31  ;;  %v12762_v1 = vsel %vm4064_vm13, 1e+30, %v12532_v30 }
0x122a   : > { %8919 = vmatmul.msk.f32.gmra.mxu0 %vm1007_vm1, %v8847_v43  ;;  %v4100_v23 = vsel %vm1007_vm1, %v12762_v1, inf }
0x122b   : > { %v4001_v42 = vadd.s32 %v4000_v39, %v3998_v35  ;;  %4101 = vmin.xlane.f32.xlu1 %v4100_v23  ;;  %v4012_v15 = vpop.xlane.xlu1 %4011 }
0x122c   : > { %v4013_v20 = vcvt.f32.s32 %v4012_v15 }
0x122d   : > { %vm4065_vm14 = vcmp.eq.s32.totalorder %v10356_v19, %v4001_v42 }
0x122e   : > { %v4016_v40 = vadd.s32 %v4015_v37, %v4013_v20  ;;  %v12770_v34 = vsel %vm4065_vm14, 1e+30, %v12526_v13  ;;  %v8848_v33 = vsel %vm4065_vm14, 1.0, %v15230_v31 }
0x122f   : > { %v4103_v30 = vsel %vm1007_vm1, %v12770_v34, inf }
0x1230   : > { %4104 = vmin.xlane.f32.xlu0 %v4103_v30  ;;  %v4027_v49 = vpop.xlane.xlu0 %4026  ;;  %vm4066_vm15 = vcmp.eq.s32.totalorder %v10356_v19, %v4016_v40 }
0x1231   : > { %v4028_v62 = vcvt.f32.s32 %v4027_v49  ;;  %v12779_v5 = vsel %vm4066_vm15, 1e+30, %v12551_v8  ;;  %v8849_v55 = vsel %vm4066_vm15, 1.0, %v15230_v31 }
0x1232   : > { %8920 = vmatmul.msk.f32.gmra.mxu0 %vm1007_vm1, %v8848_v33  ;;  %v4106_v13 = vsel %vm1007_vm1, %v12779_v5, inf }
0x1233   : > { %v4031_v12 = vadd.s32 %v4030_v58, %v4028_v62  ;;  %4107 = vmin.xlane.f32.xlu1 %v4106_v13 }
0x1235   : > { %vm4067_vm2 = vcmp.eq.s32.totalorder %v10356_v19, %v4031_v12 }
0x1236   : > { %v12787_v10 = vsel %vm4067_vm2, 1e+30, %v12544_v52  ;;  %v8850_v29 = vsel %vm4067_vm2, 1.0, %v15230_v31 }
0x1237   : > { %v4109_v9 = vsel %vm1007_vm1, %v12787_v10, inf }
0x1238   : > { %4110 = vmin.xlane.f32.xlu2 %v4109_v9  ;;  %v4042_v8 = vpop.xlane.xlu0 %4041 }
0x1239   : > { %v4043_v25 = vcvt.f32.s32 %v4042_v8 }
0x123a   : > { %8921 = vmatmul.msk.f32.gmra.mxu0 %vm1007_vm1, %v8849_v55 }
0x123b   : > { %v4046_v41 = vadd.s32 %v4045_v44, %v4043_v25 }
0x123d   : > { %vm4068_vm3 = vcmp.eq.s32.totalorder %v10356_v19, %v4046_v41 }
0x123e   : > { %v12797_v16 = vsel %vm4068_vm3, 1e+30, %v12560_v50  ;;  %v8851_v47 = vsel %vm4068_vm3, 1.0, %v15230_v31 }
0x123f   : > { %v4112_v52 = vsel %vm1007_vm1, %v12797_v16, inf }
0x1240   : > { %4113 = vmin.xlane.f32.xlu1 %v4112_v52 }
0x1242   : > { %8922 = vmatmul.msk.f32.gmra.mxu0 %vm1007_vm1, %v8850_v29 }
0x124a   : > { %8923 = vmatmul.msk.f32.gmra.mxu0 %vm1007_vm1, %v8851_v47 }
0x128e   : > { %v4096_v54 = vpop.xlane.xlu1 %4095 }
0x128f   : > { %vm4118_vm4 = vcmp.eq.f32.partialorder %v12738_v60, %v4096_v54 }
0x1290   : > { %v4126_v17 = vsel %vm4118_vm4, %v10356_v19, 64 }
0x1291   : > { %v12808_v50 = vsel %vm1007_vm1, %v4126_v17, 2147483647 }
0x1292   : > { %v4136_v24 = vshra.s32 %v12808_v50, 16 }
0x1294   : > { %v12812_v32 = vcvt.s32.f32 %v4136_v24 }
0x1296   : > { %v4099_v21 = vpop.xlane.xlu1 %4098  ;;  %4139 = vmin.xlane.f32.xlu0 %v12812_v32  ;;  %v4057_v48 = vpop.xlane.xlu0 %4056 }
0x1297   : > { %vm4119_vm5 = vcmp.eq.f32.partialorder %v12750_v59, %v4099_v21  ;;  %v4058_v28 = vcvt.f32.s32 %v4057_v48  ;;  %v5572_v3 = vpop.f32.mrf.mxu0 }
0x1298   : > { %v4127_v0 = vsel %vm4119_vm5, %v10356_v19, 64  ;;  %v5748_v39 = vadd.f32 %v5572_v3, %v12596_v57 }
0x1299   : > { %v12818_v22 = vsel %vm1007_vm1, %v4127_v0, 2147483647  ;;  %v4061_v6 = vadd.s32 %v4060_v2, %v4058_v28 }
0x129a   : > { %v4151_v14 = vshra.s32 %v12818_v22, 16  ;;  %v5812_v15 = vmax.f32 %v5748_v39, 0.0 }
0x129b   : > { %vm4069_vm6 = vcmp.eq.s32.totalorder %v10356_v19, %v4061_v6 }
0x129c   : > { %v8852_v27 = vsel %vm4069_vm6, 1.0, %v15230_v31  ;;  %v12823_v56 = vcvt.s32.f32 %v4151_v14  ;;  %v12826_v7 = vsel %vm4069_vm6, 1e+30, %v12600_v4 }
0x129d   : > { %8924 = vmatmul.msk.f32.gmra.mxu0 %vm1007_vm1, %v8852_v27  ;;  %v4115_v18 = vsel %vm1007_vm1, %v12826_v7, inf }
0x129e   : > { %v4102_v35 = vpop.xlane.xlu1 %4101  ;;  %4154 = vmin.xlane.f32.xlu2 %v12823_v56  ;;  %4116 = vmin.xlane.f32.xlu0 %v4115_v18 }
0x129f   : > { %vm4120_vm7 = vcmp.eq.f32.partialorder %v12762_v1, %v4102_v35  ;;  %v5575_v43 = vpop.f32.mrf.mxu0 }
0x12a0   : > { %v4128_v23 = vsel %vm4120_vm7, %v10356_v19, 64  ;;  %v5749_v42 = vadd.f32 %v5575_v43, %v12608_v36 }
0x12a1   : > { %v12837_v4 = vsel %vm1007_vm1, %v4128_v23, 2147483647  ;;  %v6012_v23 = vpop.f32.mrf.mxu2 }
0x12a2   : > { %v5813_v37 = vmax.f32 %v5749_v42, 0.0  ;;  %v4166_v20 = vshra.s32 %v12837_v4, 16 }
0x12a3   : > { %v4105_v11 = vpop.xlane.xlu0 %4104 }
0x12a4   : > { %v5872_v40 = vpack.c.bf16 %v5813_v37, %v5812_v15  ;;  %vm4121_vm8 = vcmp.eq.f32.partialorder %v12770_v34, %v4105_v11  ;;  %v12841_v30 = vcvt.s32.f32 %v4166_v20  ;;  %v4135_v11 = vand.u32 65535, %v12808_v50 }
0x12a5   : > { %v4129_v49 = vsel %vm4121_vm8, %v10356_v19, 64 }
0x12a6   : > { %v12845_v58 = vsel %vm1007_vm1, %v4129_v49, 2147483647  ;;  %v4108_v62 = vpop.xlane.xlu1 %4107  ;;  %8977 = vmatmul.msk.bf16.gmra.mxu2 %vm1007_vm1, %v5872_v40  ;;  %4169 = vmin.xlane.f32.xlu1 %v12841_v30  ;;  %v4137_v49 = vcvt.s32.f32 %v4135_v11 }
0x12a7   : > { %vm4122_vm9 = vcmp.eq.f32.partialorder %v12779_v5, %v4108_v62  ;;  %v5578_v33 = vpop.f32.mrf.mxu0  ;;  %v4181_v13 = vshra.s32 %v12845_v58, 16 }
0x12a8   : > { %v4130_v12 = vsel %vm4122_vm9, %v10356_v19, 64  ;;  %v5750_v41 = vadd.f32 %v5578_v33, %v12649_v38  ;;  %v4150_v33 = vand.u32 65535, %v12818_v22 }
0x12a9   : > { %v12853_v61 = vsel %vm1007_vm1, %v4130_v12, 2147483647  ;;  %v12855_v9 = vcvt.s32.f32 %v4181_v13  ;;  %v12886_v42 = vpop.f32.mrf.mxu2 }
0x12aa   : > { %v4196_v8 = vshra.s32 %v12853_v61, 16  ;;  %v5814_v24 = vmax.f32 %v5750_v41, 0.0 }
0x12ab   : > { %v4111_v44 = vpop.xlane.xlu2 %4110  ;;  %4184 = vmin.xlane.f32.xlu2 %v12855_v9 }
0x12ac   : > { %vm4123_vm10 = vcmp.eq.f32.partialorder %v12787_v10, %v4111_v44  ;;  %v12860_v25 = vcvt.s32.f32 %v4196_v8  ;;  %v4152_v44 = vcvt.s32.f32 %v4150_v33 }
0x12ad   : > { %v4131_v55 = vsel %vm4123_vm10, %v10356_v19, 64 }
0x12ae   : > { %v12865_v52 = vsel %vm1007_vm1, %v4131_v55, 2147483647  ;;  %4199 = vmin.xlane.f32.xlu0 %v12860_v25 }
0x12af   : > { %v5581_v29 = vpop.f32.mrf.mxu0  ;;  %v4211_v47 = vshra.s32 %v12865_v52, 16 }
0x12b0   : > { %v5751_v54 = vadd.f32 %v5581_v29, %v12656_v63  ;;  %v4165_v29 = vand.u32 65535, %v12837_v4 }
0x12b1   : > { %v12870_v17 = vcvt.s32.f32 %v4211_v47  ;;  %v12888_v15 = vpop.f32.mrf.mxu2 }
0x12b2   : > { %v5815_v26 = vmax.f32 %v5751_v54, 0.0 }
0x12b3   : > { %4214 = vmin.xlane.f32.xlu1 %v12870_v17  ;;  %v4114_v21 = vpop.xlane.xlu1 %4113 }
0x12b4   : > { %v5873_v48 = vpack.c.bf16 %v5815_v26, %v5814_v24  ;;  %vm4124_vm11 = vcmp.eq.f32.partialorder %v12797_v16, %v4114_v21 }
0x12b5   : > { %v4132_v2 = vsel %vm4124_vm11, %v10356_v19, 64 }
0x12b6   : > { %v12876_v28 = vsel %vm1007_vm1, %v4132_v2, 2147483647  ;;  %8978 = vmatmul.msk.bf16.gmra.mxu2 %vm1007_vm1, %v5873_v48  ;;  %v4180_v48 = vand.u32 65535, %v12845_v58 }
0x12b7   : > { %v5584_v3 = vpop.f32.mrf.mxu0  ;;  %v4226_v0 = vshra.s32 %v12876_v28, 16 }
0x12b8   : > { %v5752_v14 = vadd.f32 %v5584_v3, %v12677_v46 }
0x12b9   : > { %v12880_v6 = vcvt.s32.f32 %v4226_v0  ;;  %v12890_v37 = vpop.f32.mrf.mxu2 }
0x12ba   : > { %v5816_v39 = vmax.f32 %v5752_v14, 0.0  ;;  %v4195_v14 = vand.u32 65535, %v12853_v61  ;;  %v4210_v61 = vand.u32 65535, %v12865_v52 }
0x12bb   : > { %4229 = vmin.xlane.f32.xlu0 %v12880_v6 }
0x12bc   : > { %v4197_v58 = vcvt.s32.f32 %v4195_v14 }
0x12bf   : > { %v5587_v27 = vpop.f32.mrf.mxu0 }
0x12c0   : > { %v5753_v18 = vadd.f32 %v5587_v27, %v12680_v53 }
0x12c1   : > { %v12892_v20 = vpop.f32.mrf.mxu2 }
0x12c2   : > { %v5817_v35 = vmax.f32 %v5753_v18, 0.0  ;;  %v4182_v18 = vcvt.s32.f32 %v4180_v48 }
0x12c4   : > { %v5874_v43 = vpack.c.bf16 %v5817_v35, %v5816_v39 }
0x12c6   : > { %8979 = vmatmul.msk.bf16.gmra.mxu2 %vm1007_vm1, %v5874_v43 }
0x12c7   : > { %v5590_v55 = vpop.f32.mrf.mxu0 }
0x12c8   : > { %v5754_v24 = vadd.f32 %v5590_v55, %v12450_v45 }
0x12c9   : > { %v12900_v13 = vpop.f32.mrf.mxu2 }
0x12ca   : > { %15243 = vst [vmem:[#allocation35_spill] sm:$0xff] %v12900_v13  ;;  %v5818_v3 = vmax.f32 %v5754_v24, 0.0 }
0x12d1   : > { %v12913_v47 = vpop.f32.mrf.mxu2 }
0x12d9   : > { %v12930_v43 = vpop.f32.mrf.mxu2 }
0x12da   : > { %15244 = vst [vmem:[#allocation33_spill] sm:$0xff] %v12930_v43 }
0x1309   : > { %v12895_v40 = vpop.xlane.xlu0 %4139 }
0x130a   : > { %vm4141_vm0 = vcmp.eq.f32.partialorder %v12812_v32, %v12895_v40 }
0x130b   : > { %v4142_v62 = vsel %vm4141_vm0, %v4137_v49, inf }
0x130c   : > { %4143 = vmin.xlane.f32.xlu2 %v4142_v62  ;;  %v4212_v62 = vcvt.s32.f32 %v4210_v61 }
0x1311   : > { %v12902_v12 = vpop.xlane.xlu2 %4154  ;;  %v4117_v8 = vpop.xlane.xlu0 %4116 }
0x1312   : > { %vm4125_vm12 = vcmp.eq.f32.partialorder %v12826_v7, %v4117_v8  ;;  %vm4156_vm13 = vcmp.eq.f32.partialorder %v12823_v56, %v12902_v12  ;;  %v4167_v56 = vcvt.s32.f32 %v4165_v29 }
0x1313   : > { %v4133_v50 = vsel %vm4125_vm12, %v10356_v19, 64  ;;  %v4157_v41 = vsel %vm4156_vm13, %v4152_v44, inf  ;;  %v4225_v44 = vand.u32 65535, %v12876_v28 }
0x1314   : > { %v12909_v32 = vsel %vm1007_vm1, %v4133_v50, 2147483647  ;;  %4158 = vmin.xlane.f32.xlu1 %v4157_v41 }
0x1315   : > { %v4241_v22 = vshra.s32 %v12909_v32, 16  ;;  %v4227_v41 = vcvt.s32.f32 %v4225_v44 }
0x1317   : > { %v12915_v54 = vcvt.s32.f32 %v4241_v22 }
0x1319   : > { %v12918_v26 = vpop.xlane.xlu1 %4169  ;;  %4244 = vmin.xlane.f32.xlu2 %v12915_v54 }
0x131a   : > { %v5593_v21 = vpop.f32.mrf.mxu0  ;;  %vm4171_vm14 = vcmp.eq.f32.partialorder %v12841_v30, %v12918_v26 }
0x131b   : > { %v5755_v2 = vadd.f32 %v5593_v21, %v12704_v51  ;;  %v4172_v4 = vsel %vm4171_vm14, %v4167_v56, inf }
0x131c   : > { %4173 = vmin.xlane.f32.xlu0 %v4172_v4 }
0x131d   : > { %v5819_v0 = vmax.f32 %v5755_v2, 0.0  ;;  %v4146_v2 = vcvt.f32.s32 %v12895_v40 }
0x131e   : > { %v12926_v27 = vpop.xlane.xlu2 %4184 }
0x131f   : > { %v5875_v39 = vpack.c.bf16 %v5819_v0, %v5818_v3  ;;  %vm4186_vm15 = vcmp.eq.f32.partialorder %v12855_v9, %v12926_v27  ;;  %v12941_v9 = vld [vmem:[%s15161_s10] ss:$0 sm:$0xff]  ;;  %v4147_v3 = vshll.u32 %v4146_v2, 16 }
0x1320   : > { %v4187_v35 = vsel %vm4186_vm15, %v4182_v18, inf  ;;  %v12964_v29 = vadd.f32 %v12941_v9, %v12888_v15  ;;  %v4161_v18 = vcvt.f32.s32 %v12902_v12  ;;  %v4176_v12 = vcvt.f32.s32 %v12918_v26 }
0x1321   : > { %8980 = vmatmul.msk.bf16.gmra.mxu2 %vm1007_vm1, %v5875_v39  ;;  %4188 = vmin.xlane.f32.xlu1 %v4187_v35  ;;  %v12933_v30 = vpop.xlane.xlu0 %4199 }
0x1322   : > { %vm4201_vm2 = vcmp.eq.f32.partialorder %v12860_v25, %v12933_v30  ;;  %v12948_v25 = vadd.f32 %v12941_v9, %v6012_v23  ;;  %v4162_v40 = vshll.u32 %v4161_v18, 16 }
0x1323   : > { %v4202_v11 = vsel %vm4201_vm2, %v4197_v58, inf }
0x1324   : > { %4203 = vmin.xlane.f32.xlu2 %v4202_v11  ;;  %v4240_v11 = vand.u32 65535, %v12909_v32 }
0x1326   : > { %v12943_v49 = vpop.xlane.xlu1 %4214 }
0x1327   : > { %vm4216_vm3 = vcmp.eq.f32.partialorder %v12870_v17, %v12943_v49 }
0x1328   : > { %v4217_v33 = vsel %vm4216_vm3, %v4212_v62, inf }
0x1329   : > { %v6032_v8 = vpop.f32.mrf.mxu2  ;;  %4218 = vmin.xlane.f32.xlu0 %v4217_v33 }
0x132a   : > { %v12951_v52 = vadd.f32 %v12941_v9, %v6032_v8 }
0x132c   : > { %v6172_v55 = vmax.f32 %v12948_v25, %v12951_v52 }
0x132e   : > { %v12956_v50 = vpop.xlane.xlu0 %4229 }
0x132f   : > { %vm4231_vm4 = vcmp.eq.f32.partialorder %v12880_v6, %v12956_v50  ;;  %v12975_v6 = vadd.f32 %v12941_v9, %v12892_v20 }
0x1330   : > { %v4232_v17 = vsel %vm4231_vm4, %v4227_v41, inf }
0x1331   : > { %v12960_v22 = vpop.f32.mrf.mxu2  ;;  %4233 = vmin.xlane.f32.xlu2 %v4232_v17  ;;  %v4177_v17 = vshll.u32 %v4176_v12, 16 }
0x1339   : > { %v6037_v23 = vpop.f32.mrf.mxu2 }
0x133a   : > { %v12967_v28 = vadd.f32 %v12941_v9, %v6037_v23 }
0x133c   : > { %v6174_v24 = vmax.f32 %v12964_v29, %v12967_v28 }
0x1341   : > { %v12971_v56 = vpop.f32.mrf.mxu2 }
0x1349   : > { %v6042_v21 = vpop.f32.mrf.mxu2 }
0x134a   : > { %v12978_v48 = vadd.f32 %v12941_v9, %v6042_v21  ;;  %v4191_v21 = vcvt.f32.s32 %v12926_v27 }
0x137f   : > { %v4144_v4 = vpop.xlane.xlu2 %4143 }
0x1380   : > { %v4145_v0 = vcvt.f32.s32 %v4144_v4 }
0x1382   : > { %v4148_v14 = vadd.s32 %v4147_v3, %v4145_v0 }
0x1384   : > { %vm4254_vm5 = vcmp.eq.s32.totalorder %v10356_v19, %v4148_v14 }
0x1385   : > { %v8853_v39 = vsel %vm4254_vm5, 1.0, %v15230_v31  ;;  %v12987_v20 = vsel %vm4254_vm5, 1e+30, %v12738_v60  ;;  %v4242_v60 = vcvt.s32.f32 %v4240_v11  ;;  %v13023_v11 = vpop.f32.mrf.mxu2 }
0x1386   : > { %8925 = vmatmul.msk.f32.gmra.mxu0 %vm1007_vm1, %v8853_v39  ;;  %v4286_v35 = vsel %vm1007_vm1, %v12987_v20, inf }
0x1387   : > { %v4159_v58 = vpop.xlane.xlu1 %4158  ;;  %4287 = vmin.xlane.f32.xlu1 %v4286_v35 }
0x1388   : > { %v4160_v61 = vcvt.f32.s32 %v4159_v58  ;;  %v4221_v58 = vcvt.f32.s32 %v12943_v49 }
0x138a   : > { %v4163_v62 = vadd.s32 %v4162_v40, %v4160_v61  ;;  %v4222_v12 = vshll.u32 %v4221_v58, 16 }
0x138c   : > { %v12994_v33 = vpop.xlane.xlu2 %4244  ;;  %vm4255_vm6 = vcmp.eq.s32.totalorder %v10356_v19, %v4163_v62 }
0x138d   : > { %v8854_v8 = vsel %vm4255_vm6, 1.0, %v15230_v31  ;;  %v12999_v44 = vsel %vm4255_vm6, 1e+30, %v12750_v59  ;;  %vm4246_vm7 = vcmp.eq.f32.partialorder %v12915_v54, %v12994_v33  ;;  %v4206_v59 = vcvt.f32.s32 %v12933_v30 }
0x138e   : > { %8926 = vmatmul.msk.f32.gmra.mxu0 %vm1007_vm1, %v8854_v8  ;;  %v4289_v32 = vsel %vm1007_vm1, %v12999_v44, inf  ;;  %v4247_v41 = vsel %vm4246_vm7, %v4242_v60, inf  ;;  %v4192_v54 = vshll.u32 %v4191_v21, 16 }
0x138f   : > { %4290 = vmin.xlane.f32.xlu0 %v4289_v32  ;;  %4248 = vmin.xlane.f32.xlu1 %v4247_v41  ;;  %v4174_v26 = vpop.xlane.xlu0 %4173  ;;  %v4207_v35 = vshll.u32 %v4206_v59, 16  ;;  %v4236_v41 = vcvt.f32.s32 %v12956_v50 }
0x1390   : > { %v4175_v23 = vcvt.f32.s32 %v4174_v26 }
0x1392   : > { %v4178_v2 = vadd.s32 %v4177_v17, %v4175_v23  ;;  %v13046_v17 = vadd.f32 %v12941_v9, %v12913_v47 }
0x1394   : > { %v4189_v4 = vpop.xlane.xlu1 %4188  ;;  %vm4256_vm8 = vcmp.eq.s32.totalorder %v10356_v19, %v4178_v2  ;;  %v4237_v2 = vshll.u32 %v4236_v41, 16 }
0x1395   : > { %v4190_v3 = vcvt.f32.s32 %v4189_v4  ;;  %v8855_v0 = vsel %vm4256_vm8, 1.0, %v15230_v31  ;;  %v13011_v14 = vsel %vm4256_vm8, 1e+30, %v12762_v1 }
0x1396   : > { %8927 = vmatmul.msk.f32.gmra.mxu0 %vm1007_vm1, %v8855_v0  ;;  %v4292_v18 = vsel %vm1007_vm1, %v13011_v14, inf }
0x1397   : > { %v4193_v39 = vadd.s32 %v4192_v54, %v4190_v3  ;;  %v4204_v27 = vpop.xlane.xlu2 %4203  ;;  %4293 = vmin.xlane.f32.xlu2 %v4292_v18 }
0x1398   : > { %v4205_v30 = vcvt.f32.s32 %v4204_v27 }
0x1399   : > { %vm4257_vm9 = vcmp.eq.s32.totalorder %v10356_v19, %v4193_v39 }
0x139a   : > { %v4208_v40 = vadd.s32 %v4207_v35, %v4205_v30  ;;  %v13019_v61 = vsel %vm4257_vm9, 1e+30, %v12770_v34  ;;  %v8856_v8 = vsel %vm4257_vm9, 1.0, %v15230_v31  ;;  %v4251_v30 = vcvt.f32.s32 %v12994_v33 }
0x139b   : > { %v4295_v1 = vsel %vm1007_vm1, %v13019_v61, inf }
0x139c   : > { %4296 = vmin.xlane.f32.xlu0 %v4295_v1  ;;  %v4219_v62 = vpop.xlane.xlu0 %4218  ;;  %vm4258_vm10 = vcmp.eq.s32.totalorder %v10356_v19, %v4208_v40 }
0x139d   : > { %v4220_v60 = vcvt.f32.s32 %v4219_v62  ;;  %v13030_v49 = vsel %vm4258_vm10, 1e+30, %v12779_v5  ;;  %v4252_v62 = vshll.u32 %v4251_v30, 16 }
0x139e   : > { %8928 = vmatmul.msk.f32.gmra.mxu0 %vm1007_vm1, %v8856_v8  ;;  %v4298_v34 = vsel %vm1007_vm1, %v13030_v49, inf }
0x139f   : > { %v4223_v32 = vadd.s32 %v4222_v12, %v4220_v60  ;;  %4299 = vmin.xlane.f32.xlu1 %v4298_v34 }
0x13a1   : > { %vm4259_vm11 = vcmp.eq.s32.totalorder %v10356_v19, %v4223_v32 }
0x13a2   : > { %v13040_v26 = vsel %vm4259_vm11, 1e+30, %v12787_v10  ;;  %v8857_v10 = vsel %vm4258_vm10, 1.0, %v15230_v31  ;;  %v8858_v0 = vsel %vm4259_vm11, 1.0, %v15230_v31 }
0x13a3   : > { %v4301_v5 = vsel %vm1007_vm1, %v13040_v26, inf }
0x13a4   : > { %v6047_v23 = vpop.f32.mrf.mxu2  ;;  %v4234_v21 = vpop.xlane.xlu2 %4233  ;;  %4302 = vmin.xlane.f32.xlu2 %v4301_v5 }
0x13a5   : > { %v13049_v50 = vadd.f32 %v12941_v9, %v6047_v23  ;;  %v4235_v59 = vcvt.f32.s32 %v4234_v21 }
0x13a6   : > { %8929 = vmatmul.msk.f32.gmra.mxu0 %vm1007_vm1, %v8857_v10 }
0x13a7   : > { %v4238_v54 = vadd.s32 %v4237_v2, %v4235_v59 }
0x13a9   : > { %vm4260_vm0 = vcmp.eq.s32.totalorder %v10356_v19, %v4238_v54 }
0x13aa   : > { %v13059_v47 = vsel %vm4260_vm0, 1e+30, %v12797_v16  ;;  %v8859_v18 = vsel %vm4260_vm0, 1.0, %v15230_v31 }
0x13ab   : > { %v4304_v3 = vsel %vm1007_vm1, %v13059_v47, inf }
0x13ac   : > { %4305 = vmin.xlane.f32.xlu1 %v4304_v3  ;;  %v13182_v15 = vpop.f32.mrf.mxu2 }
0x13ad   : > { %15245 = vst [vmem:[#allocation32_spill] sm:$0xff] %v13182_v15 }
0x13ae   : > { %8930 = vmatmul.msk.f32.gmra.mxu0 %vm1007_vm1, %v8858_v0 }
0x13b6   : > { %8931 = vmatmul.msk.f32.gmra.mxu0 %vm1007_vm1, %v8859_v18 }
0x13fa   : > { %v4288_v39 = vpop.xlane.xlu1 %4287 }
0x13fb   : > { %vm4310_vm12 = vcmp.eq.f32.partialorder %v12987_v20, %v4288_v39 }
0x13fc   : > { %v4318_v16 = vsel %vm4310_vm12, %v10356_v19, 64 }
0x13fd   : > { %v13072_v27 = vsel %vm1007_vm1, %v4318_v16, 2147483647 }
0x13fe   : > { %v4328_v35 = vshra.s32 %v13072_v27, 16 }
0x1400   : > { %v13076_v58 = vcvt.s32.f32 %v4328_v35 }
0x1402   : > { %4331 = vmin.xlane.f32.xlu0 %v13076_v58  ;;  %v4249_v40 = vpop.xlane.xlu1 %4248  ;;  %v4291_v1 = vpop.xlane.xlu0 %4290 }
0x1403   : > { %v4250_v12 = vcvt.f32.s32 %v4249_v40  ;;  %vm4311_vm13 = vcmp.eq.f32.partialorder %v12999_v44, %v4291_v1  ;;  %v5596_v60 = vpop.f32.mrf.mxu0 }
0x1404   : > { %v4319_v8 = vsel %vm4311_vm13, %v10356_v19, 64  ;;  %v5756_v2 = vadd.f32 %v5596_v60, %v12596_v57 }
0x1405   : > { %v4253_v34 = vadd.s32 %v4252_v62, %v4250_v12  ;;  %v13082_v32 = vsel %vm1007_vm1, %v4319_v8, 2147483647 }
0x1406   : > { %v4343_v41 = vshra.s32 %v13082_v32, 16  ;;  %v5820_v0 = vmax.f32 %v5756_v2, 0.0 }
0x1407   : > { %vm4261_vm14 = vcmp.eq.s32.totalorder %v10356_v19, %v4253_v34 }
0x1408   : > { %v8860_v33 = vsel %vm4261_vm14, 1.0, %v15230_v31  ;;  %v13088_v5 = vsel %vm4261_vm14, 1e+30, %v12826_v7  ;;  %v13090_v23 = vcvt.s32.f32 %v4343_v41 }
0x1409   : > { %8932 = vmatmul.msk.f32.gmra.mxu0 %vm1007_vm1, %v8860_v33  ;;  %v4307_v21 = vsel %vm1007_vm1, %v13088_v5, inf }
0x140a   : > { %4308 = vmin.xlane.f32.xlu0 %v4307_v21  ;;  %v4294_v59 = vpop.xlane.xlu2 %4293  ;;  %4346 = vmin.xlane.f32.xlu2 %v13090_v23 }
0x140b   : > { %vm4312_vm15 = vcmp.eq.f32.partialorder %v13011_v14, %v4294_v59  ;;  %v5599_v10 = vpop.f32.mrf.mxu0 }
0x140c   : > { %v4320_v54 = vsel %vm4312_vm15, %v10356_v19, 64  ;;  %v5757_v7 = vadd.f32 %v5599_v10, %v12608_v36 }
0x140d   : > { %v13101_v3 = vsel %vm1007_vm1, %v4320_v54, 2147483647 }
0x140e   : > { %v5821_v18 = vmax.f32 %v5757_v7, 0.0  ;;  %v4358_v39 = vshra.s32 %v13101_v3, 16 }
0x140f   : > { %v4297_v16 = vpop.xlane.xlu0 %4296 }
0x1410   : > { %v5876_v35 = vpack.c.bf16 %v5821_v18, %v5820_v0  ;;  %vm4313_vm2 = vcmp.eq.f32.partialorder %v13019_v61, %v4297_v16  ;;  %v13105_v30 = vcvt.s32.f32 %v4358_v39 }
0x1411   : > { %v4321_v40 = vsel %vm4313_vm2, %v10356_v19, 64 }
0x1412   : > { %v13109_v1 = vsel %vm1007_vm1, %v4321_v40, 2147483647  ;;  %8981 = vmatmul.msk.bf16.gmra.mxu2 %vm1007_vm1, %v5876_v35  ;;  %v4300_v62 = vpop.xlane.xlu1 %4299  ;;  %4361 = vmin.xlane.f32.xlu1 %v13105_v30 }
0x1413   : > { %vm4314_vm3 = vcmp.eq.f32.partialorder %v13030_v49, %v4300_v62  ;;  %v5602_v12 = vpop.f32.mrf.mxu0  ;;  %v4373_v60 = vshra.s32 %v13109_v1, 16 }
0x1414   : > { %v4322_v8 = vsel %vm4314_vm3, %v10356_v19, 64  ;;  %v5758_v10 = vadd.f32 %v5602_v12, %v12649_v38 }
0x1415   : > { %v13117_v34 = vsel %vm1007_vm1, %v4322_v8, 2147483647  ;;  %v13119_v41 = vcvt.s32.f32 %v4373_v60 }
0x1416   : > { %v4388_v33 = vshra.s32 %v13117_v34, 16  ;;  %v5822_v16 = vmax.f32 %v5758_v10, 0.0 }
0x1417   : > { %v4303_v21 = vpop.xlane.xlu2 %4302  ;;  %4376 = vmin.xlane.f32.xlu2 %v13119_v41 }
0x1418   : > { %vm4315_vm4 = vcmp.eq.f32.partialorder %v13040_v26, %v4303_v21  ;;  %v13124_v2 = vcvt.s32.f32 %v4388_v33 }
0x1419   : > { %v4323_v59 = vsel %vm4315_vm4, %v10356_v19, 64 }
0x141a   : > { %v13129_v54 = vsel %vm1007_vm1, %v4323_v59, 2147483647  ;;  %4391 = vmin.xlane.f32.xlu0 %v13124_v2 }
0x141b   : > { %v5605_v7 = vpop.f32.mrf.mxu0  ;;  %v4403_v0 = vshra.s32 %v13129_v54, 16 }
0x141c   : > { %v5759_v18 = vadd.f32 %v5605_v7, %v12656_v63 }
0x141d   : > { %v13134_v39 = vcvt.s32.f32 %v4403_v0 }
0x141e   : > { %v5823_v35 = vmax.f32 %v5759_v18, 0.0 }
0x141f   : > { %v4306_v40 = vpop.xlane.xlu1 %4305  ;;  %4406 = vmin.xlane.f32.xlu1 %v13134_v39 }
0x1420   : > { %v5877_v62 = vpack.c.bf16 %v5823_v35, %v5822_v16  ;;  %vm4316_vm5 = vcmp.eq.f32.partialorder %v13059_v47, %v4306_v40  ;;  %v4327_v35 = vand.u32 65535, %v13072_v27 }
0x1421   : > { %v4324_v12 = vsel %vm4316_vm5, %v10356_v19, 64 }
0x1422   : > { %v13140_v60 = vsel %vm1007_vm1, %v4324_v12, 2147483647  ;;  %8982 = vmatmul.msk.bf16.gmra.mxu2 %vm1007_vm1, %v5877_v62  ;;  %v4329_v62 = vcvt.s32.f32 %v4327_v35 }
0x1423   : > { %v5608_v8 = vpop.f32.mrf.mxu0  ;;  %v4418_v33 = vshra.s32 %v13140_v60, 16 }
0x1424   : > { %v5760_v59 = vadd.f32 %v5608_v8, %v12677_v46  ;;  %v4342_v8 = vand.u32 65535, %v13082_v32  ;;  %v4357_v32 = vand.u32 65535, %v13101_v3 }
0x1425   : > { %v13144_v21 = vcvt.s32.f32 %v4418_v33 }
0x1426   : > { %v5824_v0 = vmax.f32 %v5760_v59, 0.0  ;;  %v4344_v59 = vcvt.s32.f32 %v4342_v8  ;;  %v4372_v8 = vand.u32 65535, %v13109_v1 }
0x1427   : > { %4421 = vmin.xlane.f32.xlu0 %v13144_v21 }
0x142b   : > { %v5611_v10 = vpop.f32.mrf.mxu0 }
0x142c   : > { %v5761_v7 = vadd.f32 %v5611_v10, %v12680_v53 }
0x142e   : > { %v5825_v18 = vmax.f32 %v5761_v7, 0.0 }
0x1430   : > { %v5878_v16 = vpack.c.bf16 %v5825_v18, %v5824_v0 }
0x1432   : > { %8983 = vmatmul.msk.bf16.gmra.mxu2 %vm1007_vm1, %v5878_v16 }
0x1433   : > { %v5614_v7 = vpop.f32.mrf.mxu0 }
0x1434   : > { %v5762_v35 = vadd.f32 %v5614_v7, %v12450_v45 }
0x1436   : > { %v5826_v3 = vmax.f32 %v5762_v35, 0.0 }
0x1475   : > { %v13151_v40 = vpop.xlane.xlu0 %4331 }
0x1476   : > { %vm4333_vm6 = vcmp.eq.f32.partialorder %v13076_v58, %v13151_v40 }
0x1477   : > { %v4334_v12 = vsel %vm4333_vm6, %v4329_v62, inf }
0x1478   : > { %4335 = vmin.xlane.f32.xlu2 %v4334_v12 }
0x147d   : > { %v13156_v33 = vpop.xlane.xlu2 %4346  ;;  %v4309_v10 = vpop.xlane.xlu0 %4308 }
0x147e   : > { %vm4317_vm7 = vcmp.eq.f32.partialorder %v13088_v5, %v4309_v10  ;;  %vm4348_vm8 = vcmp.eq.f32.partialorder %v13090_v23, %v13156_v33  ;;  %v4359_v23 = vcvt.s32.f32 %v4357_v32  ;;  %v4353_v29 = vcvt.f32.s32 %v13156_v33 }
0x147f   : > { %v4325_v27 = vsel %vm4317_vm7, %v10356_v19, 64  ;;  %v4349_v0 = vsel %vm4348_vm8, %v4344_v59, inf }
0x1480   : > { %v13163_v18 = vsel %vm1007_vm1, %v4325_v27, 2147483647  ;;  %4350 = vmin.xlane.f32.xlu1 %v4349_v0  ;;  %v4387_v0 = vand.u32 65535, %v13117_v34  ;;  %v4402_v34 = vand.u32 65535, %v13129_v54 }
0x1481   : > { %v4433_v58 = vshra.s32 %v13163_v18, 16 }
0x1482   : > { %v4389_v1 = vcvt.s32.f32 %v4387_v0 }
0x1483   : > { %v13167_v16 = vcvt.s32.f32 %v4433_v58  ;;  %v4374_v58 = vcvt.s32.f32 %v4372_v8 }
0x1485   : > { %v13170_v62 = vpop.xlane.xlu1 %4361  ;;  %4436 = vmin.xlane.f32.xlu2 %v13167_v16 }
0x1486   : > { %v5617_v12 = vpop.f32.mrf.mxu0  ;;  %vm4363_vm9 = vcmp.eq.f32.partialorder %v13105_v30, %v13170_v62  ;;  %v4368_v33 = vcvt.f32.s32 %v13170_v62 }
0x1487   : > { %v5763_v10 = vadd.f32 %v5617_v12, %v12704_v51  ;;  %v4364_v59 = vsel %vm4363_vm9, %v4359_v23, inf  ;;  %v4404_v12 = vcvt.s32.f32 %v4402_v34 }
0x1488   : > { %4365 = vmin.xlane.f32.xlu0 %v4364_v59 }
0x1489   : > { %v5827_v27 = vmax.f32 %v5763_v10, 0.0  ;;  %v4417_v10 = vand.u32 65535, %v13140_v60 }
0x148a   : > { %v13178_v7 = vpop.xlane.xlu2 %4376 }
0x148b   : > { %v5879_v4 = vpack.c.bf16 %v5827_v27, %v5826_v3  ;;  %vm4378_vm10 = vcmp.eq.f32.partialorder %v13119_v41, %v13178_v7  ;;  %v4419_v59 = vcvt.s32.f32 %v4417_v10 }
0x148c   : > { %v4379_v32 = vsel %vm4378_vm10, %v4374_v58, inf }
0x148d   : > { %8984 = vmatmul.msk.bf16.gmra.mxu2 %vm1007_vm1, %v5879_v4  ;;  %4380 = vmin.xlane.f32.xlu1 %v4379_v32  ;;  %v13185_v30 = vpop.xlane.xlu0 %4391  ;;  %v4338_v32 = vcvt.f32.s32 %v13151_v40  ;;  %v4354_v40 = vshll.u32 %v4353_v29, 16 }
0x148e   : > { %vm4393_vm11 = vcmp.eq.f32.partialorder %v13124_v2, %v13185_v30 }
0x148f   : > { %v4394_v35 = vsel %vm4393_vm11, %v4389_v1, inf  ;;  %v4339_v34 = vshll.u32 %v4338_v32, 16 }
0x1490   : > { %4395 = vmin.xlane.f32.xlu2 %v4394_v35 }
0x1492   : > { %v13190_v23 = vpop.xlane.xlu1 %4406 }
0x1493   : > { %vm4408_vm0 = vcmp.eq.f32.partialorder %v13134_v39, %v13190_v23 }
0x1494   : > { %v4409_v41 = vsel %vm4408_vm0, %v4404_v12, inf }
0x1495   : > { %v6052_v8 = vpop.f32.mrf.mxu2  ;;  %4410 = vmin.xlane.f32.xlu0 %v4409_v41 }
0x1496   : > { %v6053_v4 = vadd.f32 %v12941_v9, %v6052_v8  ;;  %v4432_v8 = vand.u32 65535, %v13163_v18 }
0x1498   : > { %v13199_v2 = vmax.f32 %v6172_v55, %v6053_v4 }
0x149a   : > { %v13201_v54 = vpop.xlane.xlu0 %4421 }
0x149b   : > { %vm4423_vm12 = vcmp.eq.f32.partialorder %v13144_v21, %v13201_v54  ;;  %v15246_v21 = vmax.f32 %v12975_v6, %v12978_v48 }
0x149c   : > { %v4424_v3 = vsel %vm4423_vm12, %v4419_v59, inf }
0x149d   : > { %v13205_v39 = vpop.f32.mrf.mxu2  ;;  %4425 = vmin.xlane.f32.xlu2 %v4424_v3 }
0x14a5   : > { %v6057_v27 = vpop.f32.mrf.mxu2 }
0x14a6   : > { %v6058_v0 = vadd.f32 %v12941_v9, %v6057_v27 }
0x14a8   : > { %v13211_v60 = vmax.f32 %v6174_v24, %v6058_v0  ;;  %v4369_v0 = vshll.u32 %v4368_v33, 16 }
0x14ad   : > { %v13213_v25 = vpop.f32.mrf.mxu2 }
0x14b5   : > { %v6062_v52 = vpop.f32.mrf.mxu2 }
0x14b6   : > { %v6063_v55 = vadd.f32 %v12941_v9, %v6062_v52 }
0x14b8   : > { %v13219_v58 = vmax.f32 %v15246_v21, %v6063_v55  ;;  %v4383_v55 = vcvt.f32.s32 %v13178_v7 }
0x14eb   : > { %v4336_v1 = vpop.xlane.xlu2 %4335 }
0x14ec   : > { %v4337_v35 = vcvt.f32.s32 %v4336_v1 }
0x14ee   : > { %v4340_v12 = vadd.s32 %v4339_v34, %v4337_v35 }
0x14f0   : > { %vm4446_vm13 = vcmp.eq.s32.totalorder %v10356_v19, %v4340_v12 }
0x14f1   : > { %v8861_v28 = vsel %vm4446_vm13, 1.0, %v15230_v31  ;;  %v13226_v24 = vsel %vm4446_vm13, 1e+30, %v12987_v20  ;;  %v4434_v20 = vcvt.s32.f32 %v4432_v8 }
0x14f2   : > { %8933 = vmatmul.msk.f32.gmra.mxu0 %vm1007_vm1, %v8861_v28  ;;  %v4478_v6 = vsel %vm1007_vm1, %v13226_v24, inf }
0x14f3   : > { %v4351_v48 = vpop.xlane.xlu1 %4350  ;;  %4479 = vmin.xlane.f32.xlu1 %v4478_v6  ;;  %v4413_v6 = vcvt.f32.s32 %v13190_v23 }
0x14f4   : > { %v4352_v41 = vcvt.f32.s32 %v4351_v48 }
0x14f6   : > { %v4355_v4 = vadd.s32 %v4354_v40, %v4352_v41  ;;  %v13262_v41 = vpop.f32.mrf.mxu2 }
0x14f7   : > { %15247 = vst [vmem:[#allocation34_spill] sm:$0xff] %v13262_v41 }
0x14f8   : > { %v13233_v10 = vpop.xlane.xlu2 %4436  ;;  %vm4447_vm14 = vcmp.eq.s32.totalorder %v10356_v19, %v4355_v4  ;;  %v4414_v4 = vshll.u32 %v4413_v6, 16 }
0x14f9   : > { %v8862_v59 = vsel %vm4447_vm14, 1.0, %v15230_v31  ;;  %v13238_v3 = vsel %vm4447_vm14, 1e+30, %v12999_v44  ;;  %vm4438_vm15 = vcmp.eq.f32.partialorder %v13167_v16, %v13233_v10  ;;  %v4398_v44 = vcvt.f32.s32 %v13185_v30 }
0x14fa   : > { %8934 = vmatmul.msk.f32.gmra.mxu0 %vm1007_vm1, %v8862_v59  ;;  %v4481_v18 = vsel %vm1007_vm1, %v13238_v3, inf  ;;  %v4439_v27 = vsel %vm4438_vm15, %v4434_v20, inf  ;;  %v4384_v16 = vshll.u32 %v4383_v55, 16 }
0x14fb   : > { %4482 = vmin.xlane.f32.xlu0 %v4481_v18  ;;  %4440 = vmin.xlane.f32.xlu1 %v4439_v27  ;;  %v4366_v62 = vpop.xlane.xlu0 %4365  ;;  %v4399_v28 = vshll.u32 %v4398_v44, 16  ;;  %v4428_v18 = vcvt.f32.s32 %v13201_v54 }
0x14fc   : > { %v4367_v52 = vcvt.f32.s32 %v4366_v62 }
0x14fe   : > { %v4370_v21 = vadd.s32 %v4369_v0, %v4367_v52  ;;  %v4429_v52 = vshll.u32 %v4428_v18, 16 }
0x1500   : > { %v4381_v32 = vpop.xlane.xlu1 %4380  ;;  %vm4448_vm2 = vcmp.eq.s32.totalorder %v10356_v19, %v4370_v21 }
0x1501   : > { %v4382_v1 = vcvt.f32.s32 %v4381_v32  ;;  %v8863_v34 = vsel %vm4448_vm2, 1.0, %v15230_v31  ;;  %v13250_v35 = vsel %vm4448_vm2, 1e+30, %v13011_v14 }
0x1502   : > { %8935 = vmatmul.msk.f32.gmra.mxu0 %vm1007_vm1, %v8863_v34  ;;  %v4484_v12 = vsel %vm1007_vm1, %v13250_v35, inf }
0x1503   : > { %v4385_v29 = vadd.s32 %v4384_v16, %v4382_v1  ;;  %v4396_v7 = vpop.xlane.xlu2 %4395  ;;  %4485 = vmin.xlane.f32.xlu2 %v4484_v12 }
0x1504   : > { %v4397_v30 = vcvt.f32.s32 %v4396_v7  ;;  %v4443_v7 = vcvt.f32.s32 %v13233_v10 }
0x1505   : > { %vm4449_vm3 = vcmp.eq.s32.totalorder %v10356_v19, %v4385_v29 }
0x1506   : > { %v4400_v48 = vadd.s32 %v4399_v28, %v4397_v30  ;;  %v13258_v40 = vsel %vm4449_vm3, 1e+30, %v13019_v61  ;;  %v8864_v20 = vsel %vm4449_vm3, 1.0, %v15230_v31 }
0x1507   : > { %v4487_v14 = vsel %vm1007_vm1, %v13258_v40, inf }
0x1508   : > { %4488 = vmin.xlane.f32.xlu0 %v4487_v14  ;;  %v4411_v8 = vpop.xlane.xlu0 %4410  ;;  %vm4450_vm4 = vcmp.eq.s32.totalorder %v10356_v19, %v4400_v48  ;;  %v4444_v48 = vshll.u32 %v4443_v7, 16 }
0x1509   : > { %v4412_v33 = vcvt.f32.s32 %v4411_v8  ;;  %v13269_v23 = vsel %vm4450_vm4, 1e+30, %v13030_v49  ;;  %v8865_v54 = vsel %vm4450_vm4, 1.0, %v15230_v31 }
0x150a   : > { %8936 = vmatmul.msk.f32.gmra.mxu0 %vm1007_vm1, %v8864_v20  ;;  %v4490_v61 = vsel %vm1007_vm1, %v13269_v23, inf }
0x150b   : > { %v4415_v59 = vadd.s32 %v4414_v4, %v4412_v33  ;;  %4491 = vmin.xlane.f32.xlu1 %v4490_v61 }
0x150d   : > { %vm4451_vm5 = vcmp.eq.s32.totalorder %v10356_v19, %v4415_v59 }
0x150e   : > { %v13279_v27 = vsel %vm4451_vm5, 1e+30, %v13040_v26  ;;  %v15248_v26 = vmax.f32 %v13046_v17, %v13049_v50  ;;  %v8866_v34 = vsel %vm4451_vm5, 1.0, %v15230_v31 }
0x150f   : > { %v4493_v49 = vsel %vm1007_vm1, %v13279_v27, inf }
0x1510   : > { %v6067_v62 = vpop.f32.mrf.mxu2  ;;  %v4426_v0 = vpop.xlane.xlu2 %4425  ;;  %4494 = vmin.xlane.f32.xlu2 %v4493_v49 }
0x1511   : > { %v6068_v55 = vadd.f32 %v12941_v9, %v6067_v62  ;;  %v4427_v21 = vcvt.f32.s32 %v4426_v0 }
0x1512   : > { %8937 = vmatmul.msk.f32.gmra.mxu0 %vm1007_vm1, %v8865_v54 }
0x1513   : > { %v13291_v44 = vmax.f32 %v15248_v26, %v6068_v55  ;;  %v4430_v32 = vadd.s32 %v4429_v52, %v4427_v21 }
0x1515   : > { %vm4452_vm6 = vcmp.eq.s32.totalorder %v10356_v19, %v4430_v32 }
0x1516   : > { %v13295_v16 = vsel %vm4452_vm6, 1e+30, %v13059_v47  ;;  %v8867_v17 = vsel %vm4452_vm6, 1.0, %v15230_v31 }
0x1517   : > { %v4496_v1 = vsel %vm1007_vm1, %v13295_v16, inf }
0x1518   : > { %4497 = vmin.xlane.f32.xlu1 %v4496_v1 }
0x151a   : > { %8938 = vmatmul.msk.f32.gmra.mxu0 %vm1007_vm1, %v8866_v34 }
0x1522   : > { %8939 = vmatmul.msk.f32.gmra.mxu0 %vm1007_vm1, %v8867_v17 }
0x1566   : > { %v4480_v50 = vpop.xlane.xlu1 %4479 }
0x1567   : > { %vm4502_vm7 = vcmp.eq.f32.partialorder %v13226_v24, %v4480_v50 }
0x1568   : > { %v4510_v47 = vsel %vm4502_vm7, %v10356_v19, 64 }
0x1569   : > { %v13308_v12 = vsel %vm1007_vm1, %v4510_v47, 2147483647 }
0x156a   : > { %v4520_v29 = vshra.s32 %v13308_v12, 16 }
0x156c   : > { %v13312_v28 = vcvt.s32.f32 %v4520_v29 }
0x156e   : > { %4523 = vmin.xlane.f32.xlu0 %v13312_v28  ;;  %v4441_v30 = vpop.xlane.xlu1 %4440  ;;  %v4483_v6 = vpop.xlane.xlu0 %4482 }
0x156f   : > { %v4442_v14 = vcvt.f32.s32 %v4441_v30  ;;  %vm4503_vm8 = vcmp.eq.f32.partialorder %v13238_v3, %v4483_v6  ;;  %v5620_v8 = vpop.f32.mrf.mxu0 }
0x1570   : > { %v4511_v4 = vsel %vm4503_vm8, %v10356_v19, 64  ;;  %v5764_v62 = vadd.f32 %v5620_v8, %v12596_v57 }
0x1571   : > { %v4445_v33 = vadd.s32 %v4444_v48, %v4442_v14  ;;  %v13318_v20 = vsel %vm1007_vm1, %v4511_v4, 2147483647 }
0x1572   : > { %v4535_v61 = vshra.s32 %v13318_v20, 16  ;;  %v5828_v54 = vmax.f32 %v5764_v62, 0.0 }
0x1573   : > { %vm4453_vm9 = vcmp.eq.s32.totalorder %v10356_v19, %v4445_v33 }
0x1574   : > { %v8868_v10 = vsel %vm4453_vm9, 1.0, %v15230_v31  ;;  %v13324_v59 = vsel %vm4453_vm9, 1e+30, %v13088_v5  ;;  %v13326_v18 = vcvt.s32.f32 %v4535_v61 }
0x1575   : > { %8940 = vmatmul.msk.f32.gmra.mxu0 %vm1007_vm1, %v8868_v10  ;;  %v4499_v49 = vsel %vm1007_vm1, %v13324_v59, inf }
0x1576   : > { %4500 = vmin.xlane.f32.xlu0 %v4499_v49  ;;  %v4486_v0 = vpop.xlane.xlu2 %4485  ;;  %4538 = vmin.xlane.f32.xlu2 %v13326_v18 }
0x1577   : > { %vm4504_vm10 = vcmp.eq.f32.partialorder %v13250_v35, %v4486_v0  ;;  %v5623_v52 = vpop.f32.mrf.mxu0 }
0x1578   : > { %v4512_v55 = vsel %vm4504_vm10, %v10356_v19, 64  ;;  %v5765_v5 = vadd.f32 %v5623_v52, %v12608_v36 }
0x1579   : > { %v13337_v21 = vsel %vm1007_vm1, %v4512_v55, 2147483647 }
0x157a   : > { %v5829_v26 = vmax.f32 %v5765_v5, 0.0  ;;  %v4550_v32 = vshra.s32 %v13337_v21, 16 }
0x157b   : > { %v4489_v1 = vpop.xlane.xlu0 %4488 }
0x157c   : > { %v5880_v34 = vpack.c.bf16 %v5829_v26, %v5828_v54  ;;  %vm4505_vm11 = vcmp.eq.f32.partialorder %v13258_v40, %v4489_v1  ;;  %v13341_v17 = vcvt.s32.f32 %v4550_v32 }
0x157d   : > { %v4513_v50 = vsel %vm4505_vm11, %v10356_v19, 64 }
0x157e   : > { %v13345_v47 = vsel %vm1007_vm1, %v4513_v50, 2147483647  ;;  %8985 = vmatmul.msk.bf16.gmra.mxu2 %vm1007_vm1, %v5880_v34  ;;  %v4492_v29 = vpop.xlane.xlu1 %4491  ;;  %4553 = vmin.xlane.f32.xlu1 %v13341_v17 }
0x157f   : > { %vm4506_vm0 = vcmp.eq.f32.partialorder %v13269_v23, %v4492_v29  ;;  %v5626_v7 = vpop.f32.mrf.mxu0  ;;  %v4565_v30 = vshra.s32 %v13345_v47, 16 }
0x1580   : > { %v4514_v6 = vsel %vm4506_vm0, %v10356_v19, 64  ;;  %v5766_v10 = vadd.f32 %v5626_v7, %v12649_v38 }
0x1581   : > { %v13353_v48 = vsel %vm1007_vm1, %v4514_v6, 2147483647  ;;  %v13355_v14 = vcvt.s32.f32 %v4565_v30 }
0x1582   : > { %v4580_v8 = vshra.s32 %v13353_v48, 16  ;;  %v5830_v5 = vmax.f32 %v5766_v10, 0.0 }
0x1583   : > { %v4495_v4 = vpop.xlane.xlu2 %4494  ;;  %4568 = vmin.xlane.f32.xlu2 %v13355_v14 }
0x1584   : > { %vm4507_vm12 = vcmp.eq.f32.partialorder %v13279_v27, %v4495_v4  ;;  %v13360_v33 = vcvt.s32.f32 %v4580_v8 }
0x1585   : > { %v4515_v61 = vsel %vm4507_vm12, %v10356_v19, 64 }
0x1586   : > { %v13365_v49 = vsel %vm1007_vm1, %v4515_v61, 2147483647  ;;  %4583 = vmin.xlane.f32.xlu0 %v13360_v33 }
0x1587   : > { %v5629_v62 = vpop.f32.mrf.mxu0  ;;  %v4595_v0 = vshra.s32 %v13365_v49, 16 }
0x1588   : > { %v5767_v52 = vadd.f32 %v5629_v62, %v12656_v63  ;;  %v4519_v62 = vand.u32 65535, %v13308_v12 }
0x1589   : > { %v13370_v55 = vcvt.s32.f32 %v4595_v0 }
0x158a   : > { %v5831_v54 = vmax.f32 %v5767_v52, 0.0  ;;  %v4521_v52 = vcvt.s32.f32 %v4519_v62 }
0x158b   : > { %v4498_v26 = vpop.xlane.xlu1 %4497  ;;  %4598 = vmin.xlane.f32.xlu1 %v13370_v55 }
0x158c   : > { %v5881_v32 = vpack.c.bf16 %v5831_v54, %v5830_v5  ;;  %vm4508_vm13 = vcmp.eq.f32.partialorder %v13295_v16, %v4498_v26  ;;  %v4534_v54 = vand.u32 65535, %v13318_v20  ;;  %v4549_v20 = vand.u32 65535, %v13337_v21 }
0x158d   : > { %v4516_v1 = vsel %vm4508_vm13, %v10356_v19, 64 }
0x158e   : > { %v13376_v34 = vsel %vm1007_vm1, %v4516_v1, 2147483647  ;;  %8986 = vmatmul.msk.bf16.gmra.mxu2 %vm1007_vm1, %v5881_v32  ;;  %v4536_v1 = vcvt.s32.f32 %v4534_v54  ;;  %v4579_v54 = vand.u32 65535, %v13353_v48  ;;  %v4594_v48 = vand.u32 65535, %v13365_v49 }
0x158f   : > { %v5632_v50 = vpop.f32.mrf.mxu0  ;;  %v4610_v29 = vshra.s32 %v13376_v34, 16 }
0x1590   : > { %v5768_v30 = vadd.f32 %v5632_v50, %v12677_v46 }
0x1591   : > { %v13380_v7 = vcvt.s32.f32 %v4610_v29 }
0x1592   : > { %v5832_v4 = vmax.f32 %v5768_v30, 0.0 }
0x1593   : > { %4613 = vmin.xlane.f32.xlu0 %v13380_v7 }
0x1597   : > { %v5635_v6 = vpop.f32.mrf.mxu0 }
0x1598   : > { %v5769_v8 = vadd.f32 %v5635_v6, %v12680_v53 }
0x159a   : > { %v5833_v61 = vmax.f32 %v5769_v8, 0.0 }
0x159c   : > { %v5882_v10 = vpack.c.bf16 %v5833_v61, %v5832_v4 }
0x159e   : > { %8987 = vmatmul.msk.bf16.gmra.mxu2 %vm1007_vm1, %v5882_v10  ;;  %v4564_v10 = vand.u32 65535, %v13345_v47  ;;  %v4581_v47 = vcvt.s32.f32 %v4579_v54 }
0x159f   : > { %v5638_v50 = vpop.f32.mrf.mxu0 }
0x15a0   : > { %v5770_v8 = vadd.f32 %v5638_v50, %v12450_v45 }
0x15a2   : > { %v5834_v21 = vmax.f32 %v5770_v8, 0.0  ;;  %v4596_v8 = vcvt.s32.f32 %v4594_v48 }
0x15e1   : > { %v13387_v0 = vpop.xlane.xlu0 %4523 }
0x15e2   : > { %vm4525_vm14 = vcmp.eq.f32.partialorder %v13312_v28, %v13387_v0 }
0x15e3   : > { %v4526_v5 = vsel %vm4525_vm14, %v4521_v52, inf }
0x15e4   : > { %4527 = vmin.xlane.f32.xlu2 %v4526_v5 }
0x15e9   : > { %v13392_v26 = vpop.xlane.xlu2 %4538  ;;  %v4501_v32 = vpop.xlane.xlu0 %4500 }
0x15ea   : > { %vm4509_vm15 = vcmp.eq.f32.partialorder %v13324_v59, %v4501_v32  ;;  %vm4540_vm2 = vcmp.eq.f32.partialorder %v13326_v18, %v13392_v26  ;;  %v4551_v18 = vcvt.s32.f32 %v4549_v20 }
0x15eb   : > { %v4517_v12 = vsel %vm4509_vm15, %v10356_v19, 64  ;;  %v4541_v29 = vsel %vm4540_vm2, %v4536_v1, inf  ;;  %v4566_v1 = vcvt.s32.f32 %v4564_v10  ;;  %v4609_v10 = vand.u32 65535, %v13376_v34 }
0x15ec   : > { %v13399_v30 = vsel %vm1007_vm1, %v4517_v12, 2147483647  ;;  %4542 = vmin.xlane.f32.xlu1 %v4541_v29  ;;  %v13418_v29 = vpop.f32.mrf.mxu2 }
0x15ed   : > { %v4625_v28 = vshra.s32 %v13399_v30, 16  ;;  %15249 = vst [vmem:[#allocation36_spill] sm:$0xff] %v13418_v29 }
0x15ef   : > { %v13403_v6 = vcvt.s32.f32 %v4625_v28 }
0x15f1   : > { %v13406_v4 = vpop.xlane.xlu1 %4553  ;;  %4628 = vmin.xlane.f32.xlu2 %v13403_v6 }
0x15f2   : > { %v5641_v61 = vpop.f32.mrf.mxu0  ;;  %vm4555_vm3 = vcmp.eq.f32.partialorder %v13341_v17, %v13406_v4 }
0x15f3   : > { %v5771_v62 = vadd.f32 %v5641_v61, %v12704_v51  ;;  %v4556_v52 = vsel %vm4555_vm3, %v4551_v18, inf }
0x15f4   : > { %4557 = vmin.xlane.f32.xlu0 %v4556_v52 }
0x15f5   : > { %v5835_v5 = vmax.f32 %v5771_v62, 0.0  ;;  %v4611_v62 = vcvt.s32.f32 %v4609_v10 }
0x15f6   : > { %v13414_v32 = vpop.xlane.xlu2 %4568 }
0x15f7   : > { %v5883_v50 = vpack.c.bf16 %v5835_v5, %v5834_v21  ;;  %vm4570_vm4 = vcmp.eq.f32.partialorder %v13355_v14, %v13414_v32 }
0x15f8   : > { %v4571_v12 = vsel %vm4570_vm4, %v4566_v1, inf }
0x15f9   : > { %8988 = vmatmul.msk.bf16.gmra.mxu2 %vm1007_vm1, %v5883_v50  ;;  %4572 = vmin.xlane.f32.xlu1 %v4571_v12  ;;  %v13421_v17 = vpop.xlane.xlu0 %4583  ;;  %v4530_v12 = vcvt.f32.s32 %v13387_v0 }
0x15fa   : > { %vm4585_vm5 = vcmp.eq.f32.partialorder %v13360_v33, %v13421_v17 }
0x15fb   : > { %v4586_v28 = vsel %vm4585_vm5, %v4581_v47, inf  ;;  %v4531_v48 = vshll.u32 %v4530_v12, 16 }
0x15fc   : > { %4587 = vmin.xlane.f32.xlu2 %v4586_v28 }
0x15fe   : > { %v13426_v20 = vpop.xlane.xlu1 %4598 }
0x15ff   : > { %vm4600_vm6 = vcmp.eq.f32.partialorder %v13370_v55, %v13426_v20 }
0x1600   : > { %v4601_v14 = vsel %vm4600_vm6, %v4596_v8, inf }
0x1601   : > { %v6072_v18 = vpop.f32.mrf.mxu2  ;;  %4602 = vmin.xlane.f32.xlu0 %v4601_v14  ;;  %v4545_v14 = vcvt.f32.s32 %v13392_v26  ;;  %v4560_v26 = vcvt.f32.s32 %v13406_v4 }
0x1602   : > { %v13431_v61 = vadd.f32 %v12941_v9, %v6072_v18 }
0x1603   : > { %v4546_v0 = vshll.u32 %v4545_v14, 16 }
0x1606   : > { %v13436_v49 = vpop.xlane.xlu0 %4613 }
0x1607   : > { %vm4615_vm7 = vcmp.eq.f32.partialorder %v13380_v7, %v13436_v49 }
0x1608   : > { %v4616_v52 = vsel %vm4615_vm7, %v4611_v62, inf }
0x1609   : > { %v13440_v21 = vpop.f32.mrf.mxu2  ;;  %4617 = vmin.xlane.f32.xlu2 %v4616_v52 }
0x1611   : > { %v6077_v55 = vpop.f32.mrf.mxu2 }
0x1612   : > { %v13443_v5 = vadd.f32 %v12941_v9, %v6077_v55  ;;  %v4624_v55 = vand.u32 65535, %v13399_v30 }
0x1619   : > { %v13447_v54 = vpop.f32.mrf.mxu2 }
0x1621   : > { %v6082_v1 = vpop.f32.mrf.mxu2 }
0x1622   : > { %v13450_v50 = vadd.f32 %v12941_v9, %v6082_v1 }
0x1657   : > { %v4528_v47 = vpop.xlane.xlu2 %4527 }
0x1658   : > { %v4529_v28 = vcvt.f32.s32 %v4528_v47 }
0x165a   : > { %v4532_v8 = vadd.s32 %v4531_v48, %v4529_v28 }
0x165c   : > { %vm4638_vm8 = vcmp.eq.s32.totalorder %v10356_v19, %v4532_v8  ;;  %v4561_v8 = vshll.u32 %v4560_v26, 16 }
0x165d   : > { %v8869_v18 = vsel %vm4638_vm8, 1.0, %v15230_v31  ;;  %v13459_v10 = vsel %vm4638_vm8, 1e+30, %v13226_v24  ;;  %v4626_v24 = vcvt.s32.f32 %v4624_v55 }
0x165e   : > { %8941 = vmatmul.msk.f32.gmra.mxu0 %vm1007_vm1, %v8869_v18  ;;  %v4670_v9 = vsel %vm1007_vm1, %v13459_v10, inf  ;;  %v4575_v18 = vcvt.f32.s32 %v13414_v32 }
0x165f   : > { %v4543_v62 = vpop.xlane.xlu1 %4542  ;;  %4671 = vmin.xlane.f32.xlu1 %v4670_v9 }
0x1660   : > { %v4544_v52 = vcvt.f32.s32 %v4543_v62 }
0x1662   : > { %v4547_v1 = vadd.s32 %v4546_v0, %v4544_v52 }
0x1664   : > { %v13466_v12 = vpop.xlane.xlu2 %4628  ;;  %vm4639_vm9 = vcmp.eq.s32.totalorder %v10356_v19, %v4547_v1 }
0x1665   : > { %v8870_v47 = vsel %vm4639_vm9, 1.0, %v15230_v31  ;;  %v13471_v48 = vsel %vm4639_vm9, 1e+30, %v13238_v3  ;;  %vm4630_vm10 = vcmp.eq.f32.partialorder %v13403_v6, %v13466_v12  ;;  %v4590_v3 = vcvt.f32.s32 %v13421_v17 }
0x1666   : > { %8942 = vmatmul.msk.f32.gmra.mxu0 %vm1007_vm1, %v8870_v47  ;;  %v4673_v30 = vsel %vm1007_vm1, %v13471_v48, inf  ;;  %v4631_v28 = vsel %vm4630_vm10, %v4626_v24, inf  ;;  %v4576_v6 = vshll.u32 %v4575_v18, 16  ;;  %v4605_v47 = vcvt.f32.s32 %v13426_v20 }
0x1667   : > { %4674 = vmin.xlane.f32.xlu0 %v4673_v30  ;;  %4632 = vmin.xlane.f32.xlu1 %v4631_v28  ;;  %v4558_v4 = vpop.xlane.xlu0 %4557  ;;  %v4591_v24 = vshll.u32 %v4590_v3, 16 }
0x1668   : > { %v4559_v14 = vcvt.f32.s32 %v4558_v4  ;;  %v13495_v4 = vpop.f32.mrf.mxu2 }
0x1669   : > { %15250 = vst [vmem:[#allocation37_spill] sm:$0xff] %v13495_v4 }
0x166a   : > { %v4562_v9 = vadd.s32 %v4561_v8, %v4559_v14  ;;  %v4606_v14 = vshll.u32 %v4605_v47, 16 }
0x166c   : > { %v4573_v62 = vpop.xlane.xlu1 %4572  ;;  %vm4640_vm11 = vcmp.eq.s32.totalorder %v10356_v19, %v4562_v9 }
0x166d   : > { %v4574_v0 = vcvt.f32.s32 %v4573_v62  ;;  %v8871_v52 = vsel %vm4640_vm11, 1.0, %v15230_v31  ;;  %v13483_v55 = vsel %vm4640_vm11, 1e+30, %v13250_v35  ;;  %v4620_v62 = vcvt.f32.s32 %v13436_v49 }
0x166e   : > { %8943 = vmatmul.msk.f32.gmra.mxu0 %vm1007_vm1, %v8871_v52  ;;  %v4676_v1 = vsel %vm1007_vm1, %v13483_v55, inf }
0x166f   : > { %v4577_v26 = vadd.s32 %v4576_v6, %v4574_v0  ;;  %v4588_v32 = vpop.xlane.xlu2 %4587  ;;  %4677 = vmin.xlane.f32.xlu2 %v4676_v1  ;;  %v4621_v1 = vshll.u32 %v4620_v62, 16 }
0x1670   : > { %v4589_v17 = vcvt.f32.s32 %v4588_v32 }
0x1671   : > { %vm4641_vm0 = vcmp.eq.s32.totalorder %v10356_v19, %v4577_v26  ;;  %v13519_v26 = vld [vmem:[%s15161_s10] ss:$0 sm:$0xff] }
0x1672   : > { %v4592_v30 = vadd.s32 %v4591_v24, %v4589_v17  ;;  %v13491_v28 = vsel %vm4641_vm0, 1e+30, %v13258_v40  ;;  %v8872_v9 = vsel %vm4641_vm0, 1.0, %v15230_v31 }
0x1673   : > { %v4679_v35 = vsel %vm1007_vm1, %v13491_v28, inf }
0x1674   : > { %4680 = vmin.xlane.f32.xlu0 %v4679_v35  ;;  %v4603_v8 = vpop.xlane.xlu0 %4602  ;;  %vm4642_vm12 = vcmp.eq.s32.totalorder %v10356_v19, %v4592_v30 }
0x1675   : > { %v4604_v18 = vcvt.f32.s32 %v4603_v8  ;;  %v13502_v20 = vsel %vm4642_vm12, 1e+30, %v13269_v23 }
0x1676   : > { %8944 = vmatmul.msk.f32.gmra.mxu0 %vm1007_vm1, %v8872_v9  ;;  %v4682_v40 = vsel %vm1007_vm1, %v13502_v20, inf }
0x1677   : > { %v4607_v3 = vadd.s32 %v4606_v14, %v4604_v18  ;;  %4683 = vmin.xlane.f32.xlu1 %v4682_v40  ;;  %v4635_v40 = vcvt.f32.s32 %v13466_v12 }
0x1679   : > { %vm4643_vm13 = vcmp.eq.s32.totalorder %v10356_v19, %v4607_v3 }
0x167a   : > { %v13512_v6 = vsel %vm4643_vm13, 1e+30, %v13279_v27  ;;  %v8873_v27 = vsel %vm4642_vm12, 1.0, %v15230_v31  ;;  %v8874_v30 = vsel %vm4643_vm13, 1.0, %v15230_v31 }
0x167b   : > { %v4685_v23 = vsel %vm1007_vm1, %v13512_v6, inf }
0x167c   : > { %v6087_v0 = vpop.f32.mrf.mxu2  ;;  %v4618_v52 = vpop.xlane.xlu2 %4617  ;;  %4686 = vmin.xlane.f32.xlu2 %v4685_v23 }
0x167d   : > { %v13522_v49 = vadd.f32 %v13519_v26, %v6087_v0  ;;  %v4619_v32 = vcvt.f32.s32 %v4618_v52  ;;  %v4636_v0 = vshll.u32 %v4635_v40, 16 }
0x167e   : > { %8945 = vmatmul.msk.f32.gmra.mxu0 %vm1007_vm1, %v8873_v27 }
0x167f   : > { %v4622_v17 = vadd.s32 %v4621_v1, %v4619_v32 }
0x1681   : > { %vm4644_vm14 = vcmp.eq.s32.totalorder %v10356_v19, %v4622_v17 }
0x1682   : > { %v13532_v47 = vsel %vm4644_vm14, 1e+30, %v13295_v16  ;;  %v8875_v8 = vsel %vm4644_vm14, 1.0, %v15230_v31 }
0x1683   : > { %v4688_v35 = vsel %vm1007_vm1, %v13532_v47, inf }
0x1684   : > { %4689 = vmin.xlane.f32.xlu1 %v4688_v35  ;;  %v13655_v13 = vpop.f32.mrf.mxu2 }
0x1686   : > { %8946 = vmatmul.msk.f32.gmra.mxu0 %vm1007_vm1, %v8874_v30 }
0x168e   : > { %8947 = vmatmul.msk.f32.gmra.mxu0 %vm1007_vm1, %v8875_v8 }
0x16d2   : > { %v4672_v14 = vpop.xlane.xlu1 %4671 }
0x16d3   : > { %vm4694_vm15 = vcmp.eq.f32.partialorder %v13459_v10, %v4672_v14 }
0x16d4   : > { %v4702_v16 = vsel %vm4694_vm15, %v10356_v19, 64 }
0x16d5   : > { %v13545_v18 = vsel %vm1007_vm1, %v4702_v16, 2147483647 }
0x16d6   : > { %v4712_v9 = vshra.s32 %v13545_v18, 16 }
0x16d8   : > { %v13549_v3 = vcvt.s32.f32 %v4712_v9 }
0x16da   : > { %4715 = vmin.xlane.f32.xlu0 %v13549_v3  ;;  %v4633_v62 = vpop.xlane.xlu1 %4632  ;;  %v4675_v23 = vpop.xlane.xlu0 %4674 }
0x16db   : > { %v4634_v52 = vcvt.f32.s32 %v4633_v62  ;;  %vm4695_vm2 = vcmp.eq.f32.partialorder %v13471_v48, %v4675_v23  ;;  %v5644_v1 = vpop.f32.mrf.mxu0 }
0x16dc   : > { %v4703_v32 = vsel %vm4695_vm2, %v10356_v19, 64  ;;  %v5772_v16 = vadd.f32 %v5644_v1, %v12596_v57 }
0x16dd   : > { %v4637_v27 = vadd.s32 %v4636_v0, %v4634_v52  ;;  %v13555_v17 = vsel %vm1007_vm1, %v4703_v32, 2147483647 }
0x16de   : > { %v4727_v35 = vshra.s32 %v13555_v17, 16  ;;  %v5836_v0 = vmax.f32 %v5772_v16, 0.0 }
0x16df   : > { %vm4645_vm3 = vcmp.eq.s32.totalorder %v10356_v19, %v4637_v27 }
0x16e0   : > { %v8876_v12 = vsel %vm4645_vm3, 1.0, %v15230_v31  ;;  %v13561_v30 = vsel %vm4645_vm3, 1e+30, %v13324_v59  ;;  %v13563_v8 = vcvt.s32.f32 %v4727_v35 }
0x16e1   : > { %8948 = vmatmul.msk.f32.gmra.mxu0 %vm1007_vm1, %v8876_v12  ;;  %v4691_v14 = vsel %vm1007_vm1, %v13561_v30, inf }
0x16e2   : > { %4692 = vmin.xlane.f32.xlu0 %v4691_v14  ;;  %v4678_v9 = vpop.xlane.xlu2 %4677  ;;  %4730 = vmin.xlane.f32.xlu2 %v13563_v8 }
0x16e3   : > { %vm4696_vm4 = vcmp.eq.f32.partialorder %v13483_v55, %v4678_v9  ;;  %v5647_v40 = vpop.f32.mrf.mxu0 }
0x16e4   : > { %v4704_v62 = vsel %vm4696_vm4, %v10356_v19, 64  ;;  %v5773_v59 = vadd.f32 %v5647_v40, %v12608_v36 }
0x16e5   : > { %v13574_v23 = vsel %vm1007_vm1, %v4704_v62, 2147483647 }
0x16e6   : > { %v5837_v52 = vmax.f32 %v5773_v59, 0.0  ;;  %v4742_v32 = vshra.s32 %v13574_v23, 16 }
0x16e7   : > { %v4681_v27 = vpop.xlane.xlu0 %4680 }
0x16e8   : > { %v5884_v1 = vpack.c.bf16 %v5837_v52, %v5836_v0  ;;  %vm4697_vm5 = vcmp.eq.f32.partialorder %v13491_v28, %v4681_v27  ;;  %v13578_v35 = vcvt.s32.f32 %v4742_v32 }
0x16e9   : > { %v4705_v12 = vsel %vm4697_vm5, %v10356_v19, 64 }
0x16ea   : > { %v13582_v14 = vsel %vm1007_vm1, %v4705_v12, 2147483647  ;;  %8989 = vmatmul.msk.bf16.gmra.mxu2 %vm1007_vm1, %v5884_v1  ;;  %v4684_v9 = vpop.xlane.xlu1 %4683  ;;  %4745 = vmin.xlane.f32.xlu1 %v13578_v35 }
0x16eb   : > { %vm4698_vm6 = vcmp.eq.f32.partialorder %v13502_v20, %v4684_v9  ;;  %v5650_v16 = vpop.f32.mrf.mxu0  ;;  %v4757_v40 = vshra.s32 %v13582_v14, 16 }
0x16ec   : > { %v4706_v62 = vsel %vm4698_vm6, %v10356_v19, 64  ;;  %v5774_v12 = vadd.f32 %v5650_v16, %v12649_v38 }
0x16ed   : > { %v13590_v59 = vsel %vm1007_vm1, %v4706_v62, 2147483647  ;;  %v13592_v0 = vcvt.s32.f32 %v4757_v40 }
0x16ee   : > { %v4772_v52 = vshra.s32 %v13590_v59, 16  ;;  %v5838_v34 = vmax.f32 %v5774_v12, 0.0 }
0x16ef   : > { %v4687_v32 = vpop.xlane.xlu2 %4686  ;;  %4760 = vmin.xlane.f32.xlu2 %v13592_v0 }
0x16f0   : > { %vm4699_vm7 = vcmp.eq.f32.partialorder %v13512_v6, %v4687_v32  ;;  %v13597_v27 = vcvt.s32.f32 %v4772_v52 }
0x16f1   : > { %v4707_v1 = vsel %vm4699_vm7, %v10356_v19, 64 }
0x16f2   : > { %v13602_v9 = vsel %vm1007_vm1, %v4707_v1, 2147483647  ;;  %4775 = vmin.xlane.f32.xlu0 %v13597_v27 }
0x16f3   : > { %v5653_v40 = vpop.f32.mrf.mxu0  ;;  %v4787_v62 = vshra.s32 %v13602_v9, 16 }
0x16f4   : > { %v5775_v24 = vadd.f32 %v5653_v40, %v12656_v63 }
0x16f5   : > { %v13607_v7 = vcvt.s32.f32 %v4787_v62 }
0x16f6   : > { %v5839_v32 = vmax.f32 %v5775_v24, 0.0 }
0x16f7   : > { %v4690_v52 = vpop.xlane.xlu1 %4689  ;;  %4790 = vmin.xlane.f32.xlu1 %v13607_v7 }
0x16f8   : > { %v5885_v33 = vpack.c.bf16 %v5839_v32, %v5838_v34  ;;  %vm4700_vm8 = vcmp.eq.f32.partialorder %v13532_v47, %v4690_v52 }
0x16f9   : > { %v4708_v16 = vsel %vm4700_vm8, %v10356_v19, 64 }
0x16fa   : > { %v13613_v1 = vsel %vm1007_vm1, %v4708_v16, 2147483647  ;;  %8990 = vmatmul.msk.bf16.gmra.mxu2 %vm1007_vm1, %v5885_v33  ;;  %v4711_v16 = vand.u32 65535, %v13545_v18 }
0x16fb   : > { %v5656_v29 = vpop.f32.mrf.mxu0  ;;  %v4802_v40 = vshra.s32 %v13613_v1, 16 }
0x16fc   : > { %v5776_v24 = vadd.f32 %v5656_v29, %v12677_v46  ;;  %v4713_v15 = vcvt.s32.f32 %v4711_v16  ;;  %v4726_v29 = vand.u32 65535, %v13555_v17 }
0x16fd   : > { %v13617_v62 = vcvt.s32.f32 %v4802_v40 }
0x16fe   : > { %v5840_v32 = vmax.f32 %v5776_v24, 0.0  ;;  %v4728_v24 = vcvt.s32.f32 %v4726_v29  ;;  %v4756_v29 = vand.u32 65535, %v13582_v14 }
0x16ff   : > { %4805 = vmin.xlane.f32.xlu0 %v13617_v62 }
0x1703   : > { %v5659_v12 = vpop.f32.mrf.mxu0 }
0x1704   : > { %v5777_v34 = vadd.f32 %v5659_v12, %v12680_v53 }
0x1706   : > { %v5841_v52 = vmax.f32 %v5777_v34, 0.0 }
0x1708   : > { %v5886_v43 = vpack.c.bf16 %v5841_v52, %v5840_v32 }
0x170a   : > { %8991 = vmatmul.msk.bf16.gmra.mxu2 %vm1007_vm1, %v5886_v43 }
0x170b   : > { %v5662_v34 = vpop.f32.mrf.mxu0 }
0x170c   : > { %v5778_v52 = vadd.f32 %v5662_v34, %v12450_v45 }
0x174d   : > { %v13624_v33 = vpop.xlane.xlu0 %4715 }
0x174e   : > { %vm4717_vm9 = vcmp.eq.f32.partialorder %v13549_v3, %v13624_v33  ;;  %v4741_v3 = vand.u32 65535, %v13574_v23  ;;  %v5842_v23 = vmax.f32 %v5778_v52, 0.0 }
0x174f   : > { %v4718_v40 = vsel %vm4717_vm9, %v4713_v15, inf }
0x1750   : > { %4719 = vmin.xlane.f32.xlu2 %v4718_v40 }
0x1755   : > { %v13629_v4 = vpop.xlane.xlu2 %4730  ;;  %v4693_v12 = vpop.xlane.xlu0 %4692 }
0x1756   : > { %vm4701_vm10 = vcmp.eq.f32.partialorder %v13561_v30, %v4693_v12  ;;  %vm4732_vm11 = vcmp.eq.f32.partialorder %v13563_v8, %v13629_v4  ;;  %v4743_v8 = vcvt.s32.f32 %v4741_v3 }
0x1757   : > { %v4709_v43 = vsel %vm4701_vm10, %v10356_v19, 64  ;;  %v4733_v18 = vsel %vm4732_vm11, %v4728_v24, inf }
0x1758   : > { %v13636_v32 = vsel %vm1007_vm1, %v4709_v43, 2147483647  ;;  %4734 = vmin.xlane.f32.xlu1 %v4733_v18  ;;  %v4771_v18 = vand.u32 65535, %v13590_v59  ;;  %v4786_v59 = vand.u32 65535, %v13602_v9 }
0x1759   : > { %v4817_v15 = vshra.s32 %v13636_v32, 16 }
0x175a   : > { %v4773_v14 = vcvt.s32.f32 %v4771_v18 }
0x175b   : > { %v13640_v17 = vcvt.s32.f32 %v4817_v15  ;;  %v4758_v15 = vcvt.s32.f32 %v4756_v29 }
0x175d   : > { %v13643_v16 = vpop.xlane.xlu1 %4745  ;;  %4820 = vmin.xlane.f32.xlu2 %v13640_v17 }
0x175e   : > { %v5665_v40 = vpop.f32.mrf.mxu0  ;;  %vm4747_vm0 = vcmp.eq.f32.partialorder %v13578_v35, %v13643_v16 }
0x175f   : > { %v5779_v12 = vadd.f32 %v5665_v40, %v12704_v51  ;;  %v4748_v24 = vsel %vm4747_vm0, %v4743_v8, inf  ;;  %v4788_v40 = vcvt.s32.f32 %v4786_v59 }
0x1760   : > { %4749 = vmin.xlane.f32.xlu0 %v4748_v24 }
0x1761   : > { %v5843_v43 = vmax.f32 %v5779_v12, 0.0  ;;  %v4801_v12 = vand.u32 65535, %v13613_v1  ;;  %v15252_v1 = vmax.f32 %v13211_v60, %v13443_v5  ;;  %v4737_v60 = vcvt.f32.s32 %v13629_v4 }
0x1762   : > { %v13651_v34 = vpop.xlane.xlu2 %4760  ;;  %v4752_v4 = vcvt.f32.s32 %v13643_v16 }
0x1763   : > { %v5887_v41 = vpack.c.bf16 %v5843_v43, %v5842_v23  ;;  %vm4762_vm12 = vcmp.eq.f32.partialorder %v13592_v0, %v13651_v34  ;;  %v4803_v23 = vcvt.s32.f32 %v4801_v12 }
0x1764   : > { %v4763_v3 = vsel %vm4762_vm12, %v4758_v15, inf }
0x1765   : > { %8992 = vmatmul.msk.bf16.gmra.mxu2 %vm1007_vm1, %v5887_v41  ;;  %4764 = vmin.xlane.f32.xlu1 %v4763_v3  ;;  %v13658_v35 = vpop.xlane.xlu0 %4775 }
0x1766   : > { %vm4777_vm13 = vcmp.eq.f32.partialorder %v13597_v27, %v13658_v35  ;;  %v15251_v27 = vmax.f32 %v13199_v2, %v13431_v61 }
0x1767   : > { %v4778_v52 = vsel %vm4777_vm13, %v4773_v14, inf }
0x1768   : > { %4779 = vmin.xlane.f32.xlu2 %v4778_v52  ;;  %v4722_v52 = vcvt.f32.s32 %v13624_v33  ;;  %v4738_v33 = vshll.u32 %v4737_v60, 16 }
0x176a   : > { %v13663_v8 = vpop.xlane.xlu1 %4790 }
0x176b   : > { %vm4792_vm14 = vcmp.eq.f32.partialorder %v13607_v7, %v13663_v8 }
0x176c   : > { %v4793_v0 = vsel %vm4792_vm14, %v4788_v40, inf }
0x176d   : > { %v6092_v29 = vpop.f32.mrf.mxu2  ;;  %4794 = vmin.xlane.f32.xlu0 %v4793_v0  ;;  %v4723_v0 = vshll.u32 %v4722_v52, 16  ;;  %v4767_v52 = vcvt.f32.s32 %v13651_v34 }
0x176e   : > { %v6093_v41 = vadd.f32 %v13519_v26, %v6092_v29 }
0x1770   : > { %v13672_v24 = vmax.f32 %v15251_v27, %v6093_v41 }
0x1772   : > { %v13674_v9 = vpop.xlane.xlu0 %4805 }
0x1773   : > { %vm4807_vm15 = vcmp.eq.f32.partialorder %v13617_v62, %v13674_v9  ;;  %v15253_v62 = vmax.f32 %v13219_v58, %v13450_v50 }
0x1774   : > { %v4808_v43 = vsel %vm4807_vm15, %v4803_v23, inf  ;;  %v4816_v23 = vand.u32 65535, %v13636_v32 }
0x1775   : > { %v13678_v7 = vpop.f32.mrf.mxu2  ;;  %4809 = vmin.xlane.f32.xlu2 %v4808_v43 }
0x177d   : > { %v6097_v18 = vpop.f32.mrf.mxu2 }
0x177e   : > { %v6098_v15 = vadd.f32 %v13519_v26, %v6097_v18 }
0x1780   : > { %v13684_v3 = vmax.f32 %v15252_v1, %v6098_v15 }
0x1785   : > { %v13686_v2 = vpop.f32.mrf.mxu2 }
0x178d   : > { %v6102_v61 = vpop.f32.mrf.mxu2 }
0x178e   : > { %v6103_v14 = vadd.f32 %v13519_v26, %v6102_v61 }
0x1790   : > { %v13692_v59 = vmax.f32 %v15253_v62, %v6103_v14  ;;  %v4753_v14 = vshll.u32 %v4752_v4, 16 }
0x17c3   : > { %v4720_v40 = vpop.xlane.xlu2 %4719 }
0x17c4   : > { %v4721_v29 = vcvt.f32.s32 %v4720_v40 }
0x17c6   : > { %v4724_v41 = vadd.s32 %v4723_v0, %v4721_v29 }
0x17c8   : > { %vm4830_vm2 = vcmp.eq.s32.totalorder %v10356_v19, %v4724_v41 }
0x17c9   : > { %v8877_v5 = vsel %vm4830_vm2, 1.0, %v15230_v31  ;;  %v13699_v12 = vsel %vm4830_vm2, 1e+30, %v13459_v10  ;;  %v4818_v10 = vcvt.s32.f32 %v4816_v23 }
0x17ca   : > { %8949 = vmatmul.msk.f32.gmra.mxu0 %vm1007_vm1, %v8877_v5  ;;  %v4862_v58 = vsel %vm1007_vm1, %v13699_v12, inf }
0x17cb   : > { %v4735_v50 = vpop.xlane.xlu1 %4734  ;;  %4863 = vmin.xlane.f32.xlu1 %v4862_v58 }
0x17cc   : > { %v4736_v27 = vcvt.f32.s32 %v4735_v50 }
0x17ce   : > { %v4739_v43 = vadd.s32 %v4738_v33, %v4736_v27  ;;  %v4797_v33 = vcvt.f32.s32 %v13663_v8 }
0x17d0   : > { %v13706_v18 = vpop.xlane.xlu2 %4820  ;;  %vm4831_vm3 = vcmp.eq.s32.totalorder %v10356_v19, %v4739_v43  ;;  %v13735_v43 = vpop.f32.mrf.mxu2 }
0x17d1   : > { %v8878_v15 = vsel %vm4831_vm3, 1.0, %v15230_v31  ;;  %v13711_v1 = vsel %vm4831_vm3, 1e+30, %v13471_v48  ;;  %vm4822_vm4 = vcmp.eq.f32.partialorder %v13640_v17, %v13706_v18  ;;  %v4782_v48 = vcvt.f32.s32 %v13658_v35 }
0x17d2   : > { %8950 = vmatmul.msk.f32.gmra.mxu0 %vm1007_vm1, %v8878_v15  ;;  %v4865_v32 = vsel %vm1007_vm1, %v13711_v1, inf  ;;  %v4823_v61 = vsel %vm4822_vm4, %v4818_v10, inf  ;;  %v4768_v17 = vshll.u32 %v4767_v52, 16  ;;  %v4798_v10 = vshll.u32 %v4797_v33, 16 }
0x17d3   : > { %4866 = vmin.xlane.f32.xlu0 %v4865_v32  ;;  %4824 = vmin.xlane.f32.xlu1 %v4823_v61  ;;  %v4750_v16 = vpop.xlane.xlu0 %4749  ;;  %v4783_v50 = vshll.u32 %v4782_v48, 16 }
0x17d4   : > { %v4751_v62 = vcvt.f32.s32 %v4750_v16  ;;  %v4812_v16 = vcvt.f32.s32 %v13674_v9 }
0x17d6   : > { %v4754_v40 = vadd.s32 %v4753_v14, %v4751_v62 }
0x17d8   : > { %v4765_v0 = vpop.xlane.xlu1 %4764  ;;  %vm4832_vm5 = vcmp.eq.s32.totalorder %v10356_v19, %v4754_v40  ;;  %v4813_v40 = vshll.u32 %v4812_v16, 16 }
0x17d9   : > { %v4766_v29 = vcvt.f32.s32 %v4765_v0  ;;  %v8879_v41 = vsel %vm4832_vm5, 1.0, %v15230_v31  ;;  %v13723_v60 = vsel %vm4832_vm5, 1e+30, %v13483_v55 }
0x17da   : > { %8951 = vmatmul.msk.f32.gmra.mxu0 %vm1007_vm1, %v8879_v41  ;;  %v4868_v5 = vsel %vm1007_vm1, %v13723_v60, inf }
0x17db   : > { %v4769_v58 = vadd.s32 %v4768_v17, %v4766_v29  ;;  %v4780_v34 = vpop.xlane.xlu2 %4779  ;;  %4869 = vmin.xlane.f32.xlu2 %v4868_v5 }
0x17dc   : > { %v4781_v35 = vcvt.f32.s32 %v4780_v34 }
0x17dd   : > { %vm4833_vm6 = vcmp.eq.s32.totalorder %v10356_v19, %v4769_v58 }
0x17de   : > { %v4784_v27 = vadd.s32 %v4783_v50, %v4781_v35  ;;  %v13731_v23 = vsel %vm4833_vm6, 1e+30, %v13491_v28  ;;  %v8880_v32 = vsel %vm4833_vm6, 1.0, %v15230_v31  ;;  %v4827_v35 = vcvt.f32.s32 %v13706_v18 }
0x17df   : > { %v4871_v55 = vsel %vm1007_vm1, %v13731_v23, inf }
0x17e0   : > { %4872 = vmin.xlane.f32.xlu0 %v4871_v55  ;;  %v4795_v4 = vpop.xlane.xlu0 %4794  ;;  %vm4834_vm7 = vcmp.eq.s32.totalorder %v10356_v19, %v4784_v27 }
0x17e1   : > { %v4796_v15 = vcvt.f32.s32 %v4795_v4  ;;  %v13742_v8 = vsel %vm4834_vm7, 1e+30, %v13502_v20  ;;  %v8881_v9 = vsel %vm4834_vm7, 1.0, %v15230_v31  ;;  %v4828_v4 = vshll.u32 %v4827_v35, 16 }
0x17e2   : > { %8952 = vmatmul.msk.f32.gmra.mxu0 %vm1007_vm1, %v8880_v32  ;;  %v4874_v28 = vsel %vm1007_vm1, %v13742_v8, inf }
0x17e3   : > { %v4799_v61 = vadd.s32 %v4798_v10, %v4796_v15  ;;  %4875 = vmin.xlane.f32.xlu1 %v4874_v28 }
0x17e5   : > { %vm4835_vm8 = vcmp.eq.s32.totalorder %v10356_v19, %v4799_v61 }
0x17e6   : > { %v13752_v14 = vsel %vm4835_vm8, 1e+30, %v13512_v6  ;;  %v15254_v6 = vmax.f32 %v13291_v44, %v13522_v49  ;;  %v8882_v58 = vsel %vm4835_vm8, 1.0, %v15230_v31 }
0x17e7   : > { %v4877_v20 = vsel %vm1007_vm1, %v13752_v14, inf }
0x17e8   : > { %v6107_v62 = vpop.f32.mrf.mxu2  ;;  %v4810_v52 = vpop.xlane.xlu2 %4809  ;;  %4878 = vmin.xlane.f32.xlu2 %v4877_v20 }
0x17e9   : > { %v6108_v48 = vadd.f32 %v13519_v26, %v6107_v62  ;;  %v4811_v0 = vcvt.f32.s32 %v4810_v52 }
0x17ea   : > { %8953 = vmatmul.msk.f32.gmra.mxu0 %vm1007_vm1, %v8881_v9 }
0x17eb   : > { %v13764_v17 = vmax.f32 %v15254_v6, %v6108_v48  ;;  %v4814_v29 = vadd.s32 %v4813_v40, %v4811_v0 }
0x17ed   : > { %vm4836_vm9 = vcmp.eq.s32.totalorder %v10356_v19, %v4814_v29 }
0x17ee   : > { %v13768_v41 = vsel %vm4836_vm9, 1e+30, %v13532_v47  ;;  %v8883_v44 = vsel %vm4836_vm9, 1.0, %v15230_v31 }
0x17ef   : > { %v4880_v5 = vsel %vm1007_vm1, %v13768_v41, inf }
0x17f0   : > { %4881 = vmin.xlane.f32.xlu1 %v4880_v5 }
0x17f2   : > { %8954 = vmatmul.msk.f32.gmra.mxu0 %vm1007_vm1, %v8882_v58 }
0x17fa   : > { %8955 = vmatmul.msk.f32.gmra.mxu0 %vm1007_vm1, %v8883_v44 }
0x183e   : > { %v4864_v49 = vpop.xlane.xlu1 %4863 }
0x183f   : > { %vm4886_vm10 = vcmp.eq.f32.partialorder %v13699_v12, %v4864_v49 }
0x1840   : > { %v4894_v47 = vsel %vm4886_vm10, %v10356_v19, 64 }
0x1841   : > { %v13781_v34 = vsel %vm1007_vm1, %v4894_v47, 2147483647 }
0x1842   : > { %v4904_v50 = vshra.s32 %v13781_v34, 16 }
0x1844   : > { %v13785_v33 = vcvt.s32.f32 %v4904_v50 }
0x1846   : > { %4907 = vmin.xlane.f32.xlu0 %v13785_v33  ;;  %v4825_v27 = vpop.xlane.xlu1 %4824  ;;  %v4867_v55 = vpop.xlane.xlu0 %4866 }
0x1847   : > { %v4826_v10 = vcvt.f32.s32 %v4825_v27  ;;  %vm4887_vm11 = vcmp.eq.f32.partialorder %v13711_v1, %v4867_v55  ;;  %v5668_v15 = vpop.f32.mrf.mxu0 }
0x1848   : > { %v4895_v32 = vsel %vm4887_vm11, %v10356_v19, 64  ;;  %v5780_v40 = vadd.f32 %v5668_v15, %v12596_v57 }
0x1849   : > { %v4829_v28 = vadd.s32 %v4828_v4, %v4826_v10  ;;  %v13791_v61 = vsel %vm1007_vm1, %v4895_v32, 2147483647 }
0x184a   : > { %v4919_v16 = vshra.s32 %v13791_v61, 16  ;;  %v5844_v29 = vmax.f32 %v5780_v40, 0.0 }
0x184b   : > { %vm4837_vm0 = vcmp.eq.s32.totalorder %v10356_v19, %v4829_v28 }
0x184c   : > { %v8884_v18 = vsel %vm4837_vm0, 1.0, %v15230_v31  ;;  %v13797_v20 = vsel %vm4837_vm0, 1e+30, %v13561_v30  ;;  %v13799_v62 = vcvt.s32.f32 %v4919_v16 }
0x184d   : > { %8956 = vmatmul.msk.f32.gmra.mxu0 %vm1007_vm1, %v8884_v18  ;;  %v4883_v52 = vsel %vm1007_vm1, %v13797_v20, inf }
0x184e   : > { %4884 = vmin.xlane.f32.xlu0 %v4883_v52  ;;  %v4870_v48 = vpop.xlane.xlu2 %4869  ;;  %4922 = vmin.xlane.f32.xlu2 %v13799_v62 }
0x184f   : > { %vm4888_vm12 = vcmp.eq.f32.partialorder %v13723_v60, %v4870_v48  ;;  %v5671_v0 = vpop.f32.mrf.mxu0 }
0x1850   : > { %v4896_v9 = vsel %vm4888_vm12, %v10356_v19, 64  ;;  %v5781_v30 = vadd.f32 %v5671_v0, %v12608_v36 }
0x1851   : > { %v13810_v6 = vsel %vm1007_vm1, %v4896_v9, 2147483647 }
0x1852   : > { %v5845_v5 = vmax.f32 %v5781_v30, 0.0  ;;  %v4934_v58 = vshra.s32 %v13810_v6, 16 }
0x1853   : > { %v4873_v44 = vpop.xlane.xlu0 %4872 }
0x1854   : > { %v5888_v49 = vpack.c.bf16 %v5845_v5, %v5844_v29  ;;  %vm4889_vm13 = vcmp.eq.f32.partialorder %v13731_v23, %v4873_v44  ;;  %v13814_v47 = vcvt.s32.f32 %v4934_v58 }
0x1855   : > { %v4897_v50 = vsel %vm4889_vm13, %v10356_v19, 64 }
0x1856   : > { %v13818_v35 = vsel %vm1007_vm1, %v4897_v50, 2147483647  ;;  %8993 = vmatmul.msk.bf16.gmra.mxu2 %vm1007_vm1, %v5888_v49  ;;  %v4876_v27 = vpop.xlane.xlu1 %4875  ;;  %4937 = vmin.xlane.f32.xlu1 %v13814_v47 }
0x1857   : > { %vm4890_vm14 = vcmp.eq.f32.partialorder %v13742_v8, %v4876_v27  ;;  %v5674_v55 = vpop.f32.mrf.mxu0  ;;  %v4949_v4 = vshra.s32 %v13818_v35, 16 }
0x1858   : > { %v4898_v10 = vsel %vm4890_vm14, %v10356_v19, 64  ;;  %v5782_v40 = vadd.f32 %v5674_v55, %v12649_v38 }
0x1859   : > { %v13826_v15 = vsel %vm1007_vm1, %v4898_v10, 2147483647  ;;  %v13828_v32 = vcvt.s32.f32 %v4949_v4 }
0x185a   : > { %v4964_v28 = vshra.s32 %v13826_v15, 16  ;;  %v5846_v5 = vmax.f32 %v5782_v40, 0.0 }
0x185b   : > { %v4879_v16 = vpop.xlane.xlu2 %4878  ;;  %4952 = vmin.xlane.f32.xlu2 %v13828_v32 }
0x185c   : > { %vm4891_vm15 = vcmp.eq.f32.partialorder %v13752_v14, %v4879_v16  ;;  %v13833_v18 = vcvt.s32.f32 %v4964_v28 }
0x185d   : > { %v4899_v52 = vsel %vm4891_vm15, %v10356_v19, 64 }
0x185e   : > { %v13838_v48 = vsel %vm1007_vm1, %v4899_v52, 2147483647  ;;  %4967 = vmin.xlane.f32.xlu0 %v13833_v18 }
0x185f   : > { %v5677_v0 = vpop.f32.mrf.mxu0  ;;  %v4979_v9 = vshra.s32 %v13838_v48, 16 }
0x1860   : > { %v5783_v30 = vadd.f32 %v5677_v0, %v12656_v63 }
0x1861   : > { %v13843_v29 = vcvt.s32.f32 %v4979_v9 }
0x1862   : > { %v5847_v58 = vmax.f32 %v5783_v30, 0.0  ;;  %v4903_v30 = vand.u32 65535, %v13781_v34 }
0x1863   : > { %v4882_v44 = vpop.xlane.xlu1 %4881  ;;  %4982 = vmin.xlane.f32.xlu1 %v13843_v29 }
0x1864   : > { %v5889_v49 = vpack.c.bf16 %v5847_v58, %v5846_v5  ;;  %vm4892_vm2 = vcmp.eq.f32.partialorder %v13768_v41, %v4882_v44  ;;  %v4905_v58 = vcvt.s32.f32 %v4903_v30 }
0x1865   : > { %v4900_v50 = vsel %vm4892_vm2, %v10356_v19, 64 }
0x1866   : > { %v13849_v27 = vsel %vm1007_vm1, %v4900_v50, 2147483647  ;;  %8994 = vmatmul.msk.bf16.gmra.mxu2 %vm1007_vm1, %v5889_v49  ;;  %v4918_v49 = vand.u32 65535, %v13791_v61  ;;  %v4933_v61 = vand.u32 65535, %v13810_v6 }
0x1867   : > { %v5680_v55 = vpop.f32.mrf.mxu0  ;;  %v4994_v4 = vshra.s32 %v13849_v27, 16 }
0x1868   : > { %v5784_v28 = vadd.f32 %v5680_v55, %v12677_v46 }
0x1869   : > { %v13853_v10 = vcvt.s32.f32 %v4994_v4  ;;  %v4920_v4 = vcvt.s32.f32 %v4918_v49 }
0x186a   : > { %v5848_v40 = vmax.f32 %v5784_v28, 0.0 }
0x186b   : > { %4997 = vmin.xlane.f32.xlu0 %v13853_v10 }
0x186f   : > { %v5683_v16 = vpop.f32.mrf.mxu0 }
0x1870   : > { %v5785_v52 = vadd.f32 %v5683_v16, %v12680_v53 }
0x1872   : > { %v5849_v0 = vmax.f32 %v5785_v52, 0.0 }
0x1874   : > { %v5890_v9 = vpack.c.bf16 %v5849_v0, %v5848_v40 }
0x1876   : > { %8995 = vmatmul.msk.bf16.gmra.mxu2 %vm1007_vm1, %v5890_v9 }
0x1877   : > { %v5686_v28 = vpop.f32.mrf.mxu0 }
0x1878   : > { %v5786_v0 = vadd.f32 %v5686_v28, %v12450_v45 }
0x187a   : > { %v5850_v6 = vmax.f32 %v5786_v0, 0.0 }
0x18b9   : > { %v13860_v5 = vpop.xlane.xlu0 %4907 }
0x18ba   : > { %vm4909_vm3 = vcmp.eq.f32.partialorder %v13785_v33, %v13860_v5 }
0x18bb   : > { %v4910_v44 = vsel %vm4909_vm3, %v4905_v58, inf  ;;  %v4948_v58 = vand.u32 65535, %v13818_v35 }
0x18bc   : > { %4911 = vmin.xlane.f32.xlu2 %v4910_v44 }
0x18c1   : > { %v13865_v50 = vpop.xlane.xlu2 %4922  ;;  %v4885_v55 = vpop.xlane.xlu0 %4884 }
0x18c2   : > { %vm4893_vm4 = vcmp.eq.f32.partialorder %v13797_v20, %v4885_v55  ;;  %vm4924_vm5 = vcmp.eq.f32.partialorder %v13799_v62, %v13865_v50  ;;  %v4935_v62 = vcvt.s32.f32 %v4933_v61  ;;  %v13891_v61 = vpop.f32.mrf.mxu2 }
0x18c3   : > { %v4901_v34 = vsel %vm4893_vm4, %v10356_v19, 64  ;;  %v4925_v16 = vsel %vm4924_vm5, %v4920_v4, inf  ;;  %v4963_v4 = vand.u32 65535, %v13826_v15  ;;  %v4978_v15 = vand.u32 65535, %v13838_v48 }
0x18c4   : > { %v13872_v52 = vsel %vm1007_vm1, %v4901_v34, 2147483647  ;;  %4926 = vmin.xlane.f32.xlu1 %v4925_v16  ;;  %v4950_v34 = vcvt.s32.f32 %v4948_v58 }
0x18c5   : > { %v5009_v33 = vshra.s32 %v13872_v52, 16  ;;  %v4965_v35 = vcvt.s32.f32 %v4963_v4 }
0x18c7   : > { %v13876_v40 = vcvt.s32.f32 %v5009_v33 }
0x18c9   : > { %v13879_v9 = vpop.xlane.xlu1 %4937  ;;  %5012 = vmin.xlane.f32.xlu2 %v13876_v40 }
0x18ca   : > { %v5689_v30 = vpop.f32.mrf.mxu0  ;;  %vm4939_vm6 = vcmp.eq.f32.partialorder %v13814_v47, %v13879_v9 }
0x18cb   : > { %v5787_v44 = vadd.f32 %v5689_v30, %v12704_v51  ;;  %v4940_v49 = vsel %vm4939_vm6, %v4935_v62, inf  ;;  %v4980_v30 = vcvt.s32.f32 %v4978_v15  ;;  %v4914_v15 = vcvt.f32.s32 %v13860_v5 }
0x18cc   : > { %4941 = vmin.xlane.f32.xlu0 %v4940_v49  ;;  %v4993_v49 = vand.u32 65535, %v13849_v27 }
0x18cd   : > { %v5851_v55 = vmax.f32 %v5787_v44, 0.0 }
0x18ce   : > { %v13887_v28 = vpop.xlane.xlu2 %4952 }
0x18cf   : > { %v5891_v16 = vpack.c.bf16 %v5851_v55, %v5850_v6  ;;  %vm4954_vm7 = vcmp.eq.f32.partialorder %v13828_v32, %v13887_v28  ;;  %v4995_v6 = vcvt.s32.f32 %v4993_v49  ;;  %v4929_v49 = vcvt.f32.s32 %v13865_v50 }
0x18d0   : > { %v4955_v33 = vsel %vm4954_vm7, %v4950_v34, inf  ;;  %v4944_v50 = vcvt.f32.s32 %v13879_v9 }
0x18d1   : > { %8996 = vmatmul.msk.bf16.gmra.mxu2 %vm1007_vm1, %v5891_v16  ;;  %4956 = vmin.xlane.f32.xlu1 %v4955_v33  ;;  %v13894_v47 = vpop.xlane.xlu0 %4967  ;;  %v4930_v5 = vshll.u32 %v4929_v49, 16 }
0x18d2   : > { %vm4969_vm8 = vcmp.eq.f32.partialorder %v13833_v18, %v13894_v47 }
0x18d3   : > { %v4970_v0 = vsel %vm4969_vm8, %v4965_v35, inf }
0x18d4   : > { %4971 = vmin.xlane.f32.xlu2 %v4970_v0 }
0x18d6   : > { %v13899_v62 = vpop.xlane.xlu1 %4982 }
0x18d7   : > { %vm4984_vm9 = vcmp.eq.f32.partialorder %v13843_v29, %v13899_v62 }
0x18d8   : > { %v4985_v32 = vsel %vm4984_vm9, %v4980_v30, inf  ;;  %v4915_v30 = vshll.u32 %v4914_v15, 16 }
0x18d9   : > { %v6112_v58 = vpop.f32.mrf.mxu2  ;;  %4986 = vmin.xlane.f32.xlu0 %v4985_v32 }
0x18da   : > { %v13904_v44 = vadd.f32 %v13519_v26, %v6112_v58 }
0x18dc   : > { %v6204_v18 = vmax.f32 %v13672_v24, %v13904_v44 }
0x18de   : > { %v13909_v48 = vpop.xlane.xlu0 %4997 }
0x18df   : > { %vm4999_vm10 = vcmp.eq.f32.partialorder %v13853_v10, %v13909_v48 }
0x18e0   : > { %v5000_v55 = vsel %vm4999_vm10, %v4995_v6, inf }
0x18e1   : > { %v13913_v4 = vpop.f32.mrf.mxu2  ;;  %5001 = vmin.xlane.f32.xlu2 %v5000_v55 }
0x18e9   : > { %v6117_v29 = vpop.f32.mrf.mxu2 }
0x18ea   : > { %v13916_v34 = vadd.f32 %v13519_v26, %v6117_v29 }
0x18f1   : > { %v13920_v16 = vpop.f32.mrf.mxu2 }
0x18f9   : > { %v6122_v33 = vpop.f32.mrf.mxu2 }
0x18fa   : > { %v13923_v35 = vadd.f32 %v13519_v26, %v6122_v33 }
0x192f   : > { %v4912_v0 = vpop.xlane.xlu2 %4911 }
0x1930   : > { %v4913_v32 = vcvt.f32.s32 %v4912_v0  ;;  %v5008_v0 = vand.u32 65535, %v13872_v52 }
0x1932   : > { %v4916_v58 = vadd.s32 %v4915_v30, %v4913_v32 }
0x1934   : > { %vm5022_vm11 = vcmp.eq.s32.totalorder %v10356_v19, %v4916_v58 }
0x1935   : > { %v8885_v6 = vsel %vm5022_vm11, 1.0, %v15230_v31  ;;  %v13932_v55 = vsel %vm5022_vm11, 1e+30, %v13699_v12  ;;  %v5010_v12 = vcvt.s32.f32 %v5008_v0 }
0x1936   : > { %8957 = vmatmul.msk.f32.gmra.mxu0 %vm1007_vm1, %v8885_v6  ;;  %v5054_v29 = vsel %vm1007_vm1, %v13932_v55, inf }
0x1937   : > { %v4927_v33 = vpop.xlane.xlu1 %4926  ;;  %5055 = vmin.xlane.f32.xlu1 %v5054_v29  ;;  %v4945_v29 = vshll.u32 %v4944_v50, 16 }
0x1938   : > { %v4928_v15 = vcvt.f32.s32 %v4927_v33 }
0x193a   : > { %v4931_v30 = vadd.s32 %v4930_v5, %v4928_v15  ;;  %v4959_v5 = vcvt.f32.s32 %v13887_v28 }
0x193c   : > { %v13939_v32 = vpop.xlane.xlu2 %5012  ;;  %vm5023_vm0 = vcmp.eq.s32.totalorder %v10356_v19, %v4931_v30 }
0x193d   : > { %v8886_v58 = vsel %vm5023_vm0, 1.0, %v15230_v31  ;;  %v13944_v6 = vsel %vm5023_vm0, 1e+30, %v13711_v1  ;;  %vm5014_vm12 = vcmp.eq.f32.partialorder %v13876_v40, %v13939_v32  ;;  %v4974_v1 = vcvt.f32.s32 %v13894_v47 }
0x193e   : > { %8958 = vmatmul.msk.f32.gmra.mxu0 %vm1007_vm1, %v8886_v58  ;;  %v5057_v52 = vsel %vm1007_vm1, %v13944_v6, inf  ;;  %v5015_v49 = vsel %vm5014_vm12, %v5010_v12, inf  ;;  %v4960_v40 = vshll.u32 %v4959_v5, 16 }
0x193f   : > { %5058 = vmin.xlane.f32.xlu0 %v5057_v52  ;;  %5016 = vmin.xlane.f32.xlu1 %v5015_v49  ;;  %v4942_v9 = vpop.xlane.xlu0 %4941  ;;  %v4975_v52 = vshll.u32 %v4974_v1, 16  ;;  %v4989_v49 = vcvt.f32.s32 %v13899_v62 }
0x1940   : > { %v4943_v33 = vcvt.f32.s32 %v4942_v9 }
0x1942   : > { %v4946_v15 = vadd.s32 %v4945_v29, %v4943_v33  ;;  %v13968_v33 = vpop.f32.mrf.mxu2 }
0x1944   : > { %v4957_v0 = vpop.xlane.xlu1 %4956  ;;  %vm5024_vm13 = vcmp.eq.s32.totalorder %v10356_v19, %v4946_v15  ;;  %v4990_v15 = vshll.u32 %v4989_v49, 16 }
0x1945   : > { %v4958_v30 = vcvt.f32.s32 %v4957_v0  ;;  %v8887_v58 = vsel %vm5024_vm13, 1.0, %v15230_v31  ;;  %v13956_v10 = vsel %vm5024_vm13, 1e+30, %v13723_v60 }
0x1946   : > { %8959 = vmatmul.msk.f32.gmra.mxu0 %vm1007_vm1, %v8887_v58  ;;  %v5060_v50 = vsel %vm1007_vm1, %v13956_v10, inf }
0x1947   : > { %v4961_v12 = vadd.s32 %v4960_v40, %v4958_v30  ;;  %v4972_v28 = vpop.xlane.xlu2 %4971  ;;  %5061 = vmin.xlane.f32.xlu2 %v5060_v50  ;;  %v5004_v30 = vcvt.f32.s32 %v13909_v48 }
0x1948   : > { %v4973_v47 = vcvt.f32.s32 %v4972_v28 }
0x1949   : > { %vm5025_vm14 = vcmp.eq.s32.totalorder %v10356_v19, %v4961_v12  ;;  %v5005_v28 = vshll.u32 %v5004_v30, 16 }
0x194a   : > { %v4976_v9 = vadd.s32 %v4975_v52, %v4973_v47  ;;  %v13964_v29 = vsel %vm5025_vm14, 1e+30, %v13731_v23  ;;  %v8888_v0 = vsel %vm5025_vm14, 1.0, %v15230_v31 }
0x194b   : > { %v5063_v60 = vsel %vm1007_vm1, %v13964_v29, inf }
0x194c   : > { %5064 = vmin.xlane.f32.xlu0 %v5063_v60  ;;  %v4987_v5 = vpop.xlane.xlu0 %4986  ;;  %vm5026_vm15 = vcmp.eq.s32.totalorder %v10356_v19, %v4976_v9 }
0x194d   : > { %v4988_v1 = vcvt.f32.s32 %v4987_v5  ;;  %v13975_v62 = vsel %vm5026_vm15, 1e+30, %v13742_v8  ;;  %v8889_v48 = vsel %vm5026_vm15, 1.0, %v15230_v31 }
0x194e   : > { %8960 = vmatmul.msk.f32.gmra.mxu0 %vm1007_vm1, %v8888_v0  ;;  %v5066_v23 = vsel %vm1007_vm1, %v13975_v62, inf }
0x194f   : > { %v4991_v40 = vadd.s32 %v4990_v15, %v4988_v1  ;;  %5067 = vmin.xlane.f32.xlu1 %v5066_v23  ;;  %v5019_v23 = vcvt.f32.s32 %v13939_v32 }
0x1951   : > { %vm5027_vm2 = vcmp.eq.s32.totalorder %v10356_v19, %v4991_v40 }
0x1952   : > { %v13985_v58 = vsel %vm5027_vm2, 1e+30, %v13752_v14  ;;  %v8890_v9 = vsel %vm5027_vm2, 1.0, %v15230_v31  ;;  %v6271_v14 = vld [vmem:[#allocation11 + $0x158] sm:$0xff] }
0x1953   : > { %v5069_v8 = vsel %vm1007_vm1, %v13985_v58, inf }
0x1954   : > { %v6127_v50 = vpop.f32.mrf.mxu2  ;;  %v5002_v12 = vpop.xlane.xlu2 %5001  ;;  %5070 = vmin.xlane.f32.xlu2 %v5069_v8 }
0x1955   : > { %v13990_v52 = vadd.f32 %v13519_v26, %v6127_v50  ;;  %v5003_v47 = vcvt.f32.s32 %v5002_v12  ;;  %v5020_v50 = vshll.u32 %v5019_v23, 16 }
0x1956   : > { %8961 = vmatmul.msk.f32.gmra.mxu0 %vm1007_vm1, %v8889_v48 }
0x1957   : > { %v5006_v49 = vadd.s32 %v5005_v28, %v5003_v47 }
0x1959   : > { %vm5028_vm3 = vcmp.eq.s32.totalorder %v10356_v19, %v5006_v49 }
0x195a   : > { %v14000_v60 = vsel %vm5028_vm3, 1e+30, %v13768_v41  ;;  %v8891_v5 = vsel %vm5028_vm3, 1.0, %v15230_v31 }
0x195b   : > { %v5072_v26 = vsel %vm1007_vm1, %v14000_v60, inf }
0x195c   : > { %5073 = vmin.xlane.f32.xlu1 %v5072_v26 }
0x195e   : > { %8962 = vmatmul.msk.f32.gmra.mxu0 %vm1007_vm1, %v8890_v9 }
0x1966   : > { %8963 = vmatmul.msk.f32.gmra.mxu0 %vm1007_vm1, %v8891_v5 }
0x19aa   : > { %v5056_v15 = vpop.xlane.xlu1 %5055 }
0x19ab   : > { %vm5078_vm4 = vcmp.eq.f32.partialorder %v13932_v55, %v5056_v15 }
0x19ac   : > { %v5086_v41 = vsel %vm5078_vm4, %v10356_v19, 64 }
0x19ad   : > { %v14013_v1 = vsel %vm1007_vm1, %v5086_v41, 2147483647 }
0x19ae   : > { %v5096_v0 = vshra.s32 %v14013_v1, 16 }
0x19b0   : > { %v14017_v40 = vcvt.s32.f32 %v5096_v0 }
0x19b2   : > { %5099 = vmin.xlane.f32.xlu0 %v14017_v40  ;;  %v5017_v30 = vpop.xlane.xlu1 %5016  ;;  %v5059_v8 = vpop.xlane.xlu0 %5058 }
0x19b3   : > { %v5018_v12 = vcvt.f32.s32 %v5017_v30  ;;  %vm5079_vm5 = vcmp.eq.f32.partialorder %v13944_v6, %v5059_v8  ;;  %v5692_v55 = vpop.f32.mrf.mxu0 }
0x19b4   : > { %v5087_v28 = vsel %vm5079_vm5, %v10356_v19, 64  ;;  %v5788_v5 = vadd.f32 %v5692_v55, %v12596_v57 }
0x19b5   : > { %v5021_v47 = vadd.s32 %v5020_v50, %v5018_v12  ;;  %v14023_v48 = vsel %vm1007_vm1, %v5087_v28, 2147483647 }
0x19b6   : > { %v5111_v49 = vshra.s32 %v14023_v48, 16  ;;  %v5852_v30 = vmax.f32 %v5788_v5, 0.0  ;;  %v5110_v27 = vand.u32 65535, %v14023_v48 }
0x19b7   : > { %vm5029_vm6 = vcmp.eq.s32.totalorder %v10356_v19, %v5021_v47 }
0x19b8   : > { %v8892_v32 = vsel %vm5029_vm6, 1.0, %v15230_v31  ;;  %v14029_v26 = vsel %vm5029_vm6, 1e+30, %v13797_v20  ;;  %v14031_v9 = vcvt.s32.f32 %v5111_v49 }
0x19b9   : > { %8964 = vmatmul.msk.f32.gmra.mxu0 %vm1007_vm1, %v8892_v32  ;;  %v5075_v6 = vsel %vm1007_vm1, %v14029_v26, inf }
0x19ba   : > { %5076 = vmin.xlane.f32.xlu0 %v5075_v6  ;;  %v5062_v15 = vpop.xlane.xlu2 %5061  ;;  %5114 = vmin.xlane.f32.xlu2 %v14031_v9 }
0x19bb   : > { %vm5080_vm7 = vcmp.eq.f32.partialorder %v13956_v10, %v5062_v15  ;;  %v5695_v41 = vpop.f32.mrf.mxu0 }
0x19bc   : > { %v5088_v0 = vsel %vm5080_vm7, %v10356_v19, 64  ;;  %v5789_v20 = vadd.f32 %v5695_v41, %v12608_v36 }
0x19bd   : > { %v14042_v23 = vsel %vm1007_vm1, %v5088_v0, 2147483647 }
0x19be   : > { %v5853_v8 = vmax.f32 %v5789_v20, 0.0  ;;  %v5126_v50 = vshra.s32 %v14042_v23, 16  ;;  %v5125_v48 = vand.u32 65535, %v14042_v23 }
0x19bf   : > { %v5065_v12 = vpop.xlane.xlu0 %5064 }
0x19c0   : > { %v5892_v55 = vpack.c.bf16 %v5853_v8, %v5852_v30  ;;  %vm5081_vm8 = vcmp.eq.f32.partialorder %v13964_v29, %v5065_v12  ;;  %v14046_v28 = vcvt.s32.f32 %v5126_v50 }
0x19c1   : > { %v5089_v10 = vsel %vm5081_vm8, %v10356_v19, 64 }
0x19c2   : > { %v14050_v47 = vsel %vm1007_vm1, %v5089_v10, 2147483647  ;;  %8997 = vmatmul.msk.bf16.gmra.mxu2 %vm1007_vm1, %v5892_v55  ;;  %v5068_v49 = vpop.xlane.xlu1 %5067  ;;  %5129 = vmin.xlane.f32.xlu1 %v14046_v28 }
0x19c3   : > { %vm5082_vm9 = vcmp.eq.f32.partialorder %v13975_v62, %v5068_v49  ;;  %v5698_v32 = vpop.f32.mrf.mxu0  ;;  %v5141_v6 = vshra.s32 %v14050_v47, 16 }
0x19c4   : > { %v5090_v5 = vsel %vm5082_vm9, %v10356_v19, 64  ;;  %v5790_v30 = vadd.f32 %v5698_v32, %v12649_v38 }
0x19c5   : > { %v14058_v29 = vsel %vm1007_vm1, %v5090_v5, 2147483647  ;;  %v14060_v15 = vcvt.s32.f32 %v5141_v6 }
0x19c6   : > { %v5156_v41 = vshra.s32 %v14058_v29, 16  ;;  %v5854_v49 = vmax.f32 %v5790_v30, 0.0  ;;  %v5155_v23 = vand.u32 65535, %v14058_v29 }
0x19c7   : > { %v5071_v0 = vpop.xlane.xlu2 %5070  ;;  %5144 = vmin.xlane.f32.xlu2 %v14060_v15 }
0x19c8   : > { %vm5083_vm10 = vcmp.eq.f32.partialorder %v13985_v58, %v5071_v0  ;;  %v14065_v20 = vcvt.s32.f32 %v5156_v41 }
0x19c9   : > { %v5091_v62 = vsel %vm5083_vm10, %v10356_v19, 64 }
0x19ca   : > { %v14070_v8 = vsel %vm1007_vm1, %v5091_v62, 2147483647  ;;  %5159 = vmin.xlane.f32.xlu0 %v14065_v20 }
0x19cb   : > { %v5171_v50 = vshra.s32 %v14070_v8, 16  ;;  %v5701_v12 = vpop.f32.mrf.mxu0  ;;  %v5170_v29 = vand.u32 65535, %v14070_v8  ;;  %v14139_v8 = vld [vmem:[%s15161_s10] ss:$0 sm:$0xff] }
0x19cc   : > { %v5791_v55 = vadd.f32 %v5701_v12, %v12656_v63 }
0x19cd   : > { %v14075_v10 = vcvt.s32.f32 %v5171_v50 }
0x19ce   : > { %v5855_v58 = vmax.f32 %v5791_v55, 0.0 }
0x19cf   : > { %v5074_v6 = vpop.xlane.xlu1 %5073  ;;  %5174 = vmin.xlane.f32.xlu1 %v14075_v10 }
0x19d0   : > { %v5893_v5 = vpack.c.bf16 %v5855_v58, %v5854_v49  ;;  %vm5084_vm11 = vcmp.eq.f32.partialorder %v14000_v60, %v5074_v6  ;;  %v5095_v6 = vand.u32 65535, %v14013_v1 }
0x19d1   : > { %v5092_v32 = vsel %vm5084_vm11, %v10356_v19, 64 }
0x19d2   : > { %v14081_v41 = vsel %vm1007_vm1, %v5092_v32, 2147483647  ;;  %8998 = vmatmul.msk.bf16.gmra.mxu2 %vm1007_vm1, %v5893_v5  ;;  %v5097_v32 = vcvt.s32.f32 %v5095_v6 }
0x19d3   : > { %v5186_v0 = vshra.s32 %v14081_v41, 16  ;;  %v5704_v62 = vpop.f32.mrf.mxu0 }
0x19d4   : > { %v5792_v30 = vadd.f32 %v5704_v62, %v12677_v46  ;;  %v6274_v62 = vld [vmem:[#allocation11 + $0x170] sm:$0xff] }
0x19d5   : > { %v14085_v50 = vcvt.s32.f32 %v5186_v0 }
0x19d6   : > { %v5856_v60 = vmax.f32 %v5792_v30, 0.0 }
0x19d7   : > { %5189 = vmin.xlane.f32.xlu0 %v14085_v50 }
0x19db   : > { %v5707_v12 = vpop.f32.mrf.mxu0 }
0x19dc   : > { %v5793_v55 = vadd.f32 %v5707_v12, %v12680_v53  ;;  %v6319_v12 = vpack.c.bf16 %v6274_v62, %v6271_v14 }
0x19de   : > { %v5857_v49 = vmax.f32 %v5793_v55, 0.0  ;;  %9048 = vmatpush.bf16.msra.mxu1 %v6319_v12  ;;  %6350 = vmatpush.bf16.msrb.mxu0 %v6319_v12 }
0x19e0   : > { %v5894_v58 = vpack.c.bf16 %v5857_v49, %v5856_v60  ;;  %v5112_v60 = vcvt.s32.f32 %v5110_v27 }
0x19e2   : > { %8999 = vmatmul.msk.bf16.gmra.mxu2 %vm1007_vm1, %v5894_v58 }
0x19e3   : > { %v5710_v1 = vpop.f32.mrf.mxu0 }
0x19e4   : > { %v5794_v27 = vadd.f32 %v5710_v1, %v12450_v45 }
0x1a25   : > { %v14092_v5 = vpop.xlane.xlu0 %5099 }
0x1a26   : > { %vm5101_vm0 = vcmp.eq.f32.partialorder %v14017_v40, %v14092_v5 }
0x1a27   : > { %v5102_v0 = vsel %vm5101_vm0, %v5097_v32, inf }
0x1a28   : > { %5103 = vmin.xlane.f32.xlu2 %v5102_v0  ;;  %v5140_v0 = vand.u32 65535, %v14050_v47 }
0x1a2d   : > { %v14097_v30 = vpop.xlane.xlu2 %5114  ;;  %v5077_v55 = vpop.xlane.xlu0 %5076 }
0x1a2e   : > { %vm5116_vm12 = vcmp.eq.f32.partialorder %v14031_v9, %v14097_v30  ;;  %vm5085_vm13 = vcmp.eq.f32.partialorder %v14029_v26, %v5077_v55  ;;  %v5127_v26 = vcvt.s32.f32 %v5125_v48  ;;  %v5858_v55 = vmax.f32 %v5794_v27, 0.0 }
0x1a2f   : > { %v5093_v40 = vsel %vm5085_vm13, %v10356_v19, 64  ;;  %v5117_v49 = vsel %vm5116_vm12, %v5112_v60, inf  ;;  %v5157_v48 = vcvt.s32.f32 %v5155_v23  ;;  %vm6752_vm13 = vcmask 261120  }
0x1a30   : > { %v14104_v58 = vsel %vm1007_vm1, %v5093_v40, 2147483647  ;;  %5118 = vmin.xlane.f32.xlu1 %v5117_v49  ;;  %v5142_v40 = vcvt.s32.f32 %v5140_v0 }
0x1a31   : > { %v5201_v14 = vshra.s32 %v14104_v58, 16 }
0x1a33   : > { %v14108_v6 = vcvt.s32.f32 %v5201_v14 }
0x1a35   : > { %v14111_v32 = vpop.xlane.xlu1 %5129  ;;  %5204 = vmin.xlane.f32.xlu2 %v14108_v6 }
0x1a36   : > { %vm5131_vm14 = vcmp.eq.f32.partialorder %v14046_v28, %v14111_v32  ;;  %v5713_v9 = vpop.f32.mrf.mxu0  ;;  %v14123_v28 = vpop.f32.mrf.mxu2 }
0x1a37   : > { %v5795_v62 = vadd.f32 %v5713_v9, %v12704_v51  ;;  %v5132_v12 = vsel %vm5131_vm14, %v5127_v26, inf  ;;  %v5172_v9 = vcvt.s32.f32 %v5170_v29  ;;  %vm7985_vm14 = vcmask 785408  }
0x1a38   : > { %5133 = vmin.xlane.f32.xlu0 %v5132_v12 }
0x1a39   : > { %v5859_v60 = vmax.f32 %v5795_v62, 0.0  ;;  %v5185_v62 = vand.u32 65535, %v14081_v41 }
0x1a3a   : > { %v14119_v1 = vpop.xlane.xlu2 %5144 }
0x1a3b   : > { %v5895_v49 = vpack.c.bf16 %v5859_v60, %v5858_v55  ;;  %vm5146_vm15 = vcmp.eq.f32.partialorder %v14060_v15, %v14119_v1  ;;  %v6270_v60 = vld [vmem:[#allocation11 + $0x150] sm:$0xff] }
0x1a3c   : > { %v5147_v14 = vsel %vm5146_vm15, %v5142_v40, inf  ;;  %v6273_v40 = vld [vmem:[#allocation11 + $0x168] sm:$0xff] }
0x1a3d   : > { %9000 = vmatmul.msk.bf16.gmra.mxu2 %vm1007_vm1, %v5895_v49  ;;  %5148 = vmin.xlane.f32.xlu1 %v5147_v14  ;;  %v14126_v47 = vpop.xlane.xlu0 %5159  ;;  %v6265_v49 = vld [vmem:[#allocation11 + $0x128] sm:$0xff]  ;;  %v6318_v14 = vpack.c.bf16 %v6273_v40, %v6270_v60  ;;  %v5106_v60 = vcvt.f32.s32 %v14092_v5  ;;  %v5136_v5 = vcvt.f32.s32 %v14111_v32 }
0x1a3e   : > { %vm5161_vm2 = vcmp.eq.f32.partialorder %v14065_v20, %v14126_v47 }
0x1a3f   : > { %v5162_v27 = vsel %vm5161_vm2, %v5157_v48, inf  ;;  %v6268_v48 = vld [vmem:[#allocation11 + $0x140] sm:$0xff]  ;;  %6321 = vmatpush.bf16.msrb.mxu3 %v6318_v14  ;;  %v5121_v14 = vcvt.f32.s32 %v14097_v30 }
0x1a40   : > { %5163 = vmin.xlane.f32.xlu2 %v5162_v27  ;;  %v6316_v29 = vpack.c.bf16 %v6268_v48, %v6265_v49 }
0x1a42   : > { %v14131_v26 = vpop.xlane.xlu1 %5174  ;;  %9049 = vmatpush.bf16.msra.mxu1 %v6316_v29  ;;  %6351 = vmatpush.bf16.msrb.mxu0 %v6316_v29 }
0x1a43   : > { %vm5176_vm3 = vcmp.eq.f32.partialorder %v14075_v10, %v14131_v26  ;;  %v5187_v10 = vcvt.s32.f32 %v5185_v62 }
0x1a44   : > { %v5177_v15 = vsel %vm5176_vm3, %v5172_v9, inf }
0x1a45   : > { %v6132_v0 = vpop.f32.mrf.mxu2  ;;  %5178 = vmin.xlane.f32.xlu0 %v5177_v15 }
0x1a46   : > { %v6133_v20 = vadd.f32 %v14139_v8, %v6132_v0  ;;  %v15256_v0 = vmax.f32 %v13692_v59, %v13923_v35  ;;  %v5122_v35 = vshll.u32 %v5121_v14, 16  ;;  %v6258_v14 = vld [vmem:[#allocation11 + $0xf0] sm:$0xff] }
0x1a48   : > { %v14145_v12 = vmax.f32 %v6204_v18, %v6133_v20  ;;  %v15255_v18 = vmax.f32 %v13684_v3, %v13916_v34  ;;  %v6264_v20 = vld [vmem:[#allocation11 + $0x120] sm:$0xff]  ;;  %v5107_v3 = vshll.u32 %v5106_v60, 16  ;;  %v5151_v60 = vcvt.f32.s32 %v14119_v1 }
0x1a49   : > { %v5166_v1 = vcvt.f32.s32 %v14126_v47 }
0x1a4a   : > { %v14147_v23 = vpop.xlane.xlu0 %5189 }
0x1a4b   : > { %vm5191_vm4 = vcmp.eq.f32.partialorder %v14085_v50, %v14147_v23 }
0x1a4c   : > { %v5192_v55 = vsel %vm5191_vm4, %v5187_v10, inf  ;;  %v6267_v10 = vld [vmem:[#allocation11 + $0x138] sm:$0xff] }
0x1a4d   : > { %v14151_v41 = vpop.f32.mrf.mxu2  ;;  %5193 = vmin.xlane.f32.xlu1 %v5192_v55  ;;  %v6315_v55 = vpack.c.bf16 %v6267_v10, %v6264_v20  ;;  %v6259_v20 = vld [vmem:[#allocation11 + $0xf8] sm:$0xff]  ;;  %v5137_v10 = vshll.u32 %v5136_v5, 16 }
0x1a4f   : > { %6322 = vmatpush.bf16.msrb.mxu3 %v6315_v55 }
0x1a55   : > { %v6137_v24 = vpop.f32.mrf.mxu2 }
0x1a56   : > { %v6138_v44 = vadd.f32 %v14139_v8, %v6137_v24  ;;  %v5200_v24 = vand.u32 65535, %v14104_v58  ;;  %v6262_v58 = vld [vmem:[#allocation11 + $0x110] sm:$0xff] }
0x1a57   : > { %v6313_v32 = vpack.c.bf16 %v6262_v58, %v6259_v20 }
0x1a58   : > { %v14157_v50 = vmax.f32 %v15255_v18, %v6138_v44 }
0x1a59   : > { %9050 = vmatpush.bf16.msra.mxu1 %v6313_v32  ;;  %6352 = vmatpush.bf16.msrb.mxu0 %v6313_v32 }
0x1a5d   : > { %v14159_v27 = vpop.f32.mrf.mxu2 }
0x1a65   : > { %v6142_v9 = vpop.f32.mrf.mxu2 }
0x1a66   : > { %v6143_v15 = vadd.f32 %v14139_v8, %v6142_v9  ;;  %v5202_v9 = vcvt.s32.f32 %v5200_v24 }
0x1a68   : > { %v14165_v62 = vmax.f32 %v15256_v0, %v6143_v15 }
0x1a9b   : > { %v5104_v40 = vpop.xlane.xlu2 %5103 }
0x1a9c   : > { %v5105_v34 = vcvt.f32.s32 %v5104_v40 }
0x1a9e   : > { %v5108_v49 = vadd.s32 %v5107_v3, %v5105_v34 }
0x1aa0   : > { %vm5214_vm5 = vcmp.eq.s32.totalorder %v10356_v19, %v5108_v49 }
0x1aa1   : > { %v8893_v48 = vsel %vm5214_vm5, 1.0, %v15230_v31 }
0x1aa2   : > { %8965 = vmatmul.msk.f32.gmra.mxu0 %vm1007_vm1, %v8893_v48  ;;  %v6261_v48 = vld [vmem:[#allocation11 + $0x108] sm:$0xff] }
0x1aa3   : > { %v5119_v59 = vpop.xlane.xlu1 %5118  ;;  %v6312_v24 = vpack.c.bf16 %v6261_v48, %v6258_v14 }
0x1aa4   : > { %v5120_v29 = vcvt.f32.s32 %v5119_v59  ;;  %v6253_v59 = vld [vmem:[#allocation11 + $0xc8] sm:$0xff] }
0x1aa5   : > { %6323 = vmatpush.bf16.msrb.mxu3 %v6312_v24 }
0x1aa6   : > { %v5123_v44 = vadd.s32 %v5122_v35, %v5120_v29 }
0x1aa8   : > { %v14174_v18 = vpop.xlane.xlu2 %5204  ;;  %vm5215_vm6 = vcmp.eq.s32.totalorder %v10356_v19, %v5123_v44  ;;  %v6256_v44 = vld [vmem:[#allocation11 + $0xe0] sm:$0xff] }
0x1aa9   : > { %vm5206_vm7 = vcmp.eq.f32.partialorder %v14108_v6, %v14174_v18  ;;  %v8894_v30 = vsel %vm5215_vm6, 1.0, %v15230_v31  ;;  %v5152_v6 = vshll.u32 %v5151_v60, 16  ;;  %v6310_v5 = vpack.c.bf16 %v6256_v44, %v6253_v59 }
0x1aaa   : > { %8966 = vmatmul.msk.f32.gmra.mxu0 %vm1007_vm1, %v8894_v30  ;;  %v5207_v15 = vsel %vm5206_vm7, %v5202_v9, inf  ;;  %v5167_v30 = vshll.u32 %v5166_v1, 16 }
0x1aab   : > { %5208 = vmin.xlane.f32.xlu2 %v5207_v15  ;;  %v5134_v0 = vpop.xlane.xlu0 %5133  ;;  %9051 = vmatpush.bf16.msra.mxu1 %v6310_v5  ;;  %v14187_v15 = vpop.f32.mrf.mxu2 }
0x1aac   : > { %v5135_v55 = vcvt.f32.s32 %v5134_v0  ;;  %6353 = vmatpush.bf16.msrb.mxu0 %v6310_v5 }
0x1aae   : > { %v5138_v40 = vadd.s32 %v5137_v10, %v5135_v55  ;;  %v5181_v10 = vcvt.f32.s32 %v14131_v26  ;;  %v5196_v26 = vcvt.f32.s32 %v14147_v23  ;;  %v5211_v23 = vcvt.f32.s32 %v14174_v18  ;;  %v6247_v18 = vld [vmem:[#allocation11 + $0x98] sm:$0xff] }
0x1ab0   : > { %v5149_v3 = vpop.xlane.xlu1 %5148  ;;  %vm5216_vm8 = vcmp.eq.s32.totalorder %v10356_v19, %v5138_v40  ;;  %v5182_v47 = vshll.u32 %v5181_v10, 16  ;;  %v5197_v48 = vshll.u32 %v5196_v26, 16  ;;  %v5212_v1 = vshll.u32 %v5211_v23, 16  ;;  %v6244_v26 = vld [vmem:[#allocation11 + $0x80] sm:$0xff] }
0x1ab1   : > { %v5150_v34 = vcvt.f32.s32 %v5149_v3  ;;  %v8895_v49 = vsel %vm5216_vm8, 1.0, %v15230_v31 }
0x1ab2   : > { %8967 = vmatmul.msk.f32.gmra.mxu0 %vm1007_vm1, %v8895_v49 }
0x1ab3   : > { %v5153_v35 = vadd.s32 %v5152_v6, %v5150_v34  ;;  %v5164_v29 = vpop.xlane.xlu2 %5163  ;;  %v15257_v6 = vmax.f32 %v13764_v17, %v13990_v52  ;;  %v6252_v17 = vld [vmem:[#allocation11 + $0xc0] sm:$0xff]  ;;  %v6255_v52 = vld [vmem:[#allocation11 + $0xd8] sm:$0xff] }
0x1ab4   : > { %v5165_v9 = vcvt.f32.s32 %v5164_v29  ;;  %v6309_v24 = vpack.c.bf16 %v6255_v52, %v6252_v17 }
0x1ab5   : > { %vm5217_vm9 = vcmp.eq.s32.totalorder %v10356_v19, %v5153_v35 }
0x1ab6   : > { %v8896_v0 = vsel %vm5217_vm9, 1.0, %v15230_v31  ;;  %v5168_v20 = vadd.s32 %v5167_v30, %v5165_v9  ;;  %6324 = vmatpush.bf16.msrb.mxu3 %v6309_v24 }
0x1ab8   : > { %v5179_v58 = vpop.xlane.xlu0 %5178  ;;  %vm5218_vm10 = vcmp.eq.s32.totalorder %v10356_v19, %v5168_v20 }
0x1ab9   : > { %v5180_v55 = vcvt.f32.s32 %v5179_v58  ;;  %v8897_v40 = vsel %vm5218_vm10, 1.0, %v15230_v31 }
0x1aba   : > { %8968 = vmatmul.msk.f32.gmra.mxu0 %vm1007_vm1, %v8896_v0 }
0x1abb   : > { %v5183_v3 = vadd.s32 %v5182_v47, %v5180_v55 }
0x1abd   : > { %vm5219_vm11 = vcmp.eq.s32.totalorder %v10356_v19, %v5183_v3 }
0x1abe   : > { %v8898_v59 = vsel %vm5219_vm11, 1.0, %v15230_v31 }
0x1ac0   : > { %v6147_v32 = vpop.f32.mrf.mxu2  ;;  %v5194_v49 = vpop.xlane.xlu1 %5193 }
0x1ac1   : > { %v6148_v60 = vadd.f32 %v14139_v8, %v6147_v32  ;;  %v5195_v14 = vcvt.f32.s32 %v5194_v49 }
0x1ac2   : > { %8969 = vmatmul.msk.f32.gmra.mxu0 %vm1007_vm1, %v8897_v40 }
0x1ac3   : > { %v14199_v34 = vmax.f32 %v15257_v6, %v6148_v60  ;;  %v5198_v35 = vadd.s32 %v5197_v48, %v5195_v14  ;;  %v6250_v60 = vld [vmem:[#allocation11 + $0xb0] sm:$0xff]  ;;  %v6241_v6 = vld [vmem:[#allocation11 + $0x68] sm:$0xff] }
0x1ac4   : > { %v6307_v40 = vpack.c.bf16 %v6250_v60, %v6247_v18  ;;  %v6232_v60 = vld [vmem:[#allocation11 + $0x20] sm:$0xff] }
0x1ac5   : > { %vm5220_vm0 = vcmp.eq.s32.totalorder %v10356_v19, %v5198_v35 }
0x1ac6   : > { %v8899_v29 = vsel %vm5220_vm0, 1.0, %v15230_v31  ;;  %9052 = vmatpush.bf16.msra.mxu1 %v6307_v40  ;;  %6354 = vmatpush.bf16.msrb.mxu0 %v6307_v40 }
0x1aca   : > { %8970 = vmatmul.msk.f32.gmra.mxu0 %vm1007_vm1, %v8898_v59 }
0x1ad2   : > { %8971 = vmatmul.msk.f32.gmra.mxu0 %vm1007_vm1, %v8899_v29 }
0x1b1e   : > { %v5209_v44 = vpop.xlane.xlu2 %5208 }
0x1b1f   : > { %v5210_v5 = vcvt.f32.s32 %v5209_v44  ;;  %v5716_v9 = vpop.f32.mrf.mxu0 }
0x1b20   : > { %v5796_v20 = vadd.f32 %v5716_v9, %v12596_v57  ;;  %v6304_v57 = vpack.c.bf16 %v6244_v26, %v6241_v6  ;;  %v6243_v9 = vld [vmem:[#allocation11 + $0x78] sm:$0xff] }
0x1b21   : > { %v5213_v30 = vadd.s32 %v5212_v1, %v5210_v5 }
0x1b22   : > { %v5860_v55 = vmax.f32 %v5796_v20, 0.0  ;;  %9053 = vmatpush.bf16.msra.mxu1 %v6304_v57  ;;  %6355 = vmatpush.bf16.msrb.mxu0 %v6304_v57  ;;  %v6235_v20 = vld [vmem:[#allocation11 + $0x38] sm:$0xff]  ;;  %v14223_v57 = vpop.f32.mrf.mxu2 }
0x1b23   : > { %vm5221_vm12 = vcmp.eq.s32.totalorder %v10356_v19, %v5213_v30  ;;  %v6246_v19 = vld [vmem:[#allocation11 + $0x90] sm:$0xff] }
0x1b24   : > { %v8900_v0 = vsel %vm5221_vm12, 1.0, %v15230_v31  ;;  %v6249_v31 = vld [vmem:[#allocation11 + $0xa8] sm:$0xff] }
0x1b25   : > { %8972 = vmatmul.msk.f32.gmra.mxu0 %vm1007_vm1, %v8900_v0  ;;  %v6306_v49 = vpack.c.bf16 %v6249_v31, %v6246_v19  ;;  %v6237_v0 = vld [vmem:[#allocation11 + $0x48] sm:$0xff] }
0x1b27   : > { %v5719_v58 = vpop.f32.mrf.mxu0  ;;  %6325 = vmatpush.bf16.msrb.mxu3 %v6306_v49 }
0x1b28   : > { %v5797_v10 = vadd.f32 %v5719_v58, %v12608_v36 }
0x1b2a   : > { %v5861_v47 = vmax.f32 %v5797_v10, 0.0 }
0x1b2c   : > { %v5896_v32 = vpack.c.bf16 %v5861_v47, %v5860_v55  ;;  %v6238_v55 = vld [vmem:[#allocation11 + $0x50] sm:$0xff] }
0x1b2d   : > { %v6301_v47 = vpack.c.bf16 %v6238_v55, %v6235_v20  ;;  %v6140_v20 = vadd.f32 %v14139_v8, %v14159_v27 }
0x1b2e   : > { %9001 = vmatmul.msk.bf16.gmra.mxu2 %vm1007_vm1, %v5896_v32  ;;  %v6229_v32 = vld [vmem:[#allocation11 + $0x8] sm:$0xff] }
0x1b2f   : > { %v5722_v3 = vpop.f32.mrf.mxu0  ;;  %6356 = vmatpush.bf16.msrb.mxu0 %v6301_v47  ;;  %9054 = vmatpush.bf16.msra.mxu1 %v6301_v47  ;;  %v6298_v40 = vpack.c.bf16 %v6232_v60, %v6229_v32 }
0x1b30   : > { %v5798_v36 = vadd.f32 %v5722_v3, %v12649_v38  ;;  %v6240_v38 = vld [vmem:[#allocation11 + $0x60] sm:$0xff] }
0x1b31   : > { %v6303_v30 = vpack.c.bf16 %v6243_v9, %v6240_v38  ;;  %v6060_v38 = vadd.f32 %v14139_v8, %v13213_v25 }
0x1b32   : > { %v5862_v59 = vmax.f32 %v5798_v36, 0.0  ;;  %v6035_v36 = vadd.f32 %v14139_v8, %v12960_v22 }
0x1b33   : > { %6326 = vmatpush.bf16.msrb.mxu3 %v6303_v30  ;;  %6357 = vmatpush.bf16.msrb.mxu0 %v6298_v40  ;;  %v6080_v30 = vadd.f32 %v14139_v8, %v13447_v54 }
0x1b34   : > { %9055 = vmatpush.bf16.msra.mxu1 %v6298_v40 }
0x1b37   : > { %v5725_v14 = vpop.f32.mrf.mxu0 }
0x1b38   : > { %v5799_v48 = vadd.f32 %v5725_v14, %v12656_v63  ;;  %v6234_v63 = vld [vmem:[#allocation11 + $0x30] sm:$0xff]  ;;  %v6015_v14 = vadd.f32 %v14139_v8, %v12886_v42  ;;  %v6135_v42 = vadd.f32 %v14139_v8, %v14151_v41 }
0x1b39   : > { %v6300_v10 = vpack.c.bf16 %v6237_v0, %v6234_v63 }
0x1b3a   : > { %v5863_v35 = vmax.f32 %v5799_v48, 0.0  ;;  %v6173_v48 = vmax.f32 %v6015_v14, %v6035_v36 }
0x1b3b   : > { %6327 = vmatpush.bf16.msrb.mxu3 %v6300_v10 }
0x1b3c   : > { %v5897_v29 = vpack.c.bf16 %v5863_v35, %v5862_v59 }
0x1b3e   : > { %9002 = vmatmul.msk.bf16.gmra.mxu2 %vm1007_vm1, %v5897_v29  ;;  %v6095_v29 = vadd.f32 %v14139_v8, %v13678_v7 }
0x1b3f   : > { %v5728_v17 = vpop.f32.mrf.mxu0 }
0x1b40   : > { %v5800_v52 = vadd.f32 %v5728_v17, %v12677_v46  ;;  %v6228_v46 = vld [vmem:[#allocation11] sm:$0xff] }
0x1b42   : > { %v5864_v44 = vmax.f32 %v5800_v52, 0.0  ;;  %v6115_v52 = vadd.f32 %v14139_v8, %v13913_v4  ;;  %v6020_v4 = vadd.f32 %v14139_v8, %v12890_v37  ;;  %v6120_v37 = vadd.f32 %v14139_v8, %v13920_v16  ;;  %v15258_v16 = vld [vmem:[#allocation35_spill] sm:$0xff] }
0x1b43   : > { %v6025_v32 = vadd.f32 %v14139_v8, %v15258_v16 }
0x1b47   : > { %v5731_v24 = vpop.f32.mrf.mxu0 }
0x1b48   : > { %v5801_v23 = vadd.f32 %v5731_v24, %v12680_v53  ;;  %v6231_v53 = vld [vmem:[#allocation11 + $0x18] sm:$0xff] }
0x1b49   : > { %v6297_v18 = vpack.c.bf16 %v6231_v53, %v6228_v46  ;;  %v6045_v46 = vadd.f32 %v14139_v8, %v13023_v11 }
0x1b4a   : > { %v5865_v1 = vmax.f32 %v5801_v23, 0.0 }
0x1b4b   : > { %6328 = vmatpush.bf16.msrb.mxu3 %v6297_v18  ;;  %v15259_v18 = vld [vmem:[#allocation34_spill] sm:$0xff]  ;;  %v6177_v40 = vmax.f32 %v6025_v32, %v6045_v46  ;;  %v15263_v46 = vld [vmem:[#allocation36_spill] sm:$0xff] }
0x1b4c   : > { %v5898_v5 = vpack.c.bf16 %v5865_v1, %v5864_v44  ;;  %v6040_v1 = vadd.f32 %v14139_v8, %v12971_v56  ;;  %v6065_v27 = vadd.f32 %v14139_v8, %v15259_v18  ;;  %v6070_v16 = vadd.f32 %v14139_v8, %v15263_v46 }
0x1b4d   : > { %v6090_v18 = vadd.f32 %v14139_v8, %v13655_v13 }
0x1b4e   : > { %9003 = vmatmul.msk.bf16.gmra.mxu2 %vm1007_vm1, %v5898_v5  ;;  %v6175_v9 = vmax.f32 %v6020_v4, %v6040_v1  ;;  %v6254_v1 = vld [vmem:[#allocation11 + $0xd0] sm:$0xff]  ;;  %v6248_v4 = vld [vmem:[#allocation11 + $0xa0] sm:$0xff] }
0x1b4f   : > { %v5734_v58 = vpop.f32.mrf.mxu0 }
0x1b50   : > { %v5802_v3 = vadd.f32 %v5734_v58, %v12450_v45  ;;  %v6055_v45 = vadd.f32 %v14139_v8, %v13205_v39  ;;  %v6183_v63 = vmax.f32 %v6175_v9, %v6060_v38  ;;  %v6251_v38 = vld [vmem:[#allocation11 + $0xb8] sm:$0xff] }
0x1b51   : > { %v6308_v9 = vpack.c.bf16 %v6251_v38, %v6248_v4 }
0x1b52   : > { %v5866_v6 = vmax.f32 %v5802_v3, 0.0  ;;  %v6181_v35 = vmax.f32 %v6173_v48, %v6055_v45  ;;  %v6191_v0 = vmax.f32 %v6183_v63, %v6080_v30  ;;  %v15260_v3 = vld [vmem:[#allocation37_spill] sm:$0xff]  ;;  %v6145_v45 = vadd.f32 %v14139_v8, %v14187_v15  ;;  %v6266_v15 = vld [vmem:[#allocation11 + $0x130] sm:$0xff] }
0x1b53   : > { %v6242_v30 = vld [vmem:[#allocation11 + $0x70] sm:$0xff] }
0x1ba2   : > { %v5737_v19 = vpop.f32.mrf.mxu0 }
0x1ba3   : > { %v5803_v31 = vadd.f32 %v5737_v19, %v12704_v51  ;;  %v6075_v51 = vadd.f32 %v14139_v8, %v13440_v21  ;;  %v6085_v19 = vadd.f32 %v14139_v8, %v15260_v3  ;;  %v6110_v3 = vadd.f32 %v14139_v8, %v13891_v61 }
0x1ba5   : > { %v5867_v49 = vmax.f32 %v5803_v31, 0.0  ;;  %v6189_v17 = vmax.f32 %v6181_v35, %v6075_v51  ;;  %v6105_v31 = vadd.f32 %v14139_v8, %v13735_v43 }
0x1ba7   : > { %v5899_v26 = vpack.c.bf16 %v5867_v49, %v5866_v6  ;;  %v6197_v22 = vmax.f32 %v6189_v17, %v6095_v29 }
0x1ba9   : > { %9004 = vmatmul.msk.bf16.gmra.mxu2 %vm1007_vm1, %v5899_v26  ;;  %v6205_v24 = vmax.f32 %v6197_v22, %v6115_v52  ;;  %v6125_v26 = vadd.f32 %v14139_v8, %v13968_v33  ;;  %v6272_v33 = vld [vmem:[#allocation11 + $0x160] sm:$0xff] }
0x1bab   : > { %v6213_v44 = vmax.f32 %v6205_v24, %v6135_v42  ;;  %v6269_v24 = vld [vmem:[#allocation11 + $0x148] sm:$0xff] }
0x1bb1   : > { %v6152_v59 = vpop.f32.mrf.mxu2 }
0x1bb2   : > { %v6153_v39 = vadd.f32 %v14139_v8, %v6152_v59 }
0x1bb4   : > { %v6220_v7 = vmax.f32 %v14145_v12, %v6153_v39  ;;  %v6100_v12 = vadd.f32 %v14139_v8, %v13686_v2  ;;  %v6317_v39 = vpack.c.bf16 %v6269_v24, %v6266_v15 }
0x1bb6   : > { %v6199_v25 = vmax.f32 %v6191_v0, %v6100_v12  ;;  %v6236_v12 = vld [vmem:[#allocation11 + $0x40] sm:$0xff]  ;;  %v6239_v0 = vld [vmem:[#allocation11 + $0x58] sm:$0xff] }
0x1bb8   : > { %v6207_v58 = vmax.f32 %v6199_v25, %v6120_v37  ;;  %v6302_v37 = vpack.c.bf16 %v6239_v0, %v6236_v12  ;;  %v6230_v25 = vld [vmem:[#allocation11 + $0x10] sm:$0xff] }
0x1bb9   : > { %v6154_v23 = vpop.f32.mrf.mxu2 }
0x1bba   : > { %v6155_v21 = vadd.f32 %v14139_v8, %v6154_v23  ;;  %v6215_v55 = vmax.f32 %v6207_v58, %v6140_v20  ;;  %v6260_v23 = vld [vmem:[#allocation11 + $0x100] sm:$0xff]  ;;  %v6233_v20 = vld [vmem:[#allocation11 + $0x28] sm:$0xff] }
0x1bbb   : > { %v15261_v58 = vld [vmem:[#allocation32_spill] sm:$0xff] }
0x1bbc   : > { %v6221_v5 = vmax.f32 %v6213_v44, %v6155_v21  ;;  %v6263_v44 = vld [vmem:[#allocation11 + $0x118] sm:$0xff] }
0x1bbd   : > { %v6314_v21 = vpack.c.bf16 %v6263_v44, %v6260_v23 }
0x1bbe   : > { %v14249_v41 = vpack.c.bf16 %v6221_v5, %v6220_v7 }
0x1bc0   : > { %6329 = vmatmul.bf16.vlgmr.msrb.gmra.mxu3 %v14249_v41  ;;  %6358 = vmatmul.bf16.vlgmr.msrb.gmra.mxu0 %v14249_v41 }
0x1bc1   : > { %v6157_v56 = vpop.f32.mrf.mxu2 }
0x1bc2   : > { %v6158_v54 = vadd.f32 %v14139_v8, %v6157_v56  ;;  %v6245_v56 = vld [vmem:[#allocation11 + $0x88] sm:$0xff] }
0x1bc3   : > { %v6305_v63 = vpack.c.bf16 %v6245_v56, %v6242_v30 }
0x1bc4   : > { %v14266_v2 = vmax.f32 %v14157_v50, %v6158_v54  ;;  %v6185_v50 = vmax.f32 %v6177_v40, %v6065_v27  ;;  %v6050_v54 = vadd.f32 %v14139_v8, %v15261_v58 }
0x1bc6   : > { %v6193_v49 = vmax.f32 %v6185_v50, %v6085_v19 }
0x1bc8   : > { %v6201_v14 = vmax.f32 %v6193_v49, %v6105_v31  ;;  %v6150_v31 = vadd.f32 %v14139_v8, %v14223_v57 }
0x1bc9   : > { %v6159_v10 = vpop.f32.mrf.mxu2 }
0x1bca   : > { %v6160_v47 = vadd.f32 %v14139_v8, %v6159_v10  ;;  %v6209_v51 = vmax.f32 %v6201_v14, %v6125_v26  ;;  %v6299_v10 = vpack.c.bf16 %v6233_v20, %v6230_v25 }
0x1bcc   : > { %v14268_v53 = vmax.f32 %v6215_v55, %v6160_v47  ;;  %v6217_v35 = vmax.f32 %v6209_v51, %v6145_v45  ;;  %v15262_v55 = vld [vmem:[#allocation33_spill] sm:$0xff] }
0x1bcd   : > { %v6030_v47 = vadd.f32 %v14139_v8, %v15262_v55 }
0x1bce   : > { %v14276_v60 = vpack.c.bf16 %v14268_v53, %v14266_v2 }
0x1bcf   : > { %v6179_v32 = vmax.f32 %v6030_v47, %v6050_v54 }
0x1bd0   : > { %6334 = vmatmul.bf16.gmra.mxu3 %v14276_v60  ;;  %6363 = vmatmul.bf16.gmra.mxu0 %v14276_v60 }
0x1bd1   : > { %v6162_v11 = vpop.f32.mrf.mxu2  ;;  %v6187_v40 = vmax.f32 %v6179_v32, %v6070_v16 }
0x1bd2   : > { %v6163_v6 = vadd.f32 %v14139_v8, %v6162_v11  ;;  %v6130_v11 = vadd.f32 %v14139_v8, %v14123_v28 }
0x1bd3   : > { %v6195_v19 = vmax.f32 %v6187_v40, %v6090_v18 }
0x1bd4   : > { %v6224_v36 = vmax.f32 %v14165_v62, %v6163_v6  ;;  %v6275_v62 = vld [vmem:[#allocation11 + $0x178] sm:$0xff] }
0x1bd5   : > { %v6320_v42 = vpack.c.bf16 %v6275_v62, %v6272_v33  ;;  %v6203_v50 = vmax.f32 %v6195_v19, %v6110_v3 }
0x1bd6   : > { %v8113_v48 = vmax.f32 %v6220_v7, %v6224_v36  ;;  %v6257_v7 = vld [vmem:[#allocation11 + $0xe8] sm:$0xff] }
0x1bd7   : > { %6379 = vmatpush.bf16.msra.mxu3 %v6320_v42  ;;  %v6211_v49 = vmax.f32 %v6203_v50, %v6130_v11 }
0x1bd9   : > { %v6164_v59 = vpop.f32.mrf.mxu2 }
0x1bda   : > { %v6165_v29 = vadd.f32 %v14139_v8, %v6164_v59 }
0x1bdb   : > { %6380 = vmatpush.bf16.msra.mxu3 %v6317_v39 }
0x1bdc   : > { %v6225_v17 = vmax.f32 %v6217_v35, %v6165_v29 }
0x1bde   : > { %v14291_v43 = vpack.c.bf16 %v6225_v17, %v6224_v36  ;;  %v8114_v52 = vmax.f32 %v6221_v5, %v6225_v17  ;;  %v6311_v5 = vpack.c.bf16 %v6257_v7, %v6254_v1  ;;  %v6219_v36 = vmax.f32 %v6211_v49, %v6150_v31 }
0x1bdf   : > { %6381 = vmatpush.bf16.msra.mxu3 %v6314_v21 }
0x1be0   : > { %v8117_v22 = vmax.f32 %v8113_v48, %v8114_v52  ;;  %6339 = vmatmul.bf16.gmra.mxu3 %v14291_v43  ;;  %6368 = vmatmul.bf16.vlgmr.msra.gmra.mxu1 %v14291_v43 }
0x1be3   : > { %6382 = vmatpush.bf16.msra.mxu3 %v6311_v5 }
0x1be7   : > { %6383 = vmatpush.bf16.msra.mxu3 %v6308_v9 }
0x1beb   : > { %6384 = vmatpush.bf16.msra.mxu3 %v6305_v63 }
0x1bef   : > { %6385 = vmatpush.bf16.msra.mxu3 %v6302_v37 }
0x1bf3   : > { %6386 = vmatpush.bf16.msra.mxu3 %v6299_v10 }
0x1c2c   : > { %v6167_v27 = vpop.f32.mrf.mxu2 }
0x1c2d   : > { %v6168_v6 = vadd.f32 %v14139_v8, %v6167_v27 }
0x1c2f   : > { %v6226_v13 = vmax.f32 %v14199_v34, %v6168_v6 }
0x1c31   : > { %v8115_v61 = vmax.f32 %v14266_v2, %v6226_v13 }
0x1c34   : > { %v6169_v26 = vpop.f32.mrf.mxu2 }
0x1c35   : > { %v6170_v14 = vadd.f32 %v14139_v8, %v6169_v26 }
0x1c37   : > { %v6227_v45 = vmax.f32 %v6219_v36, %v6170_v14 }
0x1c39   : > { %v14313_v48 = vpack.c.bf16 %v6227_v45, %v6226_v13  ;;  %v8116_v28 = vmax.f32 %v14268_v53, %v6227_v45 }
0x1c3b   : > { %v8118_v51 = vmax.f32 %v8115_v61, %v8116_v28  ;;  %6344 = vmatmul.bf16.gmra.mxu3 %v14313_v48  ;;  %6373 = vmatmul.bf16.gmra.mxu1 %v14313_v48 }
0x1c3d   : > { %v14318_v57 = vmax.f32 %v8117_v22, %v8118_v51  ;;  %v14321_v59 = vpop.f32.mrf.mxu0 }
0x1c3e   : > { %v6680_v40 = vpack.c.bf16 %v14321_v59, %v14321_v59 }
0x1c40   : > { %v6740_v31 = vunpack.c.l.b16 %v6680_v40 }
0x1c43   : > { %v14326_v2 = vpop.f32.mrf.mxu3 }
0x1c44   : > { %v6648_v36 = vpack.c.bf16 %v14326_v2, %v14326_v2 }
0x1c45   : > { %v14323_v34 = vpop.f32.mrf.mxu0 }
0x1c46   : > { %v14337_v62 = vpack.i.bf16 %v14323_v34, %v14321_v59  ;;  %v6681_v27 = vpack.c.bf16 %v14323_v34, %v14323_v34  ;;  %v6720_v45 = vunpack.c.l.b16 %v6648_v36 }
0x1c48   : > { %v6741_v50 = vunpack.c.l.b16 %v6681_v27 }
0x1c4a   : > { %v6748_v6 = vpack.c.b16 %v6741_v50, %v6740_v31 }
0x1c4b   : > { %6387 = vmatmul.bf16.vlgmr.msra.gmra.mxu3 %v14249_v41  ;;  %v14329_v17 = vpop.f32.mrf.mxu3 }
0x1c4c   : > { %v14344_v42 = vpack.i.bf16 %v14329_v17, %v14326_v2  ;;  %v6649_v49 = vpack.c.bf16 %v14329_v17, %v14329_v17  ;;  %v6766_v13 = vsel %vm6752_vm13, %v6748_v6, 0 }
0x1c4d   : > { %v6364_v35 = vpop.f32.mrf.mxu0 }
0x1c4e   : > { %v6682_v55 = vpack.c.bf16 %v6364_v35, %v6364_v35  ;;  %v6721_v14 = vunpack.c.l.b16 %v6649_v49 }
0x1c50   : > { %v6742_v32 = vunpack.c.l.b16 %v6682_v55  ;;  %v6728_v61 = vpack.c.b16 %v6721_v14, %v6720_v45 }
0x1c53   : > { %v14333_v33 = vpop.f32.mrf.mxu3 }
0x1c54   : > { %v6650_v34 = vpack.c.bf16 %v14333_v33, %v14333_v33 }
0x1c55   : > { %v6366_v52 = vpop.f32.mrf.mxu0 }
0x1c56   : > { %v9212_v22 = vpack.i.bf16 %v6366_v52, %v6364_v35  ;;  %v6683_v10 = vpack.c.bf16 %v6366_v52, %v6366_v52  ;;  %v6722_v2 = vunpack.c.l.b16 %v6650_v34 }
0x1c58   : > { %v6743_v16 = vunpack.c.l.b16 %v6683_v10 }
0x1c5a   : > { %v6749_v18 = vpack.c.b16 %v6743_v16, %v6742_v32 }
0x1c5b   : > { %6392 = vmatmul.bf16.gmra.mxu3 %v14276_v60  ;;  %v14346_v15 = vpop.f32.mrf.mxu3 }
0x1c5c   : > { %v14356_v39 = vpack.i.bf16 %v14346_v15, %v14333_v33  ;;  %v6769_v19 = vsel %vm6752_vm13, %v6749_v18, 0  ;;  %v6651_v51 = vpack.c.bf16 %v14346_v15, %v14346_v15 }
0x1c5d   : > { %v6369_v8 = vpop.f32.mrf.mxu1 }
0x1c5e   : > { %v6684_v63 = vpack.c.bf16 %v6369_v8, %v6369_v8 }
0x1c60   : > { %v6744_v58 = vunpack.c.l.b16 %v6684_v63 }
0x1c63   : > { %v14352_v24 = vpop.f32.mrf.mxu3 }
0x1c65   : > { %v6371_v53 = vpop.f32.mrf.mxu1 }
0x1c66   : > { %v9202_v29 = vpack.i.bf16 %v6371_v53, %v6369_v8  ;;  %v6685_v56 = vpack.c.bf16 %v6371_v53, %v6371_v53  ;;  %v6723_v8 = vunpack.c.l.b16 %v6651_v51 }
0x1c68   : > { %9203 = vrot.lane.b32.xlu1 %v9202_v29, %s9978_s22  ;;  %v6745_v20 = vunpack.c.l.b16 %v6685_v56  ;;  %v6729_v35 = vpack.c.b16 %v6723_v8, %v6722_v2 }
0x1c6a   : > { %v6750_v54 = vpack.c.b16 %v6745_v20, %v6744_v58 }
0x1c6b   : > { %6397 = vmatmul.bf16.gmra.mxu3 %v14291_v43  ;;  %v14360_v23 = vpop.f32.mrf.mxu3 }
0x1c6c   : > { %v14364_v44 = vpack.i.bf16 %v14360_v23, %v14352_v24  ;;  %v6772_v46 = vsel %vm6752_vm13, %v6750_v54, 0  ;;  %v6653_v17 = vpack.c.bf16 %v14360_v23, %v14360_v23 }
0x1c6e   : > { %v6725_v33 = vunpack.c.l.b16 %v6653_v17 }
0x1c70   : > { %9213 = vrot.lane.b32.xlu1 %v9212_v22, %s9978_s22 }
0x1c78   : > { %9233 = vrot.lane.b32.xlu1 %v14337_v62, %s9978_s22 }
0x1c7b   : > { %6402 = vmatmul.bf16.gmra.mxu3 %v14313_v48 }
0x1c80   : > { %9248 = vrot.lane.b32.xlu1 %v14344_v42, %s9978_s22 }
0x1c88   : > { %9263 = vrot.lane.b32.xlu1 %v14344_v42, %s9979_s30 }
0x1c90   : > { %9278 = vrot.lane.b32.xlu1 %v14356_v39, %s9979_s30 }
0x1c98   : > { %9293 = vrot.lane.b32.xlu1 %v14364_v44, %s9979_s30 }
0x1cb8   : > { %v6374_v21 = vpop.f32.mrf.mxu1 }
0x1cb9   : > { %v6686_v7 = vpack.c.bf16 %v6374_v21, %v6374_v21 }
0x1cbb   : > { %v6746_v9 = vunpack.c.l.b16 %v6686_v7 }
0x1cbe   : > { %v14368_v1 = vpop.f32.mrf.mxu3 }
0x1cc0   : > { %v6376_v5 = vpop.f32.mrf.mxu1 }
0x1cc1   : > { %v9207_v4 = vpack.i.bf16 %v6376_v5, %v6374_v21  ;;  %v6687_v38 = vpack.c.bf16 %v6376_v5, %v6376_v5 }
0x1cc3   : > { %9208 = vrot.lane.b32.xlu2 %v9207_v4, %s9979_s30  ;;  %9198 = vrot.lane.b32.xlu0 %v9207_v4, %s9978_s22  ;;  %v6747_v30 = vunpack.c.l.b16 %v6687_v38 }
0x1cc5   : > { %v6751_v12 = vpack.c.b16 %v6747_v30, %v6746_v9 }
0x1cc6   : > { %v14372_v0 = vpop.f32.mrf.mxu3 }
0x1cc7   : > { %v6775_v37 = vsel %vm6752_vm13, %v6751_v12, 0  ;;  %v14377_v25 = vpack.i.bf16 %v14372_v0, %v14368_v1  ;;  %v6655_v56 = vpack.c.bf16 %v14372_v0, %v14372_v0 }
0x1cc8   : > { %6781 = vmatpush.bf16.xpose.msrb.mxu1 %v6775_v37  ;;  %v6654_v37 = vpack.c.bf16 %v14368_v1, %v14368_v1 }
0x1cc9   : > { %9308 = vrot.lane.b32.xlu1 %v14377_v25, %s9979_s30  ;;  %v6727_v54 = vunpack.c.l.b16 %v6655_v56 }
0x1ccb   : > { %9228 = vrot.lane.b32.xlu2 %v9202_v29, %s9980_s3  ;;  %9218 = vrot.lane.b32.xlu0 %v9207_v4, %s9980_s3 }
0x1cce   : > { %v14383_v47 = vpop.f32.mrf.mxu3 }
0x1ccf   : > { %v7501_v10 = vpack.c.bf16 %v14383_v47, %v14383_v47 }
0x1cd0   : > { %6782 = vmatpush.bf16.xpose.msrb.mxu1 %v6772_v46  ;;  %v6726_v46 = vunpack.c.l.b16 %v6654_v37 }
0x1cd1   : > { %v7561_v32 = vunpack.c.l.b16 %v7501_v10 }
0x1cd2   : > { %v6731_v1 = vpack.c.b16 %v6727_v54, %v6726_v46 }
0x1cd3   : > { %9243 = vrot.lane.b32.xlu2 %v9212_v22, %s9980_s3  ;;  %9223 = vrot.lane.b32.xlu0 %v9202_v29, %s9979_s30 }
0x1cd6   : > { %v14392_v3 = vpop.f32.mrf.mxu3 }
0x1cd7   : > { %v9322_v11 = vpack.i.bf16 %v14392_v3, %v14383_v47  ;;  %v7502_v58 = vpack.c.bf16 %v14392_v3, %v14392_v3 }
0x1cd8   : > { %6783 = vmatpush.bf16.xpose.msrb.mxu1 %v6769_v19 }
0x1cd9   : > { %9323 = vrot.lane.b32.xlu1 %v9322_v11, %s9979_s30  ;;  %v7562_v16 = vunpack.c.l.b16 %v7502_v58 }
0x1cda   : > { %v9204_v47 = vpop.permute.xlu1 %9203 }
0x1cdb   : > { %9258 = vrot.lane.b32.xlu2 %v14337_v62, %s9980_s3  ;;  %9238 = vrot.lane.b32.xlu0 %v9212_v22, %s9979_s30  ;;  %v6652_v22 = vpack.c.bf16 %v14352_v24, %v14352_v24  ;;  %v7569_v18 = vpack.c.b16 %v7562_v16, %v7561_v32  ;;  %v9206_v45 = vunpack.i.h.bf16 %v9204_v47 }
0x1cdd   : > { %v6693_v8 = vpack.c.bf16 %v9206_v45, %v9206_v45 }
0x1cde   : > { %v6393_v26 = vpop.f32.mrf.mxu3 }
0x1cdf   : > { %v7503_v63 = vpack.c.bf16 %v6393_v26, %v6393_v26 }
0x1ce0   : > { %6784 = vmatpush.bf16.xpose.msrb.mxu1 %v6766_v13 }
0x1ce1   : > { %v7563_v55 = vunpack.c.l.b16 %v7503_v63 }
0x1ce2   : > { %v9214_v36 = vpop.permute.xlu1 %9213 }
0x1ce3   : > { %9273 = vrot.lane.b32.xlu2 %v14356_v39, %s9978_s22  ;;  %9253 = vrot.lane.b32.xlu0 %v14337_v62, %s9979_s30 }
0x1ce6   : > { %v6395_v28 = vpop.f32.mrf.mxu3 }
0x1ce7   : > { %9005 = vmatmul.msk.bf16.vlgmr.msrb.gmra.mxu1 %vm6752_vm13, %v6728_v61  ;;  %v9337_v62 = vpack.i.bf16 %v6395_v28, %v6393_v26  ;;  %v7504_v30 = vpack.c.bf16 %v6395_v28, %v6395_v28  ;;  %v9205_v61 = vunpack.i.l.bf16 %v9204_v47 }
0x1ce9   : > { %v7564_v20 = vunpack.c.l.b16 %v7504_v30  ;;  %v6692_v2 = vpack.c.bf16 %v9205_v61, %v9205_v61 }
0x1cea   : > { %v9234_v14 = vpop.permute.xlu1 %9233 }
0x1ceb   : > { %9288 = vrot.lane.b32.xlu2 %v14364_v44, %s9978_s22  ;;  %9268 = vrot.lane.b32.xlu0 %v14344_v42, %s9980_s3  ;;  %v6724_v42 = vunpack.c.l.b16 %v6652_v22  ;;  %v7570_v0 = vpack.c.b16 %v7564_v20, %v7563_v55  ;;  %v6839_v22 = vunpack.c.l.b16 %v6693_v8  ;;  %v9236_v10 = vunpack.i.h.bf16 %v9234_v14 }
0x1cec   : > { %v9235_v16 = vunpack.i.l.bf16 %v9234_v14 }
0x1cee   : > { %v6398_v59 = vpop.f32.mrf.mxu3 }
0x1cef   : > { %v7505_v5 = vpack.c.bf16 %v6398_v59, %v6398_v59 }
0x1cf1   : > { %v7565_v12 = vunpack.c.l.b16 %v7505_v5 }
0x1cf3   : > { %9283 = vrot.lane.b32.xlu0 %v14356_v39, %s9980_s3  ;;  %9303 = vrot.lane.b32.xlu2 %v14377_v25, %s9978_s22  ;;  %v6730_v39 = vpack.c.b16 %v6725_v33, %v6724_v42  ;;  %v6838_v33 = vunpack.c.l.b16 %v6692_v2  ;;  %v9216_v42 = vunpack.i.h.bf16 %v9214_v36 }
0x1cf6   : > { %v6400_v53 = vpop.f32.mrf.mxu3 }
0x1cf7   : > { %9006 = vmatmul.msk.bf16.gmra.mxu1 %vm6752_vm13, %v6729_v35  ;;  %v14424_v29 = vpack.i.bf16 %v6400_v53, %v6398_v59  ;;  %v7506_v23 = vpack.c.bf16 %v6400_v53, %v6400_v53 }
0x1cf9   : > { %9358 = vrot.lane.b32.xlu1 %v14424_v29, %s9980_s3  ;;  %v7566_v9 = vunpack.c.l.b16 %v7506_v23 }
0x1cfb   : > { %9298 = vrot.lane.b32.xlu0 %v14364_v44, %s9980_s3  ;;  %9318 = vrot.lane.b32.xlu2 %v9322_v11, %s9978_s22 }
0x1cfe   : > { %v6403_v52 = vpop.f32.mrf.mxu3 }
0x1cff   : > { %v7507_v15 = vpack.c.bf16 %v6403_v52, %v6403_v52 }
0x1d01   : > { %v7567_v4 = vunpack.c.l.b16 %v7507_v15  ;;  %v9215_v15 = vunpack.i.l.bf16 %v9214_v36 }
0x1d03   : > { %9313 = vrot.lane.b32.xlu0 %v14377_v25, %s9980_s3  ;;  %9338 = vrot.lane.b32.xlu2 %v9337_v62, %s9979_s30  ;;  %v7571_v25 = vpack.c.b16 %v7566_v9, %v7565_v12  ;;  %v6690_v9 = vpack.c.bf16 %v9215_v15, %v9215_v15 }
0x1d05   : > { %v6836_v54 = vunpack.c.l.b16 %v6690_v9 }
0x1d06   : > { %v6405_v44 = vpop.f32.mrf.mxu3 }
0x1d07   : > { %v7508_v21 = vpack.c.bf16 %v6405_v44, %v6405_v44  ;;  %9007 = vmatmul.msk.bf16.gmra.mxu1 %vm6752_vm13, %v6730_v39  ;;  %v9372_v7 = vpack.i.bf16 %v6405_v44, %v6403_v52 }
0x1d09   : > { %v7568_v38 = vunpack.c.l.b16 %v7508_v21  ;;  %9373 = vrot.lane.b32.xlu1 %v9372_v7, %s9980_s3 }
0x1d0b   : > { %9328 = vrot.lane.b32.xlu0 %v9322_v11, %s9980_s3  ;;  %9363 = vrot.lane.b32.xlu2 %v9372_v7, %s9978_s22  ;;  %v7572_v24 = vpack.c.b16 %v7568_v38, %v7567_v4  ;;  %v6844_v38 = vpack.c.b16 %v6839_v22, %v6838_v33 }
0x1d0d   : > { %7593 = vmatpush.bf16.msra.mxu2 %v7572_v24  ;;  %v6691_v24 = vpack.c.bf16 %v9216_v42, %v9216_v42  ;;  %v6865_v20 = vsel %vm6752_vm13, %v6844_v38, 0 }
0x1d0f   : > { %v6837_v58 = vunpack.c.l.b16 %v6691_v24 }
0x1d11   : > { %7594 = vmatpush.bf16.msra.mxu2 %v7571_v25 }
0x1d13   : > { %9333 = vrot.lane.b32.xlu0 %v9337_v62, %s9978_s22  ;;  %9368 = vrot.lane.b32.xlu2 %v9372_v7, %s9979_s30 }
0x1d15   : > { %7595 = vmatpush.bf16.msra.mxu2 %v7570_v0 }
0x1d17   : > { %9008 = vmatmul.msk.bf16.gmra.mxu1 %vm6752_vm13, %v6731_v1 }
0x1d19   : > { %7596 = vmatpush.bf16.msra.mxu2 %v7569_v18 }
0x1d1b   : > { %9343 = vrot.lane.b32.xlu0 %v9337_v62, %s9980_s3  ;;  %v14463_v62 = vpop.permute.xlu1 %9248 }
0x1d1d   : > { %v9209_v27 = vpop.permute.xlu2 %9208 }
0x1d1e   : > { %v9211_v40 = vunpack.i.h.bf16 %v9209_v27  ;;  %v9210_v3 = vunpack.i.l.bf16 %v9209_v27 }
0x1d20   : > { %v6703_v19 = vpack.c.bf16 %v9211_v40, %v9211_v40  ;;  %v6702_v11 = vpack.c.bf16 %v9210_v3, %v9210_v3 }
0x1d22   : > { %v6934_v50 = vunpack.c.l.b16 %v6703_v19  ;;  %v6933_v31 = vunpack.c.l.b16 %v6702_v11 }
0x1d23   : > { %9348 = vrot.lane.b32.xlu0 %v14424_v29, %s9978_s22  ;;  %v14471_v27 = vpop.permute.xlu1 %9263 }
0x1d24   : > { %v6938_v6 = vpack.c.b16 %v6934_v50, %v6933_v31  ;;  %v6843_v31 = vpack.c.b16 %v6837_v58, %v6836_v54 }
0x1d25   : > { %v9229_v49 = vpop.permute.xlu2 %9228 }
0x1d26   : > { %v6961_v26 = vsel %vm6752_vm13, %v6938_v6, 0  ;;  %v9231_v21 = vunpack.i.h.bf16 %v9229_v49  ;;  %v9230_v7 = vunpack.i.l.bf16 %v9229_v49  ;;  %v6689_v6 = vpack.c.bf16 %v9236_v10, %v9236_v10 }
0x1d27   : > { %6967 = vmatpush.bf16.xpose.msra.mxu0 %v6961_v26  ;;  %v6688_v49 = vpack.c.bf16 %v9235_v16, %v9235_v16 }
0x1d28   : > { %v6709_v63 = vpack.c.bf16 %v9231_v21, %v9231_v21  ;;  %v6708_v12 = vpack.c.bf16 %v9230_v7, %v9230_v7  ;;  %v6835_v8 = vunpack.c.l.b16 %v6689_v6  ;;  %v9251_v21 = vunpack.i.h.bf16 %v14463_v62 }
0x1d29   : > { %v6834_v2 = vunpack.c.l.b16 %v6688_v49  ;;  %v9250_v7 = vunpack.i.l.bf16 %v14463_v62 }
0x1d2a   : > { %v7025_v1 = vunpack.c.l.b16 %v6709_v63  ;;  %v7024_v47 = vunpack.c.l.b16 %v6708_v12  ;;  %v6657_v63 = vpack.c.bf16 %v9251_v21, %v9251_v21 }
0x1d2b   : > { %9353 = vrot.lane.b32.xlu0 %v14424_v29, %s9979_s30  ;;  %v6842_v38 = vpack.c.b16 %v6835_v8, %v6834_v2 }
0x1d2c   : > { %v7030_v61 = vpack.c.b16 %v7025_v1, %v7024_v47  ;;  %v6815_v1 = vunpack.c.l.b16 %v6657_v63  ;;  %v9265_v47 = vunpack.i.l.bf16 %v14471_v27 }
0x1d2d   : > { %v14459_v13 = vpop.permute.xlu2 %9243  ;;  %v6859_v58 = vsel %vm6752_vm13, %v6842_v38, 0 }
0x1d2e   : > { %v9246_v40 = vunpack.i.h.bf16 %v14459_v13  ;;  %v9245_v3 = vunpack.i.l.bf16 %v14459_v13  ;;  %v6862_v13 = vsel %vm6752_vm13, %v6843_v31, 0  ;;  %v7051_v33 = vsel %vm6752_vm13, %v7030_v61, 0 }
0x1d30   : > { %v6707_v14 = vpack.c.bf16 %v9246_v40, %v9246_v40  ;;  %v6706_v45 = vpack.c.bf16 %v9245_v3, %v9245_v3 }
0x1d35   : > { %v14461_v28 = vpop.permute.xlu2 %9258  ;;  %v9199_v51 = vpop.permute.xlu0 %9198 }
0x1d36   : > { %v9201_v59 = vunpack.i.h.bf16 %v9199_v51  ;;  %v9200_v34 = vunpack.i.l.bf16 %v9199_v51  ;;  %v9260_v42 = vunpack.i.l.bf16 %v14461_v28 }
0x1d38   : > { %v6695_v35 = vpack.c.bf16 %v9201_v59, %v9201_v59  ;;  %v6694_v53 = vpack.c.bf16 %v9200_v34, %v9200_v34 }
0x1d3a   : > { %v6841_v17 = vunpack.c.l.b16 %v6695_v35  ;;  %v6840_v52 = vunpack.c.l.b16 %v6694_v53 }
0x1d3c   : > { %v6845_v29 = vpack.c.b16 %v6841_v17, %v6840_v52  ;;  %v7023_v17 = vunpack.c.l.b16 %v6707_v14  ;;  %v7022_v52 = vunpack.c.l.b16 %v6706_v45 }
0x1d3d   : > { %v14465_v39 = vpop.permute.xlu2 %9273  ;;  %v9219_v44 = vpop.permute.xlu0 %9218 }
0x1d3e   : > { %v9221_v23 = vunpack.i.h.bf16 %v9219_v44  ;;  %v9220_v5 = vunpack.i.l.bf16 %v9219_v44  ;;  %v6868_v4 = vsel %vm6752_vm13, %v6845_v29, 0  ;;  %v9261_v29 = vunpack.i.h.bf16 %v14461_v28 }
0x1d3f   : > { %6874 = vmatpush.bf16.xpose.msrb.mxu3 %v6868_v4  ;;  %v7029_v24 = vpack.c.b16 %v7023_v17, %v7022_v52  ;;  %v6656_v28 = vpack.c.bf16 %v9250_v7, %v9250_v7  ;;  %v9275_v8 = vunpack.i.l.bf16 %v14465_v39 }
0x1d40   : > { %v6711_v30 = vpack.c.bf16 %v9221_v23, %v9221_v23  ;;  %v6710_v56 = vpack.c.bf16 %v9220_v5, %v9220_v5  ;;  %v14485_v23 = vpop.permute.xlu1 %9278  ;;  %v6705_v9 = vpack.c.bf16 %v9261_v29, %v9261_v29 }
0x1d41   : > { %v7048_v54 = vsel %vm6752_vm13, %v7029_v24, 0  ;;  %v6658_v29 = vpack.c.bf16 %v9275_v8, %v9275_v8  ;;  %v9280_v63 = vunpack.i.l.bf16 %v14485_v23 }
0x1d42   : > { %v7027_v37 = vunpack.c.l.b16 %v6711_v30  ;;  %v7026_v25 = vunpack.c.l.b16 %v6710_v56  ;;  %v6704_v30 = vpack.c.bf16 %v9260_v42, %v9260_v42  ;;  %v7021_v10 = vunpack.c.l.b16 %v6705_v9 }
0x1d43   : > { %v9281_v9 = vunpack.i.h.bf16 %v14485_v23 }
0x1d44   : > { %v7031_v55 = vpack.c.b16 %v7027_v37, %v7026_v25 }
0x1d45   : > { %v14469_v46 = vpop.permute.xlu2 %9288  ;;  %v9224_v0 = vpop.permute.xlu0 %9223 }
0x1d46   : > { %v9226_v32 = vunpack.i.h.bf16 %v9224_v0  ;;  %v9225_v18 = vunpack.i.l.bf16 %v9224_v0  ;;  %v7054_v19 = vsel %vm6752_vm13, %v7031_v55, 0  ;;  %v7020_v55 = vunpack.c.l.b16 %v6704_v30 }
0x1d47   : > { %6875 = vmatpush.bf16.xpose.msrb.mxu3 %v6865_v20  ;;  %7060 = vmatpush.bf16.xpose.msra.mxu1 %v7054_v19 }
0x1d48   : > { %v6701_v11 = vpack.c.bf16 %v9226_v32, %v9226_v32  ;;  %v6700_v50 = vpack.c.bf16 %v9225_v18, %v9225_v18  ;;  %v6814_v32 = vunpack.c.l.b16 %v6656_v28  ;;  %v9266_v18 = vunpack.i.h.bf16 %v14471_v27  ;;  %v14494_v19 = vpop.permute.xlu1 %9293 }
0x1d4a   : > { %v6932_v26 = vunpack.c.l.b16 %v6701_v11  ;;  %v6931_v36 = vunpack.c.l.b16 %v6700_v50  ;;  %v7028_v50 = vpack.c.b16 %v7021_v10, %v7020_v55  ;;  %v6822_v31 = vpack.c.b16 %v6815_v1, %v6814_v32 }
0x1d4b   : > { %v6667_v1 = vpack.c.bf16 %v9281_v9, %v9281_v9  ;;  %v6666_v32 = vpack.c.bf16 %v9280_v63, %v9280_v63 }
0x1d4c   : > { %v6937_v51 = vpack.c.b16 %v6932_v26, %v6931_v36  ;;  %v6665_v26 = vpack.c.bf16 %v9266_v18, %v9266_v18  ;;  %v6664_v36 = vpack.c.bf16 %v9265_v47, %v9265_v47 }
0x1d4d   : > { %v9239_v59 = vpop.permute.xlu0 %9238  ;;  %v14476_v34 = vpop.permute.xlu2 %9303 }
0x1d4e   : > { %v9241_v35 = vunpack.i.h.bf16 %v9239_v59  ;;  %v9240_v53 = vunpack.i.l.bf16 %v9239_v59  ;;  %v6958_v22 = vsel %vm6752_vm13, %v6937_v51, 0  ;;  %v7045_v59 = vsel %vm6752_vm13, %v7028_v50, 0 }
0x1d4f   : > { %6876 = vmatpush.bf16.xpose.msrb.mxu3 %v6862_v13  ;;  %6968 = vmatpush.bf16.xpose.msra.mxu0 %v6958_v22  ;;  %v9276_v13 = vunpack.i.h.bf16 %v14465_v39  ;;  %v6908_v2 = vunpack.c.l.b16 %v6665_v26  ;;  %v9290_v50 = vunpack.i.l.bf16 %v14469_v46  ;;  %v6910_v26 = vunpack.c.l.b16 %v6667_v1 }
0x1d50   : > { %v6699_v15 = vpack.c.bf16 %v9241_v35, %v9241_v35  ;;  %v6698_v44 = vpack.c.bf16 %v9240_v53, %v9240_v53  ;;  %7061 = vmatpush.bf16.xpose.msra.mxu1 %v7051_v33  ;;  %v6907_v35 = vunpack.c.l.b16 %v6664_v36  ;;  %v14503_v52 = vpop.permute.xlu1 %9308  ;;  %v6909_v36 = vunpack.c.l.b16 %v6666_v32 }
0x1d51   : > { %v6659_v33 = vpack.c.bf16 %v9276_v13, %v9276_v13  ;;  %v6660_v8 = vpack.c.bf16 %v9290_v50, %v9290_v50  ;;  %v9306_v32 = vunpack.i.h.bf16 %v14476_v34 }
0x1d52   : > { %v6930_v5 = vunpack.c.l.b16 %v6699_v15  ;;  %v6929_v4 = vunpack.c.l.b16 %v6698_v44  ;;  %v6915_v7 = vpack.c.b16 %v6908_v2, %v6907_v35 }
0x1d53   : > { %v6817_v30 = vunpack.c.l.b16 %v6659_v33 }
0x1d54   : > { %v6936_v56 = vpack.c.b16 %v6930_v5, %v6929_v4 }
0x1d55   : > { %v9254_v12 = vpop.permute.xlu0 %9253  ;;  %v14487_v37 = vpop.permute.xlu2 %9318 }
0x1d56   : > { %v9256_v25 = vunpack.i.h.bf16 %v9254_v12  ;;  %v9255_v20 = vunpack.i.l.bf16 %v9254_v12  ;;  %v6955_v62 = vsel %vm6752_vm13, %v6936_v56, 0  ;;  %v6816_v56 = vunpack.c.l.b16 %v6658_v29 }
0x1d57   : > { %6877 = vmatpush.bf16.xpose.msrb.mxu3 %v6859_v58  ;;  %6969 = vmatpush.bf16.xpose.msra.mxu0 %v6955_v62  ;;  %v6818_v29 = vunpack.c.l.b16 %v6660_v8 }
0x1d58   : > { %v6697_v0 = vpack.c.bf16 %v9256_v25, %v9256_v25  ;;  %v6696_v16 = vpack.c.bf16 %v9255_v20, %v9255_v20  ;;  %7062 = vmatpush.bf16.xpose.msra.mxu1 %v7048_v54  ;;  %v14513_v20 = vpop.permute.xlu1 %9323  ;;  %v6823_v10 = vpack.c.b16 %v6817_v30, %v6816_v56 }
0x1d5a   : > { %v6928_v40 = vunpack.c.l.b16 %v6697_v0  ;;  %v6927_v3 = vunpack.c.l.b16 %v6696_v16 }
0x1d5c   : > { %v6935_v11 = vpack.c.b16 %v6928_v40, %v6927_v3 }
0x1d5d   : > { %v9269_v6 = vpop.permute.xlu0 %9268  ;;  %v14496_v49 = vpop.permute.xlu2 %9338 }
0x1d5e   : > { %v9271_v14 = vunpack.i.h.bf16 %v9269_v6  ;;  %v9270_v45 = vunpack.i.l.bf16 %v9269_v6  ;;  %9009 = vmatmul.msk.bf16.vlgmr.msrb.gmra.mxu3 %vm6752_vm13, %v6822_v31  ;;  %v6952_v61 = vsel %vm6752_vm13, %v6935_v11, 0  ;;  %v9291_v11 = vunpack.i.h.bf16 %v14469_v46 }
0x1d5f   : > { %6970 = vmatpush.bf16.xpose.msra.mxu0 %v6952_v61 }
0x1d60   : > { %v6673_v51 = vpack.c.bf16 %v9271_v14, %v9271_v14  ;;  %v6672_v27 = vpack.c.bf16 %v9270_v45, %v9270_v45  ;;  %7063 = vmatpush.bf16.xpose.msra.mxu1 %v7045_v59  ;;  %v6661_v13 = vpack.c.bf16 %v9291_v11, %v9291_v11 }
0x1d62   : > { %v7001_v53 = vunpack.c.l.b16 %v6673_v51  ;;  %v7000_v17 = vunpack.c.l.b16 %v6672_v27  ;;  %v6819_v33 = vunpack.c.l.b16 %v6661_v13  ;;  %v9310_v13 = vunpack.i.l.bf16 %v14503_v52 }
0x1d64   : > { %v6786_v22 = vpop.f32.mrf.mxu1  ;;  %v7008_v42 = vpack.c.b16 %v7001_v53, %v7000_v17  ;;  %v6916_v17 = vpack.c.b16 %v6910_v26, %v6909_v36  ;;  %v6824_v30 = vpack.c.b16 %v6819_v33, %v6818_v29  ;;  %v6663_v26 = vpack.c.bf16 %v9306_v32, %v9306_v32 }
0x1d65   : > { %v14505_v15 = vmul.f32 0.17677669, %v6786_v22  ;;  %v9284_v44 = vpop.permute.xlu0 %9283  ;;  %v9364_v21 = vpop.permute.xlu2 %9363 }
0x1d66   : > { %v9366_v5 = vunpack.i.h.bf16 %v9364_v21  ;;  %v9365_v4 = vunpack.i.l.bf16 %v9364_v21  ;;  %9013 = vmatmul.msk.bf16.vlgmr.msra.gmra.mxu0 %vm6752_vm13, %v6915_v7  ;;  %v9286_v28 = vunpack.i.h.bf16 %v9284_v44  ;;  %v9285_v58 = vunpack.i.l.bf16 %v9284_v44 }
0x1d67   : > { %v7117_v39 = vsel %vm1007_vm1, %v14505_v15, -inf  ;;  %9017 = vmatmul.msk.bf16.vlgmr.msra.gmra.mxu1 %vm6752_vm13, %v7008_v42  ;;  %v9296_v42 = vunpack.i.h.bf16 %v14494_v19  ;;  %v9295_v44 = vunpack.i.l.bf16 %v14494_v19  ;;  %v6821_v8 = vunpack.c.l.b16 %v6663_v26 }
0x1d68   : > { %v7516_v38 = vpack.c.bf16 %v9366_v5, %v9366_v5  ;;  %v7515_v24 = vpack.c.bf16 %v9365_v4, %v9365_v4  ;;  %7118 = vmax.xlane.f32.xlu2 %v7117_v39  ;;  %v6675_v18 = vpack.c.bf16 %v9286_v28, %v9286_v28  ;;  %v6674_v47 = vpack.c.bf16 %v9285_v58, %v9285_v58 }
0x1d69   : > { %v6669_v28 = vpack.c.bf16 %v9296_v42, %v9296_v42 }
0x1d6a   : > { %v7653_v12 = vunpack.c.l.b16 %v7516_v38  ;;  %v7652_v25 = vunpack.c.l.b16 %v7515_v24  ;;  %v7003_v14 = vunpack.c.l.b16 %v6675_v18  ;;  %v7002_v45 = vunpack.c.l.b16 %v6674_v47 }
0x1d6b   : > { %v9359_v61 = vpop.permute.xlu1 %9358  ;;  %v9305_v18 = vunpack.i.l.bf16 %v14476_v34  ;;  %v6912_v47 = vunpack.c.l.b16 %v6669_v28 }
0x1d6c   : > { %v7657_v62 = vpack.c.b16 %v7653_v12, %v7652_v25  ;;  %v6788_v54 = vpop.f32.mrf.mxu1  ;;  %v7009_v22 = vpack.c.b16 %v7003_v14, %v7002_v45  ;;  %v9361_v4 = vunpack.i.h.bf16 %v9359_v61  ;;  %v9360_v39 = vunpack.i.l.bf16 %v9359_v61 }
0x1d6d   : > { %v14515_v55 = vmul.f32 0.17677669, %v6788_v54  ;;  %v9299_v0 = vpop.permute.xlu0 %9298  ;;  %v9369_v16 = vpop.permute.xlu2 %9368  ;;  %v6668_v12 = vpack.c.bf16 %v9295_v44, %v9295_v44  ;;  %v6662_v36 = vpack.c.bf16 %v9305_v18, %v9305_v18  ;;  %v6670_v44 = vpack.c.bf16 %v9310_v13, %v9310_v13 }
0x1d6e   : > { %7678 = vmatpush.bf16.msra.mxu3 %v7657_v62  ;;  %v9371_v40 = vunpack.i.h.bf16 %v9369_v16  ;;  %v9370_v23 = vunpack.i.l.bf16 %v9369_v16  ;;  %v9301_v21 = vunpack.i.h.bf16 %v9299_v0  ;;  %v9300_v7 = vunpack.i.l.bf16 %v9299_v0 }
0x1d6f   : > { %9010 = vmatmul.msk.bf16.gmra.mxu3 %vm6752_vm13, %v6823_v10  ;;  %v7120_v3 = vsel %vm1007_vm1, %v14515_v55, -inf  ;;  %v7530_v10 = vpack.c.bf16 %v9361_v4, %v9361_v4  ;;  %v7529_v0 = vpack.c.bf16 %v9360_v39, %v9360_v39  ;;  %v9341_v13 = vunpack.i.h.bf16 %v14496_v49 }
0x1d70   : > { %7121 = vmax.xlane.f32.xlu0 %v7120_v3  ;;  %v7524_v31 = vpack.c.bf16 %v9371_v40, %v9371_v40  ;;  %v7523_v6 = vpack.c.bf16 %v9370_v23, %v9370_v23  ;;  %v6677_v62 = vpack.c.bf16 %v9301_v21, %v9301_v21  ;;  %v6676_v54 = vpack.c.bf16 %v9300_v7, %v9300_v7 }
0x1d71   : > { %v6911_v40 = vunpack.c.l.b16 %v6668_v12  ;;  %v7821_v50 = vunpack.c.l.b16 %v7530_v10  ;;  %v6913_v12 = vunpack.c.l.b16 %v6670_v44  ;;  %v9325_v44 = vunpack.i.l.bf16 %v14513_v20 }
0x1d72   : > { %v7738_v51 = vunpack.c.l.b16 %v7524_v31  ;;  %v7737_v27 = vunpack.c.l.b16 %v7523_v6  ;;  %v7005_v3 = vunpack.c.l.b16 %v6677_v62  ;;  %v7004_v11 = vunpack.c.l.b16 %v6676_v54 }
0x1d73   : > { %v7820_v31 = vunpack.c.l.b16 %v7529_v0  ;;  %v6917_v61 = vpack.c.b16 %v6912_v47, %v6911_v40 }
0x1d74   : > { %v6791_v59 = vpop.f32.mrf.mxu1  ;;  %v7742_v2 = vpack.c.b16 %v7738_v51, %v7737_v27  ;;  %v7010_v51 = vpack.c.b16 %v7005_v3, %v7004_v11  ;;  %v9320_v3 = vunpack.i.l.bf16 %v14487_v37 }
0x1d75   : > { %v14522_v35 = vmul.f32 0.17677669, %v6791_v59  ;;  %v14524_v53 = vpop.permute.xlu0 %9313  ;;  %v7826_v34 = vpack.c.b16 %v7821_v50, %v7820_v31  ;;  %v9311_v59 = vunpack.i.h.bf16 %v14503_v52 }
0x1d76   : > { %7763 = vmatpush.bf16.msrb.mxu0 %v7742_v2  ;;  %v6820_v2 = vunpack.c.l.b16 %v6662_v36 }
0x1d77   : > { %v7123_v46 = vsel %vm1007_vm1, %v14522_v35, -inf  ;;  %9014 = vmatmul.msk.bf16.gmra.mxu0 %vm6752_vm13, %v6916_v17  ;;  %9018 = vmatmul.msk.bf16.gmra.mxu1 %vm6752_vm13, %v7009_v22  ;;  %v9316_v17 = vunpack.i.h.bf16 %v14524_v53  ;;  %v9315_v22 = vunpack.i.l.bf16 %v14524_v53  ;;  %v6671_v42 = vpack.c.bf16 %v9311_v59, %v9311_v59 }
0x1d78   : > { %7124 = vmax.xlane.f32.xlu2 %v7123_v46  ;;  %v6825_v21 = vpack.c.b16 %v6821_v8, %v6820_v2  ;;  %v7509_v59 = vpack.c.bf16 %v9320_v3, %v9320_v3  ;;  %v9340_v8 = vunpack.i.l.bf16 %v14496_v49 }
0x1d79   : > { %v6679_v4 = vpack.c.bf16 %v9316_v17, %v9316_v17  ;;  %v6914_v28 = vunpack.c.l.b16 %v6671_v42  ;;  %v9326_v42 = vunpack.i.h.bf16 %v14513_v20 }
0x1d7b   : > { %v9374_v5 = vpop.permute.xlu1 %9373  ;;  %v6918_v18 = vpack.c.b16 %v6914_v28, %v6913_v12  ;;  %v7518_v28 = vpack.c.bf16 %v9326_v42, %v9326_v42  ;;  %v7517_v12 = vpack.c.bf16 %v9325_v44, %v9325_v44 }
0x1d7c   : > { %v9376_v38 = vunpack.i.h.bf16 %v9374_v5  ;;  %v9375_v24 = vunpack.i.l.bf16 %v9374_v5  ;;  %v6793_v9 = vpop.f32.mrf.mxu1 }
0x1d7d   : > { %v14532_v56 = vmul.f32 0.17677669, %v6793_v9  ;;  %v9329_v63 = vpop.permute.xlu0 %9328 }
0x1d7e   : > { %v7532_v25 = vpack.c.bf16 %v9376_v38, %v9376_v38  ;;  %v7531_v58 = vpack.c.bf16 %v9375_v24, %v9375_v24  ;;  %v9331_v46 = vunpack.i.h.bf16 %v9329_v63  ;;  %v9330_v33 = vunpack.i.l.bf16 %v9329_v63 }
0x1d7f   : > { %9011 = vmatmul.msk.bf16.gmra.mxu3 %vm6752_vm13, %v6824_v30  ;;  %v7126_v19 = vsel %vm1007_vm1, %v14532_v56, -inf  ;;  %v6678_v38 = vpack.c.bf16 %v9315_v22, %v9315_v22 }
0x1d80   : > { %v7823_v16 = vunpack.c.l.b16 %v7532_v25  ;;  %v7822_v1 = vunpack.c.l.b16 %v7531_v58  ;;  %7127 = vmax.xlane.f32.xlu0 %v7126_v19  ;;  %v7526_v24 = vpack.c.bf16 %v9331_v46, %v9331_v46  ;;  %v7525_v9 = vpack.c.bf16 %v9330_v33, %v9330_v33 }
0x1d81   : > { %v7007_v25 = vunpack.c.l.b16 %v6679_v4  ;;  %v7006_v54 = vunpack.c.l.b16 %v6678_v38  ;;  %v7519_v38 = vpack.c.bf16 %v9340_v8, %v9340_v8 }
0x1d82   : > { %v7827_v23 = vpack.c.b16 %v7823_v16, %v7822_v1  ;;  %v7817_v19 = vunpack.c.l.b16 %v7526_v24  ;;  %v7816_v10 = vunpack.c.l.b16 %v7525_v9 }
0x1d83   : > { %v7011_v31 = vpack.c.b16 %v7007_v25, %v7006_v54  ;;  %v7733_v25 = vunpack.c.l.b16 %v7519_v38  ;;  %v7732_v54 = vunpack.c.l.b16 %v7518_v28 }
0x1d84   : > { %v6796_v6 = vpop.f32.mrf.mxu1  ;;  %7848 = vmatpush.bf16.msrb.mxu1 %v7827_v23  ;;  %v9321_v23 = vunpack.i.h.bf16 %v14487_v37  ;;  %v7824_v36 = vpack.c.b16 %v7817_v19, %v7816_v10  ;;  %v7731_v19 = vunpack.c.l.b16 %v7517_v12 }
0x1d85   : > { %v14539_v14 = vmul.f32 0.17677669, %v6796_v6  ;;  %v9334_v45 = vpop.permute.xlu0 %9333 }
0x1d86   : > { %v9336_v0 = vunpack.i.h.bf16 %v9334_v45  ;;  %v9335_v16 = vunpack.i.l.bf16 %v9334_v45  ;;  %v7510_v37 = vpack.c.bf16 %v9321_v23, %v9321_v23 }
0x1d87   : > { %v7129_v27 = vsel %vm1007_vm1, %v14539_v14, -inf  ;;  %9015 = vmatmul.msk.bf16.gmra.mxu0 %vm6752_vm13, %v6917_v61  ;;  %9019 = vmatmul.msk.bf16.gmra.mxu1 %vm6752_vm13, %v7010_v51 }
0x1d88   : > { %7130 = vmax.xlane.f32.xlu1 %v7129_v27  ;;  %7849 = vmatpush.bf16.msrb.mxu1 %v7826_v34  ;;  %v7512_v6 = vpack.c.bf16 %v9336_v0, %v9336_v0  ;;  %v7511_v45 = vpack.c.bf16 %v9335_v16, %v9335_v16  ;;  %v7647_v4 = vunpack.c.l.b16 %v7510_v37  ;;  %v7739_v0 = vpack.c.b16 %v7732_v54, %v7731_v19 }
0x1d8a   : > { %v7649_v2 = vunpack.c.l.b16 %v7512_v6  ;;  %v7648_v17 = vunpack.c.l.b16 %v7511_v45 }
0x1d8c   : > { %v6798_v29 = vpop.f32.mrf.mxu1 }
0x1d8d   : > { %v14549_v7 = vmul.f32 0.17677669, %v6798_v29  ;;  %v9344_v5 = vpop.permute.xlu0 %9343 }
0x1d8e   : > { %v9346_v52 = vunpack.i.h.bf16 %v9344_v5  ;;  %v9345_v39 = vunpack.i.l.bf16 %v9344_v5 }
0x1d8f   : > { %9012 = vmatmul.msk.bf16.gmra.mxu3 %vm6752_vm13, %v6825_v21  ;;  %v7132_v53 = vsel %vm1007_vm1, %v14549_v7, -inf }
0x1d90   : > { %v7528_v30 = vpack.c.bf16 %v9346_v52, %v9346_v52  ;;  %v7527_v63 = vpack.c.bf16 %v9345_v39, %v9345_v39  ;;  %7133 = vmax.xlane.f32.xlu2 %v7132_v53  ;;  %v7646_v52 = vunpack.c.l.b16 %v7509_v59  ;;  %v7520_v39 = vpack.c.bf16 %v9341_v13, %v9341_v13 }
0x1d91   : > { %v7655_v53 = vpack.c.b16 %v7649_v2, %v7648_v17 }
0x1d92   : > { %v7819_v58 = vunpack.c.l.b16 %v7528_v30  ;;  %v7818_v62 = vunpack.c.l.b16 %v7527_v63  ;;  %v7734_v20 = vunpack.c.l.b16 %v7520_v39 }
0x1d94   : > { %v6801_v1 = vpop.f32.mrf.mxu1  ;;  %v7825_v32 = vpack.c.b16 %v7819_v58, %v7818_v62  ;;  %v7654_v58 = vpack.c.b16 %v7647_v4, %v7646_v52  ;;  %v7740_v10 = vpack.c.b16 %v7734_v20, %v7733_v25 }
0x1d95   : > { %v14554_v47 = vmul.f32 0.17677669, %v6801_v1  ;;  %v9349_v40 = vpop.permute.xlu0 %9348 }
0x1d96   : > { %v9351_v11 = vunpack.i.h.bf16 %v9349_v40  ;;  %v9350_v50 = vunpack.i.l.bf16 %v9349_v40  ;;  %7850 = vmatpush.bf16.msrb.mxu1 %v7825_v32 }
0x1d97   : > { %v7135_v26 = vsel %vm1007_vm1, %v14554_v47, -inf  ;;  %9016 = vmatmul.msk.bf16.gmra.mxu0 %vm6752_vm13, %v6918_v18  ;;  %9020 = vmatmul.msk.bf16.gmra.mxu1 %vm6752_vm13, %v7011_v31 }
0x1d98   : > { %v7514_v61 = vpack.c.bf16 %v9351_v11, %v9351_v11  ;;  %v7513_v51 = vpack.c.bf16 %v9350_v50, %v9350_v50  ;;  %7136 = vmax.xlane.f32.xlu0 %v7135_v26 }
0x1d9a   : > { %v7651_v27 = vunpack.c.l.b16 %v7514_v61  ;;  %v7650_v34 = vunpack.c.l.b16 %v7513_v51  ;;  %7851 = vmatpush.bf16.msrb.mxu1 %v7824_v36 }
0x1d9c   : > { %v6803_v22 = vpop.f32.mrf.mxu1  ;;  %v7656_v46 = vpack.c.b16 %v7651_v27, %v7650_v34 }
0x1d9d   : > { %v14564_v33 = vmul.f32 0.17677669, %v6803_v22  ;;  %v9354_v29 = vpop.permute.xlu0 %9353 }
0x1d9e   : > { %v9356_v21 = vunpack.i.h.bf16 %v9354_v29  ;;  %v9355_v5 = vunpack.i.l.bf16 %v9354_v29  ;;  %7679 = vmatpush.bf16.msra.mxu3 %v7656_v46 }
0x1d9f   : > { %v7138_v49 = vsel %vm1007_vm1, %v14564_v33, -inf }
0x1da0   : > { %v7522_v24 = vpack.c.bf16 %v9356_v21, %v9356_v21  ;;  %v7521_v9 = vpack.c.bf16 %v9355_v5, %v9355_v5  ;;  %7139 = vmax.xlane.f32.xlu2 %v7138_v49 }
0x1da2   : > { %v7736_v30 = vunpack.c.l.b16 %v7522_v24  ;;  %v7735_v63 = vunpack.c.l.b16 %v7521_v9  ;;  %7680 = vmatpush.bf16.msra.mxu3 %v7655_v53 }
0x1da4   : > { %v7741_v62 = vpack.c.b16 %v7736_v30, %v7735_v63 }
0x1da6   : > { %7681 = vmatpush.bf16.msra.mxu3 %v7654_v58  ;;  %7764 = vmatpush.bf16.msrb.mxu0 %v7741_v62 }
0x1daa   : > { %7765 = vmatpush.bf16.msrb.mxu0 %v7740_v10 }
0x1dae   : > { %7766 = vmatpush.bf16.msrb.mxu0 %v7739_v0 }
0x1de1   : > { %v6879_v16 = vpop.f32.mrf.mxu3 }
0x1de2   : > { %v14570_v1 = vmul.f32 0.17677669, %v6879_v16 }
0x1de3   : > { %v6972_v32 = vpop.f32.mrf.mxu0 }
0x1de4   : > { %v7141_v18 = vsel %vm1007_vm1, %v14570_v1, -inf  ;;  %v14574_v40 = vmul.f32 0.17677669, %v6972_v32  ;;  %v7065_v23 = vpop.f32.mrf.mxu1 }
0x1de5   : > { %7142 = vmax.xlane.f32.xlu2 %v7141_v18  ;;  %v14576_v3 = vmul.f32 0.17677669, %v7065_v23 }
0x1de6   : > { %v7165_v11 = vsel %vm1007_vm1, %v14574_v40, -inf }
0x1de7   : > { %7166 = vmax.xlane.f32.xlu0 %v7165_v11  ;;  %v7189_v50 = vsel %vm1007_vm1, %v14576_v3, -inf }
0x1de8   : > { %7190 = vmax.xlane.f32.xlu1 %v7189_v50 }
0x1de9   : > { %v6881_v31 = vpop.f32.mrf.mxu3 }
0x1dea   : > { %v14582_v6 = vmul.f32 0.17677669, %v6881_v31 }
0x1deb   : > { %v6974_v26 = vpop.f32.mrf.mxu0 }
0x1dec   : > { %v14584_v36 = vmul.f32 0.17677669, %v6974_v26  ;;  %v7067_v45 = vpop.f32.mrf.mxu1  ;;  %v7144_v51 = vsel %vm1007_vm1, %v14582_v6, -inf }
0x1ded   : > { %v14592_v37 = vmul.f32 0.17677669, %v7067_v45 }
0x1dee   : > { %v7168_v61 = vsel %vm1007_vm1, %v14584_v36, -inf }
0x1def   : > { %7169 = vmax.xlane.f32.xlu2 %v7168_v61  ;;  %v7192_v17 = vsel %vm1007_vm1, %v14592_v37, -inf }
0x1df0   : > { %7145 = vmax.xlane.f32.xlu1 %v7144_v51 }
0x1df2   : > { %v6884_v27 = vpop.f32.mrf.mxu3 }
0x1df3   : > { %v14590_v34 = vmul.f32 0.17677669, %v6884_v27 }
0x1df4   : > { %v6977_v59 = vpop.f32.mrf.mxu0  ;;  %v7070_v8 = vpop.f32.mrf.mxu1 }
0x1df5   : > { %v7147_v13 = vsel %vm1007_vm1, %v14590_v34, -inf  ;;  %v14596_v2 = vmul.f32 0.17677669, %v7070_v8  ;;  %v14602_v29 = vmul.f32 0.17677669, %v6977_v59 }
0x1df6   : > { %7148 = vmax.xlane.f32.xlu0 %v7147_v13 }
0x1df7   : > { %7193 = vmax.xlane.f32.xlu2 %v7192_v17  ;;  %v7195_v22 = vsel %vm1007_vm1, %v14596_v2, -inf  ;;  %v7171_v4 = vsel %vm1007_vm1, %v14602_v29, -inf }
0x1df8   : > { %7196 = vmax.xlane.f32.xlu1 %v7195_v22 }
0x1dfa   : > { %v6886_v46 = vpop.f32.mrf.mxu3 }
0x1dfb   : > { %v14604_v42 = vmul.f32 0.17677669, %v6886_v46 }
0x1dfc   : > { %v6979_v44 = vpop.f32.mrf.mxu0  ;;  %v7072_v5 = vpop.f32.mrf.mxu1 }
0x1dfd   : > { %v14606_v21 = vmul.f32 0.17677669, %v6979_v44  ;;  %v7150_v39 = vsel %vm1007_vm1, %v14604_v42, -inf  ;;  %v14614_v49 = vmul.f32 0.17677669, %v7072_v5 }
0x1dff   : > { %v7174_v52 = vsel %vm1007_vm1, %v14606_v21, -inf  ;;  %7172 = vmax.xlane.f32.xlu2 %v7171_v4  ;;  %v7198_v63 = vsel %vm1007_vm1, %v14614_v49, -inf }
0x1e00   : > { %7175 = vmax.xlane.f32.xlu0 %v7174_v52  ;;  %7151 = vmax.xlane.f32.xlu1 %v7150_v39  ;;  %v7119_v52 = vpop.xlane.xlu2 %7118  ;;  %v14666_v39 = vpop.xlane.xlu0 %7121 }
0x1e02   : > { %v6889_v38 = vpop.f32.mrf.mxu3 }
0x1e03   : > { %v14626_v20 = vmul.f32 0.17677669, %v6889_v38 }
0x1e04   : > { %v6982_v24 = vpop.f32.mrf.mxu0  ;;  %v7075_v53 = vpop.f32.mrf.mxu1 }
0x1e05   : > { %v14616_v9 = vmul.f32 0.17677669, %v6982_v24  ;;  %v14618_v30 = vmul.f32 0.17677669, %v7075_v53  ;;  %v7153_v16 = vsel %vm1007_vm1, %v14626_v20, -inf }
0x1e07   : > { %v7177_v28 = vsel %vm1007_vm1, %v14616_v9, -inf  ;;  %7199 = vmax.xlane.f32.xlu2 %v7198_v63  ;;  %v7201_v12 = vsel %vm1007_vm1, %v14618_v30, -inf }
0x1e08   : > { %7202 = vmax.xlane.f32.xlu0 %v7201_v12  ;;  %7178 = vmax.xlane.f32.xlu1 %v7177_v28  ;;  %v14668_v38 = vpop.xlane.xlu2 %7124  ;;  %v14670_v24 = vpop.xlane.xlu0 %7127 }
0x1e09   : > { %v14678_v12 = vpop.xlane.xlu1 %7130 }
0x1e0a   : > { %v6891_v58 = vpop.f32.mrf.mxu3 }
0x1e0b   : > { %v14638_v32 = vmul.f32 0.17677669, %v6891_v58 }
0x1e0c   : > { %v6984_v25 = vpop.f32.mrf.mxu0  ;;  %v7077_v54 = vpop.f32.mrf.mxu1 }
0x1e0d   : > { %v14628_v62 = vmul.f32 0.17677669, %v6984_v25  ;;  %v14630_v19 = vmul.f32 0.17677669, %v7077_v54  ;;  %v7156_v26 = vsel %vm1007_vm1, %v14638_v32, -inf }
0x1e0f   : > { %v7180_v10 = vsel %vm1007_vm1, %v14628_v62, -inf  ;;  %v7204_v0 = vsel %vm1007_vm1, %v14630_v19, -inf }
0x1e10   : > { %7181 = vmax.xlane.f32.xlu2 %v7180_v10  ;;  %7205 = vmax.xlane.f32.xlu1 %v7204_v0  ;;  %v14672_v53 = vpop.xlane.xlu2 %7133  ;;  %v14674_v63 = vpop.xlane.xlu0 %7136 }
0x1e11   : > { %7154 = vmax.xlane.f32.xlu0 %v7153_v16 }
0x1e12   : > { %v6894_v50 = vpop.f32.mrf.mxu3 }
0x1e13   : > { %v14646_v45 = vmul.f32 0.17677669, %v6894_v50 }
0x1e14   : > { %v6987_v18 = vpop.f32.mrf.mxu0  ;;  %v7080_v23 = vpop.f32.mrf.mxu1 }
0x1e15   : > { %v14640_v11 = vmul.f32 0.17677669, %v7080_v23  ;;  %v14648_v61 = vmul.f32 0.17677669, %v6987_v18  ;;  %v7159_v17 = vsel %vm1007_vm1, %v14646_v45, -inf }
0x1e17   : > { %v7207_v31 = vsel %vm1007_vm1, %v14640_v11, -inf  ;;  %v7183_v8 = vsel %vm1007_vm1, %v14648_v61, -inf }
0x1e18   : > { %7157 = vmax.xlane.f32.xlu1 %v7156_v26  ;;  %v14676_v28 = vpop.xlane.xlu2 %7139 }
0x1e19   : > { %7208 = vmax.xlane.f32.xlu0 %v7207_v31 }
0x1e1a   : > { %v6896_v22 = vpop.f32.mrf.mxu3 }
0x1e1b   : > { %v14660_v44 = vmul.f32 0.17677669, %v6896_v22 }
0x1e1c   : > { %v6989_v51 = vpop.f32.mrf.mxu0  ;;  %v7082_v13 = vpop.f32.mrf.mxu1 }
0x1e1d   : > { %v14650_v27 = vmul.f32 0.17677669, %v6989_v51  ;;  %v14658_v46 = vmul.f32 0.17677669, %v7082_v13  ;;  %v7162_v4 = vsel %vm1007_vm1, %v14660_v44, -inf }
0x1e1f   : > { %v7186_v59 = vsel %vm1007_vm1, %v14650_v27, -inf  ;;  %v7210_v5 = vsel %vm1007_vm1, %v14658_v46, -inf }
0x1e20   : > { %7187 = vmax.xlane.f32.xlu2 %v7186_v59  ;;  %7184 = vmax.xlane.f32.xlu1 %v7183_v8 }
0x1e21   : > { %7160 = vmax.xlane.f32.xlu0 %v7159_v17 }
0x1e28   : > { %7211 = vmax.xlane.f32.xlu2 %v7210_v5  ;;  %7163 = vmax.xlane.f32.xlu1 %v7162_v4 }
0x1e58   : > { %v7143_v25 = vpop.xlane.xlu2 %7142 }
0x1e59   : > { %v7221_v18 = vsub.f32 %v14570_v1, %v7143_v25 }
0x1e5a   : > { %v7167_v58 = vpop.xlane.xlu0 %7166 }
0x1e5b   : > { %v7229_v54 = vsub.f32 %v14574_v40, %v7167_v58  ;;  %v7191_v10 = vpop.xlane.xlu1 %7190  ;;  %v7261_v50 = vmul.f32 1.442695, %v7221_v18 }
0x1e5c   : > { %v7237_v0 = vsub.f32 %v14576_v3, %v7191_v10 }
0x1e5d   : > { %v7277_v16 = vmul.f32 1.442695, %v7229_v54 }
0x1e5e   : > { %v7293_v23 = vmul.f32 1.442695, %v7237_v0  ;;  %v7213_v0 = vsub.f32 %v14505_v15, %v7119_v52 }
0x1e5f   : > { %9445 = vpow2.f32 %v7277_v16 }
0x1e60   : > { %9447 = vpow2.f32 %v7293_v23 }
0x1e61   : > { %9449 = vpow2.f32 %v7261_v50 }
0x1e62   : > { %v7170_v31 = vpop.xlane.xlu2 %7169 }
0x1e63   : > { %v7230_v26 = vsub.f32 %v14584_v36, %v7170_v31  ;;  %v7146_v51 = vpop.xlane.xlu1 %7145 }
0x1e64   : > { %v7222_v40 = vsub.f32 %v14582_v6, %v7146_v51 }
0x1e65   : > { %v14684_v59 = vpop.eup %9445  ;;  %v7279_v13 = vmul.f32 1.442695, %v7230_v26 }
0x1e66   : > { %v14686_v8 = vpop.eup %9447  ;;  %v7357_v3 = vsel %vm1007_vm1, %v14684_v59, 0.0  ;;  %v7263_v22 = vmul.f32 1.442695, %v7222_v40 }
0x1e67   : > { %9451 = vpow2.f32 %v7279_v13  ;;  %7358 = vadd.xlane.f32.xlu0 %v7357_v3  ;;  %v7381_v1 = vsel %vm1007_vm1, %v14686_v8, 0.0  ;;  %v14695_v54 = vpop.eup %9449 }
0x1e68   : > { %7382 = vadd.xlane.f32.xlu1 %v7381_v1 }
0x1e69   : > { %v7149_v17 = vpop.xlane.xlu0 %7148 }
0x1e6a   : > { %v7223_v36 = vsub.f32 %v14590_v34, %v7149_v17  ;;  %v7194_v4 = vpop.xlane.xlu2 %7193  ;;  %v7333_v34 = vsel %vm1007_vm1, %v14695_v54, 0.0 }
0x1e6b   : > { %v7238_v25 = vsub.f32 %v14592_v37, %v7194_v4  ;;  %v7197_v58 = vpop.xlane.xlu1 %7196  ;;  %v7245_v37 = vmul.f32 1.442695, %v7213_v0 }
0x1e6c   : > { %v7265_v5 = vmul.f32 1.442695, %v7223_v36  ;;  %v7239_v3 = vsub.f32 %v14596_v2, %v7197_v58 }
0x1e6d   : > { %v14697_v6 = vpop.eup %9451  ;;  %v7295_v10 = vmul.f32 1.442695, %v7238_v25 }
0x1e6e   : > { %9453 = vpow2.f32 %v7265_v5  ;;  %v7360_v16 = vsel %vm1007_vm1, %v14697_v6, 0.0 }
0x1e6f   : > { %9455 = vpow2.f32 %v7263_v22  ;;  %7361 = vadd.xlane.f32.xlu2 %v7360_v16 }
0x1e70   : > { %9457 = vpow2.f32 %v7295_v10  ;;  %7334 = vadd.xlane.f32.xlu1 %v7333_v34 }
0x1e71   : > { %9459 = vpow2.f32 %v7245_v37 }
0x1e72   : > { %v7173_v18 = vpop.xlane.xlu2 %7172 }
0x1e73   : > { %v7176_v23 = vpop.xlane.xlu0 %7175  ;;  %v7231_v31 = vsub.f32 %v14602_v29, %v7173_v18  ;;  %v7152_v15 = vpop.xlane.xlu1 %7151 }
0x1e74   : > { %v14704_v50 = vpop.eup %9453  ;;  %v7232_v26 = vsub.f32 %v14606_v21, %v7176_v23  ;;  %v7297_v21 = vmul.f32 1.442695, %v7239_v3  ;;  %v7224_v10 = vsub.f32 %v14604_v42, %v7152_v15  ;;  %v7214_v3 = vsub.f32 %v14515_v55, %v14666_v39 }
0x1e75   : > { %v14708_v52 = vpop.eup %9455  ;;  %v7281_v13 = vmul.f32 1.442695, %v7231_v31  ;;  %v7339_v1 = vsel %vm1007_vm1, %v14704_v50, 0.0 }
0x1e76   : > { %v14710_v51 = vpop.eup %9457  ;;  %v7283_v40 = vmul.f32 1.442695, %v7232_v26  ;;  %v7336_v29 = vsel %vm1007_vm1, %v14708_v52, 0.0  ;;  %v7267_v18 = vmul.f32 1.442695, %v7224_v10 }
0x1e77   : > { %v7384_v17 = vsel %vm1007_vm1, %v14710_v51, 0.0  ;;  %9461 = vpow2.f32 %v7281_v13  ;;  %7340 = vadd.xlane.f32.xlu2 %v7339_v1  ;;  %v14720_v4 = vpop.eup %9459  ;;  %v7247_v55 = vmul.f32 1.442695, %v7214_v3 }
0x1e78   : > { %7385 = vadd.xlane.f32.xlu0 %v7384_v17  ;;  %9463 = vpow2.f32 %v7283_v40  ;;  %7337 = vadd.xlane.f32.xlu1 %v7336_v29 }
0x1e79   : > { %9465 = vpow2.f32 %v7297_v21 }
0x1e7a   : > { %v7200_v36 = vpop.xlane.xlu2 %7199 }
0x1e7b   : > { %v7240_v22 = vsub.f32 %v14614_v49, %v7200_v36  ;;  %v7203_v5 = vpop.xlane.xlu0 %7202  ;;  %v7179_v2 = vpop.xlane.xlu1 %7178 }
0x1e7c   : > { %v7233_v25 = vsub.f32 %v14616_v9, %v7179_v2  ;;  %v7309_v9 = vsel %vm1007_vm1, %v14720_v4, 0.0 }
0x1e7d   : > { %v14723_v58 = vpop.eup %9461  ;;  %v7299_v0 = vmul.f32 1.442695, %v7240_v22 }
0x1e7e   : > { %v14726_v16 = vpop.eup %9463  ;;  %v7285_v34 = vmul.f32 1.442695, %v7233_v25  ;;  %v7363_v37 = vsel %vm1007_vm1, %v14723_v58, 0.0 }
0x1e7f   : > { %9467 = vpow2.f32 %v7299_v0  ;;  %v7366_v49 = vsel %vm1007_vm1, %v14726_v16, 0.0  ;;  %v14735_v15 = vpop.eup %9465 }
0x1e80   : > { %7364 = vadd.xlane.f32.xlu0 %v7363_v37  ;;  %7367 = vadd.xlane.f32.xlu2 %v7366_v49  ;;  %9469 = vpow2.f32 %v7285_v34  ;;  %v7215_v34 = vsub.f32 %v14522_v35, %v14668_v38 }
0x1e81   : > { %7310 = vadd.xlane.f32.xlu1 %v7309_v9  ;;  %9471 = vpow2.f32 %v7267_v18 }
0x1e82   : > { %v7249_v35 = vmul.f32 1.442695, %v7215_v34 }
0x1e83   : > { %v7182_v42 = vpop.xlane.xlu2 %7181  ;;  %v7206_v31 = vpop.xlane.xlu1 %7205 }
0x1e84   : > { %v7234_v23 = vsub.f32 %v14628_v62, %v7182_v42  ;;  %v7155_v26 = vpop.xlane.xlu0 %7154  ;;  %v7242_v62 = vsub.f32 %v14630_v19, %v7206_v31  ;;  %v7241_v19 = vsub.f32 %v14618_v30, %v7203_v5 }
0x1e85   : > { %v7225_v13 = vsub.f32 %v14626_v20, %v7155_v26  ;;  %v14738_v40 = vpop.eup %9467  ;;  %v7387_v20 = vsel %vm1007_vm1, %v14735_v15, 0.0 }
0x1e86   : > { %v7287_v1 = vmul.f32 1.442695, %v7234_v23  ;;  %v7390_v29 = vsel %vm1007_vm1, %v14738_v40, 0.0  ;;  %v14744_v21 = vpop.eup %9469  ;;  %v7303_v22 = vmul.f32 1.442695, %v7242_v62 }
0x1e87   : > { %v7269_v17 = vmul.f32 1.442695, %v7225_v13  ;;  %v7369_v36 = vsel %vm1007_vm1, %v14744_v21, 0.0  ;;  %v14751_v39 = vpop.eup %9471  ;;  %v7301_v5 = vmul.f32 1.442695, %v7241_v19 }
0x1e88   : > { %9473 = vpow2.f32 %v7287_v1  ;;  %7391 = vadd.xlane.f32.xlu0 %v7390_v29  ;;  %7370 = vadd.xlane.f32.xlu2 %v7369_v36  ;;  %v7342_v49 = vsel %vm1007_vm1, %v14751_v39, 0.0 }
0x1e89   : > { %7388 = vadd.xlane.f32.xlu1 %v7387_v20  ;;  %9475 = vpow2.f32 %v7269_v17 }
0x1e8a   : > { %9477 = vpow2.f32 %v7247_v55 }
0x1e8b   : > { %v7158_v25 = vpop.xlane.xlu1 %7157  ;;  %9479 = vpow2.f32 %v7303_v22 }
0x1e8c   : > { %v7209_v2 = vpop.xlane.xlu0 %7208  ;;  %v7226_v10 = vsub.f32 %v14638_v32, %v7158_v25  ;;  %v7216_v32 = vsub.f32 %v14532_v56, %v14670_v24 }
0x1e8d   : > { %v7243_v34 = vsub.f32 %v14640_v11, %v7209_v2  ;;  %v7218_v2 = vsub.f32 %v14549_v7, %v14672_v53 }
0x1e8e   : > { %v14754_v0 = vpop.eup %9473  ;;  %v7271_v37 = vmul.f32 1.442695, %v7226_v10  ;;  %v7251_v42 = vmul.f32 1.442695, %v7216_v32  ;;  %v7217_v10 = vsub.f32 %v14539_v14, %v14678_v12 }
0x1e8f   : > { %v7372_v9 = vsel %vm1007_vm1, %v14754_v0, 0.0  ;;  %v14763_v18 = vpop.eup %9475  ;;  %v7305_v12 = vmul.f32 1.442695, %v7243_v34 }
0x1e90   : > { %7343 = vadd.xlane.f32.xlu0 %v7342_v49  ;;  %v7345_v30 = vsel %vm1007_vm1, %v14763_v18, 0.0  ;;  %9481 = vpow2.f32 %v7271_v37  ;;  %v14769_v38 = vpop.eup %9477 }
0x1e91   : > { %7373 = vadd.xlane.f32.xlu1 %v7372_v9  ;;  %7346 = vadd.xlane.f32.xlu2 %v7345_v30  ;;  %v14771_v13 = vpop.eup %9479  ;;  %9483 = vpow2.f32 %v7301_v5  ;;  %v7312_v3 = vsel %vm1007_vm1, %v14769_v38, 0.0 }
0x1e92   : > { %9485 = vpow2.f32 %v7249_v35  ;;  %v7396_v29 = vsel %vm1007_vm1, %v14771_v13, 0.0 }
0x1e93   : > { %v7188_v23 = vpop.xlane.xlu2 %7187  ;;  %v7185_v31 = vpop.xlane.xlu1 %7184  ;;  %9487 = vpow2.f32 %v7251_v42  ;;  %v7220_v42 = vsub.f32 %v14564_v33, %v14676_v28  ;;  %v7219_v33 = vsub.f32 %v14554_v47, %v14674_v63 }
0x1e94   : > { %v7161_v26 = vpop.xlane.xlu0 %7160  ;;  %v7235_v56 = vsub.f32 %v14648_v61, %v7185_v31  ;;  %v7236_v24 = vsub.f32 %v14650_v27, %v7188_v23 }
0x1e95   : > { %v7227_v17 = vsub.f32 %v14646_v45, %v7161_v26  ;;  %v7255_v26 = vmul.f32 1.442695, %v7218_v2  ;;  %v7259_v7 = vmul.f32 1.442695, %v7220_v42 }
0x1e96   : > { %v14777_v1 = vpop.eup %9481  ;;  %v7289_v20 = vmul.f32 1.442695, %v7235_v56  ;;  %v7291_v61 = vmul.f32 1.442695, %v7236_v24 }
0x1e97   : > { %v7348_v62 = vsel %vm1007_vm1, %v14777_v1, 0.0  ;;  %v14784_v27 = vpop.eup %9483  ;;  %v7273_v36 = vmul.f32 1.442695, %v7227_v17 }
0x1e98   : > { %7313 = vadd.xlane.f32.xlu0 %v7312_v3  ;;  %v14786_v22 = vpop.eup %9485  ;;  %9489 = vpow2.f32 %v7289_v20  ;;  %v7393_v19 = vsel %vm1007_vm1, %v14784_v27, 0.0 }
0x1e99   : > { %7397 = vadd.xlane.f32.xlu2 %v7396_v29  ;;  %7349 = vadd.xlane.f32.xlu1 %v7348_v62  ;;  %v14788_v25 = vpop.eup %9487  ;;  %9491 = vpow2.f32 %v7291_v61  ;;  %v7315_v37 = vsel %vm1007_vm1, %v14786_v22, 0.0  ;;  %v7257_v29 = vmul.f32 1.442695, %v7219_v33 }
0x1e9a   : > { %9493 = vpow2.f32 %v7273_v36  ;;  %v7318_v49 = vsel %vm1007_vm1, %v14788_v25, 0.0 }
0x1e9b   : > { %v7164_v55 = vpop.xlane.xlu1 %7163  ;;  %v7212_v32 = vpop.xlane.xlu2 %7211 }
0x1e9c   : > { %v7228_v45 = vsub.f32 %v14660_v44, %v7164_v55  ;;  %v7253_v44 = vmul.f32 1.442695, %v7217_v10  ;;  %v7244_v11 = vsub.f32 %v14658_v46, %v7212_v32 }
0x1e9e   : > { %v7275_v9 = vmul.f32 1.442695, %v7228_v45  ;;  %v14800_v14 = vpop.eup %9489  ;;  %v7307_v46 = vmul.f32 1.442695, %v7244_v11 }
0x1e9f   : > { %v14802_v30 = vpop.eup %9491  ;;  %v7375_v35 = vsel %vm1007_vm1, %v14800_v14, 0.0 }
0x1ea0   : > { %7394 = vadd.xlane.f32.xlu0 %v7393_v19  ;;  %v14804_v5 = vpop.eup %9493  ;;  %9495 = vpow2.f32 %v7275_v9  ;;  %v7378_v23 = vsel %vm1007_vm1, %v14802_v30, 0.0 }
0x1ea1   : > { %7316 = vadd.xlane.f32.xlu2 %v7315_v37  ;;  %7319 = vadd.xlane.f32.xlu1 %v7318_v49  ;;  %9497 = vpow2.f32 %v7253_v44  ;;  %v7351_v31 = vsel %vm1007_vm1, %v14804_v5, 0.0 }
0x1ea2   : > { %9499 = vpow2.f32 %v7305_v12 }
0x1ea3   : > { %9501 = vpow2.f32 %v7307_v46 }
0x1ea4   : > { %9503 = vpow2.f32 %v7255_v26 }
0x1ea5   : > { %9505 = vpow2.f32 %v7259_v7 }
0x1ea6   : > { %v14817_v56 = vpop.eup %9495  ;;  %9507 = vpow2.f32 %v7257_v29 }
0x1ea7   : > { %v14819_v53 = vpop.eup %9497  ;;  %v7354_v28 = vsel %vm1007_vm1, %v14817_v56, 0.0 }
0x1ea8   : > { %7376 = vadd.xlane.f32.xlu0 %v7375_v35  ;;  %v14821_v24 = vpop.eup %9499  ;;  %v7321_v3 = vsel %vm1007_vm1, %v14819_v53, 0.0 }
0x1ea9   : > { %7379 = vadd.xlane.f32.xlu2 %v7378_v23  ;;  %7352 = vadd.xlane.f32.xlu1 %v7351_v31  ;;  %v7399_v17 = vsel %vm1007_vm1, %v14821_v24, 0.0  ;;  %v14831_v62 = vpop.eup %9501 }
0x1eaa   : > { %v14833_v20 = vpop.eup %9503  ;;  %v7402_v63 = vsel %vm1007_vm1, %v14831_v62, 0.0 }
0x1eab   : > { %v14835_v47 = vpop.eup %9505  ;;  %v7324_v36 = vsel %vm1007_vm1, %v14833_v20, 0.0 }
0x1eac   : > { %v7330_v61 = vsel %vm1007_vm1, %v14835_v47, 0.0  ;;  %v14843_v55 = vpop.eup %9507 }
0x1ead   : > { %v7327_v45 = vsel %vm1007_vm1, %v14843_v55, 0.0 }
0x1eb0   : > { %7355 = vadd.xlane.f32.xlu0 %v7354_v28 }
0x1eb1   : > { %7322 = vadd.xlane.f32.xlu2 %v7321_v3  ;;  %7400 = vadd.xlane.f32.xlu1 %v7399_v17 }
0x1eb8   : > { %7403 = vadd.xlane.f32.xlu0 %v7402_v63 }
0x1eb9   : > { %7331 = vadd.xlane.f32.xlu2 %v7330_v61  ;;  %7325 = vadd.xlane.f32.xlu1 %v7324_v36 }
0x1ec0   : > { %7328 = vadd.xlane.f32.xlu0 %v7327_v45 }
0x1eda   : > { %v7359_v10 = vpop.xlane.xlu0 %7358 }
0x1edb   : > { %v7383_v19 = vpop.xlane.xlu1 %7382  ;;  %9509 = vrcp.f32 %v7359_v10 }
0x1ee1   : > { %v9510_v37 = vpop.eup %9509 }
0x1ee2   : > { %v7362_v34 = vpop.xlane.xlu2 %7361  ;;  %v7453_v9 = vmul.f32 %v9510_v37, %v14684_v59 }
0x1ee3   : > { %9511 = vrcp.f32 %v7362_v34  ;;  %v7335_v49 = vpop.xlane.xlu1 %7334 }
0x1ee4   : > { %9513 = vrcp.f32 %v7383_v19  ;;  %v7485_v32 = vpack.c.bf16 %v7453_v9, %v7453_v9 }
0x1ee5   : > { %9515 = vrcp.f32 %v7335_v49 }
0x1ee6   : > { %v7711_v46 = vunpack.c.l.b16 %v7485_v32 }
0x1ee9   : > { %v9512_v44 = vpop.eup %9511 }
0x1eea   : > { %v7454_v12 = vmul.f32 %v9512_v44, %v14697_v6  ;;  %v7341_v11 = vpop.xlane.xlu2 %7340  ;;  %v9514_v42 = vpop.eup %9513 }
0x1eeb   : > { %v7386_v2 = vpop.xlane.xlu0 %7385  ;;  %v7338_v35 = vpop.xlane.xlu1 %7337  ;;  %v7461_v7 = vmul.f32 %v9514_v42, %v14686_v8  ;;  %v8053_v42 = vld [vmem:[%s15165_s14 + $0x78] sm:$0xff] }
0x1eec   : > { %v7486_v23 = vpack.c.bf16 %v7454_v12, %v7454_v12  ;;  %9517 = vrcp.f32 %v7386_v2  ;;  %v9516_v31 = vpop.eup %9515 }
0x1eed   : > { %9519 = vrcp.f32 %v7338_v35  ;;  %v7445_v59 = vmul.f32 %v9516_v31, %v14695_v54  ;;  %v7493_v17 = vpack.c.bf16 %v7461_v7, %v7461_v7  ;;  %v8052_v35 = vld [vmem:[%s15165_s14 + $0x70] sm:$0xff]  ;;  %v8050_v7 = vld [vmem:[%s15165_s14 + $0x60] sm:$0xff] }
0x1eee   : > { %v7712_v26 = vunpack.c.l.b16 %v7486_v23 }
0x1eef   : > { %v7477_v36 = vpack.c.bf16 %v7445_v59, %v7445_v59  ;;  %v7796_v19 = vunpack.c.l.b16 %v7493_v17 }
0x1ef0   : > { %v7719_v33 = vpack.c.b16 %v7712_v26, %v7711_v46 }
0x1ef1   : > { %v7626_v54 = vunpack.c.l.b16 %v7477_v36 }
0x1ef2   : > { %v9518_v28 = vpop.eup %9517  ;;  %9029 = vmatmul.msk.bf16.vlgmr.msrb.gmra.mxu0 %vm1007_vm1, %v7719_v33  ;;  %v8051_v33 = vld [vmem:[%s15165_s14 + $0x68] sm:$0xff] }
0x1ef3   : > { %v7365_v3 = vpop.xlane.xlu0 %7364  ;;  %v9520_v6 = vpop.eup %9519  ;;  %v7462_v29 = vmul.f32 %v9518_v28, %v14710_v51  ;;  %v8137_v59 = vpack.c.bf16 %v8051_v33, %v8050_v7  ;;  %v8064_v33 = vld [vmem:[#allocation13 + $0x50] sm:$0xff] }
0x1ef4   : > { %v7368_v63 = vpop.xlane.xlu2 %7367  ;;  %9521 = vrcp.f32 %v7365_v3  ;;  %v7311_v61 = vpop.xlane.xlu1 %7310  ;;  %v7446_v45 = vmul.f32 %v9520_v6, %v14708_v52 }
0x1ef5   : > { %9523 = vrcp.f32 %v7368_v63  ;;  %v7494_v10 = vpack.c.bf16 %v7462_v29, %v7462_v29 }
0x1ef6   : > { %v7478_v8 = vpack.c.bf16 %v7446_v45, %v7446_v45  ;;  %v8068_v45 = vld [vmem:[#allocation13 + $0x70] sm:$0xff] }
0x1ef7   : > { %v7797_v34 = vunpack.c.l.b16 %v7494_v10  ;;  %v8069_v10 = vld [vmem:[#allocation13 + $0x78] sm:$0xff] }
0x1ef8   : > { %v7627_v37 = vunpack.c.l.b16 %v7478_v8  ;;  %v8048_v8 = vld [vmem:[%s15165_s14 + $0x50] sm:$0xff] }
0x1ef9   : > { %v7804_v9 = vpack.c.b16 %v7797_v34, %v7796_v19 }
0x1efa   : > { %v9522_v49 = vpop.eup %9521  ;;  %v7634_v32 = vpack.c.b16 %v7627_v37, %v7626_v54  ;;  %v8049_v54 = vld [vmem:[%s15165_s14 + $0x58] sm:$0xff] }
0x1efb   : > { %v9524_v44 = vpop.eup %9523  ;;  %v7455_v12 = vmul.f32 %v9522_v49, %v14723_v58  ;;  %v7392_v51 = vpop.xlane.xlu0 %7391  ;;  %9033 = vmatmul.msk.bf16.vlgmr.msrb.gmra.mxu1 %vm1007_vm1, %v7804_v9  ;;  %v8138_v58 = vpack.c.bf16 %v8053_v42, %v8052_v35  ;;  %v8136_v37 = vpack.c.bf16 %v8049_v54, %v8048_v8  ;;  %v8047_v42 = vld [vmem:[%s15165_s14 + $0x48] sm:$0xff] }
0x1efc   : > { %v7456_v2 = vmul.f32 %v9524_v44, %v14726_v16  ;;  %9525 = vrcp.f32 %v7392_v51  ;;  %v7389_v52 = vpop.xlane.xlu1 %7388  ;;  %v7371_v31 = vpop.xlane.xlu2 %7370  ;;  %9025 = vmatmul.msk.bf16.vlgmr.msra.gmra.mxu3 %vm1007_vm1, %v7634_v32  ;;  %v8067_v51 = vld [vmem:[#allocation13 + $0x68] sm:$0xff] }
0x1efd   : > { %v7487_v23 = vpack.c.bf16 %v7455_v12, %v7455_v12  ;;  %9527 = vrcp.f32 %v7389_v52  ;;  %8161 = vmatpush.bf16.msra.mxu0 %v8138_v58  ;;  %v8066_v12 = vld [vmem:[#allocation13 + $0x60] sm:$0xff] }
0x1efe   : > { %9529 = vrcp.f32 %v7341_v11  ;;  %v7488_v16 = vpack.c.bf16 %v7456_v2, %v7456_v2  ;;  %v8046_v2 = vld [vmem:[%s15165_s14 + $0x40] sm:$0xff]  ;;  %v8145_v35 = vpack.c.bf16 %v8067_v51, %v8066_v12 }
0x1eff   : > { %v7713_v46 = vunpack.c.l.b16 %v7487_v23  ;;  %9531 = vrcp.f32 %v7371_v31  ;;  %v8135_v31 = vpack.c.bf16 %v8047_v42, %v8046_v2  ;;  %v8060_v2 = vld [vmem:[#allocation13 + $0x30] sm:$0xff] }
0x1f00   : > { %v7714_v26 = vunpack.c.l.b16 %v7488_v16  ;;  %9533 = vrcp.f32 %v7311_v61 }
0x1f01   : > { %8162 = vmatpush.bf16.msra.mxu0 %v8137_v59  ;;  %v8065_v59 = vld [vmem:[#allocation13 + $0x58] sm:$0xff] }
0x1f02   : > { %v9526_v28 = vpop.eup %9525  ;;  %v7720_v3 = vpack.c.b16 %v7714_v26, %v7713_v46 }
0x1f03   : > { %v9528_v6 = vpop.eup %9527  ;;  %v7464_v11 = vmul.f32 %v9526_v28, %v14738_v40  ;;  %v7344_v17 = vpop.xlane.xlu0 %7343  ;;  %v8146_v40 = vpack.c.bf16 %v8069_v10, %v8068_v45  ;;  %v8044_v28 = vld [vmem:[%s15165_s14 + $0x30] sm:$0xff] }
0x1f04   : > { %v9530_v29 = vpop.eup %9529  ;;  %v7463_v63 = vmul.f32 %v9528_v6, %v14735_v15  ;;  %9030 = vmatmul.msk.bf16.gmra.mxu0 %vm1007_vm1, %v7720_v3  ;;  %9535 = vrcp.f32 %v7344_v17  ;;  %v7374_v36 = vpop.xlane.xlu1 %7373  ;;  %v8045_v17 = vld [vmem:[%s15165_s14 + $0x38] sm:$0xff] }
0x1f05   : > { %v9532_v19 = vpop.eup %9531  ;;  %v7496_v34 = vpack.c.bf16 %v7464_v11, %v7464_v11  ;;  %v7347_v61 = vpop.xlane.xlu2 %7346  ;;  %9537 = vrcp.f32 %v7374_v36  ;;  %v7447_v49 = vmul.f32 %v9530_v29, %v14704_v50  ;;  %8147 = vmatpush.bf16.msrb.mxu3 %v8146_v40  ;;  %8163 = vmatpush.bf16.msra.mxu0 %v8136_v37 }
0x1f06   : > { %v7495_v15 = vpack.c.bf16 %v7463_v63, %v7463_v63  ;;  %v7457_v44 = vmul.f32 %v9532_v19, %v14744_v21  ;;  %v9534_v52 = vpop.eup %9533  ;;  %v8134_v63 = vpack.c.bf16 %v8045_v17, %v8044_v28  ;;  %v8062_v19 = vld [vmem:[#allocation13 + $0x40] sm:$0xff]  ;;  %v8059_v28 = vld [vmem:[#allocation13 + $0x28] sm:$0xff] }
0x1f07   : > { %v7799_v9 = vunpack.c.l.b16 %v7496_v34  ;;  %v7479_v16 = vpack.c.bf16 %v7447_v49, %v7447_v49  ;;  %v8063_v34 = vld [vmem:[#allocation13 + $0x48] sm:$0xff] }
0x1f08   : > { %v7798_v32 = vunpack.c.l.b16 %v7495_v15  ;;  %v7489_v26 = vpack.c.bf16 %v7457_v44, %v7457_v44  ;;  %v8143_v54 = vpack.c.bf16 %v8063_v34, %v8062_v19 }
0x1f09   : > { %8148 = vmatpush.bf16.msrb.mxu3 %v8145_v35  ;;  %8164 = vmatpush.bf16.msra.mxu0 %v8135_v31  ;;  %v7628_v36 = vunpack.c.l.b16 %v7479_v16  ;;  %v8040_v35 = vld [vmem:[%s15165_s14 + $0x10] sm:$0xff] }
0x1f0a   : > { %v9536_v23 = vpop.eup %9535  ;;  %v7805_v50 = vpack.c.b16 %v7799_v9, %v7798_v32  ;;  %v7715_v10 = vunpack.c.l.b16 %v7489_v26 }
0x1f0b   : > { %v9538_v58 = vpop.eup %9537  ;;  %v7448_v21 = vmul.f32 %v9536_v23, %v14751_v39  ;;  %v7314_v46 = vpop.xlane.xlu0 %7313  ;;  %v8144_v39 = vpack.c.bf16 %v8065_v59, %v8064_v33  ;;  %v8058_v59 = vld [vmem:[#allocation13 + $0x20] sm:$0xff] }
0x1f0c   : > { %v7458_v7 = vmul.f32 %v9538_v58, %v14754_v0  ;;  %9539 = vrcp.f32 %v7314_v46  ;;  %9034 = vmatmul.msk.bf16.gmra.mxu1 %vm1007_vm1, %v7805_v50  ;;  %v7350_v11 = vpop.xlane.xlu1 %7349  ;;  %v7437_v0 = vmul.f32 %v9534_v52, %v14720_v4  ;;  %v8043_v4 = vld [vmem:[%s15165_s14 + $0x28] sm:$0xff]  ;;  %v8061_v52 = vld [vmem:[#allocation13 + $0x38] sm:$0xff] }
0x1f0d   : > { %9541 = vrcp.f32 %v7347_v61  ;;  %v7480_v3 = vpack.c.bf16 %v7448_v21, %v7448_v21  ;;  %v7398_v6 = vpop.xlane.xlu2 %7397  ;;  %8149 = vmatpush.bf16.msrb.mxu3 %v8144_v39  ;;  %8165 = vmatpush.bf16.msra.mxu0 %v8134_v63  ;;  %v8042_v61 = vld [vmem:[%s15165_s14 + $0x20] sm:$0xff]  ;;  %v8041_v58 = vld [vmem:[%s15165_s14 + $0x18] sm:$0xff]  ;;  %v8141_v39 = vpack.c.bf16 %v8059_v28, %v8058_v59 }
0x1f0e   : > { %v7490_v29 = vpack.c.bf16 %v7458_v7, %v7458_v7  ;;  %9543 = vrcp.f32 %v7398_v6  ;;  %v7469_v37 = vpack.c.bf16 %v7437_v0, %v7437_v0  ;;  %v8133_v9 = vpack.c.bf16 %v8043_v4, %v8042_v61 }
0x1f0f   : > { %v7629_v45 = vunpack.c.l.b16 %v7480_v3  ;;  %9545 = vrcp.f32 %v7350_v11  ;;  %v8132_v46 = vpack.c.bf16 %v8041_v58, %v8040_v35  ;;  %v8038_v3 = vld [vmem:[%s15165_s14] sm:$0xff] }
0x1f10   : > { %v7716_v8 = vunpack.c.l.b16 %v7490_v29  ;;  %v7541_v16 = vunpack.c.l.b16 %v7469_v37 }
0x1f11   : > { %v7635_v40 = vpack.c.b16 %v7629_v45, %v7628_v36  ;;  %8150 = vmatpush.bf16.msrb.mxu3 %v8143_v54  ;;  %8166 = vmatpush.bf16.msra.mxu0 %v8133_v9  ;;  %v8056_v45 = vld [vmem:[#allocation13 + $0x10] sm:$0xff]  ;;  %v8054_v9 = vld [vmem:[#allocation13] sm:$0xff] }
0x1f12   : > { %v9540_v15 = vpop.eup %9539  ;;  %v7721_v49 = vpack.c.b16 %v7716_v8, %v7715_v10  ;;  %v8057_v10 = vld [vmem:[#allocation13 + $0x18] sm:$0xff] }
0x1f13   : > { %v9542_v44 = vpop.eup %9541  ;;  %v7438_v32 = vmul.f32 %v9540_v15, %v14769_v38  ;;  %v7395_v12 = vpop.xlane.xlu0 %7394  ;;  %9026 = vmatmul.msk.bf16.gmra.mxu3 %vm1007_vm1, %v7635_v40  ;;  %v8142_v38 = vpack.c.bf16 %v8061_v52, %v8060_v2  ;;  %v8140_v4 = vpack.c.bf16 %v8057_v10, %v8056_v45 }
0x1f14   : > { %v9544_v51 = vpop.eup %9543  ;;  %9547 = vrcp.f32 %v7395_v12  ;;  %9031 = vmatmul.msk.bf16.gmra.mxu0 %vm1007_vm1, %v7721_v49  ;;  %v7320_v31 = vpop.xlane.xlu1 %7319  ;;  %v7449_v26 = vmul.f32 %v9542_v44, %v14763_v18  ;;  %v8055_v44 = vld [vmem:[#allocation13 + $0x8] sm:$0xff] }
0x1f15   : > { %v9546_v42 = vpop.eup %9545  ;;  %v7470_v23 = vpack.c.bf16 %v7438_v32, %v7438_v32  ;;  %v7317_v50 = vpop.xlane.xlu2 %7316  ;;  %v7466_v7 = vmul.f32 %v9544_v51, %v14771_v13  ;;  %8151 = vmatpush.bf16.msrb.mxu3 %v8142_v38  ;;  %8167 = vmatpush.bf16.msra.mxu0 %v8132_v46  ;;  %v8139_v32 = vpack.c.bf16 %v8055_v44, %v8054_v9 }
0x1f16   : > { %v7450_v21 = vmul.f32 %v9546_v42, %v14777_v1  ;;  %9549 = vrcp.f32 %v7317_v50  ;;  %v8039_v1 = vld [vmem:[%s15165_s14 + $0x8] sm:$0xff]  ;;  %v7481_v13 = vpack.c.bf16 %v7449_v26, %v7449_v26 }
0x1f17   : > { %v7542_v33 = vunpack.c.l.b16 %v7470_v23  ;;  %9551 = vrcp.f32 %v7320_v31  ;;  %v8131_v17 = vpack.c.bf16 %v8039_v1, %v8038_v3  ;;  %v7498_v0 = vpack.c.bf16 %v7466_v7, %v7466_v7 }
0x1f18   : > { %v7482_v11 = vpack.c.bf16 %v7450_v21, %v7450_v21  ;;  %v8120_v7 = vrot.slane %v14318_v57, 4 }
0x1f19   : > { %v7549_v6 = vpack.c.b16 %v7542_v33, %v7541_v16  ;;  %8152 = vmatpush.bf16.msrb.mxu3 %v8141_v39  ;;  %8168 = vmatpush.bf16.msra.mxu0 %v8131_v17  ;;  %v7801_v37 = vunpack.c.l.b16 %v7498_v0 }
0x1f1a   : > { %v9548_v18 = vpop.eup %9547  ;;  %v7631_v19 = vunpack.c.l.b16 %v7482_v11  ;;  %v8121_v1 = vmax.f32 %v14318_v57, %v8120_v7 }
0x1f1b   : > { %v7465_v29 = vmul.f32 %v9548_v18, %v14784_v27  ;;  %v7377_v63 = vpop.xlane.xlu0 %7376  ;;  %9021 = vmatmul.msk.bf16.vlgmr.msra.gmra.mxu2 %vm1007_vm1, %v7549_v6  ;;  %v7630_v27 = vunpack.c.l.b16 %v7481_v13 }
0x1f1c   : > { %v9550_v36 = vpop.eup %9549  ;;  %9553 = vrcp.f32 %v7377_v63  ;;  %v7353_v54 = vpop.xlane.xlu1 %7352  ;;  %v8122_v63 = vrot.slane %v8121_v1, 2 }
0x1f1d   : > { %v9552_v8 = vpop.eup %9551  ;;  %v7439_v34 = vmul.f32 %v9550_v36, %v14786_v22  ;;  %v7497_v61 = vpack.c.bf16 %v7465_v29, %v7465_v29  ;;  %v7380_v40 = vpop.xlane.xlu2 %7379  ;;  %8153 = vmatpush.bf16.msrb.mxu3 %v8140_v4  ;;  %v7636_v2 = vpack.c.b16 %v7631_v19, %v7630_v27 }
0x1f1e   : > { %v7440_v15 = vmul.f32 %v9552_v8, %v14788_v25  ;;  %9555 = vrcp.f32 %v7380_v40 }
0x1f1f   : > { %v7800_v49 = vunpack.c.l.b16 %v7497_v61  ;;  %9557 = vrcp.f32 %v7353_v54  ;;  %v7471_v12 = vpack.c.bf16 %v7439_v34, %v7439_v34  ;;  %v8123_v34 = vmax.f32 %v8121_v1, %v8122_v63 }
0x1f20   : > { %v7472_v51 = vpack.c.bf16 %v7440_v15, %v7440_v15 }
0x1f21   : > { %v7806_v22 = vpack.c.b16 %v7801_v37, %v7800_v49  ;;  %8154 = vmatpush.bf16.msrb.mxu3 %v8139_v32  ;;  %v7543_v50 = vunpack.c.l.b16 %v7471_v12 }
0x1f22   : > { %v9554_v52 = vpop.eup %9553  ;;  %v7544_v31 = vunpack.c.l.b16 %v7472_v51 }
0x1f23   : > { %v7459_v35 = vmul.f32 %v9554_v52, %v14800_v14  ;;  %v7356_v42 = vpop.xlane.xlu0 %7355  ;;  %9027 = vmatmul.msk.bf16.gmra.mxu3 %vm1007_vm1, %v7636_v2  ;;  %9035 = vmatmul.msk.bf16.gmra.mxu1 %vm1007_vm1, %v7806_v22 }
0x1f24   : > { %v9556_v25 = vpop.eup %9555  ;;  %9559 = vrcp.f32 %v7356_v42  ;;  %v7401_v16 = vpop.xlane.xlu1 %7400  ;;  %v7550_v59 = vpack.c.b16 %v7544_v31, %v7543_v50 }
0x1f25   : > { %v9558_v23 = vpop.eup %9557  ;;  %v7460_v38 = vmul.f32 %v9556_v25, %v14802_v30  ;;  %v7491_v58 = vpack.c.bf16 %v7459_v35, %v7459_v35  ;;  %v7323_v21 = vpop.xlane.xlu2 %7322  ;;  %9561 = vrcp.f32 %v7401_v16 }
0x1f26   : > { %v7451_v14 = vmul.f32 %v9558_v23, %v14804_v5  ;;  %9563 = vrcp.f32 %v7323_v21 }
0x1f27   : > { %v7492_v46 = vpack.c.bf16 %v7460_v38, %v7460_v38  ;;  %v7717_v26 = vunpack.c.l.b16 %v7491_v58 }
0x1f28   : > { %v7483_v3 = vpack.c.bf16 %v7451_v14, %v7451_v14 }
0x1f29   : > { %v7718_v33 = vunpack.c.l.b16 %v7492_v46 }
0x1f2a   : > { %v9560_v28 = vpop.eup %9559  ;;  %v7632_v13 = vunpack.c.l.b16 %v7483_v3 }
0x1f2b   : > { %v7452_v6 = vmul.f32 %v9560_v28, %v14817_v56  ;;  %v7404_v11 = vpop.xlane.xlu0 %7403  ;;  %9022 = vmatmul.msk.bf16.gmra.mxu2 %vm1007_vm1, %v7550_v59  ;;  %v7722_v30 = vpack.c.b16 %v7718_v33, %v7717_v26  ;;  %v9562_v39 = vpop.eup %9561 }
0x1f2c   : > { %9565 = vrcp.f32 %v7404_v11  ;;  %v7326_v5 = vpop.xlane.xlu1 %7325  ;;  %v9564_v17 = vpop.eup %9563  ;;  %v7467_v29 = vmul.f32 %v9562_v39, %v14821_v24 }
0x1f2d   : > { %v7484_v18 = vpack.c.bf16 %v7452_v6, %v7452_v6  ;;  %9032 = vmatmul.msk.bf16.gmra.mxu0 %vm1007_vm1, %v7722_v30  ;;  %9567 = vrcp.f32 %v7326_v5  ;;  %v7441_v45 = vmul.f32 %v9564_v17, %v14819_v53  ;;  %v7332_v54 = vpop.xlane.xlu2 %7331  ;;  %v8124_v53 = vrot.slane %v8123_v34, 1 }
0x1f2e   : > { %v7499_v10 = vpack.c.bf16 %v7467_v29, %v7467_v29 }
0x1f2f   : > { %v7633_v0 = vunpack.c.l.b16 %v7484_v18  ;;  %v7473_v40 = vpack.c.bf16 %v7441_v45, %v7441_v45  ;;  %v8125_v32 = vmax.f32 %v8123_v34, %v8124_v53  ;;  %v6289_v34 = vld [vmem:[%s15163_s12 + $0x68] sm:$0xff] }
0x1f30   : > { %v7802_v24 = vunpack.c.l.b16 %v7499_v10  ;;  %v6290_v10 = vld [vmem:[%s15163_s12 + $0x70] sm:$0xff] }
0x1f31   : > { %v7637_v56 = vpack.c.b16 %v7633_v0, %v7632_v13  ;;  %v7545_v49 = vunpack.c.l.b16 %v7473_v40  ;;  %v8130_v51 = vpack.c.bf16 %v8125_v32, %v8125_v32  ;;  %v6281_v32 = vld [vmem:[%s15163_s12 + $0x28] sm:$0xff] }
0x1f32   : > { %v9566_v36 = vpop.eup %9565 }
0x1f33   : > { %v7468_v8 = vmul.f32 %v9566_v36, %v14831_v62  ;;  %9028 = vmatmul.msk.bf16.gmra.mxu3 %vm1007_vm1, %v7637_v56  ;;  %v7329_v57 = vpop.xlane.xlu0 %7328  ;;  %v9568_v19 = vpop.eup %9567 }
0x1f34   : > { %v7442_v4 = vmul.f32 %v9568_v19, %v14833_v20  ;;  %9569 = vrcp.f32 %v7329_v57  ;;  %v6288_v57 = vld [vmem:[%s15163_s12 + $0x60] sm:$0xff] }
0x1f35   : > { %v7500_v61 = vpack.c.bf16 %v7468_v8, %v7468_v8  ;;  %9571 = vrcp.f32 %v7332_v54  ;;  %v6291_v8 = vld [vmem:[%s15163_s12 + $0x78] sm:$0xff]  ;;  %v8004_v40 = vpack.c.bf16 %v6289_v34, %v6288_v57  ;;  %v6286_v54 = vld [vmem:[%s15163_s12 + $0x50] sm:$0xff] }
0x1f36   : > { %v7474_v27 = vpack.c.bf16 %v7442_v4, %v7442_v4  ;;  %v8005_v19 = vpack.c.bf16 %v6291_v8, %v6290_v10  ;;  %v6287_v4 = vld [vmem:[%s15163_s12 + $0x58] sm:$0xff]  ;;  %v8082_v8 = vld [vmem:[#allocation14 + $0x60] sm:$0xff] }
0x1f37   : > { %v7803_v15 = vunpack.c.l.b16 %v7500_v61  ;;  %v8085_v10 = vld [vmem:[#allocation14 + $0x78] sm:$0xff] }
0x1f38   : > { %v7546_v9 = vunpack.c.l.b16 %v7474_v27  ;;  %8009 = vmatpush.bf16.msrb.mxu2 %v8005_v19  ;;  %v6284_v27 = vld [vmem:[%s15163_s12 + $0x40] sm:$0xff]  ;;  %v8083_v19 = vld [vmem:[#allocation14 + $0x68] sm:$0xff] }
0x1f39   : > { %v7807_v37 = vpack.c.b16 %v7803_v15, %v7802_v24  ;;  %v8003_v24 = vpack.c.bf16 %v6287_v4, %v6286_v54  ;;  %v8196_v34 = vpack.c.bf16 %v8083_v19, %v8082_v8  ;;  %v8081_v54 = vld [vmem:[#allocation14 + $0x58] sm:$0xff] }
0x1f3a   : > { %v7551_v62 = vpack.c.b16 %v7546_v9, %v7545_v49  ;;  %v9570_v44 = vpop.eup %9569  ;;  %v6282_v49 = vld [vmem:[%s15163_s12 + $0x30] sm:$0xff]  ;;  %v6283_v9 = vld [vmem:[%s15163_s12 + $0x38] sm:$0xff] }
0x1f3b   : > { %9036 = vmatmul.msk.bf16.gmra.mxu1 %vm1007_vm1, %v7807_v37  ;;  %v9572_v12 = vpop.eup %9571  ;;  %v7443_v20 = vmul.f32 %v9570_v44, %v14843_v55  ;;  %v6285_v37 = vld [vmem:[%s15163_s12 + $0x48] sm:$0xff]  ;;  %v8001_v44 = vpack.c.bf16 %v6283_v9, %v6282_v49 }
0x1f3c   : > { %9023 = vmatmul.msk.bf16.gmra.mxu2 %vm1007_vm1, %v7551_v62  ;;  %v7444_v2 = vmul.f32 %v9572_v12, %v14835_v47  ;;  %v8002_v53 = vpack.c.bf16 %v6285_v37, %v6284_v27  ;;  %v6280_v62 = vld [vmem:[%s15163_s12 + $0x20] sm:$0xff]  ;;  %v8079_v49 = vld [vmem:[#allocation14 + $0x48] sm:$0xff] }
0x1f3d   : > { %8169 = vmatmul.bf16.vlgmr.msra.gmra.mxu0 %v14249_v41  ;;  %v7475_v22 = vpack.c.bf16 %v7443_v20, %v7443_v20  ;;  %8010 = vmatpush.bf16.msrb.mxu2 %v8004_v40  ;;  %v8000_v12 = vpack.c.bf16 %v6281_v32, %v6280_v62  ;;  %v6278_v20 = vld [vmem:[%s15163_s12 + $0x10] sm:$0xff] }
0x1f3e   : > { %v7476_v52 = vpack.c.bf16 %v7444_v2, %v7444_v2  ;;  %v8080_v40 = vld [vmem:[#allocation14 + $0x50] sm:$0xff] }
0x1f3f   : > { %v7547_v35 = vunpack.c.l.b16 %v7475_v22  ;;  %v6276_v22 = vld [vmem:[%s15163_s12] sm:$0xff]  ;;  %v8195_v27 = vpack.c.bf16 %v8081_v54, %v8080_v40  ;;  %v8101_v54 = vld [vmem:[%s15169_s18 + $0x70] sm:$0xff] }
0x1f40   : > { %v7548_v42 = vunpack.c.l.b16 %v7476_v52  ;;  %v6277_v52 = vld [vmem:[%s15163_s12 + $0x8] sm:$0xff] }
0x1f41   : > { %8011 = vmatpush.bf16.msrb.mxu2 %v8003_v24 }
0x1f42   : > { %v7552_v25 = vpack.c.b16 %v7548_v42, %v7547_v35  ;;  %v7998_v35 = vpack.c.bf16 %v6277_v52, %v6276_v22 }
0x1f43   : > { %8155 = vmatmul.bf16.vlgmr.msrb.gmra.mxu3 %v8130_v51  ;;  %v6279_v51 = vld [vmem:[%s15163_s12 + $0x18] sm:$0xff] }
0x1f44   : > { %v7999_v2 = vpack.c.bf16 %v6279_v51, %v6278_v20 }
0x1f45   : > { %8012 = vmatpush.bf16.msrb.mxu2 %v8002_v53  ;;  %v8078_v53 = vld [vmem:[#allocation14 + $0x40] sm:$0xff] }
0x1f46   : > { %v8194_v22 = vpack.c.bf16 %v8079_v49, %v8078_v53  ;;  %v8097_v49 = vld [vmem:[%s15169_s18 + $0x50] sm:$0xff] }
0x1f49   : > { %8013 = vmatpush.bf16.msrb.mxu2 %v8001_v44 }
0x1f4c   : > { %9024 = vmatmul.msk.bf16.gmra.mxu2 %vm1007_vm1, %v7552_v25 }
0x1f4d   : > { %8174 = vmatmul.bf16.gmra.mxu0 %v14276_v60  ;;  %8014 = vmatpush.bf16.msrb.mxu2 %v8000_v12 }
0x1f51   : > { %8015 = vmatpush.bf16.msrb.mxu2 %v7999_v2 }
0x1f55   : > { %8016 = vmatpush.bf16.msrb.mxu2 %v7998_v35 }
0x1f5d   : > { %8179 = vmatmul.bf16.gmra.mxu0 %v14291_v43 }
0x1f6d   : > { %8184 = vmatmul.bf16.gmra.mxu0 %v14313_v48 }
0x1f6f   : > { %v7768_v41 = vpop.f32.mrf.mxu0 }
0x1f77   : > { %v7770_v23 = vpop.f32.mrf.mxu0 }
0x1f78   : > { %v9382_v55 = vpack.i.bf16 %v7770_v23, %v7768_v41  ;;  %v7853_v50 = vpop.f32.mrf.mxu1 }
0x1f7a   : > { %9383 = vrot.lane.b32.xlu0 %v9382_v55, %s9979_s30 }
0x1f7f   : > { %v7683_v47 = vpop.f32.mrf.mxu3 }
0x1f80   : > { %v7855_v38 = vpop.f32.mrf.mxu1 }
0x1f81   : > { %v7773_v31 = vpop.f32.mrf.mxu0  ;;  %v9387_v58 = vpack.i.bf16 %v7855_v38, %v7853_v50 }
0x1f83   : > { %9388 = vrot.lane.b32.xlu2 %v9387_v58, %s9978_s22 }
0x1f87   : > { %v7685_v16 = vpop.f32.mrf.mxu3 }
0x1f88   : > { %v9377_v60 = vpack.i.bf16 %v7685_v16, %v7683_v47 }
0x1f89   : > { %v7775_v21 = vpop.f32.mrf.mxu0  ;;  %v7858_v46 = vpop.f32.mrf.mxu1 }
0x1f8a   : > { %9378 = vrot.lane.b32.xlu1 %v9377_v60, %s9980_s3  ;;  %v9397_v43 = vpack.i.bf16 %v7775_v21, %v7773_v31 }
0x1f91   : > { %v7778_v48 = vpop.f32.mrf.mxu0  ;;  %v7860_v26 = vpop.f32.mrf.mxu1 }
0x1f92   : > { %v9402_v14 = vpack.i.bf16 %v7860_v26, %v7858_v46  ;;  %9398 = vrot.lane.b32.xlu1 %v9397_v43, %s9979_s30 }
0x1f94   : > { %9403 = vrot.lane.b32.xlu2 %v9402_v14, %s9978_s22 }
0x1f96   : > { %v7688_v7 = vpop.f32.mrf.mxu3 }
0x1f99   : > { %v7780_v33 = vpop.f32.mrf.mxu0 }
0x1f9a   : > { %v9412_v59 = vpack.i.bf16 %v7780_v33, %v7778_v48 }
0x1f9c   : > { %9413 = vrot.lane.b32.xlu1 %v9412_v59, %s9979_s30 }
0x1f9e   : > { %v7690_v28 = vpop.f32.mrf.mxu3  ;;  %v7598_v42 = vpop.f32.mrf.mxu2 }
0x1f9f   : > { %v9392_v3 = vpack.i.bf16 %v7690_v28, %v7688_v7 }
0x1fa0   : > { %v7863_v6 = vpop.f32.mrf.mxu1 }
0x1fa1   : > { %9393 = vrot.lane.b32.xlu0 %v9392_v3, %s9980_s3 }
0x1fa6   : > { %v7693_v11 = vpop.f32.mrf.mxu3  ;;  %v7600_v25 = vpop.f32.mrf.mxu2 }
0x1fa8   : > { %v7865_v30 = vpop.f32.mrf.mxu1 }
0x1fa9   : > { %v9417_v39 = vpack.i.bf16 %v7865_v30, %v7863_v6 }
0x1faa   : > { %v7783_v1 = vpop.f32.mrf.mxu0 }
0x1fab   : > { %9418 = vrot.lane.b32.xlu2 %v9417_v39, %s9978_s22 }
0x1fae   : > { %v7695_v18 = vpop.f32.mrf.mxu3  ;;  %v7603_v14 = vpop.f32.mrf.mxu2 }
0x1faf   : > { %v9407_v5 = vpack.i.bf16 %v7695_v18, %v7693_v11 }
0x1fb1   : > { %9408 = vrot.lane.b32.xlu0 %v9407_v5, %s9980_s3 }
0x1fb2   : > { %v7785_v17 = vpop.f32.mrf.mxu0 }
0x1fb3   : > { %v9427_v13 = vpack.i.bf16 %v7785_v17, %v7783_v1 }
0x1fb5   : > { %9428 = vrot.lane.b32.xlu1 %v9427_v13, %s9979_s30  ;;  %s15106_s30 = scalar_lea.vmem [#allocation17], %s8634_s19 }
0x1fb6   : > { %v7698_v0 = vpop.f32.mrf.mxu3  ;;  %v7605_v33 = vpop.f32.mrf.mxu2  ;;  %s8459_s21 = sshll.u32 %s15106_s30, 4  ;;  %s8460_s21 = int_to_ptr.vmem [resolvable:$true] %s8459_s21 }
0x1fb8   : > { %v7868_v29 = vpop.f32.mrf.mxu1 }
0x1fbe   : > { %v7700_v63 = vpop.f32.mrf.mxu3 }
0x1fbf   : > { %v9422_v56 = vpack.i.bf16 %v7700_v63, %v7698_v0  ;;  %v7608_v13 = vpop.f32.mrf.mxu2 }
0x1fc0   : > { %v7870_v36 = vpop.f32.mrf.mxu1 }
0x1fc1   : > { %v9432_v45 = vpack.i.bf16 %v7870_v36, %v7868_v29  ;;  %9423 = vrot.lane.b32.xlu0 %v9422_v56, %s9980_s3 }
0x1fc3   : > { %9433 = vrot.lane.b32.xlu2 %v9432_v45, %s9978_s22  ;;  %v8084_v45 = vld [vmem:[#allocation14 + $0x70] sm:$0xff] }
0x1fc4   : > { %v8197_v57 = vpack.c.bf16 %v8085_v10, %v8084_v45 }
0x1fc6   : > { %v14973_v61 = vpop.f32.mrf.mxu3  ;;  %8198 = vmatpush.bf16.msra.mxu3 %v8197_v57 }
0x1fc7   : > { %v7610_v4 = vpop.f32.mrf.mxu2 }
0x1fca   : > { %8199 = vmatpush.bf16.msra.mxu3 %v8196_v34 }
0x1fce   : > { %v8158_v15 = vpop.f32.mrf.mxu3  ;;  %8200 = vmatpush.bf16.msra.mxu3 %v8195_v27  ;;  %v8100_v27 = vld [vmem:[%s15169_s18 + $0x68] sm:$0xff] }
0x1fd2   : > { %8201 = vmatpush.bf16.msra.mxu3 %v8194_v22 }
0x1fdd   : > { %v9389_v23 = vpop.permute.xlu2 %9388 }
0x1fde   : > { %v9391_v58 = vunpack.i.h.bf16 %v9389_v23  ;;  %v9390_v16 = vunpack.i.l.bf16 %v9389_v23 }
0x1fec   : > { %v9384_v41 = vpop.permute.xlu0 %9383 }
0x1fed   : > { %v9386_v31 = vunpack.i.h.bf16 %v9384_v41  ;;  %v9385_v38 = vunpack.i.l.bf16 %v9384_v41 }
0x1fee   : > { %v9404_v28 = vpop.permute.xlu2 %9403 }
0x1fef   : > { %v9406_v1 = vunpack.i.h.bf16 %v9404_v28  ;;  %v9405_v18 = vunpack.i.l.bf16 %v9404_v28 }
0x1ffc   : > { %v9379_v55 = vpop.permute.xlu1 %9378 }
0x1ffd   : > { %v9381_v50 = vunpack.i.h.bf16 %v9379_v55  ;;  %v9380_v47 = vunpack.i.l.bf16 %v9379_v55 }
0x1fff   : > { %v7970_v60 = vsel %vm6752_vm13, %v7600_v25, %v9381_v50  ;;  %v7969_v21 = vsel %vm6752_vm13, %v7598_v42, %v9380_v47  ;;  %v8076_v42 = vld [vmem:[#allocation14 + $0x30] sm:$0xff]  ;;  %v8077_v25 = vld [vmem:[#allocation14 + $0x38] sm:$0xff]  ;;  %v7613_v47 = vpop.f32.mrf.mxu2 }
0x2000   : > { %v7978_v46 = vsel %vm1007_vm1, %v7970_v60, %v9386_v31  ;;  %v7977_v43 = vsel %vm1007_vm1, %v7969_v21, %v9385_v38  ;;  %v8193_v50 = vpack.c.bf16 %v8077_v25, %v8076_v42 }
0x2001   : > { %v7987_v48 = vsel %vm7985_vm14, %v7978_v46, %v9391_v58  ;;  %v7986_v26 = vsel %vm7985_vm14, %v7977_v43, %v9390_v16 }
0x2002   : > { %v7994_v7 = vpack.c.bf16 %v7987_v48, %v7986_v26  ;;  %8202 = vmatpush.bf16.msra.mxu3 %v8193_v50 }
0x2004   : > { %8017 = vmatmul.bf16.vlgmr.msrb.gmra.mxu2 %v7994_v7  ;;  %v9399_v59 = vpop.permute.xlu1 %9398 }
0x2005   : > { %v9401_v30 = vunpack.i.h.bf16 %v9399_v59  ;;  %v9400_v39 = vunpack.i.l.bf16 %v9399_v59  ;;  %v9419_v24 = vpop.permute.xlu2 %9418 }
0x2006   : > { %v9421_v44 = vunpack.i.h.bf16 %v9419_v24  ;;  %v9420_v20 = vunpack.i.l.bf16 %v9419_v24  ;;  %v8099_v24 = vld [vmem:[%s15169_s18 + $0x60] sm:$0xff] }
0x2007   : > { %v7615_v21 = vpop.f32.mrf.mxu2  ;;  %v8264_v53 = vpack.c.bf16 %v8100_v27, %v8099_v24  ;;  %v8111_v24 = vld [vmem:[#allocation16 + $0x38] sm:$0xff] }
0x200e   : > { %v9414_v15 = vpop.permute.xlu1 %9413 }
0x200f   : > { %v9416_v32 = vunpack.i.h.bf16 %v9414_v15  ;;  %v9415_v12 = vunpack.i.l.bf16 %v9414_v15 }
0x2013   : > { %v9394_v3 = vpop.permute.xlu0 %9393 }
0x2014   : > { %v9396_v6 = vunpack.i.h.bf16 %v9394_v3  ;;  %v9395_v11 = vunpack.i.l.bf16 %v9394_v3 }
0x2016   : > { %v7971_v5 = vsel %vm6752_vm13, %v7603_v14, %v9395_v11  ;;  %v7972_v17 = vsel %vm6752_vm13, %v7605_v33, %v9396_v6  ;;  %v8074_v11 = vld [vmem:[#allocation14 + $0x20] sm:$0xff] }
0x2017   : > { %v7979_v0 = vsel %vm1007_vm1, %v7971_v5, %v9400_v39  ;;  %v7980_v29 = vsel %vm1007_vm1, %v7972_v17, %v9401_v30  ;;  %v8075_v30 = vld [vmem:[#allocation14 + $0x28] sm:$0xff]  ;;  %v8070_v17 = vld [vmem:[#allocation14] sm:$0xff] }
0x2018   : > { %v7988_v63 = vsel %vm7985_vm14, %v7979_v0, %v9405_v18  ;;  %v7989_v56 = vsel %vm7985_vm14, %v7980_v29, %v9406_v1  ;;  %v8192_v39 = vpack.c.bf16 %v8075_v30, %v8074_v11  ;;  %v8072_v1 = vld [vmem:[#allocation14 + $0x10] sm:$0xff]  ;;  %v8073_v18 = vld [vmem:[#allocation14 + $0x18] sm:$0xff] }
0x2019   : > { %v7995_v36 = vpack.c.bf16 %v7989_v56, %v7988_v63  ;;  %v8191_v5 = vpack.c.bf16 %v8073_v18, %v8072_v1  ;;  %v9441_v63 = vld [vmem:[%s15164_s13] ss:$0 sm:$0xff] }
0x201a   : > { %8203 = vmatpush.bf16.msra.mxu3 %v8192_v39 }
0x201b   : > { %8022 = vmatmul.bf16.gmra.mxu2 %v7995_v36 }
0x201d   : > { %v9434_v38 = vpop.permute.xlu2 %9433 }
0x201e   : > { %v9436_v48 = vunpack.i.h.bf16 %v9434_v38  ;;  %v9435_v26 = vunpack.i.l.bf16 %v9434_v38  ;;  %8204 = vmatpush.bf16.msra.mxu3 %v8191_v5 }
0x2023   : > { %v9409_v37 = vpop.permute.xlu0 %9408 }
0x2024   : > { %v9411_v9 = vunpack.i.h.bf16 %v9409_v37  ;;  %v9410_v62 = vunpack.i.l.bf16 %v9409_v37 }
0x2026   : > { %v7973_v51 = vsel %vm6752_vm13, %v7608_v13, %v9410_v62  ;;  %v7974_v2 = vsel %vm6752_vm13, %v7610_v4, %v9411_v9  ;;  %v8071_v13 = vld [vmem:[#allocation14 + $0x8] sm:$0xff]  ;;  %v8102_v4 = vld [vmem:[%s15169_s18 + $0x78] sm:$0xff] }
0x2027   : > { %v7981_v52 = vsel %vm1007_vm1, %v7973_v51, %v9415_v12  ;;  %v7982_v35 = vsel %vm1007_vm1, %v7974_v2, %v9416_v32  ;;  %v9429_v31 = vpop.permute.xlu1 %9428  ;;  %v8190_v0 = vpack.c.bf16 %v8071_v13, %v8070_v17  ;;  %v8265_v15 = vpack.c.bf16 %v8102_v4, %v8101_v54  ;;  %v8098_v9 = vld [vmem:[%s15169_s18 + $0x58] sm:$0xff]  ;;  %v8096_v32 = vld [vmem:[%s15169_s18 + $0x48] sm:$0xff] }
0x2028   : > { %v7990_v41 = vsel %vm7985_vm14, %v7981_v52, %v9420_v20  ;;  %v7991_v23 = vsel %vm7985_vm14, %v7982_v35, %v9421_v44  ;;  %v9431_v46 = vunpack.i.h.bf16 %v9429_v31  ;;  %v9430_v43 = vunpack.i.l.bf16 %v9429_v31  ;;  %v8095_v44 = vld [vmem:[%s15169_s18 + $0x40] sm:$0xff]  ;;  %v8092_v31 = vld [vmem:[%s15169_s18 + $0x28] sm:$0xff]  ;;  %v8110_v4 = vld [vmem:[#allocation16 + $0x30] sm:$0xff] }
0x2029   : > { %v7996_v55 = vpack.c.bf16 %v7991_v23, %v7990_v41  ;;  %8205 = vmatpush.bf16.msra.mxu3 %v8190_v0  ;;  %8269 = vmatpush.bf16.msra.mxu1 %v8265_v15  ;;  %v8263_v62 = vpack.c.bf16 %v8098_v9, %v8097_v49  ;;  %v8262_v20 = vpack.c.bf16 %v8096_v32, %v8095_v44  ;;  %v8093_v23 = vld [vmem:[%s15169_s18 + $0x30] sm:$0xff] }
0x202a   : > { %v8313_v15 = vpack.c.bf16 %v8111_v24, %v8110_v4  ;;  %v9444_v4 = vld [vmem:[%s15265_s25] ss:$0 sm:$0xff] }
0x202b   : > { %8027 = vmatmul.bf16.gmra.mxu2 %v7996_v55  ;;  %v8094_v55 = vld [vmem:[%s15169_s18 + $0x38] sm:$0xff] }
0x202c   : > { %v8261_v50 = vpack.c.bf16 %v8094_v55, %v8093_v23  ;;  %8333 = vmatpush.bf16.msra.mxu2 %v8313_v15 }
0x202d   : > { %8270 = vmatpush.bf16.msra.mxu1 %v8264_v53 }
0x2031   : > { %8271 = vmatpush.bf16.msra.mxu1 %v8263_v62 }
0x2033   : > { %v9424_v58 = vpop.permute.xlu0 %9423 }
0x2034   : > { %v9426_v16 = vunpack.i.h.bf16 %v9424_v58  ;;  %v9425_v60 = vunpack.i.l.bf16 %v9424_v58  ;;  %v8089_v58 = vld [vmem:[%s15169_s18 + $0x10] sm:$0xff] }
0x2035   : > { %8272 = vmatpush.bf16.msra.mxu1 %v8262_v20 }
0x2036   : > { %v7975_v14 = vsel %vm6752_vm13, %v7613_v47, %v9425_v60  ;;  %v7976_v7 = vsel %vm6752_vm13, %v7615_v21, %v9426_v16  ;;  %v8091_v47 = vld [vmem:[%s15169_s18 + $0x20] sm:$0xff]  ;;  %v8090_v16 = vld [vmem:[%s15169_s18 + $0x18] sm:$0xff] }
0x2037   : > { %v7983_v33 = vsel %vm1007_vm1, %v7975_v14, %v9430_v43  ;;  %v7984_v59 = vsel %vm1007_vm1, %v7976_v7, %v9431_v46  ;;  %v8260_v38 = vpack.c.bf16 %v8092_v31, %v8091_v47  ;;  %v8259_v60 = vpack.c.bf16 %v8090_v16, %v8089_v58  ;;  %v8087_v21 = vld [vmem:[%s15169_s18] sm:$0xff]  ;;  %v8088_v46 = vld [vmem:[%s15169_s18 + $0x8] sm:$0xff] }
0x2038   : > { %v7992_v28 = vsel %vm7985_vm14, %v7983_v33, %v9435_v26  ;;  %v7993_v3 = vsel %vm7985_vm14, %v7984_v59, %v9436_v48  ;;  %v8258_v43 = vpack.c.bf16 %v8088_v46, %v8087_v21  ;;  %v8170_v48 = vpop.f32.mrf.mxu0  ;;  %v8160_v14 = vperm.slane %v14973_v61, 0  ;;  %v8109_v58 = vld [vmem:[#allocation16 + $0x28] sm:$0xff]  ;;  %v8107_v21 = vld [vmem:[#allocation16 + $0x18] sm:$0xff] }
0x2039   : > { %v7997_v6 = vpack.c.bf16 %v7993_v3, %v7992_v28  ;;  %8273 = vmatpush.bf16.msra.mxu1 %v8261_v50  ;;  %v9442_v28 = vld [vmem:[%s15168_s17] ss:$0 sm:$0xff] }
0x203a   : > { %v8171_v33 = vadd.f32 %v8170_v48, %v8160_v14  ;;  %v8105_v48 = vld [vmem:[#allocation16 + $0x8] sm:$0xff] }
0x203b   : > { %8032 = vmatmul.bf16.gmra.mxu2 %v7997_v6 }
0x203d   : > { %8274 = vmatpush.bf16.msra.mxu1 %v8260_v38  ;;  %v8108_v38 = vld [vmem:[#allocation16 + $0x20] sm:$0xff] }
0x203e   : > { %v8312_v16 = vpack.c.bf16 %v8109_v58, %v8108_v38 }
0x2040   : > { %v8172_v26 = vpop.f32.mrf.mxu0  ;;  %8334 = vmatpush.bf16.msra.mxu2 %v8312_v16 }
0x2041   : > { %8275 = vmatpush.bf16.msra.mxu1 %v8259_v60  ;;  %v8173_v3 = vadd.f32 %v8172_v26, %v8160_v14  ;;  %v8106_v60 = vld [vmem:[#allocation16 + $0x10] sm:$0xff] }
0x2042   : > { %v8311_v46 = vpack.c.bf16 %v8107_v21, %v8106_v60 }
0x2044   : > { %8335 = vmatpush.bf16.msra.mxu2 %v8311_v46 }
0x2045   : > { %8276 = vmatpush.bf16.msra.mxu1 %v8258_v43  ;;  %v8104_v43 = vld [vmem:[#allocation16] sm:$0xff] }
0x2046   : > { %v8310_v26 = vpack.c.bf16 %v8105_v48, %v8104_v43 }
0x2048   : > { %v8175_v6 = vpop.f32.mrf.mxu0  ;;  %8336 = vmatpush.bf16.msra.mxu2 %v8310_v26 }
0x2049   : > { %v8176_v61 = vadd.f32 %v8175_v6, %v8160_v14 }
0x2050   : > { %v8177_v13 = vpop.f32.mrf.mxu0 }
0x2087   : > { %v8018_v29 = vpop.f32.mrf.mxu2 }
0x2088   : > { %v8019_v36 = vadd.f32 %v9441_v63, %v8018_v29 }
0x208f   : > { %v8020_v56 = vpop.f32.mrf.mxu2 }
0x2090   : > { %v8021_v45 = vadd.f32 %v9441_v63, %v8020_v56  ;;  %v8178_v56 = vadd.f32 %v8177_v13, %v8160_v14 }
0x2092   : > { %v8126_v10 = vpack.c.bf16 %v8021_v45, %v8019_v36 }
0x2094   : > { %8206 = vmatmul.bf16.vlgmr.msra.gmra.mxu3 %v8126_v10 }
0x209e   : > { %v8023_v8 = vpop.f32.mrf.mxu2 }
0x209f   : > { %v8024_v19 = vadd.f32 %v9441_v63, %v8023_v8 }
0x20a6   : > { %v8025_v57 = vpop.f32.mrf.mxu2 }
0x20a7   : > { %v8026_v34 = vadd.f32 %v9441_v63, %v8025_v57 }
0x20a9   : > { %v8127_v40 = vpack.c.bf16 %v8026_v34, %v8024_v19 }
0x20ab   : > { %8211 = vmatmul.bf16.gmra.mxu3 %v8127_v40 }
0x20ae   : > { %v8028_v37 = vpop.f32.mrf.mxu2 }
0x20af   : > { %v8029_v51 = vadd.f32 %v9441_v63, %v8028_v37 }
0x20b6   : > { %v8030_v12 = vpop.f32.mrf.mxu2 }
0x20b7   : > { %v8031_v2 = vadd.f32 %v9441_v63, %v8030_v12 }
0x20b9   : > { %v8128_v22 = vpack.c.bf16 %v8031_v2, %v8029_v51 }
0x20bb   : > { %8216 = vmatmul.bf16.gmra.mxu3 %v8128_v22 }
0x20be   : > { %v8033_v52 = vpop.f32.mrf.mxu2 }
0x20bf   : > { %v8034_v42 = vadd.f32 %v9441_v63, %v8033_v52 }
0x20c6   : > { %v8035_v35 = vpop.f32.mrf.mxu2 }
0x20c7   : > { %v8036_v25 = vadd.f32 %v9441_v63, %v8035_v35  ;;  %v8180_v63 = vpop.f32.mrf.mxu0 }
0x20c8   : > { %v8181_v27 = vadd.f32 %v8180_v63, %v8160_v14 }
0x20c9   : > { %v8129_v41 = vpack.c.bf16 %v8036_v25, %v8034_v42 }
0x20cb   : > { %8221 = vmatmul.bf16.gmra.mxu3 %v8129_v41 }
0x20cf   : > { %v8182_v40 = vpop.f32.mrf.mxu0 }
0x20d0   : > { %v8183_v53 = vadd.f32 %v8182_v40, %v8160_v14 }
0x20d7   : > { %v8185_v44 = vpop.f32.mrf.mxu0 }
0x20d8   : > { %v8186_v22 = vadd.f32 %v8185_v44, %v8160_v14 }
0x20df   : > { %v8187_v52 = vpop.f32.mrf.mxu0 }
0x20e0   : > { %v8188_v42 = vadd.f32 %v8187_v52, %v8160_v14 }
0x2117   : > { %v8207_v7 = vpop.f32.mrf.mxu3 }
0x2118   : > { %v8227_v59 = vadd.f32 %v8207_v7, %v8171_v33  ;;  %v9443_v7 = vld [vmem:[%s15264_s7] ss:$0 sm:$0xff] }
0x211a   : > { %v8238_v30 = vadd.f32 %v9442_v28, %v8227_v59 }
0x211c   : > { %v8246_v18 = vmax.f32 %v8238_v30, 0.0 }
0x211f   : > { %v8209_v11 = vpop.f32.mrf.mxu3 }
0x2120   : > { %v8228_v39 = vadd.f32 %v8209_v11, %v8173_v3 }
0x2122   : > { %v8239_v1 = vadd.f32 %v9442_v28, %v8228_v39 }
0x2124   : > { %v8247_v5 = vmax.f32 %v8239_v1, 0.0 }
0x2126   : > { %v8254_v17 = vpack.c.bf16 %v8247_v5, %v8246_v18 }
0x2128   : > { %8277 = vmatmul.bf16.vlgmr.msra.gmra.mxu1 %v8254_v17 }
0x212e   : > { %v8212_v0 = vpop.f32.mrf.mxu3 }
0x212f   : > { %v8229_v29 = vadd.f32 %v8212_v0, %v8176_v61 }
0x2131   : > { %v8240_v45 = vadd.f32 %v9442_v28, %v8229_v29 }
0x2133   : > { %v8248_v57 = vmax.f32 %v8240_v45, 0.0 }
0x2136   : > { %v8214_v36 = vpop.f32.mrf.mxu3 }
0x2137   : > { %v8230_v10 = vadd.f32 %v8214_v36, %v8178_v56 }
0x2139   : > { %v8241_v8 = vadd.f32 %v9442_v28, %v8230_v10 }
0x213b   : > { %v8249_v19 = vmax.f32 %v8241_v8, 0.0 }
0x213d   : > { %v8255_v34 = vpack.c.bf16 %v8249_v19, %v8248_v57 }
0x213e   : > { %v8217_v54 = vpop.f32.mrf.mxu3 }
0x213f   : > { %8282 = vmatmul.bf16.gmra.mxu1 %v8255_v34  ;;  %v8231_v37 = vadd.f32 %v8217_v54, %v8181_v27 }
0x2141   : > { %v8242_v9 = vadd.f32 %v9442_v28, %v8231_v37 }
0x2143   : > { %v8250_v12 = vmax.f32 %v8242_v9, 0.0 }
0x2146   : > { %v8219_v49 = vpop.f32.mrf.mxu3 }
0x2147   : > { %v8232_v62 = vadd.f32 %v8219_v49, %v8183_v53 }
0x2149   : > { %v8243_v32 = vadd.f32 %v9442_v28, %v8232_v62 }
0x214b   : > { %v8251_v20 = vmax.f32 %v8243_v32, 0.0 }
0x214d   : > { %v8256_v51 = vpack.c.bf16 %v8251_v20, %v8250_v12 }
0x214e   : > { %v8222_v2 = vpop.f32.mrf.mxu3 }
0x214f   : > { %8287 = vmatmul.bf16.gmra.mxu1 %v8256_v51  ;;  %v8233_v35 = vadd.f32 %v8222_v2, %v8186_v22 }
0x2151   : > { %v8244_v41 = vadd.f32 %v9442_v28, %v8233_v35 }
0x2153   : > { %v8252_v50 = vmax.f32 %v8244_v41, 0.0 }
0x2156   : > { %v8224_v25 = vpop.f32.mrf.mxu3 }
0x2157   : > { %v8234_v23 = vadd.f32 %v8224_v25, %v8188_v42 }
0x2159   : > { %v8245_v55 = vadd.f32 %v9442_v28, %v8234_v23 }
0x215b   : > { %v8253_v47 = vmax.f32 %v8245_v55, 0.0 }
0x215d   : > { %v8257_v31 = vpack.c.bf16 %v8253_v47, %v8252_v50 }
0x215f   : > { %8292 = vmatmul.bf16.gmra.mxu1 %v8257_v31 }
0x21a5   : > { %v8278_v14 = vpop.f32.mrf.mxu1 }
0x21a6   : > { %v8279_v33 = vadd.f32 %v9443_v7, %v8278_v14 }
0x21a8   : > { %v8298_v3 = vmax.f32 %v8279_v33, 0.0 }
0x21ad   : > { %v8280_v59 = vpop.f32.mrf.mxu1 }
0x21ae   : > { %v8281_v28 = vadd.f32 %v9443_v7, %v8280_v59 }
0x21b0   : > { %v8299_v6 = vmax.f32 %v8281_v28, 0.0 }
0x21b2   : > { %v8306_v11 = vpack.c.bf16 %v8299_v6, %v8298_v3 }
0x21b4   : > { %9037 = vmatmul.msk.bf16.vlgmr.msra.gmra.mxu2 %vm1007_vm1, %v8306_v11 }
0x21bc   : > { %v8283_v30 = vpop.f32.mrf.mxu1 }
0x21bd   : > { %v8284_v39 = vadd.f32 %v9443_v7, %v8283_v30 }
0x21bf   : > { %v8300_v5 = vmax.f32 %v8284_v39, 0.0 }
0x21c4   : > { %v8285_v1 = vpop.f32.mrf.mxu1 }
0x21c5   : > { %v8286_v18 = vadd.f32 %v9443_v7, %v8285_v1 }
0x21c7   : > { %v8301_v17 = vmax.f32 %v8286_v18, 0.0 }
0x21c9   : > { %v8307_v13 = vpack.c.bf16 %v8301_v17, %v8300_v5 }
0x21cb   : > { %9038 = vmatmul.msk.bf16.gmra.mxu2 %vm1007_vm1, %v8307_v13 }
0x21cc   : > { %v8288_v0 = vpop.f32.mrf.mxu1 }
0x21cd   : > { %v8289_v61 = vadd.f32 %v9443_v7, %v8288_v0 }
0x21cf   : > { %v8302_v56 = vmax.f32 %v8289_v61, 0.0 }
0x21d4   : > { %v8290_v29 = vpop.f32.mrf.mxu1 }
0x21d5   : > { %v8291_v63 = vadd.f32 %v9443_v7, %v8290_v29 }
0x21d7   : > { %v8303_v36 = vmax.f32 %v8291_v63, 0.0 }
0x21d9   : > { %v8308_v45 = vpack.c.bf16 %v8303_v36, %v8302_v56 }
0x21db   : > { %9039 = vmatmul.msk.bf16.gmra.mxu2 %vm1007_vm1, %v8308_v45 }
0x21dc   : > { %v8293_v10 = vpop.f32.mrf.mxu1 }
0x21dd   : > { %v8294_v8 = vadd.f32 %v9443_v7, %v8293_v10 }
0x21df   : > { %v8304_v34 = vmax.f32 %v8294_v8, 0.0 }
0x21e4   : > { %v8295_v57 = vpop.f32.mrf.mxu1 }
0x21e5   : > { %v8296_v19 = vadd.f32 %v9443_v7, %v8295_v57 }
0x21e7   : > { %v8305_v40 = vmax.f32 %v8296_v19, 0.0 }
0x21e9   : > { %v8309_v54 = vpack.c.bf16 %v8305_v40, %v8304_v34 }
0x21eb   : > { %9040 = vmatmul.msk.bf16.gmra.mxu2 %vm1007_vm1, %v8309_v54 }
0x2237   : > { %v8338_v24 = vpop.f32.mrf.mxu2 }
0x2238   : > { %v8339_v15 = vadd.f32 %v9444_v4, %v8338_v24 }
0x223a   : > { %8358 = vmax.xlane.f32.xlu0 %v8339_v15 }
0x223f   : > { %v8340_v27 = vpop.f32.mrf.mxu2 }
0x2240   : > { %v8341_v37 = vadd.f32 %v9444_v4, %v8340_v27 }
0x2242   : > { %8360 = vmax.xlane.f32.xlu1 %v8341_v37 }
0x224e   : > { %v8343_v53 = vpop.f32.mrf.mxu2 }
0x224f   : > { %v8344_v49 = vadd.f32 %v9444_v4, %v8343_v53 }
0x2251   : > { %8362 = vmax.xlane.f32.xlu2 %v8344_v49 }
0x2256   : > { %v8345_v9 = vpop.f32.mrf.mxu2 }
0x2257   : > { %v8346_v62 = vadd.f32 %v9444_v4, %v8345_v9 }
0x2259   : > { %8364 = vmax.xlane.f32.xlu0 %v8346_v62 }
0x225e   : > { %v8348_v44 = vpop.f32.mrf.mxu2 }
0x225f   : > { %v8349_v32 = vadd.f32 %v9444_v4, %v8348_v44 }
0x2261   : > { %8366 = vmax.xlane.f32.xlu1 %v8349_v32 }
0x2266   : > { %v8350_v12 = vpop.f32.mrf.mxu2 }
0x2267   : > { %v8351_v20 = vadd.f32 %v9444_v4, %v8350_v12 }
0x2269   : > { %8368 = vmax.xlane.f32.xlu2 %v8351_v20 }
0x226e   : > { %v8353_v51 = vpop.f32.mrf.mxu2 }
0x226f   : > { %v8354_v2 = vadd.f32 %v9444_v4, %v8353_v51 }
0x2271   : > { %8370 = vmax.xlane.f32.xlu0 %v8354_v2 }
0x2276   : > { %v8355_v22 = vpop.f32.mrf.mxu2 }
0x2277   : > { %v8356_v52 = vadd.f32 %v9444_v4, %v8355_v22 }
0x2279   : > { %8372 = vmax.xlane.f32.xlu1 %v8356_v52 }
0x22ad   : > { %v8359_v35 = vpop.xlane.xlu0 %8358 }
0x22ae   : > { %v8374_v42 = vsub.f32 %v8339_v15, %v8359_v35 }
0x22b0   : > { %v8382_v25 = vmul.f32 1.442695, %v8374_v42 }
0x22b2   : > { %9573 = vpow2.f32 %v8382_v25 }
0x22b5   : > { %v8361_v41 = vpop.xlane.xlu1 %8360 }
0x22b6   : > { %v8375_v23 = vsub.f32 %v8341_v37, %v8361_v41 }
0x22b8   : > { %v9574_v55 = vpop.eup %9573  ;;  %v8384_v50 = vmul.f32 1.442695, %v8375_v23 }
0x22b9   : > { %8398 = vadd.xlane.f32.xlu2 %v9574_v55 }
0x22ba   : > { %9575 = vpow2.f32 %v8384_v50 }
0x22c0   : > { %v9576_v47 = vpop.eup %9575 }
0x22c1   : > { %8400 = vadd.xlane.f32.xlu0 %v9576_v47 }
0x22c4   : > { %v8363_v31 = vpop.xlane.xlu2 %8362 }
0x22c5   : > { %v8376_v38 = vsub.f32 %v8344_v49, %v8363_v31 }
0x22c7   : > { %v8386_v58 = vmul.f32 1.442695, %v8376_v38 }
0x22c9   : > { %9577 = vpow2.f32 %v8386_v58 }
0x22cc   : > { %v8365_v16 = vpop.xlane.xlu0 %8364 }
0x22cd   : > { %v8377_v60 = vsub.f32 %v8346_v62, %v8365_v16 }
0x22cf   : > { %v9578_v21 = vpop.eup %9577  ;;  %v8388_v46 = vmul.f32 1.442695, %v8377_v60 }
0x22d0   : > { %8402 = vadd.xlane.f32.xlu1 %v9578_v21 }
0x22d1   : > { %9579 = vpow2.f32 %v8388_v46 }
0x22d4   : > { %v8367_v43 = vpop.xlane.xlu1 %8366 }
0x22d5   : > { %v8378_v48 = vsub.f32 %v8349_v32, %v8367_v43 }
0x22d7   : > { %v9580_v26 = vpop.eup %9579  ;;  %v8390_v14 = vmul.f32 1.442695, %v8378_v48 }
0x22d8   : > { %8404 = vadd.xlane.f32.xlu2 %v9580_v26 }
0x22d9   : > { %9581 = vpow2.f32 %v8390_v14 }
0x22dc   : > { %v8369_v7 = vpop.xlane.xlu2 %8368 }
0x22dd   : > { %v8379_v33 = vsub.f32 %v8351_v20, %v8369_v7 }
0x22df   : > { %v9582_v59 = vpop.eup %9581  ;;  %v8392_v28 = vmul.f32 1.442695, %v8379_v33 }
0x22e0   : > { %8406 = vadd.xlane.f32.xlu0 %v9582_v59 }
0x22e1   : > { %9583 = vpow2.f32 %v8392_v28 }
0x22e4   : > { %v8371_v3 = vpop.xlane.xlu0 %8370 }
0x22e5   : > { %v8380_v6 = vsub.f32 %v8354_v2, %v8371_v3 }
0x22e7   : > { %v9584_v11 = vpop.eup %9583  ;;  %v8394_v30 = vmul.f32 1.442695, %v8380_v6 }
0x22e8   : > { %8408 = vadd.xlane.f32.xlu1 %v9584_v11 }
0x22e9   : > { %9585 = vpow2.f32 %v8394_v30 }
0x22ec   : > { %v8373_v39 = vpop.xlane.xlu1 %8372 }
0x22ed   : > { %v15100_v1 = vsub.f32 %v8356_v52, %v8373_v39 }
0x22ef   : > { %v9586_v18 = vpop.eup %9585  ;;  %v8396_v5 = vmul.f32 1.442695, %v15100_v1 }
0x22f0   : > { %8410 = vadd.xlane.f32.xlu2 %v9586_v18 }
0x22f1   : > { %9587 = vpow2.f32 %v8396_v5 }
0x22f7   : > { %v9588_v17 = vpop.eup %9587 }
0x22f8   : > { %8412 = vadd.xlane.f32.xlu0 %v9588_v17 }
0x232c   : > { %v8399_v13 = vpop.xlane.xlu2 %8398 }
0x232d   : > { %9589 = vlog2.f32 %v8399_v13 }
0x2333   : > { %v9590_v0 = vpop.eup %9589 }
0x2334   : > { %v8415_v61 = vmul.f32 0.6931472, %v9590_v0  ;;  %v8401_v29 = vpop.xlane.xlu0 %8400 }
0x2335   : > { %9591 = vlog2.f32 %v8401_v29 }
0x2336   : > { %v8430_v63 = vsub.f32 %v8374_v42, %v8415_v61 }
0x2338   : > { %8438 = vst [vmem:[%s15106_s30] sm:$0xff] %v8430_v63 }
0x233b   : > { %v9592_v56 = vpop.eup %9591 }
0x233c   : > { %v8417_v36 = vmul.f32 0.6931472, %v9592_v56 }
0x233e   : > { %v8431_v45 = vsub.f32 %v8375_v23, %v8417_v36 }
0x2340   : > { %8439 = vst [vmem:[%s15106_s30 + $0x8] sm:$0xff] %v8431_v45 }
0x2343   : > { %v8403_v10 = vpop.xlane.xlu1 %8402 }
0x2344   : > { %9593 = vlog2.f32 %v8403_v10 }
0x234a   : > { %v9594_v8 = vpop.eup %9593 }
0x234b   : > { %v8419_v57 = vmul.f32 0.6931472, %v9594_v8  ;;  %v8405_v19 = vpop.xlane.xlu2 %8404 }
0x234c   : > { %9595 = vlog2.f32 %v8405_v19 }
0x234d   : > { %v8432_v34 = vsub.f32 %v8376_v38, %v8419_v57 }
0x234f   : > { %8440 = vst [vmem:[%s15106_s30 + $0x10] sm:$0xff] %v8432_v34 }
0x2352   : > { %v9596_v40 = vpop.eup %9595 }
0x2353   : > { %v8421_v54 = vmul.f32 0.6931472, %v9596_v40  ;;  %v8407_v4 = vpop.xlane.xlu0 %8406 }
0x2354   : > { %9597 = vlog2.f32 %v8407_v4 }
0x2355   : > { %v8433_v24 = vsub.f32 %v8377_v60, %v8421_v54 }
0x2357   : > { %8441 = vst [vmem:[%s15106_s30 + $0x18] sm:$0xff] %v8433_v24 }
0x235a   : > { %v9598_v15 = vpop.eup %9597 }
0x235b   : > { %v8423_v27 = vmul.f32 0.6931472, %v9598_v15  ;;  %v8409_v37 = vpop.xlane.xlu1 %8408 }
0x235c   : > { %9599 = vlog2.f32 %v8409_v37 }
0x235d   : > { %v8434_v53 = vsub.f32 %v8378_v48, %v8423_v27 }
0x235f   : > { %8442 = vst [vmem:[%s15106_s30 + $0x20] sm:$0xff] %v8434_v53 }
0x2362   : > { %v9600_v49 = vpop.eup %9599 }
0x2363   : > { %v8425_v9 = vmul.f32 0.6931472, %v9600_v49  ;;  %v8411_v62 = vpop.xlane.xlu2 %8410 }
0x2364   : > { %9601 = vlog2.f32 %v8411_v62 }
0x2365   : > { %v8435_v44 = vsub.f32 %v8379_v33, %v8425_v9 }
0x2367   : > { %8443 = vst [vmem:[%s15106_s30 + $0x28] sm:$0xff] %v8435_v44 }
0x236a   : > { %v9602_v32 = vpop.eup %9601 }
0x236b   : > { %v8427_v12 = vmul.f32 0.6931472, %v9602_v32  ;;  %v8413_v20 = vpop.xlane.xlu0 %8412 }
0x236c   : > { %9603 = vlog2.f32 %v8413_v20 }
0x236d   : > { %v8436_v51 = vsub.f32 %v8380_v6, %v8427_v12 }
0x236f   : > { %8444 = vst [vmem:[%s15106_s30 + $0x30] sm:$0xff] %v8436_v51 }
0x2372   : > { %v9604_v2 = vpop.eup %9603 }
0x2373   : > { %v8429_v22 = vmul.f32 0.6931472, %v9604_v2 }
0x2375   : > { %v8437_v52 = vsub.f32 %v15100_v1, %v8429_v22 }
0x2377   : > { %8445 = vst [vmem:[%s15106_s30 + $0x38] sm:$0xff] %v8437_v52 }
0x2378   : > { %9906 = shalt.err (!%p9903_p8)
}
0x2379   : > { %s9981_s23 = smov 128   ;;  %s9982_s11 = smov 8  }
0x237a   : > { %9092 = dma.vmem_to_hbm [thread:$0]  (%p10136_p5), %s8460_s21, 1024, %s8462_s1, %s8447_s0, %s9981_s23, %s9981_s23, %s9982_s11  }
0x237b PF: > { %s15269_s30 = sld [smem:[#allocation27_spill]] }
0x237c   : > { %s15270_s29 = sld [smem:[#allocation24_spill]] }
0x2381   : > { %p9144_p9 = scmp.ge.s32.totalorder %s15269_s30, 2 }
0x2382   : > { %s8476_s3 = sand.u32 1, %s15270_s29  }
0x2383   : > { %p9123_p10 = pnand %p9144_p9, %p10140_p6  ;;  %s8477_s27 = scalar_lea.sflag [#allocation4], %s8476_s3 }
0x2385   : > { %p9124_p11 = pneg %p9123_p10 }
0x2387   : > { %9944 = dma.done.wait (%p9124_p11), %s8477_s27, 1024  }
0x2388   : > { %9946 = vsyncadd (%p9124_p11), %s8477_s27, 4294966272  ;;  %s15272_s30 = sld [smem:[#allocation28_spill]] }
0x2389   : > { %s15273_s3 = sld [smem:[#allocation25_spill]] }
0x238a   : > { %s15274_s28 = sld [smem:[#allocation26_spill]] }
0x238b   : > { %s15275_s29 = sld [smem:[#allocation29_spill]] }
0x238e   : > { %p37_p12 = scmp.ge.s32.totalorder %s15272_s30, 4  }
0x2390   :  { %39 = sbr.rel (!%p37_p12) target bundleno = 21 (0x15), region = 180 }
0x2395   :  { %8483 = vsyncpa [#allocation3], 1 }
0x2396   :  { %8485 = vsyncpa [#allocation3 + $0x1], 1 }
0x2397   :  { %8486 = vsyncpa [#allocation6], 1 }
0x2398   :  { %8487 = vsyncpa [#allocation9], 1 }
0x2399   :  { %8488 = vsyncpa [#allocation12], 1 }
0x239a   :  { %8489 = vsyncpa [#allocation15], 1 }
0x239b   :  { %8490 = vsyncpa [#allocation4], 1 }
0x239c   :  { %8492 = vsyncpa [#allocation4 + $0x1], 1 }

</bundles_post_ra>
